<compile_context>
chip_gen: v6e
topology: v6e:2x2x1
jax: 0.10.0
libtpu: 0.0.40
codegen_flags: <defaults>
</compile_context>

<pallas_src>
import jax
import jax.numpy as jnp
import numpy as np
from jax import lax
from jax.experimental import pallas as pl
from jax.experimental.pallas import tpu as pltpu

LANE = 128


def _round_up(x, m):
    return ((x + m - 1) // m) * m


def bigru_fc_kernel(x_ref, wih_ref, whh_ref, bx_ref, bhn_ref, wfc_ref, bfc_ref,
                    out_f_ref, out_b_ref, hid_ref, xp_ref):
    """Fused bidirectional GRU + tanh(fc(cat(h_fwd, h_bwd))).

    Layouts (HP = lane-padded hidden size, multiple of 128):
      x_ref   : (T*B, 2E)    lanes [0:E] = x_t (fwd time order), [E:2E] = x_{T-1-t} (bwd order)
      wih_ref : (2E, 6*HP)   input weights, output columns [r_f, r_b, z_f, z_b, n_f, n_b]
      whh_ref : (2*HP, 6*HP) block-diagonal recurrent weights, same column order; rows [0:HP]
                             act on the h_fwd lanes, rows [HP:2HP] on the h_bwd lanes
      bx_ref  : (1, 6*HP)    b_ih (all gates) + b_hh (r, z) folded together
      bhn_ref : (1, 2*HP)    b_hh of the n gate (stays inside the r-multiplied term)
      wfc_ref : (2*HP, DP)   [wfc_fwd ; wfc_bwd] stacked rows (zero-padded), DP lane-padded
      bfc_ref : (1, DP)
      out_f_ref / out_b_ref : (T, B, HP) per-direction outputs (lane-dense full stores)
      hid_ref : (B, DP)
      xp_ref  : (T*B, 6*HP)  scratch: hoisted x-projection for both directions
    """
    T, B, HP = out_f_ref.shape
    HP2 = 2 * HP

    # ---- Hoisted input projection for BOTH directions & ALL timesteps: one MXU matmul. ----
    xp_ref[...] = (jnp.dot(x_ref[...], wih_ref[...], preferred_element_type=jnp.float32)
                   + bx_ref[...])

    # Hoist weight loads and the bias broadcast out of the recurrence (no per-step rebuild).
    whh = whh_ref[...]
    bhn = jnp.broadcast_to(bhn_ref[...], (B, HP2))

    def sigmoid(v):
        # 0.5 * (1 + tanh(0.5 v)): single EUP op, avoids exp + divide on the serial chain.
        return 0.5 * jnp.tanh(0.5 * v) + 0.5

    def body(t, h):
        # h: (B, 2HP), lanes [0:HP] = h_fwd, [HP:2HP] = h_bwd.
        row = pl.multiple_of(t * B, B)
        xp = xp_ref[pl.ds(row, B), :]                                   # (B, 6HP)
        hp = jnp.dot(h, whh, preferred_element_type=jnp.float32)        # one matmul / step
        rz = sigmoid(xp[:, 0:2 * HP2] + hp[:, 0:2 * HP2])               # r & z, both dirs
        r = rz[:, 0:HP2]
        z = rz[:, HP2:2 * HP2]
        n = jnp.tanh(xp[:, 2 * HP2:3 * HP2] + r * (hp[:, 2 * HP2:3 * HP2] + bhn))
        h_new = n + z * (h - n)                                         # == (1-z)*n + z*h
        out_f_ref[t] = h_new[:, 0:HP]                                   # fwd output @ t
        out_b_ref[T - 1 - t] = h_new[:, HP:HP2]                         # bwd output @ T-1-t
        return h_new

    h_last = lax.fori_loop(0, T, body, jnp.zeros((B, HP2), jnp.float32), unroll=True)

    # hidden = tanh(fc(cat(h_fwd_final, h_bwd_final))): one matmul on the packed carry.
    hid_ref[...] = jnp.tanh(jnp.dot(h_last, wfc_ref[...], preferred_element_type=jnp.float32)
                            + bfc_ref[...])


def encoder_forward(src, params):
    """src: (T, B) int32 token ids. Returns (outputs (T, B, 2H), hidden (B, D))."""
    emb = params["embedding"][src].astype(jnp.float32)   # (T, B, E) gather — plain-JAX glue
    # dropout: identity (inference mode)
    T, B, E = emb.shape
    H = params["whh_f"].shape[-1]
    D = params["wfc"].shape[-1]
    HP = _round_up(H, LANE)       # lane-pad hidden dim -> full-vreg gate slices & stores
    DP = _round_up(D, LANE)
    BP = _round_up(B, 8)          # sublane-pad the batch
    f32 = jnp.float32

    def pad2(w, rows, cols):      # zero-pad a 2-D block into (rows, cols)
        w = w.astype(f32)
        return jnp.pad(w, ((0, rows - w.shape[0]), (0, cols - w.shape[1])))

    wih_f, wih_b = params["wih_f"], params["wih_b"]
    whh_f, whh_b = params["whh_f"], params["whh_b"]
    bih_f, bih_b = params["bih_f"], params["bih_b"]
    bhh_f, bhh_b = params["bhh_f"], params["bhh_b"]

    zE = jnp.zeros((E, HP), f32)
    zH = jnp.zeros((HP, HP), f32)

    # Output column order: [r_f, r_b, z_f, z_b, n_f, n_b], each HP lanes wide.
    w_ih_blk = jnp.concatenate([
        jnp.concatenate([pad2(wih_f[0], E, HP), zE, pad2(wih_f[1], E, HP), zE,
                         pad2(wih_f[2], E, HP), zE], axis=1),
        jnp.concatenate([zE, pad2(wih_b[0], E, HP), zE, pad2(wih_b[1], E, HP),
                         zE, pad2(wih_b[2], E, HP)], axis=1)], axis=0)          # (2E, 6HP)

    w_hh_blk = jnp.concatenate([
        jnp.concatenate([pad2(whh_f[0], HP, HP), zH, pad2(whh_f[1], HP, HP), zH,
                         pad2(whh_f[2], HP, HP), zH], axis=1),
        jnp.concatenate([zH, pad2(whh_b[0], HP, HP), zH, pad2(whh_b[1], HP, HP),
                         zH, pad2(whh_b[2], HP, HP)], axis=1)], axis=0)         # (2HP, 6HP)

    def padb(b):                  # (1, H) -> (1, HP)
        return jnp.pad(b.astype(f32), ((0, 0), (0, HP - b.shape[-1])))

    # b_ih (all gates) + b_hh (r, z) folded into the hoisted projection; b_hh_n stays per-step.
    b_x = jnp.concatenate([padb(bih_f[0] + bhh_f[0]), padb(bih_b[0] + bhh_b[0]),
                           padb(bih_f[1] + bhh_f[1]), padb(bih_b[1] + bhh_b[1]),
                           padb(bih_f[2]), padb(bih_b[2])], axis=1)             # (1, 6HP)
    b_hh_n = jnp.concatenate([padb(bhh_f[2]), padb(bhh_b[2])], axis=1)          # (1, 2HP)

    w_fc = jnp.concatenate([pad2(params["wfc"][0], HP, DP),
                            pad2(params["wfc"][1], HP, DP)], axis=0)            # (2HP, DP)
    b_fc = jnp.pad(params["bfc"].astype(f32), ((0, 0), (0, DP - D)))            # (1, DP)

    # Pack fwd-time-order and reversed-time-order inputs side-by-side along lanes so one
    # hoisted matmul yields both directions' per-processing-step gate pre-activations.
    emb_p = jnp.pad(emb, ((0, 0), (0, BP - B), (0, 0)))
    x2 = jnp.concatenate([emb_p, emb_p[::-1]], axis=-1).reshape(T * BP, 2 * E)

    vmem = pl.BlockSpec(memory_space=pltpu.MemorySpace.VMEM)
    out_f, out_b, hidden = pl.pallas_call(
        bigru_fc_kernel,
        out_shape=(jax.ShapeDtypeStruct((T, BP, HP), f32),
                   jax.ShapeDtypeStruct((T, BP, HP), f32),
                   jax.ShapeDtypeStruct((BP, DP), f32)),
        in_specs=[vmem] * 7,
        out_specs=(vmem, vmem, vmem),
        scratch_shapes=[pltpu.VMEM((T * BP, 6 * HP), f32)],
    )(x2, w_ih_blk, w_hh_blk, b_x, b_hh_n, w_fc, b_fc)

    outputs = jnp.concatenate([out_f[:, :B, :H], out_b[:, :B, :H]], axis=-1)    # (T, B, 2H)
    return outputs, hidden[:B, :D]


# ----------------------------- pure-JAX reference ----------------------------------------------

def _gru_cell_ref(x_t, h_prev, wih, whh, bih, bhh):
    r = jax.nn.sigmoid(x_t @ wih[0] + bih[0] + h_prev @ whh[0] + bhh[0])
    z = jax.nn.sigmoid(x_t @ wih[1] + bih[1] + h_prev @ whh[1] + bhh[1])
    n = jnp.tanh(x_t @ wih[2] + bih[2] + r * (h_prev @ whh[2] + bhh[2]))
    return (1.0 - z) * n + z * h_prev


def encoder_reference(src, params):
    emb = params["embedding"][src].astype(jnp.float32)
    H = params["whh_f"].shape[-1]
    B = emb.shape[1]

    def run_dir(xs, wih, whh, bih, bhh):
        def step(h, x):
            h_new = _gru_cell_ref(x, h, wih, whh, bih, bhh)
            return h_new, h_new
        h0 = jnp.zeros((B, H), jnp.float32)
        h_last, ys = lax.scan(step, h0, xs)
        return ys, h_last

    out_f, h_f = run_dir(emb, params["wih_f"], params["whh_f"],
                         params["bih_f"], params["bhh_f"])
    out_b_rev, h_b = run_dir(emb[::-1], params["wih_b"], params["whh_b"],
                             params["bih_b"], params["bhh_b"])
    outputs = jnp.concatenate([out_f, out_b_rev[::-1]], axis=-1)
    acc = h_f @ params["wfc"][0] + h_b @ params["wfc"][1] + params["bfc"]
    return outputs, jnp.tanh(acc)


if __name__ == "__main__":
    # Module hyperparameters (small, consistent with the forward pass).
    V, E, H, D = 50, 32, 32, 32       # input_dim, emb_dim, enc_hid_dim, dec_hid_dim
    T, B = 8, 4                       # seq_len, batch

    key = jax.random.PRNGKey(0)
    keys = jax.random.split(key, 12)
    s = 1.0 / np.sqrt(H)

    def u(k, shape):
        return jax.random.uniform(k, shape, jnp.float32, -s, s)

    params = {
        "embedding": jax.random.normal(keys[0], (V, E), jnp.float32),
        "wih_f": u(keys[1], (3, E, H)),
        "whh_f": u(keys[2], (3, H, H)),
        "bih_f": u(keys[3], (3, 1, H)),
        "bhh_f": u(keys[4], (3, 1, H)),
        "wih_b": u(keys[5], (3, E, H)),
        "whh_b": u(keys[6], (3, H, H)),
        "bih_b": u(keys[7], (3, 1, H)),
        "bhh_b": u(keys[8], (3, 1, H)),
        "wfc":   u(keys[9], (2, H, D)),
        "bfc":   u(keys[10], (1, D)),
    }
    src = jax.random.randint(keys[11], (T, B), 0, V, dtype=jnp.int32)

    outputs, hidden = jax.jit(encoder_forward)(src, params)
    jax.block_until_ready((outputs, hidden))

    ref_out, ref_hid = encoder_reference(src, params)
    assert outputs.shape == (T, B, 2 * H) and hidden.shape == (B, D)
    np.testing.assert_allclose(np.asarray(outputs), np.asarray(ref_out), rtol=2e-3, atol=2e-3)
    np.testing.assert_allclose(np.asarray(hidden), np.asarray(ref_hid), rtol=2e-3, atol=2e-3)
    print("KERNEL_OK")
</pallas_src>

<mosaic_0001>
module attributes {stable_mosaic.version = 11 : i64} {
  func.func @bigru_fc_kernel(%arg0: memref<64x64xf32, #tpu.memory_space<vmem>>, %arg1: memref<64x768xf32, #tpu.memory_space<vmem>>, %arg2: memref<256x768xf32, #tpu.memory_space<vmem>>, %arg3: memref<1x768xf32, #tpu.memory_space<vmem>>, %arg4: memref<1x256xf32, #tpu.memory_space<vmem>>, %arg5: memref<256x128xf32, #tpu.memory_space<vmem>>, %arg6: memref<1x128xf32, #tpu.memory_space<vmem>>, %arg7: memref<8x8x128xf32, #tpu.memory_space<vmem>>, %arg8: memref<8x8x128xf32, #tpu.memory_space<vmem>>, %arg9: memref<8x128xf32, #tpu.memory_space<vmem>>, %arg10: memref<64x768xf32, #tpu.memory_space<vmem>>) attributes {dimension_semantics = [], scalar_prefetch = 0 : i64, scratch_operands = 1 : i64, tpu.core_type = #tpu.core_type<tc>} {
    %c0 = arith.constant 0 : index
    %c0_0 = arith.constant 0 : index
    %0 = vector.load %arg0[%c0, %c0_0] : memref<64x64xf32, #tpu.memory_space<vmem>>, vector<64x64xf32>
    %c0_1 = arith.constant 0 : index
    %c0_2 = arith.constant 0 : index
    %1 = vector.load %arg1[%c0_1, %c0_2] : memref<64x768xf32, #tpu.memory_space<vmem>>, vector<64x768xf32>
    %cst = arith.constant dense<0.000000e+00> : vector<64x768xf32>
    %2 = tpu.matmul %0, %1, %cst {dimension_numbers = #tpu.dot_dimension_numbers<[1], [0], [0], [1], [0, 0, 1, 1], [], []>} : vector<64x64xf32>, vector<64x768xf32>, vector<64x768xf32> -> vector<64x768xf32>
    %c0_3 = arith.constant 0 : index
    %c0_4 = arith.constant 0 : index
    %3 = vector.load %arg3[%c0_3, %c0_4] : memref<1x768xf32, #tpu.memory_space<vmem>>, vector<1x768xf32>
    %4 = vector.broadcast %3 : vector<1x768xf32> to vector<64x768xf32>
    %5 = arith.addf %2, %4 : vector<64x768xf32>
    %c0_5 = arith.constant 0 : index
    %c0_6 = arith.constant 0 : index
    %6 = vector.load %arg10[%c0_5, %c0_6] : memref<64x768xf32, #tpu.memory_space<vmem>>, vector<64x768xf32>
    tpu.vector_store %arg10[%c0_5, %c0_6], %5 {strides = array<i32>} : memref<64x768xf32, #tpu.memory_space<vmem>>, vector<64x768xf32>,
    %c0_7 = arith.constant 0 : index
    %c0_8 = arith.constant 0 : index
    %7 = vector.load %arg2[%c0_7, %c0_8] : memref<256x768xf32, #tpu.memory_space<vmem>>, vector<256x768xf32>
    %c0_9 = arith.constant 0 : index
    %c0_10 = arith.constant 0 : index
    %8 = vector.load %arg4[%c0_9, %c0_10] : memref<1x256xf32, #tpu.memory_space<vmem>>, vector<1x256xf32>
    %9 = vector.shape_cast %8 : vector<1x256xf32> to vector<1x256xf32>
    %10 = vector.broadcast %9 : vector<1x256xf32> to vector<8x256xf32>
    %cst_11 = arith.constant 0.000000e+00 : f32
    %11 = vector.broadcast %cst_11 : f32 to vector<8x256xf32>
    %c0_i32 = arith.constant 0 : i32
    %c8_i32 = arith.constant 8 : i32
    %12 = arith.muli %c0_i32, %c8_i32 : i32
    %13 = tpu.assume_multiple %12, 8 : i32
    %14 = arith.index_cast %13 : i32 to index
    %c0_12 = arith.constant 0 : index
    %15 = vector.load %arg10[%14, %c0_12] : memref<64x768xf32, #tpu.memory_space<vmem>>, vector<8x768xf32>
    %cst_13 = arith.constant dense<0.000000e+00> : vector<8x768xf32>
    %16 = tpu.matmul %11, %7, %cst_13 {dimension_numbers = #tpu.dot_dimension_numbers<[1], [0], [0], [1], [0, 0, 1, 1], [], []>} : vector<8x256xf32>, vector<256x768xf32>, vector<8x768xf32> -> vector<8x768xf32>
    %17 = vector.extract_strided_slice %15 {offsets = [0, 0], sizes = [8, 512], strides = [1, 1]} : vector<8x768xf32> to vector<8x512xf32>
    %18 = vector.extract_strided_slice %16 {offsets = [0, 0], sizes = [8, 512], strides = [1, 1]} : vector<8x768xf32> to vector<8x512xf32>
    %19 = arith.addf %17, %18 : vector<8x512xf32>
    %cst_14 = arith.constant 5.000000e-01 : f32
    %20 = vector.broadcast %cst_14 : f32 to vector<8x512xf32>
    %21 = arith.mulf %20, %19 : vector<8x512xf32>
    %22 = math.tanh %21 : vector<8x512xf32>
    %cst_15 = arith.constant 5.000000e-01 : f32
    %23 = vector.broadcast %cst_15 : f32 to vector<8x512xf32>
    %24 = arith.mulf %23, %22 : vector<8x512xf32>
    %cst_16 = arith.constant 5.000000e-01 : f32
    %25 = vector.broadcast %cst_16 : f32 to vector<8x512xf32>
    %26 = arith.addf %24, %25 : vector<8x512xf32>
    %27 = vector.extract_strided_slice %26 {offsets = [0, 0], sizes = [8, 256], strides = [1, 1]} : vector<8x512xf32> to vector<8x256xf32>
    %28 = vector.extract_strided_slice %26 {offsets = [0, 256], sizes = [8, 256], strides = [1, 1]} : vector<8x512xf32> to vector<8x256xf32>
    %29 = vector.extract_strided_slice %15 {offsets = [0, 512], sizes = [8, 256], strides = [1, 1]} : vector<8x768xf32> to vector<8x256xf32>
    %30 = vector.extract_strided_slice %16 {offsets = [0, 512], sizes = [8, 256], strides = [1, 1]} : vector<8x768xf32> to vector<8x256xf32>
    %31 = arith.addf %30, %10 : vector<8x256xf32>
    %32 = arith.mulf %27, %31 : vector<8x256xf32>
    %33 = arith.addf %29, %32 : vector<8x256xf32>
    %34 = math.tanh %33 : vector<8x256xf32>
    %35 = arith.subf %11, %34 : vector<8x256xf32>
    %36 = arith.mulf %28, %35 : vector<8x256xf32>
    %37 = arith.addf %34, %36 : vector<8x256xf32>
    %38 = vector.extract_strided_slice %37 {offsets = [0, 0], sizes = [8, 128], strides = [1, 1]} : vector<8x256xf32> to vector<8x128xf32>
    %39 = arith.index_cast %c0_i32 : i32 to index
    %c0_17 = arith.constant 0 : index
    %c0_18 = arith.constant 0 : index
    %40 = vector.load %arg7[%39, %c0_17, %c0_18] : memref<8x8x128xf32, #tpu.memory_space<vmem>>, vector<1x8x128xf32>
    %41 = vector.shape_cast %40 : vector<1x8x128xf32> to vector<8x128xf32>
    %42 = vector.shape_cast %38 : vector<8x128xf32> to vector<1x8x128xf32>
    tpu.vector_store %arg7[%39, %c0_17, %c0_18], %42 {strides = array<i32>} : memref<8x8x128xf32, #tpu.memory_space<vmem>>, vector<1x8x128xf32>,
    %43 = vector.extract_strided_slice %37 {offsets = [0, 128], sizes = [8, 128], strides = [1, 1]} : vector<8x256xf32> to vector<8x128xf32>
    %c7_i32 = arith.constant 7 : i32
    %44 = arith.subi %c7_i32, %c0_i32 : i32
    %45 = arith.index_cast %44 : i32 to index
    %c0_19 = arith.constant 0 : index
    %c0_20 = arith.constant 0 : index
    %46 = vector.load %arg8[%45, %c0_19, %c0_20] : memref<8x8x128xf32, #tpu.memory_space<vmem>>, vector<1x8x128xf32>
    %47 = vector.shape_cast %46 : vector<1x8x128xf32> to vector<8x128xf32>
    %48 = vector.shape_cast %43 : vector<8x128xf32> to vector<1x8x128xf32>
    tpu.vector_store %arg8[%45, %c0_19, %c0_20], %48 {strides = array<i32>} : memref<8x8x128xf32, #tpu.memory_space<vmem>>, vector<1x8x128xf32>,
    %c1_i32 = arith.constant 1 : i32
    %c8_i32_21 = arith.constant 8 : i32
    %49 = arith.muli %c1_i32, %c8_i32_21 : i32
    %50 = tpu.assume_multiple %49, 8 : i32
    %51 = arith.index_cast %50 : i32 to index
    %c0_22 = arith.constant 0 : index
    %52 = vector.load %arg10[%51, %c0_22] : memref<64x768xf32, #tpu.memory_space<vmem>>, vector<8x768xf32>
    %cst_23 = arith.constant dense<0.000000e+00> : vector<8x768xf32>
    %53 = tpu.matmul %37, %7, %cst_23 {dimension_numbers = #tpu.dot_dimension_numbers<[1], [0], [0], [1], [0, 0, 1, 1], [], []>} : vector<8x256xf32>, vector<256x768xf32>, vector<8x768xf32> -> vector<8x768xf32>
    %54 = vector.extract_strided_slice %52 {offsets = [0, 0], sizes = [8, 512], strides = [1, 1]} : vector<8x768xf32> to vector<8x512xf32>
    %55 = vector.extract_strided_slice %53 {offsets = [0, 0], sizes = [8, 512], strides = [1, 1]} : vector<8x768xf32> to vector<8x512xf32>
    %56 = arith.addf %54, %55 : vector<8x512xf32>
    %cst_24 = arith.constant 5.000000e-01 : f32
    %57 = vector.broadcast %cst_24 : f32 to vector<8x512xf32>
    %58 = arith.mulf %57, %56 : vector<8x512xf32>
    %59 = math.tanh %58 : vector<8x512xf32>
    %cst_25 = arith.constant 5.000000e-01 : f32
    %60 = vector.broadcast %cst_25 : f32 to vector<8x512xf32>
    %61 = arith.mulf %60, %59 : vector<8x512xf32>
    %cst_26 = arith.constant 5.000000e-01 : f32
    %62 = vector.broadcast %cst_26 : f32 to vector<8x512xf32>
    %63 = arith.addf %61, %62 : vector<8x512xf32>
    %64 = vector.extract_strided_slice %63 {offsets = [0, 0], sizes = [8, 256], strides = [1, 1]} : vector<8x512xf32> to vector<8x256xf32>
    %65 = vector.extract_strided_slice %63 {offsets = [0, 256], sizes = [8, 256], strides = [1, 1]} : vector<8x512xf32> to vector<8x256xf32>
    %66 = vector.extract_strided_slice %52 {offsets = [0, 512], sizes = [8, 256], strides = [1, 1]} : vector<8x768xf32> to vector<8x256xf32>
    %67 = vector.extract_strided_slice %53 {offsets = [0, 512], sizes = [8, 256], strides = [1, 1]} : vector<8x768xf32> to vector<8x256xf32>
    %68 = arith.addf %67, %10 : vector<8x256xf32>
    %69 = arith.mulf %64, %68 : vector<8x256xf32>
    %70 = arith.addf %66, %69 : vector<8x256xf32>
    %71 = math.tanh %70 : vector<8x256xf32>
    %72 = arith.subf %37, %71 : vector<8x256xf32>
    %73 = arith.mulf %65, %72 : vector<8x256xf32>
    %74 = arith.addf %71, %73 : vector<8x256xf32>
    %75 = vector.extract_strided_slice %74 {offsets = [0, 0], sizes = [8, 128], strides = [1, 1]} : vector<8x256xf32> to vector<8x128xf32>
    %76 = arith.index_cast %c1_i32 : i32 to index
    %c0_27 = arith.constant 0 : index
    %c0_28 = arith.constant 0 : index
    %77 = vector.load %arg7[%76, %c0_27, %c0_28] : memref<8x8x128xf32, #tpu.memory_space<vmem>>, vector<1x8x128xf32>
    %78 = vector.shape_cast %77 : vector<1x8x128xf32> to vector<8x128xf32>
    %79 = vector.shape_cast %75 : vector<8x128xf32> to vector<1x8x128xf32>
    tpu.vector_store %arg7[%76, %c0_27, %c0_28], %79 {strides = array<i32>} : memref<8x8x128xf32, #tpu.memory_space<vmem>>, vector<1x8x128xf32>,
    %80 = vector.extract_strided_slice %74 {offsets = [0, 128], sizes = [8, 128], strides = [1, 1]} : vector<8x256xf32> to vector<8x128xf32>
    %c7_i32_29 = arith.constant 7 : i32
    %81 = arith.subi %c7_i32_29, %c1_i32 : i32
    %82 = arith.index_cast %81 : i32 to index
    %c0_30 = arith.constant 0 : index
    %c0_31 = arith.constant 0 : index
    %83 = vector.load %arg8[%82, %c0_30, %c0_31] : memref<8x8x128xf32, #tpu.memory_space<vmem>>, vector<1x8x128xf32>
    %84 = vector.shape_cast %83 : vector<1x8x128xf32> to vector<8x128xf32>
    %85 = vector.shape_cast %80 : vector<8x128xf32> to vector<1x8x128xf32>
    tpu.vector_store %arg8[%82, %c0_30, %c0_31], %85 {strides = array<i32>} : memref<8x8x128xf32, #tpu.memory_space<vmem>>, vector<1x8x128xf32>,
    %c2_i32 = arith.constant 2 : i32
    %c8_i32_32 = arith.constant 8 : i32
    %86 = arith.muli %c2_i32, %c8_i32_32 : i32
    %87 = tpu.assume_multiple %86, 8 : i32
    %88 = arith.index_cast %87 : i32 to index
    %c0_33 = arith.constant 0 : index
    %89 = vector.load %arg10[%88, %c0_33] : memref<64x768xf32, #tpu.memory_space<vmem>>, vector<8x768xf32>
    %cst_34 = arith.constant dense<0.000000e+00> : vector<8x768xf32>
    %90 = tpu.matmul %74, %7, %cst_34 {dimension_numbers = #tpu.dot_dimension_numbers<[1], [0], [0], [1], [0, 0, 1, 1], [], []>} : vector<8x256xf32>, vector<256x768xf32>, vector<8x768xf32> -> vector<8x768xf32>
    %91 = vector.extract_strided_slice %89 {offsets = [0, 0], sizes = [8, 512], strides = [1, 1]} : vector<8x768xf32> to vector<8x512xf32>
    %92 = vector.extract_strided_slice %90 {offsets = [0, 0], sizes = [8, 512], strides = [1, 1]} : vector<8x768xf32> to vector<8x512xf32>
    %93 = arith.addf %91, %92 : vector<8x512xf32>
    %cst_35 = arith.constant 5.000000e-01 : f32
    %94 = vector.broadcast %cst_35 : f32 to vector<8x512xf32>
    %95 = arith.mulf %94, %93 : vector<8x512xf32>
    %96 = math.tanh %95 : vector<8x512xf32>
    %cst_36 = arith.constant 5.000000e-01 : f32
    %97 = vector.broadcast %cst_36 : f32 to vector<8x512xf32>
    %98 = arith.mulf %97, %96 : vector<8x512xf32>
    %cst_37 = arith.constant 5.000000e-01 : f32
    %99 = vector.broadcast %cst_37 : f32 to vector<8x512xf32>
    %100 = arith.addf %98, %99 : vector<8x512xf32>
    %101 = vector.extract_strided_slice %100 {offsets = [0, 0], sizes = [8, 256], strides = [1, 1]} : vector<8x512xf32> to vector<8x256xf32>
    %102 = vector.extract_strided_slice %100 {offsets = [0, 256], sizes = [8, 256], strides = [1, 1]} : vector<8x512xf32> to vector<8x256xf32>
    %103 = vector.extract_strided_slice %89 {offsets = [0, 512], sizes = [8, 256], strides = [1, 1]} : vector<8x768xf32> to vector<8x256xf32>
    %104 = vector.extract_strided_slice %90 {offsets = [0, 512], sizes = [8, 256], strides = [1, 1]} : vector<8x768xf32> to vector<8x256xf32>
    %105 = arith.addf %104, %10 : vector<8x256xf32>
    %106 = arith.mulf %101, %105 : vector<8x256xf32>
    %107 = arith.addf %103, %106 : vector<8x256xf32>
    %108 = math.tanh %107 : vector<8x256xf32>
    %109 = arith.subf %74, %108 : vector<8x256xf32>
    %110 = arith.mulf %102, %109 : vector<8x256xf32>
    %111 = arith.addf %108, %110 : vector<8x256xf32>
    %112 = vector.extract_strided_slice %111 {offsets = [0, 0], sizes = [8, 128], strides = [1, 1]} : vector<8x256xf32> to vector<8x128xf32>
    %113 = arith.index_cast %c2_i32 : i32 to index
    %c0_38 = arith.constant 0 : index
    %c0_39 = arith.constant 0 : index
    %114 = vector.load %arg7[%113, %c0_38, %c0_39] : memref<8x8x128xf32, #tpu.memory_space<vmem>>, vector<1x8x128xf32>
    %115 = vector.shape_cast %114 : vector<1x8x128xf32> to vector<8x128xf32>
    %116 = vector.shape_cast %112 : vector<8x128xf32> to vector<1x8x128xf32>
    tpu.vector_store %arg7[%113, %c0_38, %c0_39], %116 {strides = array<i32>} : memref<8x8x128xf32, #tpu.memory_space<vmem>>, vector<1x8x128xf32>,
    %117 = vector.extract_strided_slice %111 {offsets = [0, 128], sizes = [8, 128], strides = [1, 1]} : vector<8x256xf32> to vector<8x128xf32>
    %c7_i32_40 = arith.constant 7 : i32
    %118 = arith.subi %c7_i32_40, %c2_i32 : i32
    %119 = arith.index_cast %118 : i32 to index
    %c0_41 = arith.constant 0 : index
    %c0_42 = arith.constant 0 : index
    %120 = vector.load %arg8[%119, %c0_41, %c0_42] : memref<8x8x128xf32, #tpu.memory_space<vmem>>, vector<1x8x128xf32>
    %121 = vector.shape_cast %120 : vector<1x8x128xf32> to vector<8x128xf32>
    %122 = vector.shape_cast %117 : vector<8x128xf32> to vector<1x8x128xf32>
    tpu.vector_store %arg8[%119, %c0_41, %c0_42], %122 {strides = array<i32>} : memref<8x8x128xf32, #tpu.memory_space<vmem>>, vector<1x8x128xf32>,
    %c3_i32 = arith.constant 3 : i32
    %c8_i32_43 = arith.constant 8 : i32
    %123 = arith.muli %c3_i32, %c8_i32_43 : i32
    %124 = tpu.assume_multiple %123, 8 : i32
    %125 = arith.index_cast %124 : i32 to index
    %c0_44 = arith.constant 0 : index
    %126 = vector.load %arg10[%125, %c0_44] : memref<64x768xf32, #tpu.memory_space<vmem>>, vector<8x768xf32>
    %cst_45 = arith.constant dense<0.000000e+00> : vector<8x768xf32>
    %127 = tpu.matmul %111, %7, %cst_45 {dimension_numbers = #tpu.dot_dimension_numbers<[1], [0], [0], [1], [0, 0, 1, 1], [], []>} : vector<8x256xf32>, vector<256x768xf32>, vector<8x768xf32> -> vector<8x768xf32>
    %128 = vector.extract_strided_slice %126 {offsets = [0, 0], sizes = [8, 512], strides = [1, 1]} : vector<8x768xf32> to vector<8x512xf32>
    %129 = vector.extract_strided_slice %127 {offsets = [0, 0], sizes = [8, 512], strides = [1, 1]} : vector<8x768xf32> to vector<8x512xf32>
    %130 = arith.addf %128, %129 : vector<8x512xf32>
    %cst_46 = arith.constant 5.000000e-01 : f32
    %131 = vector.broadcast %cst_46 : f32 to vector<8x512xf32>
    %132 = arith.mulf %131, %130 : vector<8x512xf32>
    %133 = math.tanh %132 : vector<8x512xf32>
    %cst_47 = arith.constant 5.000000e-01 : f32
    %134 = vector.broadcast %cst_47 : f32 to vector<8x512xf32>
    %135 = arith.mulf %134, %133 : vector<8x512xf32>
    %cst_48 = arith.constant 5.000000e-01 : f32
    %136 = vector.broadcast %cst_48 : f32 to vector<8x512xf32>
    %137 = arith.addf %135, %136 : vector<8x512xf32>
    %138 = vector.extract_strided_slice %137 {offsets = [0, 0], sizes = [8, 256], strides = [1, 1]} : vector<8x512xf32> to vector<8x256xf32>
    %139 = vector.extract_strided_slice %137 {offsets = [0, 256], sizes = [8, 256], strides = [1, 1]} : vector<8x512xf32> to vector<8x256xf32>
    %140 = vector.extract_strided_slice %126 {offsets = [0, 512], sizes = [8, 256], strides = [1, 1]} : vector<8x768xf32> to vector<8x256xf32>
    %141 = vector.extract_strided_slice %127 {offsets = [0, 512], sizes = [8, 256], strides = [1, 1]} : vector<8x768xf32> to vector<8x256xf32>
    %142 = arith.addf %141, %10 : vector<8x256xf32>
    %143 = arith.mulf %138, %142 : vector<8x256xf32>
    %144 = arith.addf %140, %143 : vector<8x256xf32>
    %145 = math.tanh %144 : vector<8x256xf32>
    %146 = arith.subf %111, %145 : vector<8x256xf32>
    %147 = arith.mulf %139, %146 : vector<8x256xf32>
    %148 = arith.addf %145, %147 : vector<8x256xf32>
    %149 = vector.extract_strided_slice %148 {offsets = [0, 0], sizes = [8, 128], strides = [1, 1]} : vector<8x256xf32> to vector<8x128xf32>
    %150 = arith.index_cast %c3_i32 : i32 to index
    %c0_49 = arith.constant 0 : index
    %c0_50 = arith.constant 0 : index
    %151 = vector.load %arg7[%150, %c0_49, %c0_50] : memref<8x8x128xf32, #tpu.memory_space<vmem>>, vector<1x8x128xf32>
    %152 = vector.shape_cast %151 : vector<1x8x128xf32> to vector<8x128xf32>
    %153 = vector.shape_cast %149 : vector<8x128xf32> to vector<1x8x128xf32>
    tpu.vector_store %arg7[%150, %c0_49, %c0_50], %153 {strides = array<i32>} : memref<8x8x128xf32, #tpu.memory_space<vmem>>, vector<1x8x128xf32>,
    %154 = vector.extract_strided_slice %148 {offsets = [0, 128], sizes = [8, 128], strides = [1, 1]} : vector<8x256xf32> to vector<8x128xf32>
    %c7_i32_51 = arith.constant 7 : i32
    %155 = arith.subi %c7_i32_51, %c3_i32 : i32
    %156 = arith.index_cast %155 : i32 to index
    %c0_52 = arith.constant 0 : index
    %c0_53 = arith.constant 0 : index
    %157 = vector.load %arg8[%156, %c0_52, %c0_53] : memref<8x8x128xf32, #tpu.memory_space<vmem>>, vector<1x8x128xf32>
    %158 = vector.shape_cast %157 : vector<1x8x128xf32> to vector<8x128xf32>
    %159 = vector.shape_cast %154 : vector<8x128xf32> to vector<1x8x128xf32>
    tpu.vector_store %arg8[%156, %c0_52, %c0_53], %159 {strides = array<i32>} : memref<8x8x128xf32, #tpu.memory_space<vmem>>, vector<1x8x128xf32>,
    %c4_i32 = arith.constant 4 : i32
    %c8_i32_54 = arith.constant 8 : i32
    %160 = arith.muli %c4_i32, %c8_i32_54 : i32
    %161 = tpu.assume_multiple %160, 8 : i32
    %162 = arith.index_cast %161 : i32 to index
    %c0_55 = arith.constant 0 : index
    %163 = vector.load %arg10[%162, %c0_55] : memref<64x768xf32, #tpu.memory_space<vmem>>, vector<8x768xf32>
    %cst_56 = arith.constant dense<0.000000e+00> : vector<8x768xf32>
    %164 = tpu.matmul %148, %7, %cst_56 {dimension_numbers = #tpu.dot_dimension_numbers<[1], [0], [0], [1], [0, 0, 1, 1], [], []>} : vector<8x256xf32>, vector<256x768xf32>, vector<8x768xf32> -> vector<8x768xf32>
    %165 = vector.extract_strided_slice %163 {offsets = [0, 0], sizes = [8, 512], strides = [1, 1]} : vector<8x768xf32> to vector<8x512xf32>
    %166 = vector.extract_strided_slice %164 {offsets = [0, 0], sizes = [8, 512], strides = [1, 1]} : vector<8x768xf32> to vector<8x512xf32>
    %167 = arith.addf %165, %166 : vector<8x512xf32>
    %cst_57 = arith.constant 5.000000e-01 : f32
    %168 = vector.broadcast %cst_57 : f32 to vector<8x512xf32>
    %169 = arith.mulf %168, %167 : vector<8x512xf32>
    %170 = math.tanh %169 : vector<8x512xf32>
    %cst_58 = arith.constant 5.000000e-01 : f32
    %171 = vector.broadcast %cst_58 : f32 to vector<8x512xf32>
    %172 = arith.mulf %171, %170 : vector<8x512xf32>
    %cst_59 = arith.constant 5.000000e-01 : f32
    %173 = vector.broadcast %cst_59 : f32 to vector<8x512xf32>
    %174 = arith.addf %172, %173 : vector<8x512xf32>
    %175 = vector.extract_strided_slice %174 {offsets = [0, 0], sizes = [8, 256], strides = [1, 1]} : vector<8x512xf32> to vector<8x256xf32>
    %176 = vector.extract_strided_slice %174 {offsets = [0, 256], sizes = [8, 256], strides = [1, 1]} : vector<8x512xf32> to vector<8x256xf32>
    %177 = vector.extract_strided_slice %163 {offsets = [0, 512], sizes = [8, 256], strides = [1, 1]} : vector<8x768xf32> to vector<8x256xf32>
    %178 = vector.extract_strided_slice %164 {offsets = [0, 512], sizes = [8, 256], strides = [1, 1]} : vector<8x768xf32> to vector<8x256xf32>
    %179 = arith.addf %178, %10 : vector<8x256xf32>
    %180 = arith.mulf %175, %179 : vector<8x256xf32>
    %181 = arith.addf %177, %180 : vector<8x256xf32>
    %182 = math.tanh %181 : vector<8x256xf32>
    %183 = arith.subf %148, %182 : vector<8x256xf32>
    %184 = arith.mulf %176, %183 : vector<8x256xf32>
    %185 = arith.addf %182, %184 : vector<8x256xf32>
    %186 = vector.extract_strided_slice %185 {offsets = [0, 0], sizes = [8, 128], strides = [1, 1]} : vector<8x256xf32> to vector<8x128xf32>
    %187 = arith.index_cast %c4_i32 : i32 to index
    %c0_60 = arith.constant 0 : index
    %c0_61 = arith.constant 0 : index
    %188 = vector.load %arg7[%187, %c0_60, %c0_61] : memref<8x8x128xf32, #tpu.memory_space<vmem>>, vector<1x8x128xf32>
    %189 = vector.shape_cast %188 : vector<1x8x128xf32> to vector<8x128xf32>
    %190 = vector.shape_cast %186 : vector<8x128xf32> to vector<1x8x128xf32>
    tpu.vector_store %arg7[%187, %c0_60, %c0_61], %190 {strides = array<i32>} : memref<8x8x128xf32, #tpu.memory_space<vmem>>, vector<1x8x128xf32>,
    %191 = vector.extract_strided_slice %185 {offsets = [0, 128], sizes = [8, 128], strides = [1, 1]} : vector<8x256xf32> to vector<8x128xf32>
    %c7_i32_62 = arith.constant 7 : i32
    %192 = arith.subi %c7_i32_62, %c4_i32 : i32
    %193 = arith.index_cast %192 : i32 to index
    %c0_63 = arith.constant 0 : index
    %c0_64 = arith.constant 0 : index
    %194 = vector.load %arg8[%193, %c0_63, %c0_64] : memref<8x8x128xf32, #tpu.memory_space<vmem>>, vector<1x8x128xf32>
    %195 = vector.shape_cast %194 : vector<1x8x128xf32> to vector<8x128xf32>
    %196 = vector.shape_cast %191 : vector<8x128xf32> to vector<1x8x128xf32>
    tpu.vector_store %arg8[%193, %c0_63, %c0_64], %196 {strides = array<i32>} : memref<8x8x128xf32, #tpu.memory_space<vmem>>, vector<1x8x128xf32>,
    %c5_i32 = arith.constant 5 : i32
    %c8_i32_65 = arith.constant 8 : i32
    %197 = arith.muli %c5_i32, %c8_i32_65 : i32
    %198 = tpu.assume_multiple %197, 8 : i32
    %199 = arith.index_cast %198 : i32 to index
    %c0_66 = arith.constant 0 : index
    %200 = vector.load %arg10[%199, %c0_66] : memref<64x768xf32, #tpu.memory_space<vmem>>, vector<8x768xf32>
    %cst_67 = arith.constant dense<0.000000e+00> : vector<8x768xf32>
    %201 = tpu.matmul %185, %7, %cst_67 {dimension_numbers = #tpu.dot_dimension_numbers<[1], [0], [0], [1], [0, 0, 1, 1], [], []>} : vector<8x256xf32>, vector<256x768xf32>, vector<8x768xf32> -> vector<8x768xf32>
    %202 = vector.extract_strided_slice %200 {offsets = [0, 0], sizes = [8, 512], strides = [1, 1]} : vector<8x768xf32> to vector<8x512xf32>
    %203 = vector.extract_strided_slice %201 {offsets = [0, 0], sizes = [8, 512], strides = [1, 1]} : vector<8x768xf32> to vector<8x512xf32>
    %204 = arith.addf %202, %203 : vector<8x512xf32>
    %cst_68 = arith.constant 5.000000e-01 : f32
    %205 = vector.broadcast %cst_68 : f32 to vector<8x512xf32>
    %206 = arith.mulf %205, %204 : vector<8x512xf32>
    %207 = math.tanh %206 : vector<8x512xf32>
    %cst_69 = arith.constant 5.000000e-01 : f32
    %208 = vector.broadcast %cst_69 : f32 to vector<8x512xf32>
    %209 = arith.mulf %208, %207 : vector<8x512xf32>
    %cst_70 = arith.constant 5.000000e-01 : f32
    %210 = vector.broadcast %cst_70 : f32 to vector<8x512xf32>
    %211 = arith.addf %209, %210 : vector<8x512xf32>
    %212 = vector.extract_strided_slice %211 {offsets = [0, 0], sizes = [8, 256], strides = [1, 1]} : vector<8x512xf32> to vector<8x256xf32>
    %213 = vector.extract_strided_slice %211 {offsets = [0, 256], sizes = [8, 256], strides = [1, 1]} : vector<8x512xf32> to vector<8x256xf32>
    %214 = vector.extract_strided_slice %200 {offsets = [0, 512], sizes = [8, 256], strides = [1, 1]} : vector<8x768xf32> to vector<8x256xf32>
    %215 = vector.extract_strided_slice %201 {offsets = [0, 512], sizes = [8, 256], strides = [1, 1]} : vector<8x768xf32> to vector<8x256xf32>
    %216 = arith.addf %215, %10 : vector<8x256xf32>
    %217 = arith.mulf %212, %216 : vector<8x256xf32>
    %218 = arith.addf %214, %217 : vector<8x256xf32>
    %219 = math.tanh %218 : vector<8x256xf32>
    %220 = arith.subf %185, %219 : vector<8x256xf32>
    %221 = arith.mulf %213, %220 : vector<8x256xf32>
    %222 = arith.addf %219, %221 : vector<8x256xf32>
    %223 = vector.extract_strided_slice %222 {offsets = [0, 0], sizes = [8, 128], strides = [1, 1]} : vector<8x256xf32> to vector<8x128xf32>
    %224 = arith.index_cast %c5_i32 : i32 to index
    %c0_71 = arith.constant 0 : index
    %c0_72 = arith.constant 0 : index
    %225 = vector.load %arg7[%224, %c0_71, %c0_72] : memref<8x8x128xf32, #tpu.memory_space<vmem>>, vector<1x8x128xf32>
    %226 = vector.shape_cast %225 : vector<1x8x128xf32> to vector<8x128xf32>
    %227 = vector.shape_cast %223 : vector<8x128xf32> to vector<1x8x128xf32>
    tpu.vector_store %arg7[%224, %c0_71, %c0_72], %227 {strides = array<i32>} : memref<8x8x128xf32, #tpu.memory_space<vmem>>, vector<1x8x128xf32>,
    %228 = vector.extract_strided_slice %222 {offsets = [0, 128], sizes = [8, 128], strides = [1, 1]} : vector<8x256xf32> to vector<8x128xf32>
    %c7_i32_73 = arith.constant 7 : i32
    %229 = arith.subi %c7_i32_73, %c5_i32 : i32
    %230 = arith.index_cast %229 : i32 to index
    %c0_74 = arith.constant 0 : index
    %c0_75 = arith.constant 0 : index
    %231 = vector.load %arg8[%230, %c0_74, %c0_75] : memref<8x8x128xf32, #tpu.memory_space<vmem>>, vector<1x8x128xf32>
    %232 = vector.shape_cast %231 : vector<1x8x128xf32> to vector<8x128xf32>
    %233 = vector.shape_cast %228 : vector<8x128xf32> to vector<1x8x128xf32>
    tpu.vector_store %arg8[%230, %c0_74, %c0_75], %233 {strides = array<i32>} : memref<8x8x128xf32, #tpu.memory_space<vmem>>, vector<1x8x128xf32>,
    %c6_i32 = arith.constant 6 : i32
    %c8_i32_76 = arith.constant 8 : i32
    %234 = arith.muli %c6_i32, %c8_i32_76 : i32
    %235 = tpu.assume_multiple %234, 8 : i32
    %236 = arith.index_cast %235 : i32 to index
    %c0_77 = arith.constant 0 : index
    %237 = vector.load %arg10[%236, %c0_77] : memref<64x768xf32, #tpu.memory_space<vmem>>, vector<8x768xf32>
    %cst_78 = arith.constant dense<0.000000e+00> : vector<8x768xf32>
    %238 = tpu.matmul %222, %7, %cst_78 {dimension_numbers = #tpu.dot_dimension_numbers<[1], [0], [0], [1], [0, 0, 1, 1], [], []>} : vector<8x256xf32>, vector<256x768xf32>, vector<8x768xf32> -> vector<8x768xf32>
    %239 = vector.extract_strided_slice %237 {offsets = [0, 0], sizes = [8, 512], strides = [1, 1]} : vector<8x768xf32> to vector<8x512xf32>
    %240 = vector.extract_strided_slice %238 {offsets = [0, 0], sizes = [8, 512], strides = [1, 1]} : vector<8x768xf32> to vector<8x512xf32>
    %241 = arith.addf %239, %240 : vector<8x512xf32>
    %cst_79 = arith.constant 5.000000e-01 : f32
    %242 = vector.broadcast %cst_79 : f32 to vector<8x512xf32>
    %243 = arith.mulf %242, %241 : vector<8x512xf32>
    %244 = math.tanh %243 : vector<8x512xf32>
    %cst_80 = arith.constant 5.000000e-01 : f32
    %245 = vector.broadcast %cst_80 : f32 to vector<8x512xf32>
    %246 = arith.mulf %245, %244 : vector<8x512xf32>
    %cst_81 = arith.constant 5.000000e-01 : f32
    %247 = vector.broadcast %cst_81 : f32 to vector<8x512xf32>
    %248 = arith.addf %246, %247 : vector<8x512xf32>
    %249 = vector.extract_strided_slice %248 {offsets = [0, 0], sizes = [8, 256], strides = [1, 1]} : vector<8x512xf32> to vector<8x256xf32>
    %250 = vector.extract_strided_slice %248 {offsets = [0, 256], sizes = [8, 256], strides = [1, 1]} : vector<8x512xf32> to vector<8x256xf32>
    %251 = vector.extract_strided_slice %237 {offsets = [0, 512], sizes = [8, 256], strides = [1, 1]} : vector<8x768xf32> to vector<8x256xf32>
    %252 = vector.extract_strided_slice %238 {offsets = [0, 512], sizes = [8, 256], strides = [1, 1]} : vector<8x768xf32> to vector<8x256xf32>
    %253 = arith.addf %252, %10 : vector<8x256xf32>
    %254 = arith.mulf %249, %253 : vector<8x256xf32>
    %255 = arith.addf %251, %254 : vector<8x256xf32>
    %256 = math.tanh %255 : vector<8x256xf32>
    %257 = arith.subf %222, %256 : vector<8x256xf32>
    %258 = arith.mulf %250, %257 : vector<8x256xf32>
    %259 = arith.addf %256, %258 : vector<8x256xf32>
    %260 = vector.extract_strided_slice %259 {offsets = [0, 0], sizes = [8, 128], strides = [1, 1]} : vector<8x256xf32> to vector<8x128xf32>
    %261 = arith.index_cast %c6_i32 : i32 to index
    %c0_82 = arith.constant 0 : index
    %c0_83 = arith.constant 0 : index
    %262 = vector.load %arg7[%261, %c0_82, %c0_83] : memref<8x8x128xf32, #tpu.memory_space<vmem>>, vector<1x8x128xf32>
    %263 = vector.shape_cast %262 : vector<1x8x128xf32> to vector<8x128xf32>
    %264 = vector.shape_cast %260 : vector<8x128xf32> to vector<1x8x128xf32>
    tpu.vector_store %arg7[%261, %c0_82, %c0_83], %264 {strides = array<i32>} : memref<8x8x128xf32, #tpu.memory_space<vmem>>, vector<1x8x128xf32>,
    %265 = vector.extract_strided_slice %259 {offsets = [0, 128], sizes = [8, 128], strides = [1, 1]} : vector<8x256xf32> to vector<8x128xf32>
    %c7_i32_84 = arith.constant 7 : i32
    %266 = arith.subi %c7_i32_84, %c6_i32 : i32
    %267 = arith.index_cast %266 : i32 to index
    %c0_85 = arith.constant 0 : index
    %c0_86 = arith.constant 0 : index
    %268 = vector.load %arg8[%267, %c0_85, %c0_86] : memref<8x8x128xf32, #tpu.memory_space<vmem>>, vector<1x8x128xf32>
    %269 = vector.shape_cast %268 : vector<1x8x128xf32> to vector<8x128xf32>
    %270 = vector.shape_cast %265 : vector<8x128xf32> to vector<1x8x128xf32>
    tpu.vector_store %arg8[%267, %c0_85, %c0_86], %270 {strides = array<i32>} : memref<8x8x128xf32, #tpu.memory_space<vmem>>, vector<1x8x128xf32>,
    %c7_i32_87 = arith.constant 7 : i32
    %c8_i32_88 = arith.constant 8 : i32
    %271 = arith.muli %c7_i32_87, %c8_i32_88 : i32
    %272 = tpu.assume_multiple %271, 8 : i32
    %273 = arith.index_cast %272 : i32 to index
    %c0_89 = arith.constant 0 : index
    %274 = vector.load %arg10[%273, %c0_89] : memref<64x768xf32, #tpu.memory_space<vmem>>, vector<8x768xf32>
    %cst_90 = arith.constant dense<0.000000e+00> : vector<8x768xf32>
    %275 = tpu.matmul %259, %7, %cst_90 {dimension_numbers = #tpu.dot_dimension_numbers<[1], [0], [0], [1], [0, 0, 1, 1], [], []>} : vector<8x256xf32>, vector<256x768xf32>, vector<8x768xf32> -> vector<8x768xf32>
    %276 = vector.extract_strided_slice %274 {offsets = [0, 0], sizes = [8, 512], strides = [1, 1]} : vector<8x768xf32> to vector<8x512xf32>
    %277 = vector.extract_strided_slice %275 {offsets = [0, 0], sizes = [8, 512], strides = [1, 1]} : vector<8x768xf32> to vector<8x512xf32>
    %278 = arith.addf %276, %277 : vector<8x512xf32>
    %cst_91 = arith.constant 5.000000e-01 : f32
    %279 = vector.broadcast %cst_91 : f32 to vector<8x512xf32>
    %280 = arith.mulf %279, %278 : vector<8x512xf32>
    %281 = math.tanh %280 : vector<8x512xf32>
    %cst_92 = arith.constant 5.000000e-01 : f32
    %282 = vector.broadcast %cst_92 : f32 to vector<8x512xf32>
    %283 = arith.mulf %282, %281 : vector<8x512xf32>
    %cst_93 = arith.constant 5.000000e-01 : f32
    %284 = vector.broadcast %cst_93 : f32 to vector<8x512xf32>
    %285 = arith.addf %283, %284 : vector<8x512xf32>
    %286 = vector.extract_strided_slice %285 {offsets = [0, 0], sizes = [8, 256], strides = [1, 1]} : vector<8x512xf32> to vector<8x256xf32>
    %287 = vector.extract_strided_slice %285 {offsets = [0, 256], sizes = [8, 256], strides = [1, 1]} : vector<8x512xf32> to vector<8x256xf32>
    %288 = vector.extract_strided_slice %274 {offsets = [0, 512], sizes = [8, 256], strides = [1, 1]} : vector<8x768xf32> to vector<8x256xf32>
    %289 = vector.extract_strided_slice %275 {offsets = [0, 512], sizes = [8, 256], strides = [1, 1]} : vector<8x768xf32> to vector<8x256xf32>
    %290 = arith.addf %289, %10 : vector<8x256xf32>
    %291 = arith.mulf %286, %290 : vector<8x256xf32>
    %292 = arith.addf %288, %291 : vector<8x256xf32>
    %293 = math.tanh %292 : vector<8x256xf32>
    %294 = arith.subf %259, %293 : vector<8x256xf32>
    %295 = arith.mulf %287, %294 : vector<8x256xf32>
    %296 = arith.addf %293, %295 : vector<8x256xf32>
    %297 = vector.extract_strided_slice %296 {offsets = [0, 0], sizes = [8, 128], strides = [1, 1]} : vector<8x256xf32> to vector<8x128xf32>
    %298 = arith.index_cast %c7_i32_87 : i32 to index
    %c0_94 = arith.constant 0 : index
    %c0_95 = arith.constant 0 : index
    %299 = vector.load %arg7[%298, %c0_94, %c0_95] : memref<8x8x128xf32, #tpu.memory_space<vmem>>, vector<1x8x128xf32>
    %300 = vector.shape_cast %299 : vector<1x8x128xf32> to vector<8x128xf32>
    %301 = vector.shape_cast %297 : vector<8x128xf32> to vector<1x8x128xf32>
    tpu.vector_store %arg7[%298, %c0_94, %c0_95], %301 {strides = array<i32>} : memref<8x8x128xf32, #tpu.memory_space<vmem>>, vector<1x8x128xf32>,
    %302 = vector.extract_strided_slice %296 {offsets = [0, 128], sizes = [8, 128], strides = [1, 1]} : vector<8x256xf32> to vector<8x128xf32>
    %c7_i32_96 = arith.constant 7 : i32
    %303 = arith.subi %c7_i32_96, %c7_i32_87 : i32
    %304 = arith.index_cast %303 : i32 to index
    %c0_97 = arith.constant 0 : index
    %c0_98 = arith.constant 0 : index
    %305 = vector.load %arg8[%304, %c0_97, %c0_98] : memref<8x8x128xf32, #tpu.memory_space<vmem>>, vector<1x8x128xf32>
    %306 = vector.shape_cast %305 : vector<1x8x128xf32> to vector<8x128xf32>
    %307 = vector.shape_cast %302 : vector<8x128xf32> to vector<1x8x128xf32>
    tpu.vector_store %arg8[%304, %c0_97, %c0_98], %307 {strides = array<i32>} : memref<8x8x128xf32, #tpu.memory_space<vmem>>, vector<1x8x128xf32>,
    %c8_i32_99 = arith.constant 8 : i32
    %c0_100 = arith.constant 0 : index
    %c0_101 = arith.constant 0 : index
    %308 = vector.load %arg5[%c0_100, %c0_101] : memref<256x128xf32, #tpu.memory_space<vmem>>, vector<256x128xf32>
    %cst_102 = arith.constant dense<0.000000e+00> : vector<8x128xf32>
    %309 = tpu.matmul %296, %308, %cst_102 {dimension_numbers = #tpu.dot_dimension_numbers<[1], [0], [0], [1], [0, 0, 1, 1], [], []>} : vector<8x256xf32>, vector<256x128xf32>, vector<8x128xf32> -> vector<8x128xf32>
    %c0_103 = arith.constant 0 : index
    %c0_104 = arith.constant 0 : index
    %310 = vector.load %arg6[%c0_103, %c0_104] : memref<1x128xf32, #tpu.memory_space<vmem>>, vector<1x128xf32>
    %311 = vector.broadcast %310 : vector<1x128xf32> to vector<8x128xf32>
    %312 = arith.addf %309, %311 : vector<8x128xf32>
    %313 = math.tanh %312 : vector<8x128xf32>
    %c0_105 = arith.constant 0 : index
    %c0_106 = arith.constant 0 : index
    %314 = vector.load %arg9[%c0_105, %c0_106] : memref<8x128xf32, #tpu.memory_space<vmem>>, vector<8x128xf32>
    tpu.vector_store %arg9[%c0_105, %c0_106], %313 {strides = array<i32>} : memref<8x128xf32, #tpu.memory_space<vmem>>, vector<8x128xf32>,
    return
  }
}

</mosaic_0001>

<bundles_post_ra>
// kernel: encoder_forward.1
= control target key start
LH: loop header
LB: loop body
LE: loop exit
PB: predicated region body
PF: predicated region fallthrough
CT: control target
= control target key end

     0   :  { %v8739_v3 = vmov 0.0   ;;  %vm117_vm0 = vcmask 523264   ;;  %s8726_s1 = inlined_call_operand.vmem [shape: f32[64,768], index: 1, kind: input, shape index: {}]   ;;  %s8727_s0 = inlined_call_operand.vmem [shape: f32[64,64], index: 0, kind: input, shape index: {}]   ;;  %s8728_s2 = inlined_call_operand.vmem [shape: f32[256,768], index: 2, kind: input, shape index: {}]   ;;  %s8729_s3 = inlined_call_operand.vmem [shape: f32[1,768], index: 3, kind: input, shape index: {}]   ;;  %s8730_s4 = inlined_call_operand.vmem [shape: f32[1,256], index: 4, kind: input, shape index: {}]   ;;  %s8731_s7 = inlined_call_operand.vmem [shape: f32[8,8,128], index: 7, kind: output, shape index: {0}]   ;;  %s8732_s8 = inlined_call_operand.vmem [shape: f32[8,8,128], index: 8, kind: output, shape index: {1}]   ;;  %s8733_s5 = inlined_call_operand.vmem [shape: f32[256,128], index: 5, kind: input, shape index: {}]   ;;  %s8734_s6 = inlined_call_operand.vmem [shape: f32[1,128], index: 6, kind: input, shape index: {}]   ;;  %s8735_s9 = inlined_call_operand.vmem [shape: f32[8,128], index: 9, kind: output, shape index: {2}]  }
   0x1   :  { %v80_v0 = vld [vmem:[%s8726_s1 + $0x158] sm:$0xff]  ;;  %v82_v1 = vld [vmem:[%s8726_s1 + $0x168] sm:$0xff]  ;;  %v79_v2 = vld [vmem:[%s8726_s1 + $0x150] sm:$0xff]  ;;  %206 = vmatprep.mubr.f32.mxu0 %v8739_v3  ;;  %319 = vmatprep.mubr.f32.mxu1 %v8739_v3 }
   0x2   :  { %158 = vmatprep.subr.mxu0 %v80_v0  ;;  %271 = vmatprep.subr.mxu1 %v82_v1  ;;  %v81_v4 = vld [vmem:[%s8726_s1 + $0x160] sm:$0xff]  ;;  %v74_v5 = vld [vmem:[%s8726_s1 + $0x128] sm:$0xff]  ;;  %v76_v6 = vld [vmem:[%s8726_s1 + $0x138] sm:$0xff] }
   0x3   :  { %159 = vmatpush1.msra.mxu0 %v79_v2  ;;  %272 = vmatpush1.msra.mxu1 %v81_v4  ;;  %v73_v7 = vld [vmem:[%s8726_s1 + $0x120] sm:$0xff]  ;;  %v75_v8 = vld [vmem:[%s8726_s1 + $0x130] sm:$0xff]  ;;  %v68_v9 = vld [vmem:[%s8726_s1 + $0xf8] sm:$0xff] }
   0x4   :  { %160 = vmatprep.subr.mxu0 %v74_v5  ;;  %273 = vmatprep.subr.mxu1 %v76_v6  ;;  %v70_v10 = vld [vmem:[%s8726_s1 + $0x108] sm:$0xff]  ;;  %v67_v11 = vld [vmem:[%s8726_s1 + $0xf0] sm:$0xff]  ;;  %v69_v12 = vld [vmem:[%s8726_s1 + $0x100] sm:$0xff] }
   0x5   :  { %161 = vmatpush1.msra.mxu0 %v73_v7  ;;  %274 = vmatpush1.msra.mxu1 %v75_v8  ;;  %v62_v13 = vld [vmem:[%s8726_s1 + $0xc8] sm:$0xff]  ;;  %v64_v14 = vld [vmem:[%s8726_s1 + $0xd8] sm:$0xff]  ;;  %v61_v15 = vld [vmem:[%s8726_s1 + $0xc0] sm:$0xff] }
   0x6   :  { %162 = vmatprep.subr.mxu0 %v68_v9  ;;  %275 = vmatprep.subr.mxu1 %v70_v10  ;;  %v63_v16 = vld [vmem:[%s8726_s1 + $0xd0] sm:$0xff]  ;;  %v56_v17 = vld [vmem:[%s8726_s1 + $0x98] sm:$0xff]  ;;  %v58_v18 = vld [vmem:[%s8726_s1 + $0xa8] sm:$0xff] }
   0x7   :  { %163 = vmatpush1.msra.mxu0 %v67_v11  ;;  %276 = vmatpush1.msra.mxu1 %v69_v12  ;;  %v55_v19 = vld [vmem:[%s8726_s1 + $0x90] sm:$0xff]  ;;  %v57_v20 = vld [vmem:[%s8726_s1 + $0xa0] sm:$0xff]  ;;  %v50_v21 = vld [vmem:[%s8726_s1 + $0x68] sm:$0xff] }
   0x8   :  { %164 = vmatprep.subr.mxu0 %v62_v13  ;;  %277 = vmatprep.subr.mxu1 %v64_v14  ;;  %v52_v22 = vld [vmem:[%s8726_s1 + $0x78] sm:$0xff]  ;;  %v49_v23 = vld [vmem:[%s8726_s1 + $0x60] sm:$0xff]  ;;  %v51_v24 = vld [vmem:[%s8726_s1 + $0x70] sm:$0xff] }
   0x9   :  { %165 = vmatpush1.msra.mxu0 %v61_v15  ;;  %278 = vmatpush1.msra.mxu1 %v63_v16  ;;  %v44_v25 = vld [vmem:[%s8726_s1 + $0x38] sm:$0xff]  ;;  %v46_v26 = vld [vmem:[%s8726_s1 + $0x48] sm:$0xff]  ;;  %v43_v27 = vld [vmem:[%s8726_s1 + $0x30] sm:$0xff] }
   0xa   :  { %166 = vmatprep.subr.mxu0 %v56_v17  ;;  %279 = vmatprep.subr.mxu1 %v58_v18  ;;  %v45_v28 = vld [vmem:[%s8726_s1 + $0x40] sm:$0xff]  ;;  %v38_v29 = vld [vmem:[%s8726_s1 + $0x8] sm:$0xff]  ;;  %v40_v30 = vld [vmem:[%s8726_s1 + $0x18] sm:$0xff] }
   0xb   :  { %167 = vmatpush1.msra.mxu0 %v55_v19  ;;  %280 = vmatpush1.msra.mxu1 %v57_v20  ;;  %v37_v31 = vld [vmem:[%s8726_s1] sm:$0xff]  ;;  %v39_v32 = vld [vmem:[%s8726_s1 + $0x10] sm:$0xff]  ;;  %v3656_v34 = vld [vmem:[%s8728_s2 + $0x2d8] sm:$0xff] }
   0xc   :  { %168 = vmatprep.subr.mxu0 %v50_v21  ;;  %281 = vmatprep.subr.mxu1 %v52_v22  ;;  %v3651_v33 = vld [vmem:[%s8727_s0] sm:$0xff]  ;;  %v3661_v35 = vld [vmem:[%s8728_s2 + $0x2d0] sm:$0xff]  ;;  %v3670_v36 = vld [vmem:[%s8728_s2 + $0x2a8] sm:$0xff] }
   0xd   :  { %169 = vmatpush1.msra.mxu0 %v49_v23  ;;  %282 = vmatpush1.msra.mxu1 %v51_v24  ;;  %v84_v37 = vld [vmem:[%s8726_s1 + $0x178] sm:$0xff]  ;;  %v3680_v38 = vld [vmem:[%s8728_s2 + $0x2a0] sm:$0xff]  ;;  %v3685_v39 = vld [vmem:[%s8727_s0 + $0x8] sm:$0xff] }
   0xe   :  { %170 = vmatprep.subr.mxu0 %v44_v25  ;;  %283 = vmatprep.subr.mxu1 %v46_v26  ;;  %v83_v40 = vld [vmem:[%s8726_s1 + $0x170] sm:$0xff]  ;;  %v3694_v41 = vld [vmem:[%s8728_s2 + $0x278] sm:$0xff]  ;;  %v78_v43 = vld [vmem:[%s8726_s1 + $0x148] sm:$0xff] }
   0xf   :  { %171 = vmatpush1.msra.mxu0 %v43_v27  ;;  %284 = vmatpush1.msra.mxu1 %v45_v28  ;;  %v3700_v42 = vld [vmem:[%s8728_s2 + $0x270] sm:$0xff]  ;;  %v3711_v44 = vld [vmem:[%s8728_s2 + $0x248] sm:$0xff]  ;;  %v77_v45 = vld [vmem:[%s8726_s1 + $0x140] sm:$0xff] }
  0x10   :  { %172 = vmatprep.subr.mxu0 %v38_v29  ;;  %285 = vmatprep.subr.mxu1 %v40_v30  ;;  %v3721_v46 = vld [vmem:[%s8728_s2 + $0x240] sm:$0xff]  ;;  %v3726_v47 = vld [vmem:[%s8727_s0 + $0x10] sm:$0xff]  ;;  %v3732_v48 = vld [vmem:[%s8728_s2 + $0x218] sm:$0xff] }
  0x11   :  { %173 = vmatpush1.msra.mxu0 %v37_v31  ;;  %286 = vmatpush1.msra.mxu1 %v39_v32  ;;  %v3738_v49 = vld [vmem:[%s8728_s2 + $0x210] sm:$0xff]  ;;  %v72_v50 = vld [vmem:[%s8726_s1 + $0x118] sm:$0xff]  ;;  %v3749_v51 = vld [vmem:[%s8728_s2 + $0x1e8] sm:$0xff] }
  0x12   :  { %2941 = vmatmul.mubr.msk.f32.vlgmr.msra.gmra.mxu0 %vm117_vm0, %v3651_v33  ;;  %2949 = vmatmul.mubr.msk.f32.vlgmr.msra.gmra.mxu1 %vm117_vm0, %v3651_v33  ;;  %v71_v52 = vld [vmem:[%s8726_s1 + $0x110] sm:$0xff]  ;;  %v3759_v53 = vld [vmem:[%s8728_s2 + $0x1e0] sm:$0xff]  ;;  %v3764_v54 = vld [vmem:[%s8727_s0 + $0x18] sm:$0xff] }
  0x13   :  { %742 = vmatprep.subr.mxu1 %v3656_v34  ;;  %212 = vmatprep.mubr.f32.mxu0 %v8739_v3  ;;  %v3770_v55 = vld [vmem:[%s8728_s2 + $0x1b8] sm:$0xff]  ;;  %v3776_v56 = vld [vmem:[%s8728_s2 + $0x1b0] sm:$0xff]  ;;  %v66_v57 = vld [vmem:[%s8726_s1 + $0xe8] sm:$0xff] }
  0x14   :  { %743 = vmatpush1.msra.mxu1 %v3661_v35  ;;  %384 = vmatprep.subr.mxu0 %v84_v37  ;;  %v3787_v58 = vld [vmem:[%s8728_s2 + $0x188] sm:$0xff]  ;;  %v65_v59 = vld [vmem:[%s8726_s1 + $0xe0] sm:$0xff]  ;;  %v3808_v62 = vld [vmem:[%s8728_s2 + $0x158] sm:$0xff] }
  0x15   :  { %744 = vmatprep.subr.mxu1 %v3670_v36  ;;  %385 = vmatpush1.msra.mxu0 %v83_v40  ;;  %v3797_v60 = vld [vmem:[%s8728_s2 + $0x180] sm:$0xff]  ;;  %v3814_v63 = vld [vmem:[%s8728_s2 + $0x150] sm:$0xff]  ;;  %v60_v0 = vld [vmem:[%s8726_s1 + $0xb8] sm:$0xff] }
  0x16   :  { %745 = vmatpush1.msra.mxu1 %v3680_v38  ;;  %2942 = vmatmul.mubr.msk.f32.gmra.mxu0 %vm117_vm0, %v3685_v39  ;;  %v3802_v61 = vld [vmem:[%s8727_s0 + $0x20] sm:$0xff]  ;;  %v3825_v1 = vld [vmem:[%s8728_s2 + $0x128] sm:$0xff]  ;;  %v59_v2 = vld [vmem:[%s8726_s1 + $0xb0] sm:$0xff] }
  0x17   :  { %746 = vmatprep.subr.mxu1 %v3694_v41  ;;  %218 = vmatprep.mubr.f32.mxu0 %v8739_v3  ;;  %v3835_v4 = vld [vmem:[%s8728_s2 + $0x120] sm:$0xff]  ;;  %v3840_v5 = vld [vmem:[%s8727_s0 + $0x28] sm:$0xff]  ;;  %v3846_v6 = vld [vmem:[%s8728_s2 + $0xf8] sm:$0xff] }
  0x18   :  { %747 = vmatpush1.msra.mxu1 %v3700_v42  ;;  %386 = vmatprep.subr.mxu0 %v78_v43  ;;  %v3852_v7 = vld [vmem:[%s8728_s2 + $0xf0] sm:$0xff]  ;;  %v54_v8 = vld [vmem:[%s8726_s1 + $0x88] sm:$0xff]  ;;  %v53_v10 = vld [vmem:[%s8726_s1 + $0x80] sm:$0xff] }
  0x19   :  { %748 = vmatprep.subr.mxu1 %v3711_v44  ;;  %387 = vmatpush1.msra.mxu0 %v77_v45  ;;  %v3863_v9 = vld [vmem:[%s8728_s2 + $0xc8] sm:$0xff]  ;;  %v3873_v11 = vld [vmem:[%s8728_s2 + $0xc0] sm:$0xff]  ;;  %v3878_v12 = vld [vmem:[%s8727_s0 + $0x30] sm:$0xff] }
  0x1a   :  { %749 = vmatpush1.msra.mxu1 %v3721_v46  ;;  %2943 = vmatmul.mubr.msk.f32.gmra.mxu0 %vm117_vm0, %v3726_v47  ;;  %v3884_v13 = vld [vmem:[%s8728_s2 + $0x98] sm:$0xff]  ;;  %v3890_v14 = vld [vmem:[%s8728_s2 + $0x90] sm:$0xff]  ;;  %v3901_v16 = vld [vmem:[%s8728_s2 + $0x68] sm:$0xff] }
  0x1b   :  { %750 = vmatprep.subr.mxu1 %v3732_v48  ;;  %224 = vmatprep.mubr.f32.mxu0 %v8739_v3  ;;  %v48_v15 = vld [vmem:[%s8726_s1 + $0x58] sm:$0xff]  ;;  %v47_v17 = vld [vmem:[%s8726_s1 + $0x50] sm:$0xff]  ;;  %v3911_v18 = vld [vmem:[%s8728_s2 + $0x60] sm:$0xff] }
  0x1c   :  { %751 = vmatpush1.msra.mxu1 %v3738_v49  ;;  %388 = vmatprep.subr.mxu0 %v72_v50  ;;  %v3916_v19 = vld [vmem:[%s8727_s0 + $0x38] sm:$0xff]  ;;  %v42_v21 = vld [vmem:[%s8726_s1 + $0x28] sm:$0xff]  ;;  %v3931_v22 = vld [vmem:[%s8728_s2 + $0x30] sm:$0xff] }
  0x1d   :  { %752 = vmatprep.subr.mxu1 %v3749_v51  ;;  %389 = vmatpush1.msra.mxu0 %v71_v52  ;;  %v3922_v20 = vld [vmem:[%s8728_s2 + $0x38] sm:$0xff]  ;;  %v41_v23 = vld [vmem:[%s8726_s1 + $0x20] sm:$0xff]  ;;  %v3942_v24 = vld [vmem:[%s8728_s2 + $0x8] sm:$0xff] }
  0x1e   :  { %753 = vmatpush1.msra.mxu1 %v3759_v53  ;;  %2944 = vmatmul.mubr.msk.f32.gmra.mxu0 %vm117_vm0, %v3764_v54  ;;  %v3948_v25 = vld [vmem:[%s8728_s2] sm:$0xff]  ;;  %v3953_v26 = vld [vmem:[%s8728_s2 + $0x2e8] sm:$0xff]  ;;  %v3959_v27 = vld [vmem:[%s8728_s2 + $0x5d8] sm:$0xff] }
  0x1f   :  { %754 = vmatprep.subr.mxu1 %v3770_v55  ;;  %230 = vmatprep.mubr.f32.mxu0 %v8739_v3  ;;  %v3966_v28 = vld [vmem:[%s8728_s2 + $0x2e0] sm:$0xff]  ;;  %v3971_v29 = vld [vmem:[%s8728_s2 + $0x5d0] sm:$0xff]  ;;  %v3978_v30 = vld [vmem:[%s8728_s2 + $0x2b8] sm:$0xff] }
  0x20   :  { %755 = vmatpush1.msra.mxu1 %v3776_v56  ;;  %390 = vmatprep.subr.mxu0 %v66_v57  ;;  %v3986_v31 = vld [vmem:[%s8728_s2 + $0x5a8] sm:$0xff]  ;;  %v3991_v32 = vld [vmem:[%s8728_s2 + $0x2b0] sm:$0xff]  ;;  %v4005_v37 = vld [vmem:[%s8728_s2 + $0x5a0] sm:$0xff] }
  0x21   :  { %756 = vmatprep.subr.mxu1 %v3787_v58  ;;  %391 = vmatpush1.msra.mxu0 %v65_v59  ;;  %v4010_v40 = vld [vmem:[%s8728_s2 + $0x280] sm:$0xff]  ;;  %v4017_v43 = vld [vmem:[%s8728_s2 + $0x578] sm:$0xff]  ;;  %v4030_v50 = vld [vmem:[%s8728_s2 + $0x570] sm:$0xff] }
  0x22   :  { %757 = vmatpush1.msra.mxu1 %v3797_v60  ;;  %2945 = vmatmul.mubr.msk.f32.gmra.mxu0 %vm117_vm0, %v3802_v61  ;;  %v4022_v45 = vld [vmem:[%s8728_s2 + $0x258] sm:$0xff]  ;;  %v4037_v52 = vld [vmem:[%s8728_s2 + $0x548] sm:$0xff]  ;;  %v4042_v57 = vld [vmem:[%s8728_s2 + $0x250] sm:$0xff] }
  0x23   :  { %758 = vmatprep.subr.mxu1 %v3808_v62  ;;  %236 = vmatprep.mubr.f32.mxu0 %v8739_v3  ;;  %v4049_v59 = vld [vmem:[%s8728_s2 + $0x228] sm:$0xff] }
  0x24   :  { %759 = vmatpush1.msra.mxu1 %v3814_v63  ;;  %392 = vmatprep.subr.mxu0 %v60_v0  ;;  %v4056_v0 = vld [vmem:[%s8728_s2 + $0x540] sm:$0xff] }
  0x25   :  { %760 = vmatprep.subr.mxu1 %v3825_v1  ;;  %393 = vmatpush1.msra.mxu0 %v59_v2  ;;  %9421 = vst [vmem:[#allocation3_spill] sm:$0xff] %v4056_v0  ;;  %v4061_v2 = vld [vmem:[%s8728_s2 + $0x220] sm:$0xff] }
  0x26   :  { %761 = vmatpush1.msra.mxu1 %v3835_v4  ;;  %2946 = vmatmul.mubr.msk.f32.gmra.mxu0 %vm117_vm0, %v3840_v5  ;;  %9422 = vst [vmem:[#allocation4_spill] sm:$0xff] %v4061_v2 }
  0x27   :  { %762 = vmatprep.subr.mxu1 %v3846_v6  ;;  %242 = vmatprep.mubr.f32.mxu0 %v8739_v3 }
  0x28   :  { %763 = vmatpush1.msra.mxu1 %v3852_v7  ;;  %394 = vmatprep.subr.mxu0 %v54_v8  ;;  %v4068_v8 = vld [vmem:[%s8728_s2 + $0x518] sm:$0xff] }
  0x29   :  { %764 = vmatprep.subr.mxu1 %v3863_v9  ;;  %395 = vmatpush1.msra.mxu0 %v53_v10  ;;  %9423 = vst [vmem:[#allocation5_spill] sm:$0xff] %v4068_v8  ;;  %v4073_v10 = vld [vmem:[%s8728_s2 + $0x1f8] sm:$0xff] }
  0x2a   :  { %765 = vmatpush1.msra.mxu1 %v3873_v11  ;;  %2947 = vmatmul.mubr.msk.f32.gmra.mxu0 %vm117_vm0, %v3878_v12  ;;  %9424 = vst [vmem:[#allocation6_spill] sm:$0xff] %v4073_v10 }
  0x2b   :  { %766 = vmatprep.subr.mxu1 %v3884_v13  ;;  %248 = vmatprep.mubr.f32.mxu0 %v8739_v3 }
  0x2c   :  { %767 = vmatpush1.msra.mxu1 %v3890_v14  ;;  %396 = vmatprep.subr.mxu0 %v48_v15  ;;  %v4081_v15 = vld [vmem:[%s8728_s2 + $0x510] sm:$0xff] }
  0x2d   :  { %768 = vmatprep.subr.mxu1 %v3901_v16  ;;  %397 = vmatpush1.msra.mxu0 %v47_v17  ;;  %9425 = vst [vmem:[#allocation7_spill] sm:$0xff] %v4081_v15  ;;  %v4088_v17 = vld [vmem:[%s8728_s2 + $0x4e8] sm:$0xff] }
  0x2e   :  { %769 = vmatpush1.msra.mxu1 %v3911_v18  ;;  %2948 = vmatmul.mubr.msk.f32.gmra.mxu0 %vm117_vm0, %v3916_v19  ;;  %9426 = vst [vmem:[#allocation8_spill] sm:$0xff] %v4088_v17 }
  0x2f   :  { %770 = vmatprep.subr.mxu1 %v3922_v20  ;;  %398 = vmatprep.subr.mxu0 %v42_v21  ;;  %v4093_v21 = vld [vmem:[%s8728_s2 + $0x1f0] sm:$0xff] }
  0x30   :  { %771 = vmatpush1.msra.mxu1 %v3931_v22  ;;  %399 = vmatpush1.msra.mxu0 %v41_v23  ;;  %9427 = vst [vmem:[#allocation9_spill] sm:$0xff] %v4093_v21  ;;  %v4100_v23 = vld [vmem:[%s8728_s2 + $0x1c8] sm:$0xff] }
  0x31   :  { %772 = vmatprep.subr.mxu1 %v3942_v24  ;;  %432 = vmatprep.mubr.f32.mxu0 %v8739_v3  ;;  %9428 = vst [vmem:[#allocation10_spill] sm:$0xff] %v4100_v23 }
  0x32   :  { %773 = vmatpush1.msra.mxu1 %v3948_v25  ;;  %813 = vmatprep.subr.mxu0 %v3953_v26 }
  0x33   :  { %2957 = vmatmul.mubr.msk.f32.vlgmr.msra.gmra.mxu0 %vm117_vm0, %v3651_v33  ;;  %774 = vmatprep.subr.mxu1 %v3959_v27  ;;  %v3998_v33 = vld [vmem:[%s8728_s2 + $0x288] sm:$0xff] }
  0x34   :  { %814 = vmatpush1.msra.mxu0 %v3966_v28  ;;  %775 = vmatpush2.msra.mxu1 %v3971_v29 }
  0x35   :  { %815 = vmatprep.subr.mxu0 %v3978_v30  ;;  %325 = vmatprep.mubr.f32.mxu1 %v8739_v3 }
  0x36   :  { %776 = vmatprep.subr.mxu1 %v3986_v31  ;;  %816 = vmatpush1.msra.mxu0 %v3991_v32 }
  0x37   :  { %2950 = vmatmul.mubr.msk.f32.gmra.mxu1 %vm117_vm0, %v3685_v39  ;;  %817 = vmatprep.subr.mxu0 %v3998_v33 }
  0x38   :  { %777 = vmatpush2.msra.mxu1 %v4005_v37  ;;  %818 = vmatpush1.msra.mxu0 %v4010_v40 }
  0x39   :  { %778 = vmatprep.subr.mxu1 %v4017_v43  ;;  %819 = vmatprep.subr.mxu0 %v4022_v45 }
  0x3a   :  { %779 = vmatpush2.msra.mxu1 %v4030_v50  ;;  %331 = vmatprep.mubr.f32.mxu1 %v8739_v3 }
  0x3b   :  { %780 = vmatprep.subr.mxu1 %v4037_v52  ;;  %820 = vmatpush1.msra.mxu0 %v4042_v57 }
  0x3c   :  { %2951 = vmatmul.mubr.msk.f32.gmra.mxu1 %vm117_vm0, %v3726_v47  ;;  %821 = vmatprep.subr.mxu0 %v4049_v59 }
  0x3d   :  { %781 = vmatpush2.msra.mxu1 %v4056_v0  ;;  %822 = vmatpush1.msra.mxu0 %v4061_v2  ;;  %v4107_v0 = vld [vmem:[%s8728_s2 + $0x4e0] sm:$0xff]  ;;  %v4195_v2 = vld [vmem:[%s8728_s2 + $0x130] sm:$0xff] }
  0x3e   :  { %782 = vmatprep.subr.mxu1 %v4068_v8  ;;  %823 = vmatprep.subr.mxu0 %v4073_v10  ;;  %9429 = vst [vmem:[#allocation11_spill] sm:$0xff] %v4107_v0  ;;  %v4112_v8 = vld [vmem:[%s8728_s2 + $0x1c0] sm:$0xff]  ;;  %v4144_v10 = vld [vmem:[%s8728_s2 + $0x190] sm:$0xff]  ;;  %9444 = vst [vmem:[#allocation25_spill] sm:$0xff] %v4195_v2 }
  0x3f   :  { %783 = vmatpush2.msra.mxu1 %v4081_v15  ;;  %337 = vmatprep.mubr.f32.mxu1 %v8739_v3  ;;  %9430 = vst [vmem:[#allocation12_spill] sm:$0xff] %v4112_v8  ;;  %v4119_v15 = vld [vmem:[%s8728_s2 + $0x4b8] sm:$0xff]  ;;  %9435 = vst [vmem:[#allocation17_spill] sm:$0xff] %v4144_v10 }
  0x40   :  { %784 = vmatprep.subr.mxu1 %v4088_v17  ;;  %824 = vmatpush1.msra.mxu0 %v4093_v21  ;;  %9431 = vst [vmem:[#allocation13_spill] sm:$0xff] %v4119_v15  ;;  %v4124_v3 = vld [vmem:[%s8728_s2 + $0x198] sm:$0xff]  ;;  %v4132_v17 = vld [vmem:[%s8728_s2 + $0x4b0] sm:$0xff]  ;;  %v4139_v21 = vld [vmem:[%s8728_s2 + $0x488] sm:$0xff] }
  0x41   :  { %9432 = vst [vmem:[#allocation14_spill] sm:$0xff] %v4124_v3  ;;  %2952 = vmatmul.mubr.msk.f32.gmra.mxu1 %vm117_vm0, %v3764_v54  ;;  %825 = vmatprep.subr.mxu0 %v4100_v23  ;;  %9433 = vst [vmem:[#allocation15_spill] sm:$0xff] %v4132_v17  ;;  %v4158_v23 = vld [vmem:[%s8728_s2 + $0x480] sm:$0xff] }
  0x42   :  { %785 = vmatpush2.msra.mxu1 %v4107_v0  ;;  %826 = vmatpush1.msra.mxu0 %v4112_v8  ;;  %9434 = vst [vmem:[#allocation16_spill] sm:$0xff] %v4139_v21  ;;  %v4151_v0 = vld [vmem:[%s8728_s2 + $0x168] sm:$0xff]  ;;  %v9437_v8 = vmov 0.0   ;;  %9438 = vst [vmem:[#allocation19_spill] sm:$0xff] %v4158_v23 }
  0x43   :  { %786 = vmatprep.subr.mxu1 %v4119_v15  ;;  %827 = vmatprep.subr.mxu0 %v4124_v3  ;;  %9436 = vst [vmem:[#allocation18_spill] sm:$0xff] %v4151_v0  ;;  %v4163_v15 = vld [vmem:[%s8728_s2 + $0x160] sm:$0xff]  ;;  %v4175_v3 = vld [vmem:[%s8728_s2 + $0x138] sm:$0xff] }
  0x44   :  { %787 = vmatpush2.msra.mxu1 %v4132_v17  ;;  %343 = vmatprep.mubr.f32.mxu1 %v9437_v8  ;;  %9439 = vst [vmem:[#allocation20_spill] sm:$0xff] %v4163_v15  ;;  %v4170_v17 = vld [vmem:[%s8728_s2 + $0x458] sm:$0xff]  ;;  %9441 = vst [vmem:[#allocation22_spill] sm:$0xff] %v4175_v3 }
  0x45   :  { %788 = vmatprep.subr.mxu1 %v4139_v21  ;;  %828 = vmatpush1.msra.mxu0 %v4144_v10  ;;  %9440 = vst [vmem:[#allocation21_spill] sm:$0xff] %v4170_v17  ;;  %v4183_v21 = vld [vmem:[%s8728_s2 + $0x450] sm:$0xff]  ;;  %v4190_v10 = vld [vmem:[%s8728_s2 + $0x428] sm:$0xff] }
  0x46   :  { %2953 = vmatmul.mubr.msk.f32.gmra.mxu1 %vm117_vm0, %v3802_v61  ;;  %829 = vmatprep.subr.mxu0 %v4151_v0  ;;  %9442 = vst [vmem:[#allocation23_spill] sm:$0xff] %v4183_v21  ;;  %9443 = vst [vmem:[#allocation24_spill] sm:$0xff] %v4190_v10  ;;  %v4246_v0 = vld [vmem:[%s8728_s2 + $0xd0] sm:$0xff] }
  0x47   :  { %789 = vmatpush2.msra.mxu1 %v4158_v23  ;;  %830 = vmatpush1.msra.mxu0 %v4163_v15  ;;  %v4202_v23 = vld [vmem:[%s8728_s2 + $0x108] sm:$0xff]  ;;  %v4209_v15 = vld [vmem:[%s8728_s2 + $0x420] sm:$0xff]  ;;  %9452 = vst [vmem:[#allocation33_spill] sm:$0xff] %v4246_v0 }
  0x48   :  { %790 = vmatprep.subr.mxu1 %v4170_v17  ;;  %831 = vmatprep.subr.mxu0 %v4175_v3  ;;  %9445 = vst [vmem:[#allocation26_spill] sm:$0xff] %v4202_v23  ;;  %9446 = vst [vmem:[#allocation27_spill] sm:$0xff] %v4209_v15  ;;  %v4214_v17 = vld [vmem:[%s8728_s2 + $0x100] sm:$0xff]  ;;  %v4226_v3 = vld [vmem:[%s8728_s2 + $0xd8] sm:$0xff] }
  0x49   :  { %791 = vmatpush2.msra.mxu1 %v4183_v21  ;;  %349 = vmatprep.mubr.f32.mxu1 %v9437_v8  ;;  %9447 = vst [vmem:[#allocation28_spill] sm:$0xff] %v4214_v17  ;;  %v4221_v21 = vld [vmem:[%s8728_s2 + $0x3f8] sm:$0xff]  ;;  %9449 = vst [vmem:[#allocation30_spill] sm:$0xff] %v4226_v3 }
  0x4a   :  { %792 = vmatprep.subr.mxu1 %v4190_v10  ;;  %832 = vmatpush1.msra.mxu0 %v4195_v2  ;;  %9448 = vst [vmem:[#allocation29_spill] sm:$0xff] %v4221_v21  ;;  %v4234_v10 = vld [vmem:[%s8728_s2 + $0x3f0] sm:$0xff]  ;;  %v4241_v2 = vld [vmem:[%s8728_s2 + $0x3c8] sm:$0xff] }
  0x4b   :  { %2954 = vmatmul.mubr.msk.f32.gmra.mxu1 %vm117_vm0, %v3840_v5  ;;  %833 = vmatprep.subr.mxu0 %v4202_v23  ;;  %9450 = vst [vmem:[#allocation31_spill] sm:$0xff] %v4234_v10  ;;  %9451 = vst [vmem:[#allocation32_spill] sm:$0xff] %v4241_v2  ;;  %v4297_v23 = vld [vmem:[%s8728_s2 + $0x70] sm:$0xff] }
  0x4c   :  { %793 = vmatpush2.msra.mxu1 %v4209_v15  ;;  %834 = vmatpush1.msra.mxu0 %v4214_v17  ;;  %v4253_v15 = vld [vmem:[%s8728_s2 + $0xa8] sm:$0xff]  ;;  %v4260_v17 = vld [vmem:[%s8728_s2 + $0x3c0] sm:$0xff]  ;;  %9460 = vst [vmem:[#allocation41_spill] sm:$0xff] %v4297_v23 }
  0x4d   :  { %794 = vmatprep.subr.mxu1 %v4221_v21  ;;  %835 = vmatprep.subr.mxu0 %v4226_v3  ;;  %9453 = vst [vmem:[#allocation34_spill] sm:$0xff] %v4253_v15  ;;  %9454 = vst [vmem:[#allocation35_spill] sm:$0xff] %v4260_v17  ;;  %v4265_v21 = vld [vmem:[%s8728_s2 + $0xa0] sm:$0xff]  ;;  %v4277_v3 = vld [vmem:[%s8728_s2 + $0x78] sm:$0xff] }
  0x4e   :  { %795 = vmatpush2.msra.mxu1 %v4234_v10  ;;  %355 = vmatprep.mubr.f32.mxu1 %v9437_v8  ;;  %9455 = vst [vmem:[#allocation36_spill] sm:$0xff] %v4265_v21  ;;  %v4272_v10 = vld [vmem:[%s8728_s2 + $0x398] sm:$0xff]  ;;  %9457 = vst [vmem:[#allocation38_spill] sm:$0xff] %v4277_v3 }
  0x4f   :  { %796 = vmatprep.subr.mxu1 %v4241_v2  ;;  %836 = vmatpush1.msra.mxu0 %v4246_v0  ;;  %9456 = vst [vmem:[#allocation37_spill] sm:$0xff] %v4272_v10  ;;  %v4285_v2 = vld [vmem:[%s8728_s2 + $0x390] sm:$0xff]  ;;  %v4292_v0 = vld [vmem:[%s8728_s2 + $0x368] sm:$0xff] }
  0x50   :  { %2955 = vmatmul.mubr.msk.f32.gmra.mxu1 %vm117_vm0, %v3878_v12  ;;  %837 = vmatprep.subr.mxu0 %v4253_v15  ;;  %9458 = vst [vmem:[#allocation39_spill] sm:$0xff] %v4285_v2  ;;  %9459 = vst [vmem:[#allocation40_spill] sm:$0xff] %v4292_v0  ;;  %v4348_v15 = vld [vmem:[%s8728_s2 + $0x308] sm:$0xff] }
  0x51   :  { %797 = vmatpush2.msra.mxu1 %v4260_v17  ;;  %838 = vmatpush1.msra.mxu0 %v4265_v21  ;;  %v4304_v17 = vld [vmem:[%s8728_s2 + $0x48] sm:$0xff]  ;;  %v4311_v21 = vld [vmem:[%s8728_s2 + $0x360] sm:$0xff]  ;;  %9467 = vst [vmem:[#allocation48_spill] sm:$0xff] %v4348_v15 }
  0x52   :  { %798 = vmatprep.subr.mxu1 %v4272_v10  ;;  %839 = vmatprep.subr.mxu0 %v4277_v3  ;;  %9461 = vst [vmem:[#allocation42_spill] sm:$0xff] %v4304_v17  ;;  %9462 = vst [vmem:[#allocation43_spill] sm:$0xff] %v4311_v21  ;;  %v4316_v10 = vld [vmem:[%s8728_s2 + $0x40] sm:$0xff]  ;;  %v4328_v3 = vld [vmem:[%s8728_s2 + $0x18] sm:$0xff] }
  0x53   :  { %799 = vmatpush2.msra.mxu1 %v4285_v2  ;;  %361 = vmatprep.mubr.f32.mxu1 %v9437_v8  ;;  %v4323_v2 = vld [vmem:[%s8728_s2 + $0x338] sm:$0xff]  ;;  %9464 = vst [vmem:[#allocation45_spill] sm:$0xff] %v4328_v3 }
  0x54   :  { %800 = vmatprep.subr.mxu1 %v4292_v0  ;;  %840 = vmatpush1.msra.mxu0 %v4297_v23  ;;  %9463 = vst [vmem:[#allocation44_spill] sm:$0xff] %v4323_v2  ;;  %v4336_v0 = vld [vmem:[%s8728_s2 + $0x330] sm:$0xff] }
  0x55   :  { %2956 = vmatmul.mubr.msk.f32.gmra.mxu1 %vm117_vm0, %v3916_v19  ;;  %841 = vmatprep.subr.mxu0 %v4304_v17  ;;  %9465 = vst [vmem:[#allocation46_spill] sm:$0xff] %v4336_v0  ;;  %v4341_v23 = vld [vmem:[%s8728_s2 + $0x10] sm:$0xff]  ;;  %v4355_v17 = vld [vmem:[%s8728_s2 + $0x300] sm:$0xff] }
  0x56   :  { %9466 = vst [vmem:[#allocation47_spill] sm:$0xff] %v4341_v23  ;;  %801 = vmatpush2.msra.mxu1 %v4311_v21  ;;  %842 = vmatpush1.msra.mxu0 %v4316_v10  ;;  %9468 = vst [vmem:[#allocation49_spill] sm:$0xff] %v4355_v17  ;;  %v4360_v21 = vld [vmem:[%s8728_s2 + $0x5e8] sm:$0xff] }
  0x57   :  { %802 = vmatprep.subr.mxu1 %v4323_v2  ;;  %843 = vmatprep.subr.mxu0 %v4328_v3  ;;  %9469 = vst [vmem:[#allocation50_spill] sm:$0xff] %v4360_v21  ;;  %v4367_v2 = vld [vmem:[%s8728_s2 + $0x5e0] sm:$0xff]  ;;  %v4374_v3 = vld [vmem:[%s8728_s2 + $0x2f8] sm:$0xff] }
  0x58   :  { %803 = vmatpush2.msra.mxu1 %v4336_v0  ;;  %844 = vmatpush1.msra.mxu0 %v4341_v23  ;;  %9470 = vst [vmem:[#allocation51_spill] sm:$0xff] %v4367_v2  ;;  %9471 = vst [vmem:[#allocation52_spill] sm:$0xff] %v4374_v3  ;;  %v4379_v0 = vld [vmem:[%s8728_s2 + $0x5b8] sm:$0xff]  ;;  %v4393_v23 = vld [vmem:[%s8728_s2 + $0x5b0] sm:$0xff] }
  0x59   :  { %804 = vmatprep.subr.mxu1 %v4348_v15  ;;  %806 = vmatprep.mubr.f32.mxu1 %v9437_v8  ;;  %9472 = vst [vmem:[#allocation53_spill] sm:$0xff] %v4379_v0  ;;  %v4386_v15 = vld [vmem:[%s8728_s2 + $0x2f0] sm:$0xff]  ;;  %9474 = vst [vmem:[#allocation55_spill] sm:$0xff] %v4393_v23 }
  0x5a   :  { %805 = vmatpush2.msra.mxu1 %v4355_v17  ;;  %845 = vmatprep.subr.mxu0 %v4360_v21  ;;  %9473 = vst [vmem:[#allocation54_spill] sm:$0xff] %v4386_v15  ;;  %v4398_v17 = vld [vmem:[%s8728_s2 + $0x2c8] sm:$0xff] }
  0x5b   :  { %807 = vmatmul.mubr.f32.vlgmr.msra.gmra.mxu1 %v9437_v8  ;;  %846 = vmatpush2.msra.mxu0 %v4367_v2  ;;  %9475 = vst [vmem:[#allocation56_spill] sm:$0xff] %v4398_v17  ;;  %v4405_v21 = vld [vmem:[%s8728_s2 + $0x588] sm:$0xff]  ;;  %v4412_v2 = vld [vmem:[%s8728_s2 + $0x2c0] sm:$0xff] }
  0x5c   :  { %884 = vmatprep.subr.mxu1 %v4374_v3  ;;  %847 = vmatprep.subr.mxu0 %v4379_v0  ;;  %9476 = vst [vmem:[#allocation57_spill] sm:$0xff] %v4412_v2  ;;  %v4417_v3 = vld [vmem:[%s8728_s2 + $0x580] sm:$0xff]  ;;  %v4429_v0 = vld [vmem:[%s8728_s2 + $0x558] sm:$0xff] }
  0x5d   :  { %885 = vmatpush1.msra.mxu1 %v4386_v15  ;;  %438 = vmatprep.mubr.f32.mxu0 %v9437_v8  ;;  %9477 = vst [vmem:[#allocation58_spill] sm:$0xff] %v4417_v3  ;;  %v4424_v15 = vld [vmem:[%s8728_s2 + $0x298] sm:$0xff]  ;;  %9479 = vst [vmem:[#allocation60_spill] sm:$0xff] %v4429_v0 }
  0x5e   :  { %848 = vmatpush2.msra.mxu0 %v4393_v23  ;;  %886 = vmatprep.subr.mxu1 %v4398_v17  ;;  %9478 = vst [vmem:[#allocation59_spill] sm:$0xff] %v4424_v15  ;;  %v4437_v23 = vld [vmem:[%s8728_s2 + $0x290] sm:$0xff] }
  0x5f   :  { %2958 = vmatmul.mubr.msk.f32.gmra.mxu0 %vm117_vm0, %v3685_v39  ;;  %849 = vmatprep.subr.mxu0 %v4405_v21  ;;  %9480 = vst [vmem:[#allocation61_spill] sm:$0xff] %v4437_v23  ;;  %v4444_v17 = vld [vmem:[%s8728_s2 + $0x550] sm:$0xff]  ;;  %v4449_v39 = vld [vmem:[%s8728_s2 + $0x268] sm:$0xff] }
  0x60   :  { %887 = vmatpush1.msra.mxu1 %v4412_v2  ;;  %850 = vmatpush2.msra.mxu0 %v4417_v3  ;;  %9481 = vst [vmem:[#allocation62_spill] sm:$0xff] %v4444_v17  ;;  %9482 = vst [vmem:[#allocation63_spill] sm:$0xff] %v4449_v39  ;;  %v4456_v2 = vld [vmem:[%s8728_s2 + $0x528] sm:$0xff]  ;;  %v4463_v3 = vld [vmem:[%s8728_s2 + $0x260] sm:$0xff] }
  0x61   :  { %888 = vmatprep.subr.mxu1 %v4424_v15  ;;  %851 = vmatprep.subr.mxu0 %v4429_v0  ;;  %9483 = vst [vmem:[#allocation64_spill] sm:$0xff] %v4463_v3  ;;  %v4468_v15 = vld [vmem:[%s8728_s2 + $0x520] sm:$0xff]  ;;  %v4480_v0 = vld [vmem:[%s8728_s2 + $0x4f8] sm:$0xff] }
  0x62   :  { %889 = vmatpush1.msra.mxu1 %v4437_v23  ;;  %444 = vmatprep.mubr.f32.mxu0 %v9437_v8  ;;  %9484 = vst [vmem:[#allocation65_spill] sm:$0xff] %v4468_v15  ;;  %v4475_v23 = vld [vmem:[%s8728_s2 + $0x238] sm:$0xff]  ;;  %9486 = vst [vmem:[#allocation67_spill] sm:$0xff] %v4480_v0 }
  0x63   :  { %852 = vmatpush2.msra.mxu0 %v4444_v17  ;;  %890 = vmatprep.subr.mxu1 %v4449_v39  ;;  %9485 = vst [vmem:[#allocation66_spill] sm:$0xff] %v4475_v23  ;;  %v4488_v17 = vld [vmem:[%s8728_s2 + $0x230] sm:$0xff] }
  0x64   :  { %2959 = vmatmul.mubr.msk.f32.gmra.mxu0 %vm117_vm0, %v3726_v47  ;;  %853 = vmatprep.subr.mxu0 %v4456_v2  ;;  %9487 = vst [vmem:[#allocation68_spill] sm:$0xff] %v4488_v17  ;;  %v4495_v39 = vld [vmem:[%s8728_s2 + $0x4f0] sm:$0xff]  ;;  %v4500_v47 = vld [vmem:[%s8728_s2 + $0x208] sm:$0xff] }
  0x65   :  { %891 = vmatpush1.msra.mxu1 %v4463_v3  ;;  %854 = vmatpush2.msra.mxu0 %v4468_v15  ;;  %9488 = vst [vmem:[#allocation69_spill] sm:$0xff] %v4495_v39  ;;  %9489 = vst [vmem:[#allocation70_spill] sm:$0xff] %v4500_v47  ;;  %v4507_v3 = vld [vmem:[%s8728_s2 + $0x4c8] sm:$0xff]  ;;  %v4514_v15 = vld [vmem:[%s8728_s2 + $0x200] sm:$0xff] }
  0x66   :  { %892 = vmatprep.subr.mxu1 %v4475_v23  ;;  %855 = vmatprep.subr.mxu0 %v4480_v0  ;;  %9490 = vst [vmem:[#allocation71_spill] sm:$0xff] %v4514_v15  ;;  %v4519_v23 = vld [vmem:[%s8728_s2 + $0x4c0] sm:$0xff]  ;;  %v4531_v0 = vld [vmem:[%s8728_s2 + $0x498] sm:$0xff] }
  0x67   :  { %893 = vmatpush1.msra.mxu1 %v4488_v17  ;;  %450 = vmatprep.mubr.f32.mxu0 %v9437_v8  ;;  %9491 = vst [vmem:[#allocation72_spill] sm:$0xff] %v4519_v23  ;;  %v4526_v17 = vld [vmem:[%s8728_s2 + $0x1d8] sm:$0xff]  ;;  %9493 = vst [vmem:[#allocation74_spill] sm:$0xff] %v4531_v0 }
  0x68   :  { %856 = vmatpush2.msra.mxu0 %v4495_v39  ;;  %894 = vmatprep.subr.mxu1 %v4500_v47  ;;  %9492 = vst [vmem:[#allocation73_spill] sm:$0xff] %v4526_v17  ;;  %v4539_v39 = vld [vmem:[%s8728_s2 + $0x1d0] sm:$0xff] }
  0x69   :  { %2960 = vmatmul.mubr.msk.f32.gmra.mxu0 %vm117_vm0, %v3764_v54  ;;  %857 = vmatprep.subr.mxu0 %v4507_v3  ;;  %9494 = vst [vmem:[#allocation75_spill] sm:$0xff] %v4539_v39  ;;  %v4546_v47 = vld [vmem:[%s8728_s2 + $0x490] sm:$0xff]  ;;  %v4551_v54 = vld [vmem:[%s8728_s2 + $0x1a8] sm:$0xff] }
  0x6a   :  { %895 = vmatpush1.msra.mxu1 %v4514_v15  ;;  %858 = vmatpush2.msra.mxu0 %v4519_v23  ;;  %9495 = vst [vmem:[#allocation76_spill] sm:$0xff] %v4546_v47  ;;  %9496 = vst [vmem:[#allocation77_spill] sm:$0xff] %v4551_v54  ;;  %v4558_v15 = vld [vmem:[%s8728_s2 + $0x468] sm:$0xff]  ;;  %v4565_v23 = vld [vmem:[%s8728_s2 + $0x1a0] sm:$0xff] }
  0x6b   :  { %896 = vmatprep.subr.mxu1 %v4526_v17  ;;  %859 = vmatprep.subr.mxu0 %v4531_v0  ;;  %9497 = vst [vmem:[#allocation78_spill] sm:$0xff] %v4565_v23  ;;  %v4570_v17 = vld [vmem:[%s8728_s2 + $0x460] sm:$0xff]  ;;  %v4582_v0 = vld [vmem:[%s8728_s2 + $0x438] sm:$0xff] }
  0x6c   :  { %897 = vmatpush1.msra.mxu1 %v4539_v39  ;;  %456 = vmatprep.mubr.f32.mxu0 %v9437_v8  ;;  %9498 = vst [vmem:[#allocation79_spill] sm:$0xff] %v4570_v17  ;;  %v4577_v39 = vld [vmem:[%s8728_s2 + $0x178] sm:$0xff]  ;;  %9500 = vst [vmem:[#allocation81_spill] sm:$0xff] %v4582_v0 }
  0x6d   :  { %860 = vmatpush2.msra.mxu0 %v4546_v47  ;;  %898 = vmatprep.subr.mxu1 %v4551_v54  ;;  %9499 = vst [vmem:[#allocation80_spill] sm:$0xff] %v4577_v39  ;;  %v4590_v47 = vld [vmem:[%s8728_s2 + $0x170] sm:$0xff] }
  0x6e   :  { %2961 = vmatmul.mubr.msk.f32.gmra.mxu0 %vm117_vm0, %v3802_v61  ;;  %861 = vmatprep.subr.mxu0 %v4558_v15  ;;  %9501 = vst [vmem:[#allocation82_spill] sm:$0xff] %v4590_v47  ;;  %v4597_v54 = vld [vmem:[%s8728_s2 + $0x430] sm:$0xff]  ;;  %v4602_v61 = vld [vmem:[%s8728_s2 + $0x148] sm:$0xff] }
  0x6f   :  { %899 = vmatpush1.msra.mxu1 %v4565_v23  ;;  %862 = vmatpush2.msra.mxu0 %v4570_v17  ;;  %9502 = vst [vmem:[#allocation83_spill] sm:$0xff] %v4597_v54  ;;  %9503 = vst [vmem:[#allocation84_spill] sm:$0xff] %v4602_v61  ;;  %v4609_v23 = vld [vmem:[%s8728_s2 + $0x408] sm:$0xff]  ;;  %v4616_v17 = vld [vmem:[%s8728_s2 + $0x140] sm:$0xff] }
  0x70   :  { %900 = vmatprep.subr.mxu1 %v4577_v39  ;;  %863 = vmatprep.subr.mxu0 %v4582_v0  ;;  %9504 = vst [vmem:[#allocation85_spill] sm:$0xff] %v4616_v17  ;;  %v4621_v39 = vld [vmem:[%s8728_s2 + $0x400] sm:$0xff]  ;;  %v4633_v0 = vld [vmem:[%s8728_s2 + $0x3d8] sm:$0xff] }
  0x71   :  { %901 = vmatpush1.msra.mxu1 %v4590_v47  ;;  %462 = vmatprep.mubr.f32.mxu0 %v9437_v8  ;;  %9505 = vst [vmem:[#allocation86_spill] sm:$0xff] %v4621_v39  ;;  %v4628_v47 = vld [vmem:[%s8728_s2 + $0x118] sm:$0xff]  ;;  %9507 = vst [vmem:[#allocation88_spill] sm:$0xff] %v4633_v0 }
  0x72   :  { %864 = vmatpush2.msra.mxu0 %v4597_v54  ;;  %902 = vmatprep.subr.mxu1 %v4602_v61  ;;  %9506 = vst [vmem:[#allocation87_spill] sm:$0xff] %v4628_v47  ;;  %v4641_v54 = vld [vmem:[%s8728_s2 + $0x110] sm:$0xff] }
  0x73   :  { %2962 = vmatmul.mubr.msk.f32.gmra.mxu0 %vm117_vm0, %v3840_v5  ;;  %865 = vmatprep.subr.mxu0 %v4609_v23  ;;  %9508 = vst [vmem:[#allocation89_spill] sm:$0xff] %v4641_v54  ;;  %v4648_v61 = vld [vmem:[%s8728_s2 + $0x3d0] sm:$0xff]  ;;  %v4653_v5 = vld [vmem:[%s8728_s2 + $0xe8] sm:$0xff] }
  0x74   :  { %903 = vmatpush1.msra.mxu1 %v4616_v17  ;;  %866 = vmatpush2.msra.mxu0 %v4621_v39  ;;  %9509 = vst [vmem:[#allocation90_spill] sm:$0xff] %v4648_v61  ;;  %9510 = vst [vmem:[#allocation91_spill] sm:$0xff] %v4653_v5  ;;  %v4660_v17 = vld [vmem:[%s8728_s2 + $0x3a8] sm:$0xff]  ;;  %v4667_v39 = vld [vmem:[%s8728_s2 + $0xe0] sm:$0xff] }
  0x75   :  { %904 = vmatprep.subr.mxu1 %v4628_v47  ;;  %867 = vmatprep.subr.mxu0 %v4633_v0  ;;  %9511 = vst [vmem:[#allocation92_spill] sm:$0xff] %v4667_v39  ;;  %v4672_v47 = vld [vmem:[%s8728_s2 + $0x3a0] sm:$0xff]  ;;  %v4684_v0 = vld [vmem:[%s8728_s2 + $0x378] sm:$0xff] }
  0x76   :  { %905 = vmatpush1.msra.mxu1 %v4641_v54  ;;  %468 = vmatprep.mubr.f32.mxu0 %v9437_v8  ;;  %9512 = vst [vmem:[#allocation93_spill] sm:$0xff] %v4672_v47  ;;  %v4679_v54 = vld [vmem:[%s8728_s2 + $0xb8] sm:$0xff]  ;;  %9514 = vst [vmem:[#allocation95_spill] sm:$0xff] %v4684_v0 }
  0x77   :  { %868 = vmatpush2.msra.mxu0 %v4648_v61  ;;  %906 = vmatprep.subr.mxu1 %v4653_v5  ;;  %9513 = vst [vmem:[#allocation94_spill] sm:$0xff] %v4679_v54  ;;  %v4692_v61 = vld [vmem:[%s8728_s2 + $0xb0] sm:$0xff] }
  0x78   :  { %2963 = vmatmul.mubr.msk.f32.gmra.mxu0 %vm117_vm0, %v3878_v12  ;;  %869 = vmatprep.subr.mxu0 %v4660_v17  ;;  %9515 = vst [vmem:[#allocation96_spill] sm:$0xff] %v4692_v61  ;;  %v4699_v5 = vld [vmem:[%s8728_s2 + $0x370] sm:$0xff]  ;;  %v4704_v12 = vld [vmem:[%s8728_s2 + $0x88] sm:$0xff] }
  0x79   :  { %907 = vmatpush1.msra.mxu1 %v4667_v39  ;;  %870 = vmatpush2.msra.mxu0 %v4672_v47  ;;  %9516 = vst [vmem:[#allocation97_spill] sm:$0xff] %v4699_v5  ;;  %9517 = vst [vmem:[#allocation98_spill] sm:$0xff] %v4704_v12  ;;  %v4711_v39 = vld [vmem:[%s8728_s2 + $0x348] sm:$0xff]  ;;  %v4718_v47 = vld [vmem:[%s8728_s2 + $0x80] sm:$0xff] }
  0x7a   :  { %908 = vmatprep.subr.mxu1 %v4679_v54  ;;  %871 = vmatprep.subr.mxu0 %v4684_v0  ;;  %9518 = vst [vmem:[#allocation99_spill] sm:$0xff] %v4711_v39  ;;  %9519 = vst [vmem:[#allocation100_spill] sm:$0xff] %v4718_v47  ;;  %v4723_v54 = vld [vmem:[%s8728_s2 + $0x340] sm:$0xff]  ;;  %v4735_v0 = vld [vmem:[%s8728_s2 + $0x318] sm:$0xff] }
  0x7b   :  { %909 = vmatpush1.msra.mxu1 %v4692_v61  ;;  %474 = vmatprep.mubr.f32.mxu0 %v9437_v8  ;;  %v4730_v61 = vld [vmem:[%s8728_s2 + $0x58] sm:$0xff] }
  0x7c   :  { %872 = vmatpush2.msra.mxu0 %v4699_v5  ;;  %910 = vmatprep.subr.mxu1 %v4704_v12  ;;  %9520 = vst [vmem:[#allocation101_spill] sm:$0xff] %v4730_v61  ;;  %v4743_v5 = vld [vmem:[%s8728_s2 + $0x50] sm:$0xff] }
  0x7d   :  { %2964 = vmatmul.mubr.msk.f32.gmra.mxu0 %vm117_vm0, %v3916_v19  ;;  %873 = vmatprep.subr.mxu0 %v4711_v39  ;;  %9521 = vst [vmem:[#allocation102_spill] sm:$0xff] %v4743_v5  ;;  %v4748_v12 = vld [vmem:[%s8728_s2 + $0x310] sm:$0xff]  ;;  %v4755_v19 = vld [vmem:[%s8728_s2 + $0x28] sm:$0xff]  ;;  %v4762_v39 = vld [vmem:[%s8728_s2 + $0x20] sm:$0xff] }
  0x7e   :  { %911 = vmatpush1.msra.mxu1 %v4718_v47  ;;  %874 = vmatpush2.msra.mxu0 %v4723_v54  ;;  %9522 = vst [vmem:[#allocation103_spill] sm:$0xff] %v4755_v19  ;;  %9523 = vst [vmem:[#allocation104_spill] sm:$0xff] %v4762_v39  ;;  %v4769_v47 = vld [vmem:[%s8728_s2 + $0x5f8] sm:$0xff] }
  0x7f   :  { %912 = vmatprep.subr.mxu1 %v4730_v61  ;;  %875 = vmatprep.subr.mxu0 %v4735_v0  ;;  %9524 = vst [vmem:[#allocation105_spill] sm:$0xff] %v4769_v47  ;;  %v4776_v61 = vld [vmem:[%s8728_s2 + $0x5f0] sm:$0xff] }
  0x80   :  { %913 = vmatpush1.msra.mxu1 %v4743_v5  ;;  %876 = vmatpush2.msra.mxu0 %v4748_v12  ;;  %9525 = vst [vmem:[#allocation106_spill] sm:$0xff] %v4776_v61  ;;  %v4783_v5 = vld [vmem:[%s8728_s2 + $0x5c8] sm:$0xff] }
  0x81   :  { %877 = vmatprep.mubr.f32.mxu0 %v9437_v8  ;;  %914 = vmatprep.subr.mxu1 %v4755_v19  ;;  %v4789_v19 = vld [vmem:[%s8728_s2 + $0x5c0] sm:$0xff] }
  0x82   :  { %878 = vmatmul.mubr.f32.vlgmr.msra.gmra.mxu0 %v9437_v8  ;;  %915 = vmatpush1.msra.mxu1 %v4762_v39  ;;  %v4796_v39 = vld [vmem:[%s8728_s2 + $0x598] sm:$0xff] }
  0x83   :  { %916 = vmatprep.subr.mxu1 %v4769_v47  ;;  %948 = vmatprep.mubr.f32.mxu1 %v9437_v8  ;;  %v4803_v47 = vld [vmem:[%s8728_s2 + $0x590] sm:$0xff] }
  0x84   :  { %917 = vmatpush2.msra.mxu1 %v4776_v61  ;;  %1001 = vmatprep.subr.mxu0 %v3656_v34  ;;  %v4810_v61 = vld [vmem:[%s8728_s2 + $0x568] sm:$0xff]  ;;  %v4817_v34 = vld [vmem:[%s8728_s2 + $0x560] sm:$0xff] }
  0x85   :  { %918 = vmatprep.subr.mxu1 %v4783_v5  ;;  %1002 = vmatpush1.msra.mxu0 %v3661_v35  ;;  %v4824_v35 = vld [vmem:[%s8728_s2 + $0x538] sm:$0xff] }
  0x86   :  { %919 = vmatpush2.msra.mxu1 %v4789_v19  ;;  %1003 = vmatprep.subr.mxu0 %v3670_v36  ;;  %v4831_v36 = vld [vmem:[%s8728_s2 + $0x530] sm:$0xff] }
  0x87   :  { %920 = vmatprep.subr.mxu1 %v4796_v39  ;;  %1004 = vmatpush1.msra.mxu0 %v3680_v38  ;;  %v4838_v38 = vld [vmem:[%s8728_s2 + $0x508] sm:$0xff] }
  0x88   :  { %921 = vmatpush2.msra.mxu1 %v4803_v47  ;;  %1005 = vmatprep.subr.mxu0 %v3694_v41  ;;  %v4845_v41 = vld [vmem:[%s8728_s2 + $0x500] sm:$0xff] }
  0x89   :  { %922 = vmatprep.subr.mxu1 %v4810_v61  ;;  %1006 = vmatpush1.msra.mxu0 %v3700_v42  ;;  %v4852_v42 = vld [vmem:[%s8728_s2 + $0x4d8] sm:$0xff] }
  0x8a   :  { %923 = vmatpush2.msra.mxu1 %v4817_v34  ;;  %1007 = vmatprep.subr.mxu0 %v3711_v44  ;;  %v4859_v44 = vld [vmem:[%s8728_s2 + $0x4d0] sm:$0xff] }
  0x8b   :  { %924 = vmatprep.subr.mxu1 %v4824_v35  ;;  %1008 = vmatpush1.msra.mxu0 %v3721_v46  ;;  %v4866_v46 = vld [vmem:[%s8728_s2 + $0x4a8] sm:$0xff] }
  0x8c   :  { %925 = vmatpush2.msra.mxu1 %v4831_v36  ;;  %1009 = vmatprep.subr.mxu0 %v3732_v48  ;;  %v4873_v48 = vld [vmem:[%s8728_s2 + $0x4a0] sm:$0xff] }
  0x8d   :  { %926 = vmatprep.subr.mxu1 %v4838_v38  ;;  %1010 = vmatpush1.msra.mxu0 %v3738_v49  ;;  %v4880_v49 = vld [vmem:[%s8728_s2 + $0x478] sm:$0xff] }
  0x8e   :  { %927 = vmatpush2.msra.mxu1 %v4845_v41  ;;  %1011 = vmatprep.subr.mxu0 %v3749_v51  ;;  %v4887_v51 = vld [vmem:[%s8728_s2 + $0x470] sm:$0xff] }
  0x8f   :  { %928 = vmatprep.subr.mxu1 %v4852_v42  ;;  %1012 = vmatpush1.msra.mxu0 %v3759_v53  ;;  %v4894_v53 = vld [vmem:[%s8728_s2 + $0x448] sm:$0xff] }
  0x90   :  { %929 = vmatpush2.msra.mxu1 %v4859_v44  ;;  %1013 = vmatprep.subr.mxu0 %v3770_v55  ;;  %v4901_v55 = vld [vmem:[%s8728_s2 + $0x440] sm:$0xff] }
  0x91   :  { %930 = vmatprep.subr.mxu1 %v4866_v46  ;;  %1014 = vmatpush1.msra.mxu0 %v3776_v56  ;;  %v4908_v56 = vld [vmem:[%s8728_s2 + $0x418] sm:$0xff] }
  0x92   :  { %931 = vmatpush2.msra.mxu1 %v4873_v48  ;;  %1015 = vmatprep.subr.mxu0 %v3787_v58  ;;  %v4915_v58 = vld [vmem:[%s8728_s2 + $0x410] sm:$0xff] }
  0x93   :  { %932 = vmatprep.subr.mxu1 %v4880_v49  ;;  %1016 = vmatpush1.msra.mxu0 %v3797_v60  ;;  %v4922_v60 = vld [vmem:[%s8728_s2 + $0x3e8] sm:$0xff] }
  0x94   :  { %933 = vmatpush2.msra.mxu1 %v4887_v51  ;;  %1017 = vmatprep.subr.mxu0 %v3808_v62  ;;  %v4929_v62 = vld [vmem:[%s8728_s2 + $0x3e0] sm:$0xff] }
  0x95   :  { %934 = vmatprep.subr.mxu1 %v4894_v53  ;;  %1018 = vmatpush1.msra.mxu0 %v3814_v63  ;;  %v4936_v63 = vld [vmem:[%s8728_s2 + $0x3b8] sm:$0xff] }
  0x96   :  { %935 = vmatpush2.msra.mxu1 %v4901_v55  ;;  %1019 = vmatprep.subr.mxu0 %v3825_v1  ;;  %v4943_v1 = vld [vmem:[%s8728_s2 + $0x3b0] sm:$0xff] }
  0x97   :  { %936 = vmatprep.subr.mxu1 %v4908_v56  ;;  %1020 = vmatpush1.msra.mxu0 %v3835_v4  ;;  %v4950_v4 = vld [vmem:[%s8728_s2 + $0x388] sm:$0xff] }
  0x98   :  { %937 = vmatpush2.msra.mxu1 %v4915_v58  ;;  %1021 = vmatprep.subr.mxu0 %v3846_v6  ;;  %v4957_v6 = vld [vmem:[%s8728_s2 + $0x380] sm:$0xff] }
  0x99   :  { %938 = vmatprep.subr.mxu1 %v4922_v60  ;;  %1022 = vmatpush1.msra.mxu0 %v3852_v7  ;;  %v4964_v7 = vld [vmem:[%s8728_s2 + $0x358] sm:$0xff] }
  0x9a   :  { %939 = vmatpush2.msra.mxu1 %v4929_v62  ;;  %1023 = vmatprep.subr.mxu0 %v3863_v9  ;;  %v4971_v9 = vld [vmem:[%s8728_s2 + $0x350] sm:$0xff] }
  0x9b   :  { %940 = vmatprep.subr.mxu1 %v4936_v63  ;;  %1024 = vmatpush1.msra.mxu0 %v3873_v11  ;;  %v4978_v11 = vld [vmem:[%s8728_s2 + $0x328] sm:$0xff] }
  0x9c   :  { %941 = vmatpush2.msra.mxu1 %v4943_v1  ;;  %1025 = vmatprep.subr.mxu0 %v3884_v13  ;;  %v4985_v13 = vld [vmem:[%s8728_s2 + $0x320] sm:$0xff] }
  0x9d   :  { %942 = vmatprep.subr.mxu1 %v4950_v4  ;;  %1026 = vmatpush1.msra.mxu0 %v3890_v14  ;;  %v9526_v14 = vld [vmem:[#allocation4_spill] sm:$0xff] }
  0x9e   :  { %943 = vmatpush2.msra.mxu1 %v4957_v6  ;;  %1027 = vmatprep.subr.mxu0 %v3901_v16  ;;  %v9527_v16 = vld [vmem:[#allocation3_spill] sm:$0xff] }
  0x9f   :  { %944 = vmatprep.subr.mxu1 %v4964_v7  ;;  %1028 = vmatpush1.msra.mxu0 %v3911_v18  ;;  %v9528_v18 = vld [vmem:[#allocation6_spill] sm:$0xff] }
  0xa0   :  { %945 = vmatpush2.msra.mxu1 %v4971_v9  ;;  %1029 = vmatprep.subr.mxu0 %v3922_v20  ;;  %v9529_v20 = vld [vmem:[#allocation5_spill] sm:$0xff] }
  0xa1   :  { %946 = vmatprep.subr.mxu1 %v4978_v11  ;;  %1030 = vmatpush1.msra.mxu0 %v3931_v22  ;;  %v9530_v22 = vld [vmem:[#allocation9_spill] sm:$0xff] }
  0xa2   :  { %947 = vmatpush2.msra.mxu1 %v4985_v13  ;;  %1031 = vmatprep.subr.mxu0 %v3942_v24  ;;  %v9531_v24 = vld [vmem:[#allocation7_spill] sm:$0xff] }
  0xa3   :  { %949 = vmatmul.mubr.f32.vlgmr.msra.gmra.mxu1 %v9437_v8  ;;  %1072 = vmatprep.subr.mxu1 %v3953_v26  ;;  %v9533_v26 = vld [vmem:[#allocation8_spill] sm:$0xff] }
  0xa4   :  { %1073 = vmatpush1.msra.mxu1 %v3966_v28  ;;  %1032 = vmatpush1.msra.mxu0 %v3948_v25  ;;  %v9532_v25 = vld [vmem:[#allocation10_spill] sm:$0xff]  ;;  %v9535_v28 = vld [vmem:[#allocation11_spill] sm:$0xff]  ;;  %v9549_v8 = vld [vmem:[#allocation24_spill] sm:$0xff] }
  0xa5   :  { %1074 = vmatprep.subr.mxu1 %v3978_v30  ;;  %1033 = vmatprep.subr.mxu0 %v3959_v27  ;;  %v9534_v27 = vld [vmem:[#allocation12_spill] sm:$0xff]  ;;  %v9537_v30 = vld [vmem:[#allocation13_spill] sm:$0xff] }
  0xa6   :  { %1075 = vmatpush1.msra.mxu1 %v3991_v32  ;;  %1034 = vmatpush2.msra.mxu0 %v3971_v29  ;;  %v9536_v29 = vld [vmem:[#allocation14_spill] sm:$0xff]  ;;  %v9539_v32 = vld [vmem:[#allocation15_spill] sm:$0xff] }
  0xa7   :  { %1076 = vmatprep.subr.mxu1 %v3998_v33  ;;  %1035 = vmatprep.subr.mxu0 %v3986_v31  ;;  %v9538_v31 = vld [vmem:[#allocation17_spill] sm:$0xff]  ;;  %v9540_v33 = vld [vmem:[#allocation18_spill] sm:$0xff] }
  0xa8   :  { %1077 = vmatpush1.msra.mxu1 %v4010_v40  ;;  %1036 = vmatpush2.msra.mxu0 %v4005_v37  ;;  %v9541_v37 = vld [vmem:[#allocation16_spill] sm:$0xff] }
  0xa9   :  { %1078 = vmatprep.subr.mxu1 %v4022_v45  ;;  %1037 = vmatprep.subr.mxu0 %v4017_v43  ;;  %v9542_v40 = vld [vmem:[#allocation20_spill] sm:$0xff]  ;;  %v9543_v43 = vld [vmem:[#allocation19_spill] sm:$0xff]  ;;  %v9544_v45 = vld [vmem:[#allocation22_spill] sm:$0xff] }
  0xaa   :  { %1079 = vmatpush1.msra.mxu1 %v4042_v57  ;;  %1038 = vmatpush2.msra.mxu0 %v4030_v50  ;;  %v9545_v50 = vld [vmem:[#allocation21_spill] sm:$0xff]  ;;  %v9547_v57 = vld [vmem:[#allocation23_spill] sm:$0xff] }
  0xab   :  { %1080 = vmatprep.subr.mxu1 %v4049_v59  ;;  %1039 = vmatprep.subr.mxu0 %v4037_v52  ;;  %v9546_v52 = vld [vmem:[#allocation25_spill] sm:$0xff]  ;;  %v9548_v59 = vld [vmem:[#allocation26_spill] sm:$0xff] }
  0xac   :  { %1081 = vmatpush1.msra.mxu1 %v9526_v14  ;;  %1040 = vmatpush2.msra.mxu0 %v9527_v16  ;;  %v9550_v14 = vld [vmem:[#allocation28_spill] sm:$0xff]  ;;  %v9551_v16 = vld [vmem:[#allocation27_spill] sm:$0xff] }
  0xad   :  { %1082 = vmatprep.subr.mxu1 %v9528_v18  ;;  %1041 = vmatprep.subr.mxu0 %v9529_v20  ;;  %v9552_v18 = vld [vmem:[#allocation30_spill] sm:$0xff]  ;;  %v9553_v20 = vld [vmem:[#allocation29_spill] sm:$0xff] }
  0xae   :  { %1083 = vmatpush1.msra.mxu1 %v9530_v22  ;;  %1042 = vmatpush2.msra.mxu0 %v9531_v24  ;;  %v9554_v22 = vld [vmem:[#allocation33_spill] sm:$0xff]  ;;  %v9555_v24 = vld [vmem:[#allocation31_spill] sm:$0xff] }
  0xaf   :  { %1084 = vmatprep.subr.mxu1 %v9532_v25  ;;  %1043 = vmatprep.subr.mxu0 %v9533_v26  ;;  %v9556_v25 = vld [vmem:[#allocation34_spill] sm:$0xff]  ;;  %v9557_v26 = vld [vmem:[#allocation32_spill] sm:$0xff] }
  0xb0   :  { %1085 = vmatpush1.msra.mxu1 %v9534_v27  ;;  %1044 = vmatpush2.msra.mxu0 %v9535_v28  ;;  %v9558_v27 = vld [vmem:[#allocation36_spill] sm:$0xff]  ;;  %v9559_v28 = vld [vmem:[#allocation35_spill] sm:$0xff] }
  0xb1   :  { %1086 = vmatprep.subr.mxu1 %v9536_v29  ;;  %1045 = vmatprep.subr.mxu0 %v9537_v30  ;;  %v9560_v29 = vld [vmem:[#allocation38_spill] sm:$0xff]  ;;  %v9561_v30 = vld [vmem:[#allocation37_spill] sm:$0xff] }
  0xb2   :  { %1087 = vmatpush1.msra.mxu1 %v9538_v31  ;;  %1046 = vmatpush2.msra.mxu0 %v9539_v32  ;;  %v9562_v31 = vld [vmem:[#allocation41_spill] sm:$0xff]  ;;  %v9563_v32 = vld [vmem:[#allocation39_spill] sm:$0xff] }
  0xb3   :  { %1088 = vmatprep.subr.mxu1 %v9540_v33  ;;  %1047 = vmatprep.subr.mxu0 %v9541_v37  ;;  %v9564_v33 = vld [vmem:[#allocation42_spill] sm:$0xff]  ;;  %v9565_v37 = vld [vmem:[#allocation40_spill] sm:$0xff] }
  0xb4   :  { %1089 = vmatpush1.msra.mxu1 %v9542_v40  ;;  %1048 = vmatpush2.msra.mxu0 %v9543_v43  ;;  %v9566_v40 = vld [vmem:[#allocation43_spill] sm:$0xff]  ;;  %v9567_v43 = vld [vmem:[#allocation45_spill] sm:$0xff] }
  0xb5   :  { %1090 = vmatprep.subr.mxu1 %v9544_v45  ;;  %1049 = vmatprep.subr.mxu0 %v9545_v50  ;;  %v9568_v45 = vld [vmem:[#allocation44_spill] sm:$0xff]  ;;  %v9569_v50 = vld [vmem:[#allocation47_spill] sm:$0xff] }
  0xb6   :  { %1091 = vmatpush1.msra.mxu1 %v9546_v52  ;;  %1050 = vmatpush2.msra.mxu0 %v9547_v57  ;;  %v9570_v52 = vld [vmem:[#allocation46_spill] sm:$0xff] }
  0xb7   :  { %1092 = vmatprep.subr.mxu1 %v9548_v59  ;;  %1051 = vmatprep.subr.mxu0 %v9549_v8  ;;  %v9571_v57 = vld [vmem:[#allocation50_spill] sm:$0xff]  ;;  %v9572_v59 = vld [vmem:[#allocation48_spill] sm:$0xff]  ;;  %v9573_v8 = vld [vmem:[#allocation51_spill] sm:$0xff] }
  0xb8   :  { %1093 = vmatpush1.msra.mxu1 %v9550_v14  ;;  %1052 = vmatpush2.msra.mxu0 %v9551_v16  ;;  %v9574_v14 = vld [vmem:[#allocation49_spill] sm:$0xff] }
  0xb9   :  { %1094 = vmatprep.subr.mxu1 %v9552_v18  ;;  %1053 = vmatprep.subr.mxu0 %v9553_v20  ;;  %v9575_v16 = vld [vmem:[#allocation53_spill] sm:$0xff]  ;;  %v9577_v18 = vld [vmem:[#allocation55_spill] sm:$0xff]  ;;  %v9578_v20 = vld [vmem:[#allocation58_spill] sm:$0xff] }
  0xba   :  { %1095 = vmatpush1.msra.mxu1 %v9554_v22  ;;  %1054 = vmatpush2.msra.mxu0 %v9555_v24  ;;  %v9579_v22 = vld [vmem:[#allocation60_spill] sm:$0xff]  ;;  %v9580_v24 = vld [vmem:[#allocation62_spill] sm:$0xff] }
  0xbb   :  { %1096 = vmatprep.subr.mxu1 %v9556_v25  ;;  %1055 = vmatprep.subr.mxu0 %v9557_v26  ;;  %v87_v25 = vlaneseq  ;;  %v9581_v26 = vld [vmem:[#allocation65_spill] sm:$0xff] }
  0xbc   :  { %1097 = vmatpush1.msra.mxu1 %v9558_v27  ;;  %1056 = vmatpush2.msra.mxu0 %v9559_v28  ;;  %v9582_v27 = vld [vmem:[#allocation67_spill] sm:$0xff]  ;;  %v9583_v28 = vld [vmem:[#allocation69_spill] sm:$0xff] }
  0xbd   :  { %1098 = vmatprep.subr.mxu1 %v9560_v29  ;;  %1057 = vmatprep.subr.mxu0 %v9561_v30  ;;  %v5073_v29 = vshrl.u32 %v87_v25, 7  ;;  %v9596_v25 = vld [vmem:[#allocation95_spill] sm:$0xff] }
  0xbe   :  { %1099 = vmatpush1.msra.mxu1 %v9562_v31  ;;  %1058 = vmatpush2.msra.mxu0 %v9563_v32  ;;  %v9585_v31 = vld [vmem:[#allocation74_spill] sm:$0xff] }
  0xbf   :  { %1100 = vmatprep.subr.mxu1 %v9564_v33  ;;  %1059 = vmatprep.subr.mxu0 %v9565_v37  ;;  %v8843_v30 = vsub.s32 0, %v5073_v29  ;;  %v9586_v33 = vld [vmem:[#allocation76_spill] sm:$0xff]  ;;  %v5087_v37 = vld [vmem:[%s8729_s3] sm:$0x3f] }
  0xc0   :  { %1101 = vmatpush1.msra.mxu1 %v4316_v10  ;;  %1060 = vmatpush2.msra.mxu0 %v9566_v40  ;;  %v9576_v10 = vld [vmem:[#allocation52_spill] sm:$0xff]  ;;  %v9587_v40 = vld [vmem:[#allocation79_spill] sm:$0xff] }
  0xc1   :  { %1102 = vmatprep.subr.mxu1 %v9567_v43  ;;  %1061 = vmatprep.subr.mxu0 %v9568_v45  ;;  %v5095_v43 = vrot.slane %v5087_v37, %v8843_v30  ;;  %v9588_v45 = vld [vmem:[#allocation81_spill] sm:$0xff] }
  0xc2   :  { %1103 = vmatpush1.msra.mxu1 %v9569_v50  ;;  %1062 = vmatpush2.msra.mxu0 %v9570_v52  ;;  %v9589_v52 = vld [vmem:[#allocation83_spill] sm:$0xff] }
  0xc3   :  { %1104 = vmatprep.subr.mxu1 %v9571_v57  ;;  %1063 = vmatprep.subr.mxu0 %v9572_v59 }
  0xc4   :  { %1105 = vmatpush2.msra.mxu1 %v9573_v8  ;;  %1064 = vmatpush2.msra.mxu0 %v9574_v14  ;;  %v9590_v8 = vld [vmem:[#allocation86_spill] sm:$0xff] }
  0xc5   :  { %1106 = vmatprep.subr.mxu1 %v9575_v16  ;;  %1143 = vmatprep.subr.mxu0 %v9576_v10  ;;  %v9591_v16 = vld [vmem:[#allocation88_spill] sm:$0xff] }
  0xc6   :  { %1107 = vmatpush2.msra.mxu1 %v9577_v18  ;;  %v9592_v18 = vld [vmem:[#allocation90_spill] sm:$0xff] }
  0xc7   :  { %1108 = vmatprep.subr.mxu1 %v4405_v21  ;;  %v9584_v21 = vld [vmem:[#allocation72_spill] sm:$0xff] }
  0xc8   :  { %1109 = vmatpush2.msra.mxu1 %v9578_v20 }
  0xc9   :  { %1110 = vmatprep.subr.mxu1 %v9579_v22 }
  0xca   :  { %1111 = vmatpush2.msra.mxu1 %v9580_v24  ;;  %v9594_v24 = vld [vmem:[#allocation93_spill] sm:$0xff] }
  0xcb   :  { %1112 = vmatprep.subr.mxu1 %v4456_v2  ;;  %v8842_v2 = vsub.s32 1, %v5073_v29 }
  0xcc   :  { %1113 = vmatpush2.msra.mxu1 %v9581_v26 }
  0xcd   :  { %1114 = vmatprep.subr.mxu1 %v9582_v27  ;;  %v9597_v27 = vld [vmem:[#allocation97_spill] sm:$0xff] }
  0xce   :  { %1115 = vmatpush2.msra.mxu1 %v9583_v28 }
  0xcf   :  { %1116 = vmatprep.subr.mxu1 %v4507_v3 }
  0xd0   :  { %1117 = vmatpush2.msra.mxu1 %v9584_v21  ;;  %v9599_v21 = vld [vmem:[#allocation99_spill] sm:$0xff] }
  0xd1   :  { %1118 = vmatprep.subr.mxu1 %v9585_v31 }
  0xd2   :  { %v5079_v32 = vpop.f32.mrf.mxu0  ;;  %1119 = vmatpush2.msra.mxu1 %v9586_v33 }
  0xd3   :  { %1120 = vmatprep.subr.mxu1 %v4558_v15  ;;  %v5102_v15 = vrot.slane %v5087_v37, %v8842_v2 }
  0xd4   :  { %v5089_v3 = vpop.f32.mrf.mxu0  ;;  %1121 = vmatpush2.msra.mxu1 %v9587_v40 }
  0xd5   :  { %1122 = vmatprep.subr.mxu1 %v9588_v45  ;;  %v5140_v45 = vld [vmem:[%s8728_s2 + $0x2d8] sm:$0xff] }
  0xd6   :  { %v214_v50 = vpop.f32.mrf.mxu0  ;;  %1123 = vmatpush2.msra.mxu1 %v9589_v52 }
  0xd7   :  { %v5105_v57 = vadd.f32 %v214_v50, %v5095_v43  ;;  %1124 = vmatprep.subr.mxu1 %v4609_v23 }
  0xd8   :  { %v216_v59 = vpop.f32.mrf.mxu0  ;;  %1125 = vmatpush2.msra.mxu1 %v9590_v8 }
  0xd9   :  { %v5110_v14 = vadd.f32 %v216_v59, %v5102_v15  ;;  %1126 = vmatprep.subr.mxu1 %v9591_v16 }
  0xda   :  { %v220_v10 = vpop.f32.mrf.mxu0  ;;  %1127 = vmatpush2.msra.mxu1 %v9592_v18 }
  0xdb   :  { %v5115_v20 = vadd.f32 %v220_v10, %v5095_v43  ;;  %1128 = vmatprep.subr.mxu1 %v4660_v17 }
  0xdc   :  { %v222_v22 = vpop.f32.mrf.mxu0  ;;  %1129 = vmatpush2.msra.mxu1 %v9594_v24 }
  0xdd   :  { %9593 = vst [vmem:[#allocation4_spill] sm:$0xff] %v5115_v20  ;;  %v5120_v23 = vadd.f32 %v222_v22, %v5102_v15  ;;  %1130 = vmatprep.subr.mxu1 %v9596_v25 }
  0xde   :  { %v226_v26 = vpop.f32.mrf.mxu0  ;;  %1131 = vmatpush2.msra.mxu1 %v9597_v27  ;;  %v321_v27 = vpop.f32.mrf.mxu1 }
  0xdf   :  { %9595 = vst [vmem:[#allocation3_spill] sm:$0xff] %v5120_v23  ;;  %v5125_v28 = vadd.f32 %v226_v26, %v5095_v43  ;;  %1132 = vmatprep.subr.mxu1 %v9599_v21 }
  0xe0   :  { %v228_v31 = vpop.f32.mrf.mxu0  ;;  %1133 = vmatpush2.msra.mxu1 %v4723_v54  ;;  %v323_v21 = vpop.f32.mrf.mxu1 }
  0xe1   :  { %9598 = vst [vmem:[#allocation6_spill] sm:$0xff] %v5125_v28  ;;  %v5130_v17 = vadd.f32 %v228_v31, %v5102_v15  ;;  %1134 = vmatprep.subr.mxu1 %v4735_v0 }
  0xe2   :  { %v232_v33 = vpop.f32.mrf.mxu0  ;;  %1135 = vmatpush2.msra.mxu1 %v4748_v12 }
  0xe3   :  { %9600 = vst [vmem:[#allocation5_spill] sm:$0xff] %v5130_v17  ;;  %v5135_v40 = vadd.f32 %v232_v33, %v5095_v43  ;;  %1261 = vmatprep.subr.mxu1 %v5140_v45 }
  0xe4   :  { %v234_v50 = vpop.f32.mrf.mxu0 }
  0xe5   :  { %9601 = vst [vmem:[#allocation9_spill] sm:$0xff] %v5135_v40  ;;  %v5144_v54 = vadd.f32 %v234_v50, %v5102_v15 }
  0xe6   :  { %v238_v52 = vpop.f32.mrf.mxu0 }
  0xe7   :  { %9602 = vst [vmem:[#allocation7_spill] sm:$0xff] %v5144_v54  ;;  %v5147_v0 = vadd.f32 %v238_v52, %v5095_v43 }
  0xe8   :  { %v240_v59 = vpop.f32.mrf.mxu0 }
  0xe9   :  { %9603 = vst [vmem:[#allocation10_spill] sm:$0xff] %v5147_v0  ;;  %v5150_v12 = vadd.f32 %v240_v59, %v5102_v15 }
  0xea   :  { %v244_v8 = vpop.f32.mrf.mxu0 }
  0xeb   :  { %9604 = vst [vmem:[#allocation8_spill] sm:$0xff] %v5150_v12  ;;  %v5153_v16 = vadd.f32 %v244_v8, %v5095_v43 }
  0xec   :  { %v246_v10 = vpop.f32.mrf.mxu0 }
  0xed   :  { %9605 = vst [vmem:[#allocation12_spill] sm:$0xff] %v5153_v16  ;;  %v5156_v18 = vadd.f32 %v246_v10, %v5102_v15 }
  0xee   :  { %v250_v22 = vpop.f32.mrf.mxu0 }
  0xef   :  { %9606 = vst [vmem:[#allocation11_spill] sm:$0xff] %v5156_v18  ;;  %v5159_v24 = vadd.f32 %v250_v22, %v5095_v43 }
  0xf0   :  { %v252_v25 = vpop.f32.mrf.mxu0 }
  0xf1   :  { %9607 = vst [vmem:[#allocation14_spill] sm:$0xff] %v5159_v24  ;;  %v5162_v26 = vadd.f32 %v252_v25, %v5102_v15 }
  0xf3   :  { %9608 = vst [vmem:[#allocation13_spill] sm:$0xff] %v5162_v26  ;;  %v5172_v59 = vpop.f32.mrf.mxu0 }
  0xf5   :  { %v5176_v10 = vpop.f32.mrf.mxu0 }
  0xf7   :  { %v5164_v31 = vpop.f32.mrf.mxu1 }
  0xf9   :  { %v5166_v33 = vpop.f32.mrf.mxu1 }
  0xfc   :  { %v5168_v50 = vpop.f32.mrf.mxu1 }
  0xfd   :  { %9609 = vst [vmem:[#allocation17_spill] sm:$0xff] %v5168_v50 }
  0xfe   :  { %v5170_v52 = vpop.f32.mrf.mxu1 }
  0xff   :  { %9610 = vst [vmem:[#allocation15_spill] sm:$0xff] %v5170_v52 }
 0x101   :  { %v5174_v8 = vpop.f32.mrf.mxu1 }
 0x102   :  { %9611 = vst [vmem:[#allocation18_spill] sm:$0xff] %v5174_v8 }
 0x103   :  { %v5178_v22 = vpop.f32.mrf.mxu1 }
 0x104   :  { %9612 = vst [vmem:[#allocation16_spill] sm:$0xff] %v5178_v22 }
 0x106   :  { %v5182_v2 = vpop.f32.mrf.mxu1 }
 0x107   :  { %9613 = vst [vmem:[#allocation20_spill] sm:$0xff] %v5182_v2 }
 0x108   :  { %v5186_v26 = vpop.f32.mrf.mxu1 }
 0x109   :  { %9615 = vst [vmem:[#allocation22_spill] sm:$0xff] %v5186_v26 }
 0x10b   :  { %v5190_v18 = vpop.f32.mrf.mxu1 }
 0x10c   :  { %9617 = vst [vmem:[#allocation25_spill] sm:$0xff] %v5190_v18 }
 0x10d   :  { %v5194_v12 = vpop.f32.mrf.mxu1 }
 0x10e   :  { %9619 = vst [vmem:[#allocation26_spill] sm:$0xff] %v5194_v12 }
 0x110   :  { %v5198_v54 = vpop.f32.mrf.mxu1 }
 0x111   :  { %9621 = vst [vmem:[#allocation28_spill] sm:$0xff] %v5198_v54  ;;  %v209_v54 = vadd.f32 %v5079_v32, %v5095_v43  ;;  %v101_v32 = vsub.s32 3, %v5073_v29 }
 0x112   :  { %v5202_v22 = vpop.f32.mrf.mxu1 }
 0x113   :  { %9623 = vst [vmem:[#allocation30_spill] sm:$0xff] %v5202_v22  ;;  %v211_v22 = vadd.f32 %v5089_v3, %v5102_v15  ;;  %v5234_v15 = vrot.slane %v5087_v37, %v101_v32  ;;  %v9635_v32 = vsub.s32 0, %v5073_v29 }
 0x115   :  { %v5206_v8 = vpop.f32.mrf.mxu1 }
 0x116   :  { %9625 = vst [vmem:[#allocation33_spill] sm:$0xff] %v5206_v8 }
 0x117   :  { %v5210_v17 = vpop.f32.mrf.mxu1 }
 0x118   :  { %9627 = vst [vmem:[#allocation34_spill] sm:$0xff] %v5210_v17 }
 0x11b   :  { %v808_v28 = vpop.f32.mrf.mxu1 }
 0x11f   :  { %v5180_v25 = vpop.f32.mrf.mxu0 }
 0x121   :  { %v5184_v30 = vpop.f32.mrf.mxu0 }
 0x122   :  { %9614 = vst [vmem:[#allocation19_spill] sm:$0xff] %v5184_v30 }
 0x124   :  { %v5188_v24 = vpop.f32.mrf.mxu0 }
 0x125   :  { %9616 = vst [vmem:[#allocation21_spill] sm:$0xff] %v5188_v24 }
 0x126   :  { %v5192_v16 = vpop.f32.mrf.mxu0 }
 0x127   :  { %9618 = vst [vmem:[#allocation23_spill] sm:$0xff] %v5192_v16 }
 0x129   :  { %v5196_v0 = vpop.f32.mrf.mxu0 }
 0x12a   :  { %9620 = vst [vmem:[#allocation24_spill] sm:$0xff] %v5196_v0  ;;  %v810_v0 = vpop.f32.mrf.mxu1 }
 0x12b   :  { %v5200_v40 = vpop.f32.mrf.mxu0  ;;  %v956_v8 = vadd.f32 %v810_v0, %v211_v22 }
 0x12c   :  { %9622 = vst [vmem:[#allocation27_spill] sm:$0xff] %v5200_v40 }
 0x12d   :  { %v960_v17 = vmul.f32 0.5, %v956_v8  ;;  %v721_v8 = vld [vmem:[%s8730_s4] sm:$0x3] }
 0x12e   :  { %v5204_v2 = vpop.f32.mrf.mxu0 }
 0x12f   :  { %9624 = vst [vmem:[#allocation29_spill] sm:$0xff] %v5204_v2  ;;  %v955_v2 = vadd.f32 %v808_v28, %v209_v54  ;;  %v324_v54 = vadd.f32 %v323_v21, %v5234_v15 }
 0x130   :  { %v5208_v26 = vpop.f32.mrf.mxu0 }
 0x131   :  { %9626 = vst [vmem:[#allocation31_spill] sm:$0xff] %v5208_v26  ;;  %v959_v26 = vmul.f32 0.5, %v955_v2 }
 0x133   :  { %v5212_v18 = vpop.f32.mrf.mxu0  ;;  %3016 = vtanh.f32 %v959_v26 }
 0x134   :  { %9628 = vst [vmem:[#allocation32_spill] sm:$0xff] %v5212_v18  ;;  %3018 = vtanh.f32 %v960_v17  ;;  %v105_v17 = vsub.s32 4, %v5073_v29 }
 0x135   :  { %v5214_v12 = vpop.f32.mrf.mxu0 }
 0x136   :  { %9629 = vst [vmem:[#allocation36_spill] sm:$0xff] %v5214_v12  ;;  %v97_v12 = vsub.s32 2, %v5073_v29  ;;  %v5248_v21 = vrot.slane %v5087_v37, %v105_v17 }
 0x138   :  { %v5218_v40 = vpop.f32.mrf.mxu0  ;;  %v5231_v43 = vrot.slane %v5087_v37, %v97_v12 }
 0x139   :  { %9630 = vst [vmem:[#allocation35_spill] sm:$0xff] %v5218_v40 }
 0x13a   :  { %v5222_v16 = vpop.f32.mrf.mxu0  ;;  %9634 = vst [vmem:[#allocation39_spill] sm:$0xff] %v5231_v43  ;;  %v322_v2 = vadd.f32 %v321_v27, %v5231_v43 }
 0x13b   :  { %9631 = vst [vmem:[#allocation38_spill] sm:$0xff] %v5222_v16  ;;  %v5245_v16 = vrot.slane %v721_v8, %v9635_v32 }
 0x13d   :  { %v5224_v24 = vpop.f32.mrf.mxu0  ;;  %9636 = vst [vmem:[#allocation42_spill] sm:$0xff] %v5245_v16 }
 0x13e   :  { %9632 = vst [vmem:[#allocation37_spill] sm:$0xff] %v5224_v24 }
 0x13f   :  { %v5227_v18 = vpop.f32.mrf.mxu0 }
 0x140   :  { %9633 = vst [vmem:[#allocation41_spill] sm:$0xff] %v5227_v18  ;;  %v3017_v26 = vpop.eup %3016  ;;  %v109_v18 = vsub.s32 5, %v5073_v29 }
 0x141   :  { %v3019_v12 = vpop.eup %3018  ;;  %v967_v27 = vmul.f32 0.5, %v3017_v26  ;;  %v435_v26 = vadd.f32 %v5172_v59, %v5248_v21 }
 0x142   :  { %v879_v3 = vpop.f32.mrf.mxu0  ;;  %v968_v52 = vmul.f32 0.5, %v3019_v12 }
 0x143   :  { %v957_v0 = vadd.f32 %v879_v3, %v322_v2  ;;  %v9637_v2 = vsub.s32 1, %v5073_v29 }
 0x144   :  { %v881_v28 = vpop.f32.mrf.mxu0 }
 0x145   :  { %v958_v22 = vadd.f32 %v881_v28, %v324_v54  ;;  %v961_v24 = vmul.f32 0.5, %v957_v0  ;;  %v5252_v40 = vrot.slane %v721_v8, %v9637_v2  ;;  %v5255_v28 = vrot.slane %v5087_v37, %v109_v18 }
 0x146   :  { %v971_v54 = vadd.f32 0.5, %v967_v27 }
 0x147   :  { %v962_v3 = vmul.f32 0.5, %v958_v22  ;;  %9638 = vst [vmem:[#allocation40_spill] sm:$0xff] %v5252_v40  ;;  %3020 = vtanh.f32 %v961_v24  ;;  %v972_v22 = vadd.f32 0.5, %v968_v52  ;;  %v437_v8 = vadd.f32 %v5176_v10, %v5255_v28 }
 0x149   :  { %3022 = vtanh.f32 %v962_v3 }
 0x154   :  { %v3021_v18 = vpop.eup %3020 }
 0x156   :  { %v3023_v24 = vpop.eup %3022 }
 0x157   :  { %v970_v27 = vmul.f32 0.5, %v3023_v24  ;;  %v9645_v24 = vld [vmem:[#allocation64_spill] sm:$0xff] }
 0x163   :  { %v950_v50 = vpop.f32.mrf.mxu1 }
 0x164   :  { %v975_v0 = vadd.f32 %v950_v50, %v5245_v16  ;;  %v969_v50 = vmul.f32 0.5, %v3021_v18  ;;  %v5313_v18 = vld [vmem:[%s8728_s2 + $0x270] sm:$0xff] }
 0x165   :  { %v952_v32 = vpop.f32.mrf.mxu1 }
 0x166   :  { %v977_v17 = vmul.f32 %v975_v0, %v971_v54  ;;  %v976_v29 = vadd.f32 %v952_v32, %v5252_v40  ;;  %v973_v59 = vadd.f32 0.5, %v969_v50  ;;  %v974_v54 = vadd.f32 0.5, %v970_v27  ;;  %v5320_v50 = vld [vmem:[%s8728_s2 + $0x248] sm:$0xff]  ;;  %v9646_v27 = vld [vmem:[#allocation66_spill] sm:$0xff] }
 0x168   :  { %v979_v12 = vadd.f32 %v977_v17, %v435_v26  ;;  %v978_v2 = vmul.f32 %v976_v29, %v972_v22  ;;  %v5285_v26 = vld [vmem:[%s8728_s2 + $0x2d0] sm:$0xff]  ;;  %v5292_v22 = vld [vmem:[%s8728_s2 + $0x2a8] sm:$0xff]  ;;  %v9642_v29 = vld [vmem:[#allocation59_spill] sm:$0xff] }
 0x169   :  { %v9641_v17 = vld [vmem:[#allocation57_spill] sm:$0xff] }
 0x16a   :  { %3024 = vtanh.f32 %v979_v12  ;;  %v980_v37 = vadd.f32 %v978_v2, %v437_v8  ;;  %v5299_v8 = vld [vmem:[%s8728_s2 + $0x2a0] sm:$0xff]  ;;  %v9643_v12 = vld [vmem:[#allocation61_spill] sm:$0xff]  ;;  %v5306_v2 = vld [vmem:[%s8728_s2 + $0x278] sm:$0xff] }
 0x16c   :  { %3026 = vtanh.f32 %v980_v37  ;;  %v9644_v37 = vld [vmem:[#allocation63_spill] sm:$0xff] }
 0x177   :  { %v3025_v23 = vpop.eup %3024 }
 0x178   :  { %v983_v20 = vsub.f32 0.0, %v3025_v23 }
 0x179   :  { %v3027_v3 = vpop.eup %3026 }
 0x17a   :  { %v984_v52 = vsub.f32 0.0, %v3027_v3  ;;  %v985_v0 = vmul.f32 %v983_v20, %v973_v59  ;;  %v9639_v20 = vld [vmem:[#allocation54_spill] sm:$0xff]  ;;  %v5327_v59 = vld [vmem:[%s8728_s2 + $0x240] sm:$0xff] }
 0x17c   :  { %v986_v32 = vmul.f32 %v984_v52, %v974_v54  ;;  %v5263_v30 = vadd.f32 %v3025_v23, %v985_v0  ;;  %v9640_v23 = vld [vmem:[#allocation56_spill] sm:$0xff]  ;;  %v5334_v54 = vld [vmem:[%s8728_s2 + $0x218] sm:$0xff]  ;;  %v5341_v0 = vld [vmem:[%s8728_s2 + $0x210] sm:$0xff] }
 0x17d   :  { %v9648_v52 = vld [vmem:[#allocation70_spill] sm:$0xff] }
 0x17e   :  { %v5265_v10 = vadd.f32 %v3027_v3, %v986_v32  ;;  %989 = vst [vmem:[%s8731_s7] sm:$0xff] %v5263_v30  ;;  %v9647_v3 = vld [vmem:[#allocation68_spill] sm:$0xff]  ;;  %v9649_v32 = vld [vmem:[#allocation71_spill] sm:$0xff] }
 0x180   :  { %1065 = vmatprep.mubr.f32.mxu0 %v5265_v10  ;;  %1136 = vmatprep.mubr.f32.mxu1 %v5265_v10  ;;  %2965 = vst [vmem:[%s8732_s8 + $0x38] sm:$0xff] %v5265_v10 }
 0x181   :  { %1066 = vmatmul.mubr.f32.vlgmr.msra.gmra.mxu0 %v5263_v30  ;;  %1137 = vmatmul.mubr.f32.vlgmr.msra.gmra.mxu1 %v5263_v30 }
 0x182   :  { %1144 = vmatpush1.msra.mxu0 %v9639_v20  ;;  %1207 = vmatprep.mubr.f32.mxu0 %v5265_v10  ;;  %v5348_v20 = vld [vmem:[%s8728_s2 + $0x1e8] sm:$0xff] }
 0x183   :  { %1145 = vmatprep.subr.mxu0 %v9640_v23  ;;  %1262 = vmatpush1.msra.mxu1 %v5285_v26  ;;  %v9650_v23 = vld [vmem:[#allocation73_spill] sm:$0xff] }
 0x184   :  { %1146 = vmatpush1.msra.mxu0 %v9641_v17  ;;  %1263 = vmatprep.subr.mxu1 %v5292_v22  ;;  %v5355_v17 = vld [vmem:[%s8728_s2 + $0x1e0] sm:$0xff] }
 0x185   :  { %1147 = vmatprep.subr.mxu0 %v9642_v29  ;;  %1264 = vmatpush1.msra.mxu1 %v5299_v8  ;;  %v9651_v29 = vld [vmem:[#allocation75_spill] sm:$0xff] }
 0x186   :  { %1148 = vmatpush1.msra.mxu0 %v9643_v12  ;;  %1265 = vmatprep.subr.mxu1 %v5306_v2  ;;  %v5362_v12 = vld [vmem:[%s8728_s2 + $0x1b8] sm:$0xff] }
 0x187   :  { %1149 = vmatprep.subr.mxu0 %v9644_v37  ;;  %1266 = vmatpush1.msra.mxu1 %v5313_v18  ;;  %v9652_v37 = vld [vmem:[#allocation77_spill] sm:$0xff] }
 0x188   :  { %1150 = vmatpush1.msra.mxu0 %v9645_v24  ;;  %1267 = vmatprep.subr.mxu1 %v5320_v50  ;;  %v5369_v24 = vld [vmem:[%s8728_s2 + $0x1b0] sm:$0xff] }
 0x189   :  { %1151 = vmatprep.subr.mxu0 %v9646_v27  ;;  %1268 = vmatpush1.msra.mxu1 %v5327_v59  ;;  %v9653_v27 = vld [vmem:[#allocation78_spill] sm:$0xff] }
 0x18a   :  { %1152 = vmatpush1.msra.mxu0 %v9647_v3  ;;  %1269 = vmatprep.subr.mxu1 %v5334_v54  ;;  %v5376_v3 = vld [vmem:[%s8728_s2 + $0x188] sm:$0xff] }
 0x18b   :  { %1153 = vmatprep.subr.mxu0 %v9648_v52  ;;  %1270 = vmatpush1.msra.mxu1 %v5341_v0  ;;  %v9654_v52 = vld [vmem:[#allocation80_spill] sm:$0xff] }
 0x18c   :  { %1154 = vmatpush1.msra.mxu0 %v9649_v32  ;;  %1271 = vmatprep.subr.mxu1 %v5348_v20  ;;  %v5383_v32 = vld [vmem:[%s8728_s2 + $0x180] sm:$0xff] }
 0x18d   :  { %1155 = vmatprep.subr.mxu0 %v9650_v23  ;;  %1272 = vmatpush1.msra.mxu1 %v5355_v17  ;;  %9655 = vst [vmem:[#allocation43_spill] sm:$0xff] %v5383_v32  ;;  %v9656_v23 = vld [vmem:[#allocation82_spill] sm:$0xff] }
 0x18e   :  { %1156 = vmatpush1.msra.mxu0 %v9651_v29  ;;  %1273 = vmatprep.subr.mxu1 %v5362_v12  ;;  %v5390_v29 = vld [vmem:[%s8728_s2 + $0x158] sm:$0xff] }
 0x18f   :  { %1157 = vmatprep.subr.mxu0 %v9652_v37  ;;  %1274 = vmatpush1.msra.mxu1 %v5369_v24  ;;  %9657 = vst [vmem:[#allocation45_spill] sm:$0xff] %v5390_v29  ;;  %v9658_v37 = vld [vmem:[#allocation84_spill] sm:$0xff] }
 0x190   :  { %1158 = vmatpush1.msra.mxu0 %v9653_v27  ;;  %1275 = vmatprep.subr.mxu1 %v5376_v3  ;;  %v5397_v27 = vld [vmem:[%s8728_s2 + $0x150] sm:$0xff] }
 0x191   :  { %1159 = vmatprep.subr.mxu0 %v9654_v52  ;;  %1276 = vmatpush1.msra.mxu1 %v5383_v32  ;;  %9659 = vst [vmem:[#allocation44_spill] sm:$0xff] %v5397_v27  ;;  %v9660_v52 = vld [vmem:[#allocation85_spill] sm:$0xff]  ;;  %v9662_v32 = vld [vmem:[#allocation87_spill] sm:$0xff] }
 0x192   :  { %1160 = vmatpush1.msra.mxu0 %v9656_v23  ;;  %1277 = vmatprep.subr.mxu1 %v5390_v29  ;;  %v5404_v23 = vld [vmem:[%s8728_s2 + $0x128] sm:$0xff]  ;;  %v9664_v29 = vld [vmem:[#allocation89_spill] sm:$0xff] }
 0x193   :  { %1161 = vmatprep.subr.mxu0 %v9658_v37  ;;  %1278 = vmatpush1.msra.mxu1 %v5397_v27  ;;  %9661 = vst [vmem:[#allocation47_spill] sm:$0xff] %v5404_v23  ;;  %v5411_v37 = vld [vmem:[%s8728_s2 + $0x120] sm:$0xff] }
 0x194   :  { %1162 = vmatpush1.msra.mxu0 %v9660_v52  ;;  %1279 = vmatprep.subr.mxu1 %v5404_v23  ;;  %9663 = vst [vmem:[#allocation46_spill] sm:$0xff] %v5411_v37  ;;  %v5418_v52 = vld [vmem:[%s8728_s2 + $0xf8] sm:$0xff]  ;;  %v9666_v27 = vld [vmem:[#allocation91_spill] sm:$0xff]  ;;  %v9668_v23 = vld [vmem:[#allocation92_spill] sm:$0xff] }
 0x195   :  { %1163 = vmatprep.subr.mxu0 %v9662_v32  ;;  %1280 = vmatpush1.msra.mxu1 %v5411_v37  ;;  %9665 = vst [vmem:[#allocation50_spill] sm:$0xff] %v5418_v52  ;;  %v5425_v32 = vld [vmem:[%s8728_s2 + $0xf0] sm:$0xff]  ;;  %v9670_v37 = vld [vmem:[#allocation94_spill] sm:$0xff] }
 0x196   :  { %1164 = vmatpush1.msra.mxu0 %v9664_v29  ;;  %1281 = vmatprep.subr.mxu1 %v5418_v52  ;;  %9667 = vst [vmem:[#allocation48_spill] sm:$0xff] %v5425_v32  ;;  %v5432_v29 = vld [vmem:[%s8728_s2 + $0xc8] sm:$0xff] }
 0x197   :  { %1165 = vmatprep.subr.mxu0 %v9666_v27  ;;  %1282 = vmatpush1.msra.mxu1 %v5425_v32  ;;  %9669 = vst [vmem:[#allocation51_spill] sm:$0xff] %v5432_v29  ;;  %v5439_v27 = vld [vmem:[%s8728_s2 + $0xc0] sm:$0xff]  ;;  %v9672_v52 = vld [vmem:[#allocation96_spill] sm:$0xff]  ;;  %v9674_v32 = vld [vmem:[#allocation98_spill] sm:$0xff] }
 0x198   :  { %1166 = vmatpush1.msra.mxu0 %v9668_v23  ;;  %1283 = vmatprep.subr.mxu1 %v5432_v29  ;;  %9671 = vst [vmem:[#allocation49_spill] sm:$0xff] %v5439_v27  ;;  %v5446_v23 = vld [vmem:[%s8728_s2 + $0x98] sm:$0xff]  ;;  %v9676_v29 = vld [vmem:[#allocation100_spill] sm:$0xff] }
 0x199   :  { %1167 = vmatprep.subr.mxu0 %v9670_v37  ;;  %1284 = vmatpush1.msra.mxu1 %v5439_v27  ;;  %9673 = vst [vmem:[#allocation53_spill] sm:$0xff] %v5446_v23  ;;  %v5453_v37 = vld [vmem:[%s8728_s2 + $0x90] sm:$0xff] }
 0x19a   :  { %1168 = vmatpush1.msra.mxu0 %v9672_v52  ;;  %1285 = vmatprep.subr.mxu1 %v5446_v23  ;;  %9675 = vst [vmem:[#allocation52_spill] sm:$0xff] %v5453_v37  ;;  %v5460_v52 = vld [vmem:[%s8728_s2 + $0x68] sm:$0xff]  ;;  %v9678_v27 = vld [vmem:[#allocation101_spill] sm:$0xff]  ;;  %v9680_v23 = vld [vmem:[#allocation102_spill] sm:$0xff] }
 0x19b   :  { %1169 = vmatprep.subr.mxu0 %v9674_v32  ;;  %1286 = vmatpush1.msra.mxu1 %v5453_v37  ;;  %9677 = vst [vmem:[#allocation55_spill] sm:$0xff] %v5460_v52  ;;  %v5467_v32 = vld [vmem:[%s8728_s2 + $0x60] sm:$0xff] }
 0x19c   :  { %1170 = vmatpush1.msra.mxu0 %v9676_v29  ;;  %1287 = vmatprep.subr.mxu1 %v5460_v52  ;;  %9679 = vst [vmem:[#allocation58_spill] sm:$0xff] %v5467_v32  ;;  %v5474_v29 = vld [vmem:[%s8728_s2 + $0x38] sm:$0xff]  ;;  %v9682_v37 = vld [vmem:[#allocation103_spill] sm:$0xff]  ;;  %v9684_v52 = vld [vmem:[#allocation104_spill] sm:$0xff] }
 0x19d   :  { %1171 = vmatprep.subr.mxu0 %v9678_v27  ;;  %1288 = vmatpush1.msra.mxu1 %v5467_v32  ;;  %9681 = vst [vmem:[#allocation60_spill] sm:$0xff] %v5474_v29  ;;  %v5481_v27 = vld [vmem:[%s8728_s2 + $0x30] sm:$0xff] }
 0x19e   :  { %1172 = vmatpush1.msra.mxu0 %v9680_v23  ;;  %1289 = vmatprep.subr.mxu1 %v5474_v29  ;;  %9683 = vst [vmem:[#allocation62_spill] sm:$0xff] %v5481_v27  ;;  %v5488_v23 = vld [vmem:[%s8728_s2 + $0x8] sm:$0xff]  ;;  %v9686_v32 = vld [vmem:[#allocation105_spill] sm:$0xff]  ;;  %v9688_v29 = vld [vmem:[#allocation106_spill] sm:$0xff] }
 0x19f   :  { %1173 = vmatprep.subr.mxu0 %v9682_v37  ;;  %1290 = vmatpush1.msra.mxu1 %v5481_v27  ;;  %9685 = vst [vmem:[#allocation65_spill] sm:$0xff] %v5488_v23  ;;  %v5495_v37 = vld [vmem:[%s8728_s2] sm:$0xff] }
 0x1a0   :  { %1174 = vmatpush1.msra.mxu0 %v9684_v52  ;;  %1291 = vmatprep.subr.mxu1 %v5488_v23  ;;  %9687 = vst [vmem:[#allocation67_spill] sm:$0xff] %v5495_v37  ;;  %v5502_v52 = vld [vmem:[%s8728_s2 + $0x5d8] sm:$0xff] }
 0x1a1   :  { %1175 = vmatprep.subr.mxu0 %v9686_v32  ;;  %1292 = vmatpush1.msra.mxu1 %v5495_v37  ;;  %9689 = vst [vmem:[#allocation69_spill] sm:$0xff] %v5502_v52  ;;  %v5509_v32 = vld [vmem:[%s8728_s2 + $0x5d0] sm:$0xff] }
 0x1a2   :  { %1176 = vmatpush2.msra.mxu0 %v9688_v29  ;;  %1293 = vmatprep.subr.mxu1 %v5502_v52  ;;  %9690 = vst [vmem:[#allocation72_spill] sm:$0xff] %v5509_v32  ;;  %v5516_v29 = vld [vmem:[%s8728_s2 + $0x5a8] sm:$0xff] }
 0x1a3   :  { %1177 = vmatprep.subr.mxu0 %v4783_v5  ;;  %1294 = vmatpush2.msra.mxu1 %v5509_v32  ;;  %9691 = vst [vmem:[#allocation74_spill] sm:$0xff] %v5516_v29  ;;  %v5523_v5 = vld [vmem:[%s8728_s2 + $0x5a0] sm:$0xff] }
 0x1a4   :  { %1178 = vmatpush2.msra.mxu0 %v4789_v19  ;;  %1295 = vmatprep.subr.mxu1 %v5516_v29  ;;  %9692 = vst [vmem:[#allocation76_spill] sm:$0xff] %v5523_v5  ;;  %v5530_v19 = vld [vmem:[%s8728_s2 + $0x578] sm:$0xff] }
 0x1a5   :  { %1179 = vmatprep.subr.mxu0 %v4796_v39  ;;  %1296 = vmatpush2.msra.mxu1 %v5523_v5  ;;  %9693 = vst [vmem:[#allocation79_spill] sm:$0xff] %v5530_v19  ;;  %v5537_v39 = vld [vmem:[%s8728_s2 + $0x570] sm:$0xff] }
 0x1a6   :  { %1180 = vmatpush2.msra.mxu0 %v4803_v47  ;;  %1297 = vmatprep.subr.mxu1 %v5530_v19  ;;  %9694 = vst [vmem:[#allocation81_spill] sm:$0xff] %v5537_v39  ;;  %v5544_v47 = vld [vmem:[%s8728_s2 + $0x548] sm:$0xff] }
 0x1a7   :  { %1181 = vmatprep.subr.mxu0 %v4810_v61  ;;  %1298 = vmatpush2.msra.mxu1 %v5537_v39  ;;  %9695 = vst [vmem:[#allocation83_spill] sm:$0xff] %v5544_v47  ;;  %v5551_v61 = vld [vmem:[%s8728_s2 + $0x540] sm:$0xff] }
 0x1a8   :  { %1182 = vmatpush2.msra.mxu0 %v4817_v34  ;;  %1299 = vmatprep.subr.mxu1 %v5544_v47  ;;  %9696 = vst [vmem:[#allocation86_spill] sm:$0xff] %v5551_v61  ;;  %v5558_v34 = vld [vmem:[%s8728_s2 + $0x518] sm:$0xff] }
 0x1a9   :  { %1183 = vmatprep.subr.mxu0 %v4824_v35  ;;  %1300 = vmatpush2.msra.mxu1 %v5551_v61  ;;  %9697 = vst [vmem:[#allocation88_spill] sm:$0xff] %v5558_v34  ;;  %v5565_v35 = vld [vmem:[%s8728_s2 + $0x510] sm:$0xff] }
 0x1aa   :  { %1184 = vmatpush2.msra.mxu0 %v4831_v36  ;;  %1301 = vmatprep.subr.mxu1 %v5558_v34  ;;  %9698 = vst [vmem:[#allocation90_spill] sm:$0xff] %v5565_v35  ;;  %v5572_v36 = vld [vmem:[%s8728_s2 + $0x4e8] sm:$0xff] }
 0x1ab   :  { %1185 = vmatprep.subr.mxu0 %v4838_v38  ;;  %1302 = vmatpush2.msra.mxu1 %v5565_v35  ;;  %9699 = vst [vmem:[#allocation93_spill] sm:$0xff] %v5572_v36  ;;  %v5579_v38 = vld [vmem:[%s8728_s2 + $0x4e0] sm:$0xff] }
 0x1ac   :  { %1186 = vmatpush2.msra.mxu0 %v4845_v41  ;;  %1303 = vmatprep.subr.mxu1 %v5572_v36  ;;  %9700 = vst [vmem:[#allocation95_spill] sm:$0xff] %v5579_v38  ;;  %v5586_v41 = vld [vmem:[%s8728_s2 + $0x4b8] sm:$0xff] }
 0x1ad   :  { %1187 = vmatprep.subr.mxu0 %v4852_v42  ;;  %1304 = vmatpush2.msra.mxu1 %v5579_v38  ;;  %9701 = vst [vmem:[#allocation97_spill] sm:$0xff] %v5586_v41  ;;  %v5593_v42 = vld [vmem:[%s8728_s2 + $0x4b0] sm:$0xff] }
 0x1ae   :  { %1188 = vmatpush2.msra.mxu0 %v4859_v44  ;;  %1305 = vmatprep.subr.mxu1 %v5586_v41  ;;  %9702 = vst [vmem:[#allocation99_spill] sm:$0xff] %v5593_v42  ;;  %v5600_v44 = vld [vmem:[%s8728_s2 + $0x488] sm:$0xff] }
 0x1af   :  { %1189 = vmatprep.subr.mxu0 %v4866_v46  ;;  %1306 = vmatpush2.msra.mxu1 %v5593_v42  ;;  %9703 = vst [vmem:[#allocation54_spill] sm:$0xff] %v5600_v44  ;;  %v5607_v46 = vld [vmem:[%s8728_s2 + $0x480] sm:$0xff] }
 0x1b0   :  { %1190 = vmatpush2.msra.mxu0 %v4873_v48  ;;  %1307 = vmatprep.subr.mxu1 %v5600_v44  ;;  %9704 = vst [vmem:[#allocation56_spill] sm:$0xff] %v5607_v46  ;;  %v5614_v48 = vld [vmem:[%s8728_s2 + $0x458] sm:$0xff] }
 0x1b1   :  { %1191 = vmatprep.subr.mxu0 %v4880_v49  ;;  %1308 = vmatpush2.msra.mxu1 %v5607_v46  ;;  %9705 = vst [vmem:[#allocation57_spill] sm:$0xff] %v5614_v48  ;;  %v5621_v49 = vld [vmem:[%s8728_s2 + $0x450] sm:$0xff] }
 0x1b2   :  { %1192 = vmatpush2.msra.mxu0 %v4887_v51  ;;  %1309 = vmatprep.subr.mxu1 %v5614_v48  ;;  %9706 = vst [vmem:[#allocation59_spill] sm:$0xff] %v5621_v49  ;;  %v5628_v51 = vld [vmem:[%s8728_s2 + $0x428] sm:$0xff] }
 0x1b3   :  { %1193 = vmatprep.subr.mxu0 %v4894_v53  ;;  %1310 = vmatpush2.msra.mxu1 %v5621_v49  ;;  %9707 = vst [vmem:[#allocation61_spill] sm:$0xff] %v5628_v51  ;;  %v5635_v53 = vld [vmem:[%s8728_s2 + $0x420] sm:$0xff] }
 0x1b4   :  { %1194 = vmatpush2.msra.mxu0 %v4901_v55  ;;  %1311 = vmatprep.subr.mxu1 %v5628_v51  ;;  %9708 = vst [vmem:[#allocation63_spill] sm:$0xff] %v5635_v53  ;;  %v5642_v55 = vld [vmem:[%s8728_s2 + $0x3f8] sm:$0xff] }
 0x1b5   :  { %1195 = vmatprep.subr.mxu0 %v4908_v56  ;;  %1312 = vmatpush2.msra.mxu1 %v5635_v53  ;;  %9709 = vst [vmem:[#allocation64_spill] sm:$0xff] %v5642_v55  ;;  %v5649_v56 = vld [vmem:[%s8728_s2 + $0x3f0] sm:$0xff] }
 0x1b6   :  { %1196 = vmatpush2.msra.mxu0 %v4915_v58  ;;  %1313 = vmatprep.subr.mxu1 %v5642_v55  ;;  %9710 = vst [vmem:[#allocation66_spill] sm:$0xff] %v5649_v56  ;;  %v5656_v58 = vld [vmem:[%s8728_s2 + $0x3c8] sm:$0xff] }
 0x1b7   :  { %1197 = vmatprep.subr.mxu0 %v4922_v60  ;;  %1314 = vmatpush2.msra.mxu1 %v5649_v56  ;;  %9711 = vst [vmem:[#allocation68_spill] sm:$0xff] %v5656_v58  ;;  %v5663_v60 = vld [vmem:[%s8728_s2 + $0x3c0] sm:$0xff] }
 0x1b8   :  { %1198 = vmatpush2.msra.mxu0 %v4929_v62  ;;  %1315 = vmatprep.subr.mxu1 %v5656_v58  ;;  %9712 = vst [vmem:[#allocation70_spill] sm:$0xff] %v5663_v60  ;;  %v5670_v62 = vld [vmem:[%s8728_s2 + $0x398] sm:$0xff] }
 0x1b9   :  { %1199 = vmatprep.subr.mxu0 %v4936_v63  ;;  %1316 = vmatpush2.msra.mxu1 %v5663_v60  ;;  %9713 = vst [vmem:[#allocation71_spill] sm:$0xff] %v5670_v62  ;;  %v5677_v63 = vld [vmem:[%s8728_s2 + $0x390] sm:$0xff] }
 0x1ba   :  { %1200 = vmatpush2.msra.mxu0 %v4943_v1  ;;  %1317 = vmatprep.subr.mxu1 %v5670_v62  ;;  %9714 = vst [vmem:[#allocation73_spill] sm:$0xff] %v5677_v63  ;;  %v5684_v1 = vld [vmem:[%s8728_s2 + $0x368] sm:$0xff]  ;;  %v328_v62 = vadd.f32 %v5164_v31, %v5231_v43  ;;  %v441_v31 = vadd.f32 %v5180_v25, %v5248_v21 }
 0x1bb   :  { %1201 = vmatprep.subr.mxu0 %v4950_v4  ;;  %1318 = vmatpush2.msra.mxu1 %v5677_v63  ;;  %9715 = vst [vmem:[#allocation75_spill] sm:$0xff] %v5684_v1  ;;  %v5691_v4 = vld [vmem:[%s8728_s2 + $0x360] sm:$0xff] }
 0x1bc   :  { %1202 = vmatpush2.msra.mxu0 %v4957_v6  ;;  %1319 = vmatprep.subr.mxu1 %v5684_v1  ;;  %9716 = vst [vmem:[#allocation77_spill] sm:$0xff] %v5691_v4  ;;  %v5698_v6 = vld [vmem:[%s8728_s2 + $0x338] sm:$0xff] }
 0x1bd   :  { %1203 = vmatprep.subr.mxu0 %v4964_v7  ;;  %1320 = vmatpush2.msra.mxu1 %v5691_v4  ;;  %9717 = vst [vmem:[#allocation78_spill] sm:$0xff] %v5698_v6  ;;  %v5705_v7 = vld [vmem:[%s8728_s2 + $0x330] sm:$0xff] }
 0x1be   :  { %1204 = vmatpush2.msra.mxu0 %v4971_v9  ;;  %1321 = vmatprep.subr.mxu1 %v5698_v6  ;;  %9718 = vst [vmem:[#allocation80_spill] sm:$0xff] %v5705_v7  ;;  %v5712_v9 = vld [vmem:[%s8728_s2 + $0x308] sm:$0xff] }
 0x1bf   :  { %1205 = vmatprep.subr.mxu0 %v4978_v11  ;;  %1322 = vmatpush2.msra.mxu1 %v5705_v7  ;;  %9719 = vst [vmem:[#allocation82_spill] sm:$0xff] %v5712_v9  ;;  %v5719_v11 = vld [vmem:[%s8728_s2 + $0x2e8] sm:$0xff]  ;;  %v5737_v7 = vld [vmem:[%s8728_s2 + $0x2b8] sm:$0xff] }
 0x1c0   :  { %1206 = vmatpush2.msra.mxu0 %v4985_v13  ;;  %1323 = vmatprep.subr.mxu1 %v5712_v9  ;;  %9720 = vst [vmem:[#allocation84_spill] sm:$0xff] %v5719_v11  ;;  %v5725_v13 = vld [vmem:[%s8728_s2 + $0x2e0] sm:$0xff]  ;;  %9723 = vst [vmem:[#allocation89_spill] sm:$0xff] %v5737_v7 }
 0x1c1   :  { %1208 = vmatmul.mubr.f32.vlgmr.msra.gmra.mxu0 %v5263_v30  ;;  %1332 = vmatprep.subr.mxu0 %v5719_v11  ;;  %9721 = vst [vmem:[#allocation85_spill] sm:$0xff] %v5725_v13  ;;  %v5731_v9 = vld [vmem:[%s8728_s2 + $0x300] sm:$0xff]  ;;  %v5743_v11 = vld [vmem:[%s8728_s2 + $0x2f8] sm:$0xff] }
 0x1c2   :  { %1333 = vmatpush1.msra.mxu0 %v5725_v13  ;;  %9722 = vst [vmem:[#allocation87_spill] sm:$0xff] %v5731_v9  ;;  %1324 = vmatpush2.msra.mxu1 %v5731_v9  ;;  %9724 = vst [vmem:[#allocation91_spill] sm:$0xff] %v5743_v11  ;;  %v5749_v13 = vld [vmem:[%s8728_s2 + $0x2b0] sm:$0xff]  ;;  %v5755_v9 = vld [vmem:[%s8728_s2 + $0x288] sm:$0xff] }
 0x1c3   :  { %1334 = vmatprep.subr.mxu0 %v5737_v7  ;;  %1403 = vmatprep.subr.mxu1 %v5743_v11  ;;  %9725 = vst [vmem:[#allocation92_spill] sm:$0xff] %v5749_v13  ;;  %9726 = vst [vmem:[#allocation94_spill] sm:$0xff] %v5755_v9  ;;  %v5761_v7 = vld [vmem:[%s8728_s2 + $0x280] sm:$0xff]  ;;  %v5767_v11 = vld [vmem:[%s8728_s2 + $0x258] sm:$0xff] }
 0x1c4   :  { %1335 = vmatpush1.msra.mxu0 %v5749_v13  ;;  %9727 = vst [vmem:[#allocation96_spill] sm:$0xff] %v5761_v7  ;;  %9728 = vst [vmem:[#allocation98_spill] sm:$0xff] %v5767_v11  ;;  %v5773_v13 = vld [vmem:[%s8728_s2 + $0x250] sm:$0xff] }
 0x1c5   :  { %1336 = vmatprep.subr.mxu0 %v5755_v9  ;;  %9729 = vst [vmem:[#allocation100_spill] sm:$0xff] %v5773_v13  ;;  %v5779_v9 = vld [vmem:[%s8728_s2 + $0x228] sm:$0xff] }
 0x1c6   :  { %1337 = vmatpush1.msra.mxu0 %v5761_v7  ;;  %9730 = vst [vmem:[#allocation101_spill] sm:$0xff] %v5779_v9  ;;  %v5785_v7 = vld [vmem:[%s8728_s2 + $0x220] sm:$0xff] }
 0x1c7   :  { %1338 = vmatprep.subr.mxu0 %v5767_v11  ;;  %9731 = vst [vmem:[#allocation102_spill] sm:$0xff] %v5785_v7  ;;  %v5791_v11 = vld [vmem:[%s8728_s2 + $0x1f8] sm:$0xff] }
 0x1c8   :  { %1339 = vmatpush1.msra.mxu0 %v5773_v13  ;;  %9732 = vst [vmem:[#allocation103_spill] sm:$0xff] %v5791_v11  ;;  %v5797_v13 = vld [vmem:[%s8728_s2 + $0x1f0] sm:$0xff] }
 0x1c9   :  { %1340 = vmatprep.subr.mxu0 %v5779_v9  ;;  %9733 = vst [vmem:[#allocation104_spill] sm:$0xff] %v5797_v13  ;;  %v5803_v9 = vld [vmem:[%s8728_s2 + $0x1c8] sm:$0xff] }
 0x1ca   :  { %1341 = vmatpush1.msra.mxu0 %v5785_v7  ;;  %9734 = vst [vmem:[#allocation105_spill] sm:$0xff] %v5803_v9  ;;  %v5809_v7 = vld [vmem:[%s8728_s2 + $0x1c0] sm:$0xff] }
 0x1cb   :  { %1342 = vmatprep.subr.mxu0 %v5791_v11  ;;  %9735 = vst [vmem:[#allocation106_spill] sm:$0xff] %v5809_v7  ;;  %v5815_v11 = vld [vmem:[%s8728_s2 + $0x198] sm:$0xff] }
 0x1cc   :  { %1343 = vmatpush1.msra.mxu0 %v5797_v13  ;;  %9736 = vst [vmem:[#allocation107_spill] sm:$0xff] %v5815_v11  ;;  %v5821_v13 = vld [vmem:[%s8728_s2 + $0x190] sm:$0xff] }
 0x1cd   :  { %1344 = vmatprep.subr.mxu0 %v5803_v9  ;;  %9737 = vst [vmem:[#allocation108_spill] sm:$0xff] %v5821_v13  ;;  %v5827_v9 = vld [vmem:[%s8728_s2 + $0x168] sm:$0xff] }
 0x1ce   :  { %1345 = vmatpush1.msra.mxu0 %v5809_v7  ;;  %9738 = vst [vmem:[#allocation109_spill] sm:$0xff] %v5827_v9  ;;  %v5833_v7 = vld [vmem:[%s8728_s2 + $0x160] sm:$0xff] }
 0x1cf   :  { %1346 = vmatprep.subr.mxu0 %v5815_v11  ;;  %9739 = vst [vmem:[#allocation110_spill] sm:$0xff] %v5833_v7  ;;  %v5839_v11 = vld [vmem:[%s8728_s2 + $0x138] sm:$0xff] }
 0x1d0   :  { %1347 = vmatpush1.msra.mxu0 %v5821_v13  ;;  %9740 = vst [vmem:[#allocation111_spill] sm:$0xff] %v5839_v11  ;;  %v5845_v13 = vld [vmem:[%s8728_s2 + $0x130] sm:$0xff] }
 0x1d1   :  { %1348 = vmatprep.subr.mxu0 %v5827_v9  ;;  %9741 = vst [vmem:[#allocation112_spill] sm:$0xff] %v5845_v13  ;;  %v5851_v9 = vld [vmem:[%s8728_s2 + $0x108] sm:$0xff] }
 0x1d2   :  { %1349 = vmatpush1.msra.mxu0 %v5833_v7  ;;  %9742 = vst [vmem:[#allocation113_spill] sm:$0xff] %v5851_v9  ;;  %v5857_v7 = vld [vmem:[%s8728_s2 + $0x100] sm:$0xff] }
 0x1d3   :  { %1350 = vmatprep.subr.mxu0 %v5839_v11  ;;  %9743 = vst [vmem:[#allocation114_spill] sm:$0xff] %v5857_v7  ;;  %v5863_v11 = vld [vmem:[%s8728_s2 + $0xd8] sm:$0xff] }
 0x1d4   :  { %1351 = vmatpush1.msra.mxu0 %v5845_v13  ;;  %9744 = vst [vmem:[#allocation115_spill] sm:$0xff] %v5863_v11  ;;  %v5869_v13 = vld [vmem:[%s8728_s2 + $0xd0] sm:$0xff] }
 0x1d5   :  { %1352 = vmatprep.subr.mxu0 %v5851_v9  ;;  %9745 = vst [vmem:[#allocation116_spill] sm:$0xff] %v5869_v13  ;;  %v5875_v9 = vld [vmem:[%s8728_s2 + $0xa8] sm:$0xff] }
 0x1d6   :  { %1353 = vmatpush1.msra.mxu0 %v5857_v7  ;;  %9746 = vst [vmem:[#allocation117_spill] sm:$0xff] %v5875_v9  ;;  %v5881_v7 = vld [vmem:[%s8728_s2 + $0xa0] sm:$0xff] }
 0x1d7   :  { %1354 = vmatprep.subr.mxu0 %v5863_v11  ;;  %9747 = vst [vmem:[#allocation118_spill] sm:$0xff] %v5881_v7  ;;  %v5887_v11 = vld [vmem:[%s8728_s2 + $0x78] sm:$0xff] }
 0x1d8   :  { %1355 = vmatpush1.msra.mxu0 %v5869_v13  ;;  %9748 = vst [vmem:[#allocation119_spill] sm:$0xff] %v5887_v11  ;;  %v5893_v13 = vld [vmem:[%s8728_s2 + $0x70] sm:$0xff] }
 0x1d9   :  { %1356 = vmatprep.subr.mxu0 %v5875_v9  ;;  %9749 = vst [vmem:[#allocation120_spill] sm:$0xff] %v5893_v13  ;;  %v5899_v9 = vld [vmem:[%s8728_s2 + $0x48] sm:$0xff] }
 0x1da   :  { %1357 = vmatpush1.msra.mxu0 %v5881_v7  ;;  %9750 = vst [vmem:[#allocation121_spill] sm:$0xff] %v5899_v9  ;;  %v5905_v7 = vld [vmem:[%s8728_s2 + $0x40] sm:$0xff] }
 0x1db   :  { %1358 = vmatprep.subr.mxu0 %v5887_v11  ;;  %9751 = vst [vmem:[#allocation122_spill] sm:$0xff] %v5905_v7  ;;  %v5911_v11 = vld [vmem:[%s8728_s2 + $0x18] sm:$0xff] }
 0x1dc   :  { %1359 = vmatpush1.msra.mxu0 %v5893_v13  ;;  %9752 = vst [vmem:[#allocation123_spill] sm:$0xff] %v5911_v11  ;;  %v5917_v13 = vld [vmem:[%s8728_s2 + $0x10] sm:$0xff] }
 0x1dd   :  { %1360 = vmatprep.subr.mxu0 %v5899_v9  ;;  %9753 = vst [vmem:[#allocation124_spill] sm:$0xff] %v5917_v13  ;;  %v5923_v9 = vld [vmem:[%s8728_s2 + $0x5e8] sm:$0xff] }
 0x1de   :  { %1361 = vmatpush1.msra.mxu0 %v5905_v7  ;;  %9754 = vst [vmem:[#allocation125_spill] sm:$0xff] %v5923_v9  ;;  %v5929_v7 = vld [vmem:[%s8728_s2 + $0x5e0] sm:$0xff] }
 0x1df   :  { %1362 = vmatprep.subr.mxu0 %v5911_v11  ;;  %9755 = vst [vmem:[#allocation126_spill] sm:$0xff] %v5929_v7  ;;  %v5935_v11 = vld [vmem:[%s8728_s2 + $0x5b8] sm:$0xff] }
 0x1e0   :  { %1363 = vmatpush1.msra.mxu0 %v5917_v13  ;;  %9756 = vst [vmem:[#allocation127_spill] sm:$0xff] %v5935_v11  ;;  %v5941_v13 = vld [vmem:[%s8728_s2 + $0x5b0] sm:$0xff] }
 0x1e1   :  { %1364 = vmatprep.subr.mxu0 %v5923_v9  ;;  %9757 = vst [vmem:[#allocation128_spill] sm:$0xff] %v5941_v13  ;;  %v5947_v9 = vld [vmem:[%s8728_s2 + $0x588] sm:$0xff] }
 0x1e2   :  { %1365 = vmatpush2.msra.mxu0 %v5929_v7  ;;  %9758 = vst [vmem:[#allocation129_spill] sm:$0xff] %v5947_v9  ;;  %v5953_v7 = vld [vmem:[%s8728_s2 + $0x580] sm:$0xff] }
 0x1e3   :  { %1366 = vmatprep.subr.mxu0 %v5935_v11  ;;  %9759 = vst [vmem:[#allocation130_spill] sm:$0xff] %v5953_v7  ;;  %v5959_v11 = vld [vmem:[%s8728_s2 + $0x558] sm:$0xff] }
 0x1e4   :  { %1367 = vmatpush2.msra.mxu0 %v5941_v13  ;;  %9760 = vst [vmem:[#allocation131_spill] sm:$0xff] %v5959_v11  ;;  %v5965_v13 = vld [vmem:[%s8728_s2 + $0x550] sm:$0xff] }
 0x1e5   :  { %1368 = vmatprep.subr.mxu0 %v5947_v9  ;;  %9761 = vst [vmem:[#allocation132_spill] sm:$0xff] %v5965_v13  ;;  %v5971_v9 = vld [vmem:[%s8728_s2 + $0x528] sm:$0xff] }
 0x1e6   :  { %1369 = vmatpush2.msra.mxu0 %v5953_v7  ;;  %9762 = vst [vmem:[#allocation133_spill] sm:$0xff] %v5971_v9  ;;  %v5977_v7 = vld [vmem:[%s8728_s2 + $0x520] sm:$0xff] }
 0x1e7   :  { %1370 = vmatprep.subr.mxu0 %v5959_v11  ;;  %9763 = vst [vmem:[#allocation134_spill] sm:$0xff] %v5977_v7  ;;  %v5983_v11 = vld [vmem:[%s8728_s2 + $0x4f8] sm:$0xff] }
 0x1e8   :  { %1371 = vmatpush2.msra.mxu0 %v5965_v13  ;;  %9764 = vst [vmem:[#allocation135_spill] sm:$0xff] %v5983_v11  ;;  %v5989_v13 = vld [vmem:[%s8728_s2 + $0x4f0] sm:$0xff] }
 0x1e9   :  { %1372 = vmatprep.subr.mxu0 %v5971_v9  ;;  %9765 = vst [vmem:[#allocation136_spill] sm:$0xff] %v5989_v13  ;;  %v5995_v9 = vld [vmem:[%s8728_s2 + $0x4c8] sm:$0xff] }
 0x1ea   :  { %1373 = vmatpush2.msra.mxu0 %v5977_v7  ;;  %9766 = vst [vmem:[#allocation137_spill] sm:$0xff] %v5995_v9  ;;  %v6001_v7 = vld [vmem:[%s8728_s2 + $0x4c0] sm:$0xff] }
 0x1eb   :  { %1374 = vmatprep.subr.mxu0 %v5983_v11  ;;  %9767 = vst [vmem:[#allocation138_spill] sm:$0xff] %v6001_v7  ;;  %v6007_v11 = vld [vmem:[%s8728_s2 + $0x498] sm:$0xff] }
 0x1ec   :  { %1375 = vmatpush2.msra.mxu0 %v5989_v13  ;;  %9768 = vst [vmem:[#allocation139_spill] sm:$0xff] %v6007_v11  ;;  %v6013_v13 = vld [vmem:[%s8728_s2 + $0x490] sm:$0xff] }
 0x1ed   :  { %1376 = vmatprep.subr.mxu0 %v5995_v9  ;;  %9769 = vst [vmem:[#allocation140_spill] sm:$0xff] %v6013_v13  ;;  %v6019_v9 = vld [vmem:[%s8728_s2 + $0x468] sm:$0xff] }
 0x1ee   :  { %1377 = vmatpush2.msra.mxu0 %v6001_v7  ;;  %9770 = vst [vmem:[#allocation141_spill] sm:$0xff] %v6019_v9  ;;  %v6025_v7 = vld [vmem:[%s8728_s2 + $0x460] sm:$0xff] }
 0x1ef   :  { %1378 = vmatprep.subr.mxu0 %v6007_v11  ;;  %9771 = vst [vmem:[#allocation142_spill] sm:$0xff] %v6025_v7  ;;  %v6031_v11 = vld [vmem:[%s8728_s2 + $0x438] sm:$0xff] }
 0x1f0   :  { %1379 = vmatpush2.msra.mxu0 %v6013_v13  ;;  %9772 = vst [vmem:[#allocation143_spill] sm:$0xff] %v6031_v11  ;;  %v6037_v13 = vld [vmem:[%s8728_s2 + $0x430] sm:$0xff] }
 0x1f1   :  { %1380 = vmatprep.subr.mxu0 %v6019_v9  ;;  %9773 = vst [vmem:[#allocation144_spill] sm:$0xff] %v6037_v13  ;;  %v6043_v9 = vld [vmem:[%s8728_s2 + $0x408] sm:$0xff] }
 0x1f2   :  { %1381 = vmatpush2.msra.mxu0 %v6025_v7  ;;  %9774 = vst [vmem:[#allocation145_spill] sm:$0xff] %v6043_v9  ;;  %v6049_v7 = vld [vmem:[%s8728_s2 + $0x400] sm:$0xff] }
 0x1f3   :  { %1382 = vmatprep.subr.mxu0 %v6031_v11  ;;  %9775 = vst [vmem:[#allocation146_spill] sm:$0xff] %v6049_v7  ;;  %v6055_v11 = vld [vmem:[%s8728_s2 + $0x3d8] sm:$0xff] }
 0x1f4   :  { %1383 = vmatpush2.msra.mxu0 %v6037_v13  ;;  %9776 = vst [vmem:[#allocation147_spill] sm:$0xff] %v6055_v11  ;;  %v6061_v13 = vld [vmem:[%s8728_s2 + $0x3d0] sm:$0xff] }
 0x1f5   :  { %1384 = vmatprep.subr.mxu0 %v6043_v9  ;;  %9777 = vst [vmem:[#allocation148_spill] sm:$0xff] %v6061_v13  ;;  %v6067_v9 = vld [vmem:[%s8728_s2 + $0x3a8] sm:$0xff] }
 0x1f6   :  { %1385 = vmatpush2.msra.mxu0 %v6049_v7  ;;  %9778 = vst [vmem:[#allocation149_spill] sm:$0xff] %v6067_v9  ;;  %v6073_v7 = vld [vmem:[%s8728_s2 + $0x3a0] sm:$0xff] }
 0x1f7   :  { %1386 = vmatprep.subr.mxu0 %v6055_v11  ;;  %9779 = vst [vmem:[#allocation150_spill] sm:$0xff] %v6073_v7  ;;  %v6079_v11 = vld [vmem:[%s8728_s2 + $0x378] sm:$0xff] }
 0x1f8   :  { %1387 = vmatpush2.msra.mxu0 %v6061_v13  ;;  %9780 = vst [vmem:[#allocation151_spill] sm:$0xff] %v6079_v11  ;;  %v6085_v13 = vld [vmem:[%s8728_s2 + $0x370] sm:$0xff] }
 0x1f9   :  { %1388 = vmatprep.subr.mxu0 %v6067_v9  ;;  %9781 = vst [vmem:[#allocation152_spill] sm:$0xff] %v6085_v13  ;;  %v6091_v9 = vld [vmem:[%s8728_s2 + $0x348] sm:$0xff] }
 0x1fa   :  { %1389 = vmatpush2.msra.mxu0 %v6073_v7  ;;  %9782 = vst [vmem:[#allocation153_spill] sm:$0xff] %v6091_v9  ;;  %v6097_v7 = vld [vmem:[%s8728_s2 + $0x340] sm:$0xff] }
 0x1fb   :  { %1390 = vmatprep.subr.mxu0 %v6079_v11  ;;  %9783 = vst [vmem:[#allocation154_spill] sm:$0xff] %v6097_v7  ;;  %v6103_v11 = vld [vmem:[%s8728_s2 + $0x318] sm:$0xff] }
 0x1fc   :  { %1391 = vmatpush2.msra.mxu0 %v6085_v13  ;;  %9784 = vst [vmem:[#allocation155_spill] sm:$0xff] %v6103_v11  ;;  %v6109_v13 = vld [vmem:[%s8728_s2 + $0x310] sm:$0xff] }
 0x1fd   :  { %1392 = vmatprep.subr.mxu0 %v6091_v9  ;;  %9785 = vst [vmem:[#allocation156_spill] sm:$0xff] %v6109_v13 }
 0x1fe   :  { %1393 = vmatpush2.msra.mxu0 %v6097_v7 }
 0x1ff   :  { %1394 = vmatprep.subr.mxu0 %v6103_v11 }
 0x200   :  { %1395 = vmatpush2.msra.mxu0 %v6109_v13  ;;  %v330_v13 = vadd.f32 %v5166_v33, %v5234_v15 }
 0x201   :  { %1521 = vmatprep.subr.mxu0 %v5140_v45 }
 0x241   :  { %v1067_v9 = vpop.f32.mrf.mxu0  ;;  %v1138_v11 = vpop.f32.mrf.mxu1 }
 0x242   :  { %v1214_v7 = vadd.f32 %v1067_v9, %v5105_v57  ;;  %v1216_v58 = vadd.f32 %v1138_v11, %v328_v62 }
 0x243   :  { %v1069_v6 = vpop.f32.mrf.mxu0  ;;  %v1140_v60 = vpop.f32.mrf.mxu1 }
 0x244   :  { %v1215_v4 = vadd.f32 %v1069_v6, %v5110_v14  ;;  %v1218_v1 = vmul.f32 0.5, %v1214_v7  ;;  %v1217_v56 = vadd.f32 %v1140_v60, %v330_v13  ;;  %v1220_v53 = vmul.f32 0.5, %v1216_v58  ;;  %v9786_v60 = vld [vmem:[#allocation19_spill] sm:$0xff] }
 0x245   :  { %v443_v58 = vadd.f32 %v9786_v60, %v5255_v28 }
 0x246   :  { %v1219_v63 = vmul.f32 0.5, %v1215_v4  ;;  %3028 = vtanh.f32 %v1218_v1  ;;  %v1221_v9 = vmul.f32 0.5, %v1217_v56 }
 0x248   :  { %3030 = vtanh.f32 %v1219_v63 }
 0x249   :  { %3032 = vtanh.f32 %v1220_v53 }
 0x24a   :  { %3034 = vtanh.f32 %v1221_v9 }
 0x253   :  { %v3029_v45 = vpop.eup %3028 }
 0x254   :  { %v1226_v57 = vmul.f32 0.5, %v3029_v45 }
 0x255   :  { %v3031_v55 = vpop.eup %3030 }
 0x256   :  { %v1227_v14 = vmul.f32 0.5, %v3031_v55  ;;  %v1230_v1 = vadd.f32 0.5, %v1226_v57  ;;  %v3033_v53 = vpop.eup %3032 }
 0x257   :  { %v3035_v13 = vpop.eup %3034  ;;  %v1228_v45 = vmul.f32 0.5, %v3033_v53  ;;  %v6216_v53 = vld [vmem:[%s8728_s2 + $0x200] sm:$0xff] }
 0x258   :  { %v1231_v33 = vadd.f32 0.5, %v1227_v14  ;;  %v1229_v57 = vmul.f32 0.5, %v3035_v13  ;;  %v6223_v13 = vld [vmem:[%s8728_s2 + $0x1d8] sm:$0xff] }
 0x259   :  { %v1232_v25 = vadd.f32 0.5, %v1228_v45  ;;  %v6230_v45 = vld [vmem:[%s8728_s2 + $0x1d0] sm:$0xff] }
 0x25a   :  { %v1233_v14 = vadd.f32 0.5, %v1229_v57  ;;  %v6237_v57 = vld [vmem:[%s8728_s2 + $0x1a8] sm:$0xff] }
 0x281   :  { %v1209_v6 = vpop.f32.mrf.mxu0 }
 0x282   :  { %v1234_v63 = vadd.f32 %v1209_v6, %v5245_v16 }
 0x283   :  { %v1211_v4 = vpop.f32.mrf.mxu0 }
 0x284   :  { %v1236_v7 = vmul.f32 %v1234_v63, %v1230_v1  ;;  %v1235_v62 = vadd.f32 %v1211_v4, %v5252_v40 }
 0x286   :  { %v1238_v11 = vadd.f32 %v1236_v7, %v441_v31  ;;  %v1237_v56 = vmul.f32 %v1235_v62, %v1231_v33  ;;  %v6167_v7 = vld [vmem:[%s8728_s2 + $0x298] sm:$0xff]  ;;  %v6174_v33 = vld [vmem:[%s8728_s2 + $0x290] sm:$0xff]  ;;  %v6181_v62 = vld [vmem:[%s8728_s2 + $0x268] sm:$0xff] }
 0x288   :  { %3036 = vtanh.f32 %v1238_v11  ;;  %v1239_v55 = vadd.f32 %v1237_v56, %v443_v58  ;;  %v6188_v58 = vld [vmem:[%s8728_s2 + $0x260] sm:$0xff]  ;;  %v6195_v11 = vld [vmem:[%s8728_s2 + $0x238] sm:$0xff]  ;;  %v6202_v56 = vld [vmem:[%s8728_s2 + $0x230] sm:$0xff] }
 0x28a   :  { %3038 = vtanh.f32 %v1239_v55  ;;  %v6209_v55 = vld [vmem:[%s8728_s2 + $0x208] sm:$0xff] }
 0x295   :  { %v3037_v6 = vpop.eup %3036 }
 0x296   :  { %v1242_v9 = vsub.f32 %v5263_v30, %v3037_v6  ;;  %v6146_v30 = vld [vmem:[%s8728_s2 + $0x2f0] sm:$0xff] }
 0x297   :  { %v3039_v1 = vpop.eup %3038 }
 0x298   :  { %v1243_v63 = vsub.f32 %v5265_v10, %v3039_v1  ;;  %v1244_v4 = vmul.f32 %v1242_v9, %v1232_v25  ;;  %v6160_v10 = vld [vmem:[%s8728_s2 + $0x2c0] sm:$0xff]  ;;  %v6251_v25 = vld [vmem:[%s8728_s2 + $0x178] sm:$0xff] }
 0x299   :  { %9787 = vst [vmem:[#allocation19_spill] sm:$0xff] %v6251_v25  ;;  %v9788_v9 = vld [vmem:[#allocation43_spill] sm:$0xff] }
 0x29a   :  { %v1245_v40 = vmul.f32 %v1243_v63, %v1233_v14  ;;  %v6127_v60 = vadd.f32 %v3037_v6, %v1244_v4  ;;  %v6244_v6 = vld [vmem:[%s8728_s2 + $0x1a0] sm:$0xff]  ;;  %v9790_v14 = vld [vmem:[#allocation45_spill] sm:$0xff]  ;;  %v6265_v63 = vld [vmem:[%s8728_s2 + $0x148] sm:$0xff] }
 0x29b   :  { %9791 = vst [vmem:[#allocation158_spill] sm:$0xff] %v6265_v63  ;;  %v9792_v4 = vld [vmem:[#allocation44_spill] sm:$0xff] }
 0x29c   :  { %v6129_v31 = vadd.f32 %v3039_v1, %v1245_v40  ;;  %2966 = vst [vmem:[%s8731_s7 + $0x8] sm:$0xff] %v6127_v60  ;;  %v6153_v40 = vld [vmem:[%s8728_s2 + $0x2c8] sm:$0xff]  ;;  %v6258_v1 = vld [vmem:[%s8728_s2 + $0x170] sm:$0xff] }
 0x29d   :  { %9789 = vst [vmem:[#allocation157_spill] sm:$0xff] %v6258_v1 }
 0x29e   :  { %1325 = vmatprep.mubr.f32.mxu1 %v6129_v31  ;;  %1396 = vmatprep.mubr.f32.mxu0 %v6129_v31  ;;  %2967 = vst [vmem:[%s8732_s8 + $0x30] sm:$0xff] %v6129_v31 }
 0x29f   :  { %1326 = vmatmul.mubr.f32.vlgmr.msra.gmra.mxu1 %v6127_v60  ;;  %1397 = vmatmul.mubr.f32.vlgmr.msra.gmra.mxu0 %v6127_v60 }
 0x2a0   :  { %1404 = vmatpush1.msra.mxu1 %v6146_v30  ;;  %1467 = vmatprep.mubr.f32.mxu1 %v6129_v31 }
 0x2a1   :  { %1405 = vmatprep.subr.mxu1 %v6153_v40  ;;  %1522 = vmatpush1.msra.mxu0 %v5285_v26 }
 0x2a2   :  { %1406 = vmatpush1.msra.mxu1 %v6160_v10  ;;  %1523 = vmatprep.subr.mxu0 %v5292_v22 }
 0x2a3   :  { %1407 = vmatprep.subr.mxu1 %v6167_v7  ;;  %1524 = vmatpush1.msra.mxu0 %v5299_v8 }
 0x2a4   :  { %1408 = vmatpush1.msra.mxu1 %v6174_v33  ;;  %1525 = vmatprep.subr.mxu0 %v5306_v2 }
 0x2a5   :  { %1409 = vmatprep.subr.mxu1 %v6181_v62  ;;  %1526 = vmatpush1.msra.mxu0 %v5313_v18 }
 0x2a6   :  { %1410 = vmatpush1.msra.mxu1 %v6188_v58  ;;  %1527 = vmatprep.subr.mxu0 %v5320_v50 }
 0x2a7   :  { %1411 = vmatprep.subr.mxu1 %v6195_v11  ;;  %1528 = vmatpush1.msra.mxu0 %v5327_v59 }
 0x2a8   :  { %1412 = vmatpush1.msra.mxu1 %v6202_v56  ;;  %1529 = vmatprep.subr.mxu0 %v5334_v54 }
 0x2a9   :  { %1413 = vmatprep.subr.mxu1 %v6209_v55  ;;  %1530 = vmatpush1.msra.mxu0 %v5341_v0 }
 0x2aa   :  { %1414 = vmatpush1.msra.mxu1 %v6216_v53  ;;  %1531 = vmatprep.subr.mxu0 %v5348_v20 }
 0x2ab   :  { %1415 = vmatprep.subr.mxu1 %v6223_v13  ;;  %1532 = vmatpush1.msra.mxu0 %v5355_v17 }
 0x2ac   :  { %1416 = vmatpush1.msra.mxu1 %v6230_v45  ;;  %1533 = vmatprep.subr.mxu0 %v5362_v12 }
 0x2ad   :  { %1417 = vmatprep.subr.mxu1 %v6237_v57  ;;  %1534 = vmatpush1.msra.mxu0 %v5369_v24 }
 0x2ae   :  { %1418 = vmatpush1.msra.mxu1 %v6244_v6  ;;  %1535 = vmatprep.subr.mxu0 %v5376_v3 }
 0x2af   :  { %1419 = vmatprep.subr.mxu1 %v6251_v25  ;;  %1536 = vmatpush1.msra.mxu0 %v9788_v9  ;;  %v6272_v9 = vld [vmem:[%s8728_s2 + $0x140] sm:$0xff] }
 0x2b0   :  { %1420 = vmatpush1.msra.mxu1 %v6258_v1  ;;  %1537 = vmatprep.subr.mxu0 %v9790_v14  ;;  %9793 = vst [vmem:[#allocation159_spill] sm:$0xff] %v6272_v9  ;;  %v9794_v25 = vld [vmem:[#allocation47_spill] sm:$0xff]  ;;  %v6279_v14 = vld [vmem:[%s8728_s2 + $0x118] sm:$0xff] }
 0x2b1   :  { %1421 = vmatprep.subr.mxu1 %v6265_v63  ;;  %1538 = vmatpush1.msra.mxu0 %v9792_v4  ;;  %9795 = vst [vmem:[#allocation160_spill] sm:$0xff] %v6279_v14  ;;  %v9796_v1 = vld [vmem:[#allocation46_spill] sm:$0xff]  ;;  %v6286_v4 = vld [vmem:[%s8728_s2 + $0x110] sm:$0xff] }
 0x2b2   :  { %1422 = vmatpush1.msra.mxu1 %v6272_v9  ;;  %1539 = vmatprep.subr.mxu0 %v9794_v25  ;;  %9797 = vst [vmem:[#allocation161_spill] sm:$0xff] %v6286_v4  ;;  %v9798_v63 = vld [vmem:[#allocation50_spill] sm:$0xff]  ;;  %v6293_v25 = vld [vmem:[%s8728_s2 + $0xe8] sm:$0xff] }
 0x2b3   :  { %1423 = vmatprep.subr.mxu1 %v6279_v14  ;;  %1540 = vmatpush1.msra.mxu0 %v9796_v1  ;;  %9799 = vst [vmem:[#allocation162_spill] sm:$0xff] %v6293_v25  ;;  %v9800_v9 = vld [vmem:[#allocation48_spill] sm:$0xff]  ;;  %v6300_v1 = vld [vmem:[%s8728_s2 + $0xe0] sm:$0xff] }
 0x2b4   :  { %1424 = vmatpush1.msra.mxu1 %v6286_v4  ;;  %1541 = vmatprep.subr.mxu0 %v9798_v63  ;;  %9801 = vst [vmem:[#allocation163_spill] sm:$0xff] %v6300_v1  ;;  %v9802_v14 = vld [vmem:[#allocation51_spill] sm:$0xff]  ;;  %v6307_v63 = vld [vmem:[%s8728_s2 + $0xb8] sm:$0xff]  ;;  %v9804_v4 = vld [vmem:[#allocation49_spill] sm:$0xff] }
 0x2b5   :  { %1425 = vmatprep.subr.mxu1 %v6293_v25  ;;  %1542 = vmatpush1.msra.mxu0 %v9800_v9  ;;  %9803 = vst [vmem:[#allocation164_spill] sm:$0xff] %v6307_v63  ;;  %v6314_v9 = vld [vmem:[%s8728_s2 + $0xb0] sm:$0xff] }
 0x2b6   :  { %1426 = vmatpush1.msra.mxu1 %v6300_v1  ;;  %1543 = vmatprep.subr.mxu0 %v9802_v14  ;;  %9805 = vst [vmem:[#allocation165_spill] sm:$0xff] %v6314_v9  ;;  %v9806_v25 = vld [vmem:[#allocation53_spill] sm:$0xff]  ;;  %v6321_v14 = vld [vmem:[%s8728_s2 + $0x88] sm:$0xff] }
 0x2b7   :  { %1427 = vmatprep.subr.mxu1 %v6307_v63  ;;  %1544 = vmatpush1.msra.mxu0 %v9804_v4  ;;  %9807 = vst [vmem:[#allocation166_spill] sm:$0xff] %v6321_v14  ;;  %v9808_v1 = vld [vmem:[#allocation52_spill] sm:$0xff]  ;;  %v6328_v4 = vld [vmem:[%s8728_s2 + $0x80] sm:$0xff] }
 0x2b8   :  { %1428 = vmatpush1.msra.mxu1 %v6314_v9  ;;  %1545 = vmatprep.subr.mxu0 %v9806_v25  ;;  %v9809_v63 = vld [vmem:[#allocation55_spill] sm:$0xff]  ;;  %v6335_v25 = vld [vmem:[%s8728_s2 + $0x58] sm:$0xff] }
 0x2b9   :  { %1429 = vmatprep.subr.mxu1 %v6321_v14  ;;  %1546 = vmatpush1.msra.mxu0 %v9808_v1  ;;  %v9810_v9 = vld [vmem:[#allocation58_spill] sm:$0xff]  ;;  %v6342_v1 = vld [vmem:[%s8728_s2 + $0x50] sm:$0xff]  ;;  %v9811_v14 = vld [vmem:[#allocation60_spill] sm:$0xff] }
 0x2ba   :  { %1430 = vmatpush1.msra.mxu1 %v6328_v4  ;;  %1547 = vmatprep.subr.mxu0 %v9809_v63  ;;  %v6349_v63 = vld [vmem:[%s8728_s2 + $0x28] sm:$0xff] }
 0x2bb   :  { %1431 = vmatprep.subr.mxu1 %v6335_v25  ;;  %1548 = vmatpush1.msra.mxu0 %v9810_v9  ;;  %v6356_v9 = vld [vmem:[%s8728_s2 + $0x20] sm:$0xff] }
 0x2bc   :  { %1432 = vmatpush1.msra.mxu1 %v6342_v1  ;;  %1549 = vmatprep.subr.mxu0 %v9811_v14  ;;  %v6363_v14 = vld [vmem:[%s8728_s2 + $0x5f8] sm:$0xff] }
 0x2bd   :  { %1433 = vmatprep.subr.mxu1 %v6349_v63  ;;  %1550 = vmatpush1.msra.mxu0 %v5481_v27  ;;  %v6370_v27 = vld [vmem:[%s8728_s2 + $0x5f0] sm:$0xff] }
 0x2be   :  { %1434 = vmatpush1.msra.mxu1 %v6356_v9  ;;  %1551 = vmatprep.subr.mxu0 %v5488_v23  ;;  %v6377_v23 = vld [vmem:[%s8728_s2 + $0x5c8] sm:$0xff] }
 0x2bf   :  { %1435 = vmatprep.subr.mxu1 %v6363_v14  ;;  %1552 = vmatpush1.msra.mxu0 %v5495_v37  ;;  %v6384_v37 = vld [vmem:[%s8728_s2 + $0x5c0] sm:$0xff] }
 0x2c0   :  { %1436 = vmatpush2.msra.mxu1 %v6370_v27  ;;  %1553 = vmatprep.subr.mxu0 %v5502_v52  ;;  %v6391_v52 = vld [vmem:[%s8728_s2 + $0x598] sm:$0xff] }
 0x2c1   :  { %1437 = vmatprep.subr.mxu1 %v6377_v23  ;;  %1554 = vmatpush2.msra.mxu0 %v5509_v32  ;;  %9812 = vst [vmem:[#allocation167_spill] sm:$0xff] %v6391_v52  ;;  %v6398_v32 = vld [vmem:[%s8728_s2 + $0x590] sm:$0xff] }
 0x2c2   :  { %1438 = vmatpush2.msra.mxu1 %v6384_v37  ;;  %1555 = vmatprep.subr.mxu0 %v5516_v29  ;;  %9813 = vst [vmem:[#allocation168_spill] sm:$0xff] %v6398_v32  ;;  %v6405_v29 = vld [vmem:[%s8728_s2 + $0x568] sm:$0xff] }
 0x2c3   :  { %1439 = vmatprep.subr.mxu1 %v6391_v52  ;;  %1556 = vmatpush2.msra.mxu0 %v5523_v5  ;;  %9814 = vst [vmem:[#allocation169_spill] sm:$0xff] %v6405_v29  ;;  %v6412_v5 = vld [vmem:[%s8728_s2 + $0x560] sm:$0xff] }
 0x2c4   :  { %1440 = vmatpush2.msra.mxu1 %v6398_v32  ;;  %1557 = vmatprep.subr.mxu0 %v5530_v19  ;;  %9815 = vst [vmem:[#allocation170_spill] sm:$0xff] %v6412_v5  ;;  %v6419_v19 = vld [vmem:[%s8728_s2 + $0x538] sm:$0xff] }
 0x2c5   :  { %1441 = vmatprep.subr.mxu1 %v6405_v29  ;;  %1558 = vmatpush2.msra.mxu0 %v5537_v39  ;;  %9816 = vst [vmem:[#allocation171_spill] sm:$0xff] %v6419_v19  ;;  %v6426_v39 = vld [vmem:[%s8728_s2 + $0x530] sm:$0xff] }
 0x2c6   :  { %1442 = vmatpush2.msra.mxu1 %v6412_v5  ;;  %1559 = vmatprep.subr.mxu0 %v5544_v47  ;;  %9817 = vst [vmem:[#allocation172_spill] sm:$0xff] %v6426_v39  ;;  %v6433_v47 = vld [vmem:[%s8728_s2 + $0x508] sm:$0xff] }
 0x2c7   :  { %1443 = vmatprep.subr.mxu1 %v6419_v19  ;;  %1560 = vmatpush2.msra.mxu0 %v5551_v61  ;;  %9818 = vst [vmem:[#allocation173_spill] sm:$0xff] %v6433_v47  ;;  %v6440_v61 = vld [vmem:[%s8728_s2 + $0x500] sm:$0xff] }
 0x2c8   :  { %1444 = vmatpush2.msra.mxu1 %v6426_v39  ;;  %1561 = vmatprep.subr.mxu0 %v5558_v34  ;;  %9819 = vst [vmem:[#allocation174_spill] sm:$0xff] %v6440_v61  ;;  %v6447_v34 = vld [vmem:[%s8728_s2 + $0x4d8] sm:$0xff]  ;;  %v9922_v39 = vld [vmem:[#allocation15_spill] sm:$0xff] }
 0x2c9   :  { %1445 = vmatprep.subr.mxu1 %v6433_v47  ;;  %1562 = vmatpush2.msra.mxu0 %v5565_v35  ;;  %9820 = vst [vmem:[#allocation175_spill] sm:$0xff] %v6447_v34  ;;  %v6454_v35 = vld [vmem:[%s8728_s2 + $0x4d0] sm:$0xff]  ;;  %v336_v19 = vadd.f32 %v9922_v39, %v5234_v15 }
 0x2ca   :  { %1446 = vmatpush2.msra.mxu1 %v6440_v61  ;;  %1563 = vmatprep.subr.mxu0 %v5572_v36  ;;  %9821 = vst [vmem:[#allocation176_spill] sm:$0xff] %v6454_v35  ;;  %v6461_v36 = vld [vmem:[%s8728_s2 + $0x4a8] sm:$0xff] }
 0x2cb   :  { %1447 = vmatprep.subr.mxu1 %v6447_v34  ;;  %1564 = vmatpush2.msra.mxu0 %v5579_v38  ;;  %9822 = vst [vmem:[#allocation177_spill] sm:$0xff] %v6461_v36  ;;  %v6468_v38 = vld [vmem:[%s8728_s2 + $0x4a0] sm:$0xff]  ;;  %v9862_v34 = vld [vmem:[#allocation101_spill] sm:$0xff] }
 0x2cc   :  { %1448 = vmatpush2.msra.mxu1 %v6454_v35  ;;  %1565 = vmatprep.subr.mxu0 %v5586_v41  ;;  %9823 = vst [vmem:[#allocation178_spill] sm:$0xff] %v6468_v38  ;;  %v6475_v41 = vld [vmem:[%s8728_s2 + $0x478] sm:$0xff]  ;;  %v9859_v35 = vld [vmem:[#allocation96_spill] sm:$0xff] }
 0x2cd   :  { %1449 = vmatprep.subr.mxu1 %v6461_v36  ;;  %1566 = vmatpush2.msra.mxu0 %v5593_v42  ;;  %9824 = vst [vmem:[#allocation179_spill] sm:$0xff] %v6475_v41  ;;  %v6482_v42 = vld [vmem:[%s8728_s2 + $0x470] sm:$0xff]  ;;  %v9858_v36 = vld [vmem:[#allocation94_spill] sm:$0xff] }
 0x2ce   :  { %1450 = vmatpush2.msra.mxu1 %v6468_v38  ;;  %1567 = vmatprep.subr.mxu0 %v5600_v44  ;;  %9825 = vst [vmem:[#allocation180_spill] sm:$0xff] %v6482_v42  ;;  %v6489_v44 = vld [vmem:[%s8728_s2 + $0x448] sm:$0xff] }
 0x2cf   :  { %1451 = vmatprep.subr.mxu1 %v6475_v41  ;;  %1568 = vmatpush2.msra.mxu0 %v5607_v46  ;;  %9826 = vst [vmem:[#allocation181_spill] sm:$0xff] %v6489_v44  ;;  %v6496_v46 = vld [vmem:[%s8728_s2 + $0x440] sm:$0xff]  ;;  %v9857_v38 = vld [vmem:[#allocation92_spill] sm:$0xff] }
 0x2d0   :  { %1452 = vmatpush2.msra.mxu1 %v6482_v42  ;;  %1569 = vmatprep.subr.mxu0 %v5614_v48  ;;  %9827 = vst [vmem:[#allocation182_spill] sm:$0xff] %v6496_v46  ;;  %v6503_v48 = vld [vmem:[%s8728_s2 + $0x418] sm:$0xff]  ;;  %v9829_v42 = vld [vmem:[#allocation63_spill] sm:$0xff] }
 0x2d1   :  { %1453 = vmatprep.subr.mxu1 %v6489_v44  ;;  %1570 = vmatpush2.msra.mxu0 %v5621_v49  ;;  %9828 = vst [vmem:[#allocation183_spill] sm:$0xff] %v6503_v48  ;;  %v6510_v49 = vld [vmem:[%s8728_s2 + $0x410] sm:$0xff]  ;;  %v9831_v44 = vld [vmem:[#allocation64_spill] sm:$0xff]  ;;  %v9854_v41 = vld [vmem:[#allocation87_spill] sm:$0xff] }
 0x2d2   :  { %1454 = vmatpush2.msra.mxu1 %v6496_v46  ;;  %1571 = vmatprep.subr.mxu0 %v5628_v51  ;;  %9830 = vst [vmem:[#allocation184_spill] sm:$0xff] %v6510_v49  ;;  %v6517_v51 = vld [vmem:[%s8728_s2 + $0x3e8] sm:$0xff]  ;;  %v9833_v46 = vld [vmem:[#allocation66_spill] sm:$0xff] }
 0x2d3   :  { %1455 = vmatprep.subr.mxu1 %v6503_v48  ;;  %1572 = vmatpush2.msra.mxu0 %v9829_v42  ;;  %9832 = vst [vmem:[#allocation185_spill] sm:$0xff] %v6517_v51  ;;  %v6524_v42 = vld [vmem:[%s8728_s2 + $0x3e0] sm:$0xff]  ;;  %v9835_v48 = vld [vmem:[#allocation68_spill] sm:$0xff] }
 0x2d4   :  { %1456 = vmatpush2.msra.mxu1 %v6510_v49  ;;  %1573 = vmatprep.subr.mxu0 %v9831_v44  ;;  %9834 = vst [vmem:[#allocation186_spill] sm:$0xff] %v6524_v42  ;;  %v6531_v44 = vld [vmem:[%s8728_s2 + $0x3b8] sm:$0xff] }
 0x2d5   :  { %1457 = vmatprep.subr.mxu1 %v6517_v51  ;;  %1574 = vmatpush2.msra.mxu0 %v9833_v46  ;;  %9836 = vst [vmem:[#allocation187_spill] sm:$0xff] %v6531_v44  ;;  %v9837_v49 = vld [vmem:[#allocation70_spill] sm:$0xff]  ;;  %v6538_v46 = vld [vmem:[%s8728_s2 + $0x3b0] sm:$0xff]  ;;  %v9839_v51 = vld [vmem:[#allocation71_spill] sm:$0xff] }
 0x2d6   :  { %1458 = vmatpush2.msra.mxu1 %v6524_v42  ;;  %1575 = vmatprep.subr.mxu0 %v9835_v48  ;;  %9838 = vst [vmem:[#allocation188_spill] sm:$0xff] %v6538_v46  ;;  %v6545_v48 = vld [vmem:[%s8728_s2 + $0x388] sm:$0xff]  ;;  %v9841_v42 = vld [vmem:[#allocation73_spill] sm:$0xff] }
 0x2d7   :  { %1459 = vmatprep.subr.mxu1 %v6531_v44  ;;  %1576 = vmatpush2.msra.mxu0 %v9837_v49  ;;  %9840 = vst [vmem:[#allocation189_spill] sm:$0xff] %v6545_v48  ;;  %v6552_v49 = vld [vmem:[%s8728_s2 + $0x380] sm:$0xff] }
 0x2d8   :  { %1460 = vmatpush2.msra.mxu1 %v6538_v46  ;;  %1577 = vmatprep.subr.mxu0 %v9839_v51  ;;  %9842 = vst [vmem:[#allocation190_spill] sm:$0xff] %v6552_v49  ;;  %v9843_v44 = vld [vmem:[#allocation75_spill] sm:$0xff]  ;;  %v6559_v51 = vld [vmem:[%s8728_s2 + $0x358] sm:$0xff]  ;;  %v9845_v46 = vld [vmem:[#allocation77_spill] sm:$0xff] }
 0x2d9   :  { %1461 = vmatprep.subr.mxu1 %v6545_v48  ;;  %1578 = vmatpush2.msra.mxu0 %v9841_v42  ;;  %9844 = vst [vmem:[#allocation191_spill] sm:$0xff] %v6559_v51  ;;  %v6566_v42 = vld [vmem:[%s8728_s2 + $0x350] sm:$0xff]  ;;  %v9847_v48 = vld [vmem:[#allocation78_spill] sm:$0xff] }
 0x2da   :  { %1462 = vmatpush2.msra.mxu1 %v6552_v49  ;;  %1579 = vmatprep.subr.mxu0 %v9843_v44  ;;  %9846 = vst [vmem:[#allocation192_spill] sm:$0xff] %v6566_v42  ;;  %v6573_v44 = vld [vmem:[%s8728_s2 + $0x328] sm:$0xff] }
 0x2db   :  { %1463 = vmatprep.subr.mxu1 %v6559_v51  ;;  %1580 = vmatpush2.msra.mxu0 %v9845_v46  ;;  %9848 = vst [vmem:[#allocation193_spill] sm:$0xff] %v6573_v44  ;;  %v9849_v49 = vld [vmem:[#allocation80_spill] sm:$0xff]  ;;  %v6580_v46 = vld [vmem:[%s8728_s2 + $0x320] sm:$0xff]  ;;  %v9851_v51 = vld [vmem:[#allocation82_spill] sm:$0xff] }
 0x2dc   :  { %1464 = vmatpush2.msra.mxu1 %v6566_v42  ;;  %1581 = vmatprep.subr.mxu0 %v9847_v48  ;;  %9850 = vst [vmem:[#allocation194_spill] sm:$0xff] %v6580_v46  ;;  %v9852_v48 = vld [vmem:[#allocation84_spill] sm:$0xff]  ;;  %v9853_v42 = vld [vmem:[#allocation85_spill] sm:$0xff] }
 0x2dd   :  { %1465 = vmatprep.subr.mxu1 %v6573_v44  ;;  %1582 = vmatpush2.msra.mxu0 %v9849_v49  ;;  %v9855_v44 = vld [vmem:[#allocation89_spill] sm:$0xff]  ;;  %v9856_v49 = vld [vmem:[#allocation91_spill] sm:$0xff] }
 0x2de   :  { %1466 = vmatpush2.msra.mxu1 %v6580_v46  ;;  %1583 = vmatprep.subr.mxu0 %v9851_v51  ;;  %v9860_v46 = vld [vmem:[#allocation98_spill] sm:$0xff]  ;;  %v9861_v51 = vld [vmem:[#allocation100_spill] sm:$0xff] }
 0x2df   :  { %1468 = vmatmul.mubr.f32.vlgmr.msra.gmra.mxu1 %v6127_v60  ;;  %1592 = vmatprep.subr.mxu1 %v9852_v48  ;;  %v9863_v48 = vld [vmem:[#allocation102_spill] sm:$0xff] }
 0x2e0   :  { %1593 = vmatpush1.msra.mxu1 %v9853_v42  ;;  %1584 = vmatpush2.msra.mxu0 %v9854_v41  ;;  %v9864_v42 = vld [vmem:[#allocation103_spill] sm:$0xff]  ;;  %v9865_v41 = vld [vmem:[#allocation104_spill] sm:$0xff] }
 0x2e1   :  { %1594 = vmatprep.subr.mxu1 %v9855_v44  ;;  %1663 = vmatprep.subr.mxu0 %v9856_v49  ;;  %v9866_v44 = vld [vmem:[#allocation105_spill] sm:$0xff]  ;;  %v9867_v49 = vld [vmem:[#allocation106_spill] sm:$0xff] }
 0x2e2   :  { %1595 = vmatpush1.msra.mxu1 %v9857_v38  ;;  %v9868_v38 = vld [vmem:[#allocation107_spill] sm:$0xff] }
 0x2e3   :  { %1596 = vmatprep.subr.mxu1 %v9858_v36  ;;  %v9869_v36 = vld [vmem:[#allocation108_spill] sm:$0xff] }
 0x2e4   :  { %1597 = vmatpush1.msra.mxu1 %v9859_v35  ;;  %v9870_v35 = vld [vmem:[#allocation109_spill] sm:$0xff] }
 0x2e5   :  { %1598 = vmatprep.subr.mxu1 %v9860_v46  ;;  %v9871_v46 = vld [vmem:[#allocation110_spill] sm:$0xff] }
 0x2e6   :  { %1599 = vmatpush1.msra.mxu1 %v9861_v51  ;;  %v9872_v51 = vld [vmem:[#allocation111_spill] sm:$0xff] }
 0x2e7   :  { %1600 = vmatprep.subr.mxu1 %v9862_v34  ;;  %v9873_v34 = vld [vmem:[#allocation112_spill] sm:$0xff] }
 0x2e8   :  { %1601 = vmatpush1.msra.mxu1 %v9863_v48  ;;  %v9874_v48 = vld [vmem:[#allocation113_spill] sm:$0xff] }
 0x2e9   :  { %1602 = vmatprep.subr.mxu1 %v9864_v42  ;;  %v9875_v42 = vld [vmem:[#allocation114_spill] sm:$0xff] }
 0x2ea   :  { %1603 = vmatpush1.msra.mxu1 %v9865_v41  ;;  %v9876_v41 = vld [vmem:[#allocation115_spill] sm:$0xff] }
 0x2eb   :  { %1604 = vmatprep.subr.mxu1 %v9866_v44  ;;  %v9877_v44 = vld [vmem:[#allocation116_spill] sm:$0xff] }
 0x2ec   :  { %1605 = vmatpush1.msra.mxu1 %v9867_v49  ;;  %v9878_v49 = vld [vmem:[#allocation117_spill] sm:$0xff] }
 0x2ed   :  { %1606 = vmatprep.subr.mxu1 %v9868_v38  ;;  %v9879_v38 = vld [vmem:[#allocation118_spill] sm:$0xff] }
 0x2ee   :  { %1607 = vmatpush1.msra.mxu1 %v9869_v36  ;;  %v9880_v36 = vld [vmem:[#allocation119_spill] sm:$0xff] }
 0x2ef   :  { %1608 = vmatprep.subr.mxu1 %v9870_v35  ;;  %v9881_v35 = vld [vmem:[#allocation120_spill] sm:$0xff] }
 0x2f0   :  { %1609 = vmatpush1.msra.mxu1 %v9871_v46  ;;  %v9882_v46 = vld [vmem:[#allocation121_spill] sm:$0xff] }
 0x2f1   :  { %1610 = vmatprep.subr.mxu1 %v9872_v51  ;;  %v9883_v51 = vld [vmem:[#allocation122_spill] sm:$0xff] }
 0x2f2   :  { %1611 = vmatpush1.msra.mxu1 %v9873_v34  ;;  %v9884_v34 = vld [vmem:[#allocation123_spill] sm:$0xff] }
 0x2f3   :  { %1612 = vmatprep.subr.mxu1 %v9874_v48  ;;  %v9885_v48 = vld [vmem:[#allocation124_spill] sm:$0xff] }
 0x2f4   :  { %1613 = vmatpush1.msra.mxu1 %v9875_v42  ;;  %v9886_v42 = vld [vmem:[#allocation125_spill] sm:$0xff] }
 0x2f5   :  { %1614 = vmatprep.subr.mxu1 %v9876_v41  ;;  %v9887_v41 = vld [vmem:[#allocation126_spill] sm:$0xff] }
 0x2f6   :  { %1615 = vmatpush1.msra.mxu1 %v9877_v44  ;;  %v9888_v44 = vld [vmem:[#allocation127_spill] sm:$0xff] }
 0x2f7   :  { %1616 = vmatprep.subr.mxu1 %v9878_v49  ;;  %v9889_v49 = vld [vmem:[#allocation128_spill] sm:$0xff] }
 0x2f8   :  { %1617 = vmatpush1.msra.mxu1 %v9879_v38  ;;  %v9890_v38 = vld [vmem:[#allocation129_spill] sm:$0xff] }
 0x2f9   :  { %1618 = vmatprep.subr.mxu1 %v9880_v36  ;;  %v9891_v36 = vld [vmem:[#allocation130_spill] sm:$0xff] }
 0x2fa   :  { %1619 = vmatpush1.msra.mxu1 %v9881_v35  ;;  %v9892_v35 = vld [vmem:[#allocation131_spill] sm:$0xff] }
 0x2fb   :  { %1620 = vmatprep.subr.mxu1 %v9882_v46  ;;  %v9893_v46 = vld [vmem:[#allocation132_spill] sm:$0xff] }
 0x2fc   :  { %1621 = vmatpush1.msra.mxu1 %v9883_v51  ;;  %v9894_v51 = vld [vmem:[#allocation133_spill] sm:$0xff] }
 0x2fd   :  { %1622 = vmatprep.subr.mxu1 %v9884_v34  ;;  %v9895_v34 = vld [vmem:[#allocation134_spill] sm:$0xff] }
 0x2fe   :  { %1623 = vmatpush1.msra.mxu1 %v9885_v48  ;;  %v9896_v48 = vld [vmem:[#allocation135_spill] sm:$0xff] }
 0x2ff   :  { %1624 = vmatprep.subr.mxu1 %v9886_v42  ;;  %v9897_v42 = vld [vmem:[#allocation136_spill] sm:$0xff] }
 0x300   :  { %1625 = vmatpush2.msra.mxu1 %v9887_v41  ;;  %v9898_v41 = vld [vmem:[#allocation137_spill] sm:$0xff] }
 0x301   :  { %1626 = vmatprep.subr.mxu1 %v9888_v44  ;;  %v9899_v44 = vld [vmem:[#allocation138_spill] sm:$0xff] }
 0x302   :  { %1627 = vmatpush2.msra.mxu1 %v9889_v49  ;;  %v9900_v49 = vld [vmem:[#allocation139_spill] sm:$0xff] }
 0x303   :  { %1628 = vmatprep.subr.mxu1 %v9890_v38  ;;  %v9901_v38 = vld [vmem:[#allocation140_spill] sm:$0xff] }
 0x304   :  { %1629 = vmatpush2.msra.mxu1 %v9891_v36  ;;  %v9902_v36 = vld [vmem:[#allocation141_spill] sm:$0xff] }
 0x305   :  { %1630 = vmatprep.subr.mxu1 %v9892_v35  ;;  %v9903_v35 = vld [vmem:[#allocation142_spill] sm:$0xff] }
 0x306   :  { %1631 = vmatpush2.msra.mxu1 %v9893_v46  ;;  %v9904_v46 = vld [vmem:[#allocation143_spill] sm:$0xff] }
 0x307   :  { %1632 = vmatprep.subr.mxu1 %v9894_v51  ;;  %v9905_v51 = vld [vmem:[#allocation144_spill] sm:$0xff] }
 0x308   :  { %1633 = vmatpush2.msra.mxu1 %v9895_v34  ;;  %v9906_v34 = vld [vmem:[#allocation145_spill] sm:$0xff] }
 0x309   :  { %1634 = vmatprep.subr.mxu1 %v9896_v48  ;;  %v9907_v48 = vld [vmem:[#allocation146_spill] sm:$0xff] }
 0x30a   :  { %1635 = vmatpush2.msra.mxu1 %v9897_v42  ;;  %v9908_v42 = vld [vmem:[#allocation147_spill] sm:$0xff] }
 0x30b   :  { %1636 = vmatprep.subr.mxu1 %v9898_v41  ;;  %v9909_v41 = vld [vmem:[#allocation148_spill] sm:$0xff] }
 0x30c   :  { %1637 = vmatpush2.msra.mxu1 %v9899_v44  ;;  %v9910_v44 = vld [vmem:[#allocation149_spill] sm:$0xff] }
 0x30d   :  { %1638 = vmatprep.subr.mxu1 %v9900_v49  ;;  %v9911_v49 = vld [vmem:[#allocation150_spill] sm:$0xff] }
 0x30e   :  { %1639 = vmatpush2.msra.mxu1 %v9901_v38  ;;  %v9912_v38 = vld [vmem:[#allocation151_spill] sm:$0xff] }
 0x30f   :  { %1640 = vmatprep.subr.mxu1 %v9902_v36  ;;  %v9913_v36 = vld [vmem:[#allocation152_spill] sm:$0xff] }
 0x310   :  { %1641 = vmatpush2.msra.mxu1 %v9903_v35  ;;  %v9914_v35 = vld [vmem:[#allocation153_spill] sm:$0xff] }
 0x311   :  { %1642 = vmatprep.subr.mxu1 %v9904_v46  ;;  %v9915_v46 = vld [vmem:[#allocation154_spill] sm:$0xff] }
 0x312   :  { %1643 = vmatpush2.msra.mxu1 %v9905_v51  ;;  %v9916_v51 = vld [vmem:[#allocation155_spill] sm:$0xff] }
 0x313   :  { %1644 = vmatprep.subr.mxu1 %v9906_v34  ;;  %v9917_v34 = vld [vmem:[#allocation156_spill] sm:$0xff] }
 0x314   :  { %1645 = vmatpush2.msra.mxu1 %v9907_v48 }
 0x315   :  { %1646 = vmatprep.subr.mxu1 %v9908_v42 }
 0x316   :  { %1647 = vmatpush2.msra.mxu1 %v9909_v41  ;;  %v6654_v41 = vld [vmem:[%s8728_s2 + $0x2d8] sm:$0xff] }
 0x317   :  { %1648 = vmatprep.subr.mxu1 %v9910_v44  ;;  %9918 = vst [vmem:[#allocation195_spill] sm:$0xff] %v6654_v41 }
 0x318   :  { %1649 = vmatpush2.msra.mxu1 %v9911_v49 }
 0x319   :  { %1650 = vmatprep.subr.mxu1 %v9912_v38  ;;  %v9919_v38 = vld [vmem:[#allocation4_spill] sm:$0xff] }
 0x31a   :  { %1651 = vmatpush2.msra.mxu1 %v9913_v36  ;;  %v9920_v36 = vld [vmem:[#allocation3_spill] sm:$0xff] }
 0x31b   :  { %1652 = vmatprep.subr.mxu1 %v9914_v35 }
 0x31c   :  { %1653 = vmatpush2.msra.mxu1 %v9915_v46 }
 0x31d   :  { %1654 = vmatprep.subr.mxu1 %v9916_v51 }
 0x31e   :  { %1655 = vmatpush2.msra.mxu1 %v9917_v34  ;;  %v9921_v34 = vld [vmem:[#allocation17_spill] sm:$0xff] }
 0x31f   :  { %1781 = vmatprep.subr.mxu1 %v6654_v41  ;;  %v334_v46 = vadd.f32 %v9921_v34, %v5231_v43 }
 0x35f   :  { %v1327_v49 = vpop.f32.mrf.mxu1  ;;  %v1398_v51 = vpop.f32.mrf.mxu0 }
 0x360   :  { %v1474_v42 = vadd.f32 %v1327_v49, %v9919_v38  ;;  %v1476_v5 = vadd.f32 %v1398_v51, %v334_v46  ;;  %v9924_v46 = vld [vmem:[#allocation40_spill] sm:$0xff] }
 0x361   :  { %v1329_v44 = vpop.f32.mrf.mxu1  ;;  %v1400_v47 = vpop.f32.mrf.mxu0 }
 0x362   :  { %v1475_v48 = vadd.f32 %v1329_v44, %v9920_v36  ;;  %v1478_v35 = vmul.f32 0.5, %v1474_v42  ;;  %v1477_v29 = vadd.f32 %v1400_v47, %v336_v19  ;;  %v1480_v52 = vmul.f32 0.5, %v1476_v5  ;;  %v9923_v44 = vld [vmem:[#allocation21_spill] sm:$0xff]  ;;  %v9925_v19 = vld [vmem:[#allocation23_spill] sm:$0xff] }
 0x363   :  { %v447_v34 = vadd.f32 %v9923_v44, %v5248_v21  ;;  %v449_v5 = vadd.f32 %v9925_v19, %v5255_v28 }
 0x364   :  { %v1479_v61 = vmul.f32 0.5, %v1475_v48  ;;  %3040 = vtanh.f32 %v1478_v35  ;;  %v1481_v49 = vmul.f32 0.5, %v1477_v29 }
 0x366   :  { %3042 = vtanh.f32 %v1479_v61 }
 0x367   :  { %3044 = vtanh.f32 %v1480_v52 }
 0x368   :  { %3046 = vtanh.f32 %v1481_v49 }
 0x371   :  { %v3041_v41 = vpop.eup %3040 }
 0x372   :  { %v1486_v38 = vmul.f32 0.5, %v3041_v41 }
 0x373   :  { %v3043_v32 = vpop.eup %3042 }
 0x374   :  { %v1487_v36 = vmul.f32 0.5, %v3043_v32  ;;  %v1490_v35 = vadd.f32 0.5, %v1486_v38  ;;  %v3045_v52 = vpop.eup %3044 }
 0x375   :  { %v3047_v41 = vpop.eup %3046  ;;  %v1488_v38 = vmul.f32 0.5, %v3045_v52  ;;  %v9951_v52 = vld [vmem:[#allocation62_spill] sm:$0xff] }
 0x376   :  { %v1491_v39 = vadd.f32 0.5, %v1487_v36 }
 0x377   :  { %v1492_v44 = vadd.f32 0.5, %v1488_v38  ;;  %v9953_v38 = vld [vmem:[#allocation67_spill] sm:$0xff] }
 0x39f   :  { %v1469_v42 = vpop.f32.mrf.mxu1 }
 0x3a0   :  { %v1494_v61 = vadd.f32 %v1469_v42, %v5245_v16  ;;  %v1489_v42 = vmul.f32 0.5, %v3047_v41  ;;  %v9952_v41 = vld [vmem:[#allocation65_spill] sm:$0xff] }
 0x3a1   :  { %v1471_v48 = vpop.f32.mrf.mxu1 }
 0x3a2   :  { %v1496_v43 = vmul.f32 %v1494_v61, %v1490_v35  ;;  %v1495_v51 = vadd.f32 %v1471_v48, %v9924_v46  ;;  %v1493_v36 = vadd.f32 0.5, %v1489_v42  ;;  %v9954_v42 = vld [vmem:[#allocation69_spill] sm:$0xff] }
 0x3a4   :  { %v1498_v47 = vadd.f32 %v1496_v43, %v447_v34  ;;  %v1497_v29 = vmul.f32 %v1495_v51, %v1491_v39  ;;  %v9943_v34 = vld [vmem:[#allocation49_spill] sm:$0xff]  ;;  %v9946_v51 = vld [vmem:[#allocation166_spill] sm:$0xff] }
 0x3a5   :  { %v9944_v39 = vld [vmem:[#allocation165_spill] sm:$0xff] }
 0x3a6   :  { %3048 = vtanh.f32 %v1498_v47  ;;  %v1499_v32 = vadd.f32 %v1497_v29, %v449_v5  ;;  %v9947_v5 = vld [vmem:[#allocation52_spill] sm:$0xff]  ;;  %v9948_v47 = vld [vmem:[#allocation55_spill] sm:$0xff]  ;;  %v9949_v29 = vld [vmem:[#allocation58_spill] sm:$0xff] }
 0x3a8   :  { %3050 = vtanh.f32 %v1499_v32  ;;  %v9950_v32 = vld [vmem:[#allocation60_spill] sm:$0xff] }
 0x3b3   :  { %v3049_v16 = vpop.eup %3048 }
 0x3b4   :  { %v1502_v49 = vsub.f32 %v6127_v60, %v3049_v16  ;;  %v9941_v60 = vld [vmem:[#allocation51_spill] sm:$0xff] }
 0x3b5   :  { %v3051_v35 = vpop.eup %3050 }
 0x3b6   :  { %v1503_v61 = vsub.f32 %v6129_v31, %v3051_v35  ;;  %v1504_v48 = vmul.f32 %v1502_v49, %v1492_v44  ;;  %v9942_v31 = vld [vmem:[#allocation164_spill] sm:$0xff]  ;;  %v9956_v49 = vld [vmem:[#allocation74_spill] sm:$0xff] }
 0x3b7   :  { %v9955_v44 = vld [vmem:[#allocation72_spill] sm:$0xff] }
 0x3b8   :  { %v1505_v46 = vmul.f32 %v1503_v61, %v1493_v36  ;;  %v6671_v19 = vadd.f32 %v3049_v16, %v1504_v48  ;;  %v9926_v16 = vld [vmem:[#allocation19_spill] sm:$0xff]  ;;  %v9958_v36 = vld [vmem:[#allocation76_spill] sm:$0xff] }
 0x3b9   :  { %v9959_v61 = vld [vmem:[#allocation168_spill] sm:$0xff]  ;;  %v9960_v48 = vld [vmem:[#allocation79_spill] sm:$0xff] }
 0x3ba   :  { %v6673_v43 = vadd.f32 %v3051_v35, %v1505_v46  ;;  %2968 = vst [vmem:[%s8731_s7 + $0x10] sm:$0xff] %v6671_v19  ;;  %v9945_v46 = vld [vmem:[#allocation53_spill] sm:$0xff]  ;;  %v9957_v35 = vld [vmem:[#allocation167_spill] sm:$0xff] }
 0x3bc   :  { %1585 = vmatprep.mubr.f32.mxu0 %v6673_v43  ;;  %1656 = vmatprep.mubr.f32.mxu1 %v6673_v43  ;;  %2969 = vst [vmem:[%s8732_s8 + $0x28] sm:$0xff] %v6673_v43 }
 0x3bd   :  { %1586 = vmatmul.mubr.f32.vlgmr.msra.gmra.mxu0 %v6671_v19  ;;  %1657 = vmatmul.mubr.f32.vlgmr.msra.gmra.mxu1 %v6671_v19 }
 0x3be   :  { %1664 = vmatpush1.msra.mxu0 %v6146_v30  ;;  %1727 = vmatprep.mubr.f32.mxu0 %v6673_v43 }
 0x3bf   :  { %1665 = vmatprep.subr.mxu0 %v6153_v40  ;;  %1782 = vmatpush1.msra.mxu1 %v5285_v26  ;;  %v9927_v26 = vld [vmem:[#allocation43_spill] sm:$0xff] }
 0x3c0   :  { %1666 = vmatpush1.msra.mxu0 %v6160_v10  ;;  %1783 = vmatprep.subr.mxu1 %v5292_v22  ;;  %v9928_v22 = vld [vmem:[#allocation157_spill] sm:$0xff] }
 0x3c1   :  { %1667 = vmatprep.subr.mxu0 %v6167_v7  ;;  %1784 = vmatpush1.msra.mxu1 %v5299_v8  ;;  %v9929_v8 = vld [vmem:[#allocation45_spill] sm:$0xff] }
 0x3c2   :  { %1668 = vmatpush1.msra.mxu0 %v6174_v33  ;;  %1785 = vmatprep.subr.mxu1 %v5306_v2  ;;  %v9930_v2 = vld [vmem:[#allocation158_spill] sm:$0xff] }
 0x3c3   :  { %1669 = vmatprep.subr.mxu0 %v6181_v62  ;;  %1786 = vmatpush1.msra.mxu1 %v5313_v18  ;;  %v9931_v18 = vld [vmem:[#allocation44_spill] sm:$0xff] }
 0x3c4   :  { %1670 = vmatpush1.msra.mxu0 %v6188_v58  ;;  %1787 = vmatprep.subr.mxu1 %v5320_v50  ;;  %v9932_v50 = vld [vmem:[#allocation159_spill] sm:$0xff] }
 0x3c5   :  { %1671 = vmatprep.subr.mxu0 %v6195_v11  ;;  %1788 = vmatpush1.msra.mxu1 %v5327_v59  ;;  %v9933_v59 = vld [vmem:[#allocation47_spill] sm:$0xff] }
 0x3c6   :  { %1672 = vmatpush1.msra.mxu0 %v6202_v56  ;;  %1789 = vmatprep.subr.mxu1 %v5334_v54  ;;  %v9934_v54 = vld [vmem:[#allocation160_spill] sm:$0xff] }
 0x3c7   :  { %1673 = vmatprep.subr.mxu0 %v6209_v55  ;;  %1790 = vmatpush1.msra.mxu1 %v5341_v0  ;;  %v9935_v0 = vld [vmem:[#allocation46_spill] sm:$0xff] }
 0x3c8   :  { %1674 = vmatpush1.msra.mxu0 %v6216_v53  ;;  %1791 = vmatprep.subr.mxu1 %v5348_v20  ;;  %v9936_v20 = vld [vmem:[#allocation161_spill] sm:$0xff] }
 0x3c9   :  { %1675 = vmatprep.subr.mxu0 %v6223_v13  ;;  %1792 = vmatpush1.msra.mxu1 %v5355_v17  ;;  %v9937_v17 = vld [vmem:[#allocation50_spill] sm:$0xff] }
 0x3ca   :  { %1676 = vmatpush1.msra.mxu0 %v6230_v45  ;;  %1793 = vmatprep.subr.mxu1 %v5362_v12  ;;  %v9938_v12 = vld [vmem:[#allocation162_spill] sm:$0xff] }
 0x3cb   :  { %1677 = vmatprep.subr.mxu0 %v6237_v57  ;;  %1794 = vmatpush1.msra.mxu1 %v5369_v24  ;;  %v9939_v24 = vld [vmem:[#allocation48_spill] sm:$0xff] }
 0x3cc   :  { %1678 = vmatpush1.msra.mxu0 %v6244_v6  ;;  %1795 = vmatprep.subr.mxu1 %v5376_v3  ;;  %v9940_v3 = vld [vmem:[#allocation163_spill] sm:$0xff] }
 0x3cd   :  { %1679 = vmatprep.subr.mxu0 %v9926_v16  ;;  %1796 = vmatpush1.msra.mxu1 %v9927_v26  ;;  %v9961_v26 = vld [vmem:[#allocation169_spill] sm:$0xff] }
 0x3ce   :  { %1680 = vmatpush1.msra.mxu0 %v9928_v22  ;;  %1797 = vmatprep.subr.mxu1 %v9929_v8  ;;  %v9962_v8 = vld [vmem:[#allocation81_spill] sm:$0xff] }
 0x3cf   :  { %1681 = vmatprep.subr.mxu0 %v9930_v2  ;;  %1798 = vmatpush1.msra.mxu1 %v9931_v18  ;;  %v9963_v18 = vld [vmem:[#allocation170_spill] sm:$0xff] }
 0x3d0   :  { %1682 = vmatpush1.msra.mxu0 %v9932_v50  ;;  %1799 = vmatprep.subr.mxu1 %v9933_v59  ;;  %v9964_v59 = vld [vmem:[#allocation83_spill] sm:$0xff] }
 0x3d1   :  { %1683 = vmatprep.subr.mxu0 %v9934_v54  ;;  %1800 = vmatpush1.msra.mxu1 %v9935_v0  ;;  %v9965_v0 = vld [vmem:[#allocation171_spill] sm:$0xff] }
 0x3d2   :  { %1684 = vmatpush1.msra.mxu0 %v9936_v20  ;;  %1801 = vmatprep.subr.mxu1 %v9937_v17  ;;  %v9966_v17 = vld [vmem:[#allocation86_spill] sm:$0xff] }
 0x3d3   :  { %1685 = vmatprep.subr.mxu0 %v9938_v12  ;;  %1802 = vmatpush1.msra.mxu1 %v9939_v24  ;;  %v9967_v24 = vld [vmem:[#allocation172_spill] sm:$0xff] }
 0x3d4   :  { %1686 = vmatpush1.msra.mxu0 %v9940_v3  ;;  %1803 = vmatprep.subr.mxu1 %v9941_v60  ;;  %v9968_v60 = vld [vmem:[#allocation88_spill] sm:$0xff] }
 0x3d5   :  { %1687 = vmatprep.subr.mxu0 %v9942_v31  ;;  %1804 = vmatpush1.msra.mxu1 %v9943_v34  ;;  %v9969_v34 = vld [vmem:[#allocation173_spill] sm:$0xff] }
 0x3d6   :  { %1688 = vmatpush1.msra.mxu0 %v9944_v39  ;;  %1805 = vmatprep.subr.mxu1 %v9945_v46  ;;  %v9970_v46 = vld [vmem:[#allocation90_spill] sm:$0xff] }
 0x3d7   :  { %1689 = vmatprep.subr.mxu0 %v9946_v51  ;;  %1806 = vmatpush1.msra.mxu1 %v9947_v5  ;;  %v9971_v5 = vld [vmem:[#allocation174_spill] sm:$0xff] }
 0x3d8   :  { %1690 = vmatpush1.msra.mxu0 %v6328_v4  ;;  %1807 = vmatprep.subr.mxu1 %v9948_v47  ;;  %v9972_v47 = vld [vmem:[#allocation93_spill] sm:$0xff] }
 0x3d9   :  { %1691 = vmatprep.subr.mxu0 %v6335_v25  ;;  %1808 = vmatpush1.msra.mxu1 %v9949_v29  ;;  %v9973_v29 = vld [vmem:[#allocation175_spill] sm:$0xff] }
 0x3da   :  { %1692 = vmatpush1.msra.mxu0 %v6342_v1  ;;  %1809 = vmatprep.subr.mxu1 %v9950_v32  ;;  %v9974_v32 = vld [vmem:[#allocation95_spill] sm:$0xff] }
 0x3db   :  { %1693 = vmatprep.subr.mxu0 %v6349_v63  ;;  %1810 = vmatpush1.msra.mxu1 %v9951_v52  ;;  %v9975_v52 = vld [vmem:[#allocation176_spill] sm:$0xff] }
 0x3dc   :  { %1694 = vmatpush1.msra.mxu0 %v6356_v9  ;;  %1811 = vmatprep.subr.mxu1 %v9952_v41  ;;  %v9976_v41 = vld [vmem:[#allocation97_spill] sm:$0xff] }
 0x3dd   :  { %1695 = vmatprep.subr.mxu0 %v6363_v14  ;;  %1812 = vmatpush1.msra.mxu1 %v9953_v38  ;;  %v9977_v38 = vld [vmem:[#allocation177_spill] sm:$0xff] }
 0x3de   :  { %1696 = vmatpush2.msra.mxu0 %v6370_v27  ;;  %1813 = vmatprep.subr.mxu1 %v9954_v42  ;;  %v9978_v42 = vld [vmem:[#allocation99_spill] sm:$0xff] }
 0x3df   :  { %1697 = vmatprep.subr.mxu0 %v6377_v23  ;;  %1814 = vmatpush2.msra.mxu1 %v9955_v44  ;;  %v9979_v44 = vld [vmem:[#allocation178_spill] sm:$0xff] }
 0x3e0   :  { %1698 = vmatpush2.msra.mxu0 %v6384_v37  ;;  %1815 = vmatprep.subr.mxu1 %v9956_v49  ;;  %v9980_v49 = vld [vmem:[#allocation54_spill] sm:$0xff] }
 0x3e1   :  { %1699 = vmatprep.subr.mxu0 %v9957_v35  ;;  %1816 = vmatpush2.msra.mxu1 %v9958_v36  ;;  %v9981_v36 = vld [vmem:[#allocation179_spill] sm:$0xff] }
 0x3e2   :  { %1700 = vmatpush2.msra.mxu0 %v9959_v61  ;;  %1817 = vmatprep.subr.mxu1 %v9960_v48  ;;  %v9982_v48 = vld [vmem:[#allocation56_spill] sm:$0xff] }
 0x3e3   :  { %1701 = vmatprep.subr.mxu0 %v9961_v26  ;;  %1818 = vmatpush2.msra.mxu1 %v9962_v8  ;;  %v9983_v8 = vld [vmem:[#allocation180_spill] sm:$0xff] }
 0x3e4   :  { %1702 = vmatpush2.msra.mxu0 %v9963_v18  ;;  %1819 = vmatprep.subr.mxu1 %v9964_v59  ;;  %v9984_v59 = vld [vmem:[#allocation57_spill] sm:$0xff] }
 0x3e5   :  { %1703 = vmatprep.subr.mxu0 %v9965_v0  ;;  %1820 = vmatpush2.msra.mxu1 %v9966_v17  ;;  %v9985_v17 = vld [vmem:[#allocation181_spill] sm:$0xff] }
 0x3e6   :  { %1704 = vmatpush2.msra.mxu0 %v9967_v24  ;;  %1821 = vmatprep.subr.mxu1 %v9968_v60  ;;  %v9986_v60 = vld [vmem:[#allocation59_spill] sm:$0xff] }
 0x3e7   :  { %1705 = vmatprep.subr.mxu0 %v9969_v34  ;;  %1822 = vmatpush2.msra.mxu1 %v9970_v46  ;;  %v9987_v46 = vld [vmem:[#allocation182_spill] sm:$0xff] }
 0x3e8   :  { %1706 = vmatpush2.msra.mxu0 %v9971_v5  ;;  %1823 = vmatprep.subr.mxu1 %v9972_v47  ;;  %v9988_v47 = vld [vmem:[#allocation61_spill] sm:$0xff] }
 0x3e9   :  { %1707 = vmatprep.subr.mxu0 %v9973_v29  ;;  %1824 = vmatpush2.msra.mxu1 %v9974_v32  ;;  %v9989_v32 = vld [vmem:[#allocation183_spill] sm:$0xff] }
 0x3ea   :  { %1708 = vmatpush2.msra.mxu0 %v9975_v52  ;;  %1825 = vmatprep.subr.mxu1 %v9976_v41  ;;  %v9990_v41 = vld [vmem:[#allocation63_spill] sm:$0xff]  ;;  %v10083_v52 = vld [vmem:[#allocation18_spill] sm:$0xff] }
 0x3eb   :  { %1709 = vmatprep.subr.mxu0 %v9977_v38  ;;  %1826 = vmatpush2.msra.mxu1 %v9978_v42  ;;  %v9991_v42 = vld [vmem:[#allocation184_spill] sm:$0xff] }
 0x3ec   :  { %1710 = vmatpush2.msra.mxu0 %v9979_v44  ;;  %1827 = vmatprep.subr.mxu1 %v9980_v49  ;;  %v9992_v49 = vld [vmem:[#allocation64_spill] sm:$0xff]  ;;  %v10081_v44 = vld [vmem:[#allocation5_spill] sm:$0xff] }
 0x3ed   :  { %1711 = vmatprep.subr.mxu0 %v9981_v36  ;;  %1828 = vmatpush2.msra.mxu1 %v9982_v48  ;;  %v9993_v48 = vld [vmem:[#allocation185_spill] sm:$0xff]  ;;  %v10080_v36 = vld [vmem:[#allocation6_spill] sm:$0xff] }
 0x3ee   :  { %1712 = vmatpush2.msra.mxu0 %v9983_v8  ;;  %1829 = vmatprep.subr.mxu1 %v9984_v59  ;;  %v9994_v8 = vld [vmem:[#allocation66_spill] sm:$0xff] }
 0x3ef   :  { %1713 = vmatprep.subr.mxu0 %v9985_v17  ;;  %1830 = vmatpush2.msra.mxu1 %v9986_v60  ;;  %v9995_v59 = vld [vmem:[#allocation186_spill] sm:$0xff]  ;;  %v9996_v17 = vld [vmem:[#allocation68_spill] sm:$0xff]  ;;  %v9997_v60 = vld [vmem:[#allocation187_spill] sm:$0xff] }
 0x3f0   :  { %1714 = vmatpush2.msra.mxu0 %v9987_v46  ;;  %1831 = vmatprep.subr.mxu1 %v9988_v47  ;;  %v9998_v46 = vld [vmem:[#allocation70_spill] sm:$0xff]  ;;  %v9999_v47 = vld [vmem:[#allocation188_spill] sm:$0xff] }
 0x3f1   :  { %1715 = vmatprep.subr.mxu0 %v9989_v32  ;;  %1832 = vmatpush2.msra.mxu1 %v9990_v41  ;;  %v10000_v32 = vld [vmem:[#allocation71_spill] sm:$0xff]  ;;  %v10001_v41 = vld [vmem:[#allocation189_spill] sm:$0xff] }
 0x3f2   :  { %1716 = vmatpush2.msra.mxu0 %v9991_v42  ;;  %1833 = vmatprep.subr.mxu1 %v9992_v49  ;;  %v10002_v42 = vld [vmem:[#allocation73_spill] sm:$0xff]  ;;  %v10003_v49 = vld [vmem:[#allocation190_spill] sm:$0xff] }
 0x3f3   :  { %1717 = vmatprep.subr.mxu0 %v9993_v48  ;;  %1834 = vmatpush2.msra.mxu1 %v9994_v8  ;;  %v10004_v48 = vld [vmem:[#allocation75_spill] sm:$0xff] }
 0x3f4   :  { %1718 = vmatpush2.msra.mxu0 %v9995_v59  ;;  %1835 = vmatprep.subr.mxu1 %v9996_v17  ;;  %v10005_v8 = vld [vmem:[#allocation191_spill] sm:$0xff]  ;;  %v10006_v59 = vld [vmem:[#allocation77_spill] sm:$0xff]  ;;  %v10007_v17 = vld [vmem:[#allocation192_spill] sm:$0xff] }
 0x3f5   :  { %1719 = vmatprep.subr.mxu0 %v9997_v60  ;;  %1836 = vmatpush2.msra.mxu1 %v9998_v46  ;;  %v10008_v60 = vld [vmem:[#allocation78_spill] sm:$0xff]  ;;  %v10009_v46 = vld [vmem:[#allocation193_spill] sm:$0xff] }
 0x3f6   :  { %1720 = vmatpush2.msra.mxu0 %v9999_v47  ;;  %1837 = vmatprep.subr.mxu1 %v10000_v32  ;;  %v10010_v47 = vld [vmem:[#allocation80_spill] sm:$0xff]  ;;  %v10011_v32 = vld [vmem:[#allocation194_spill] sm:$0xff] }
 0x3f7   :  { %1721 = vmatprep.subr.mxu0 %v10001_v41  ;;  %1838 = vmatpush2.msra.mxu1 %v10002_v42  ;;  %v10012_v41 = vld [vmem:[#allocation82_spill] sm:$0xff]  ;;  %v10013_v42 = vld [vmem:[#allocation84_spill] sm:$0xff] }
 0x3f8   :  { %1722 = vmatpush2.msra.mxu0 %v10003_v49  ;;  %1839 = vmatprep.subr.mxu1 %v10004_v48  ;;  %v10014_v48 = vld [vmem:[#allocation85_spill] sm:$0xff] }
 0x3f9   :  { %1723 = vmatprep.subr.mxu0 %v10005_v8  ;;  %1840 = vmatpush2.msra.mxu1 %v10006_v59  ;;  %v10015_v8 = vld [vmem:[#allocation87_spill] sm:$0xff]  ;;  %v10016_v59 = vld [vmem:[#allocation89_spill] sm:$0xff] }
 0x3fa   :  { %1724 = vmatpush2.msra.mxu0 %v10007_v17  ;;  %1841 = vmatprep.subr.mxu1 %v10008_v60  ;;  %v10017_v17 = vld [vmem:[#allocation91_spill] sm:$0xff]  ;;  %v10018_v60 = vld [vmem:[#allocation92_spill] sm:$0xff]  ;;  %v10023_v49 = vld [vmem:[#allocation101_spill] sm:$0xff] }
 0x3fb   :  { %1725 = vmatprep.subr.mxu0 %v10009_v46  ;;  %1842 = vmatpush2.msra.mxu1 %v10010_v47  ;;  %v10019_v46 = vld [vmem:[#allocation94_spill] sm:$0xff]  ;;  %v10020_v47 = vld [vmem:[#allocation96_spill] sm:$0xff] }
 0x3fc   :  { %1726 = vmatpush2.msra.mxu0 %v10011_v32  ;;  %1843 = vmatprep.subr.mxu1 %v10012_v41  ;;  %v10021_v32 = vld [vmem:[#allocation98_spill] sm:$0xff]  ;;  %v10022_v41 = vld [vmem:[#allocation100_spill] sm:$0xff] }
 0x3fd   :  { %1728 = vmatmul.mubr.f32.vlgmr.msra.gmra.mxu0 %v6671_v19  ;;  %1852 = vmatprep.subr.mxu0 %v10013_v42  ;;  %v10024_v42 = vld [vmem:[#allocation102_spill] sm:$0xff] }
 0x3fe   :  { %1853 = vmatpush1.msra.mxu0 %v10014_v48  ;;  %1844 = vmatpush2.msra.mxu1 %v10015_v8  ;;  %v10025_v48 = vld [vmem:[#allocation103_spill] sm:$0xff]  ;;  %v10026_v8 = vld [vmem:[#allocation104_spill] sm:$0xff] }
 0x3ff   :  { %1854 = vmatprep.subr.mxu0 %v10016_v59  ;;  %1923 = vmatprep.subr.mxu1 %v10017_v17  ;;  %v10027_v59 = vld [vmem:[#allocation105_spill] sm:$0xff]  ;;  %v10028_v17 = vld [vmem:[#allocation106_spill] sm:$0xff] }
 0x400   :  { %1855 = vmatpush1.msra.mxu0 %v10018_v60  ;;  %v10029_v60 = vld [vmem:[#allocation107_spill] sm:$0xff] }
 0x401   :  { %1856 = vmatprep.subr.mxu0 %v10019_v46  ;;  %v10030_v46 = vld [vmem:[#allocation108_spill] sm:$0xff] }
 0x402   :  { %1857 = vmatpush1.msra.mxu0 %v10020_v47  ;;  %v10031_v47 = vld [vmem:[#allocation109_spill] sm:$0xff] }
 0x403   :  { %1858 = vmatprep.subr.mxu0 %v10021_v32  ;;  %v10032_v32 = vld [vmem:[#allocation110_spill] sm:$0xff] }
 0x404   :  { %1859 = vmatpush1.msra.mxu0 %v10022_v41  ;;  %v10033_v41 = vld [vmem:[#allocation111_spill] sm:$0xff] }
 0x405   :  { %1860 = vmatprep.subr.mxu0 %v10023_v49  ;;  %v10034_v49 = vld [vmem:[#allocation112_spill] sm:$0xff] }
 0x406   :  { %1861 = vmatpush1.msra.mxu0 %v10024_v42  ;;  %v10035_v42 = vld [vmem:[#allocation113_spill] sm:$0xff] }
 0x407   :  { %1862 = vmatprep.subr.mxu0 %v10025_v48  ;;  %v10036_v48 = vld [vmem:[#allocation114_spill] sm:$0xff] }
 0x408   :  { %1863 = vmatpush1.msra.mxu0 %v10026_v8  ;;  %v10037_v8 = vld [vmem:[#allocation115_spill] sm:$0xff] }
 0x409   :  { %1864 = vmatprep.subr.mxu0 %v10027_v59  ;;  %v10038_v59 = vld [vmem:[#allocation116_spill] sm:$0xff] }
 0x40a   :  { %1865 = vmatpush1.msra.mxu0 %v10028_v17  ;;  %v10039_v17 = vld [vmem:[#allocation117_spill] sm:$0xff] }
 0x40b   :  { %1866 = vmatprep.subr.mxu0 %v10029_v60  ;;  %v10040_v60 = vld [vmem:[#allocation118_spill] sm:$0xff] }
 0x40c   :  { %1867 = vmatpush1.msra.mxu0 %v10030_v46  ;;  %v10041_v46 = vld [vmem:[#allocation119_spill] sm:$0xff] }
 0x40d   :  { %1868 = vmatprep.subr.mxu0 %v10031_v47  ;;  %v10042_v47 = vld [vmem:[#allocation120_spill] sm:$0xff] }
 0x40e   :  { %1869 = vmatpush1.msra.mxu0 %v10032_v32  ;;  %v10043_v32 = vld [vmem:[#allocation121_spill] sm:$0xff] }
 0x40f   :  { %1870 = vmatprep.subr.mxu0 %v10033_v41  ;;  %v10044_v41 = vld [vmem:[#allocation122_spill] sm:$0xff] }
 0x410   :  { %1871 = vmatpush1.msra.mxu0 %v10034_v49  ;;  %v10045_v49 = vld [vmem:[#allocation123_spill] sm:$0xff] }
 0x411   :  { %1872 = vmatprep.subr.mxu0 %v10035_v42  ;;  %v10046_v42 = vld [vmem:[#allocation124_spill] sm:$0xff] }
 0x412   :  { %1873 = vmatpush1.msra.mxu0 %v10036_v48  ;;  %v10047_v48 = vld [vmem:[#allocation125_spill] sm:$0xff] }
 0x413   :  { %1874 = vmatprep.subr.mxu0 %v10037_v8  ;;  %v10048_v8 = vld [vmem:[#allocation126_spill] sm:$0xff] }
 0x414   :  { %1875 = vmatpush1.msra.mxu0 %v10038_v59  ;;  %v10049_v59 = vld [vmem:[#allocation127_spill] sm:$0xff] }
 0x415   :  { %1876 = vmatprep.subr.mxu0 %v10039_v17  ;;  %v10050_v17 = vld [vmem:[#allocation128_spill] sm:$0xff] }
 0x416   :  { %1877 = vmatpush1.msra.mxu0 %v10040_v60  ;;  %v10051_v60 = vld [vmem:[#allocation129_spill] sm:$0xff] }
 0x417   :  { %1878 = vmatprep.subr.mxu0 %v10041_v46  ;;  %v10052_v46 = vld [vmem:[#allocation130_spill] sm:$0xff] }
 0x418   :  { %1879 = vmatpush1.msra.mxu0 %v10042_v47  ;;  %v10053_v47 = vld [vmem:[#allocation131_spill] sm:$0xff] }
 0x419   :  { %1880 = vmatprep.subr.mxu0 %v10043_v32  ;;  %v10054_v32 = vld [vmem:[#allocation132_spill] sm:$0xff] }
 0x41a   :  { %1881 = vmatpush1.msra.mxu0 %v10044_v41  ;;  %v10055_v41 = vld [vmem:[#allocation133_spill] sm:$0xff] }
 0x41b   :  { %1882 = vmatprep.subr.mxu0 %v10045_v49  ;;  %v10056_v49 = vld [vmem:[#allocation134_spill] sm:$0xff] }
 0x41c   :  { %1883 = vmatpush1.msra.mxu0 %v10046_v42  ;;  %v10057_v42 = vld [vmem:[#allocation135_spill] sm:$0xff] }
 0x41d   :  { %1884 = vmatprep.subr.mxu0 %v10047_v48  ;;  %v10058_v48 = vld [vmem:[#allocation136_spill] sm:$0xff] }
 0x41e   :  { %1885 = vmatpush2.msra.mxu0 %v10048_v8  ;;  %v10059_v8 = vld [vmem:[#allocation137_spill] sm:$0xff] }
 0x41f   :  { %1886 = vmatprep.subr.mxu0 %v10049_v59  ;;  %v10060_v59 = vld [vmem:[#allocation138_spill] sm:$0xff] }
 0x420   :  { %1887 = vmatpush2.msra.mxu0 %v10050_v17  ;;  %v10061_v17 = vld [vmem:[#allocation139_spill] sm:$0xff] }
 0x421   :  { %1888 = vmatprep.subr.mxu0 %v10051_v60  ;;  %v10062_v60 = vld [vmem:[#allocation140_spill] sm:$0xff] }
 0x422   :  { %1889 = vmatpush2.msra.mxu0 %v10052_v46  ;;  %v10063_v46 = vld [vmem:[#allocation141_spill] sm:$0xff] }
 0x423   :  { %1890 = vmatprep.subr.mxu0 %v10053_v47  ;;  %v10064_v47 = vld [vmem:[#allocation142_spill] sm:$0xff] }
 0x424   :  { %1891 = vmatpush2.msra.mxu0 %v10054_v32  ;;  %v10065_v32 = vld [vmem:[#allocation143_spill] sm:$0xff] }
 0x425   :  { %1892 = vmatprep.subr.mxu0 %v10055_v41  ;;  %v10066_v41 = vld [vmem:[#allocation144_spill] sm:$0xff] }
 0x426   :  { %1893 = vmatpush2.msra.mxu0 %v10056_v49  ;;  %v10067_v49 = vld [vmem:[#allocation145_spill] sm:$0xff] }
 0x427   :  { %1894 = vmatprep.subr.mxu0 %v10057_v42  ;;  %v10068_v42 = vld [vmem:[#allocation146_spill] sm:$0xff] }
 0x428   :  { %1895 = vmatpush2.msra.mxu0 %v10058_v48  ;;  %v10069_v48 = vld [vmem:[#allocation147_spill] sm:$0xff] }
 0x429   :  { %1896 = vmatprep.subr.mxu0 %v10059_v8  ;;  %v10070_v8 = vld [vmem:[#allocation148_spill] sm:$0xff] }
 0x42a   :  { %1897 = vmatpush2.msra.mxu0 %v10060_v59  ;;  %v10071_v59 = vld [vmem:[#allocation149_spill] sm:$0xff] }
 0x42b   :  { %1898 = vmatprep.subr.mxu0 %v10061_v17  ;;  %v10072_v17 = vld [vmem:[#allocation150_spill] sm:$0xff] }
 0x42c   :  { %1899 = vmatpush2.msra.mxu0 %v10062_v60  ;;  %v10073_v60 = vld [vmem:[#allocation151_spill] sm:$0xff] }
 0x42d   :  { %1900 = vmatprep.subr.mxu0 %v10063_v46  ;;  %v10074_v46 = vld [vmem:[#allocation152_spill] sm:$0xff] }
 0x42e   :  { %1901 = vmatpush2.msra.mxu0 %v10064_v47  ;;  %v10075_v47 = vld [vmem:[#allocation153_spill] sm:$0xff] }
 0x42f   :  { %1902 = vmatprep.subr.mxu0 %v10065_v32  ;;  %v10076_v32 = vld [vmem:[#allocation154_spill] sm:$0xff] }
 0x430   :  { %1903 = vmatpush2.msra.mxu0 %v10066_v41  ;;  %v10077_v41 = vld [vmem:[#allocation155_spill] sm:$0xff] }
 0x431   :  { %1904 = vmatprep.subr.mxu0 %v10067_v49  ;;  %v10078_v49 = vld [vmem:[#allocation156_spill] sm:$0xff] }
 0x432   :  { %1905 = vmatpush2.msra.mxu0 %v10068_v42  ;;  %v10079_v42 = vld [vmem:[#allocation195_spill] sm:$0xff] }
 0x433   :  { %1906 = vmatprep.subr.mxu0 %v10069_v48 }
 0x434   :  { %1907 = vmatpush2.msra.mxu0 %v10070_v8 }
 0x435   :  { %1908 = vmatprep.subr.mxu0 %v10071_v59 }
 0x436   :  { %1909 = vmatpush2.msra.mxu0 %v10072_v17 }
 0x437   :  { %1910 = vmatprep.subr.mxu0 %v10073_v60 }
 0x438   :  { %1911 = vmatpush2.msra.mxu0 %v10074_v46 }
 0x439   :  { %1912 = vmatprep.subr.mxu0 %v10075_v47  ;;  %v10082_v47 = vld [vmem:[#allocation39_spill] sm:$0xff] }
 0x43a   :  { %1913 = vmatpush2.msra.mxu0 %v10076_v32  ;;  %v340_v32 = vadd.f32 %v10083_v52, %v10082_v47 }
 0x43b   :  { %1914 = vmatprep.subr.mxu0 %v10077_v41  ;;  %v10084_v41 = vld [vmem:[#allocation16_spill] sm:$0xff] }
 0x43c   :  { %1915 = vmatpush2.msra.mxu0 %v10078_v49  ;;  %v342_v49 = vadd.f32 %v10084_v41, %v5234_v15 }
 0x43d   :  { %2041 = vmatprep.subr.mxu0 %v10079_v42 }
 0x47d   :  { %v1587_v48 = vpop.f32.mrf.mxu0  ;;  %v1658_v46 = vpop.f32.mrf.mxu1 }
 0x47e   :  { %v1734_v59 = vadd.f32 %v1587_v48, %v10080_v36  ;;  %v1736_v5 = vadd.f32 %v1658_v46, %v340_v32  ;;  %v10087_v46 = vld [vmem:[#allocation40_spill] sm:$0xff] }
 0x47f   :  { %v1589_v8 = vpop.f32.mrf.mxu0  ;;  %v1660_v29 = vpop.f32.mrf.mxu1 }
 0x480   :  { %v1735_v17 = vadd.f32 %v1589_v8, %v10081_v44  ;;  %v1738_v38 = vmul.f32 0.5, %v1734_v59  ;;  %v1737_v34 = vadd.f32 %v1660_v29, %v342_v49  ;;  %v1740_v0 = vmul.f32 0.5, %v1736_v5  ;;  %v10085_v59 = vld [vmem:[#allocation42_spill] sm:$0xff]  ;;  %v10088_v29 = vld [vmem:[#allocation27_spill] sm:$0xff] }
 0x481   :  { %v455_v5 = vadd.f32 %v10088_v29, %v5255_v28 }
 0x482   :  { %v1739_v60 = vmul.f32 0.5, %v1735_v17  ;;  %3052 = vtanh.f32 %v1738_v38  ;;  %v1741_v48 = vmul.f32 0.5, %v1737_v34 }
 0x484   :  { %3054 = vtanh.f32 %v1739_v60  ;;  %v10086_v60 = vld [vmem:[#allocation24_spill] sm:$0xff] }
 0x485   :  { %3056 = vtanh.f32 %v1740_v0  ;;  %v453_v52 = vadd.f32 %v10086_v60, %v5248_v21 }
 0x486   :  { %3058 = vtanh.f32 %v1741_v48 }
 0x48f   :  { %v3053_v42 = vpop.eup %3052 }
 0x490   :  { %v1746_v36 = vmul.f32 0.5, %v3053_v42 }
 0x491   :  { %v3055_v24 = vpop.eup %3054 }
 0x492   :  { %v1747_v44 = vmul.f32 0.5, %v3055_v24  ;;  %v1750_v38 = vadd.f32 0.5, %v1746_v36  ;;  %v3057_v0 = vpop.eup %3056 }
 0x493   :  { %v3059_v49 = vpop.eup %3058  ;;  %v1748_v36 = vmul.f32 0.5, %v3057_v0  ;;  %v10121_v0 = vld [vmem:[#allocation176_spill] sm:$0xff] }
 0x494   :  { %v1751_v41 = vadd.f32 0.5, %v1747_v44 }
 0x495   :  { %v1752_v60 = vadd.f32 0.5, %v1748_v36  ;;  %v10123_v36 = vld [vmem:[#allocation177_spill] sm:$0xff] }
 0x4bd   :  { %v1729_v8 = vpop.f32.mrf.mxu0 }
 0x4be   :  { %v1754_v17 = vadd.f32 %v1729_v8, %v10085_v59  ;;  %v1749_v8 = vmul.f32 0.5, %v3059_v49  ;;  %v7218_v49 = vld [vmem:[%s8728_s2 + $0x4b8] sm:$0xff] }
 0x4bf   :  { %v1731_v47 = vpop.f32.mrf.mxu0  ;;  %10122 = vst [vmem:[#allocation166_spill] sm:$0xff] %v7218_v49 }
 0x4c0   :  { %v1756_v18 = vmul.f32 %v1754_v17, %v1750_v38  ;;  %v1755_v32 = vadd.f32 %v1731_v47, %v10087_v46  ;;  %v1753_v44 = vadd.f32 0.5, %v1749_v8  ;;  %v7225_v8 = vld [vmem:[%s8728_s2 + $0x4b0] sm:$0xff] }
 0x4c1   :  { %10124 = vst [vmem:[#allocation52_spill] sm:$0xff] %v7225_v8 }
 0x4c2   :  { %v1758_v42 = vadd.f32 %v1756_v18, %v453_v52  ;;  %v1757_v34 = vmul.f32 %v1755_v32, %v1751_v41  ;;  %v10113_v52 = vld [vmem:[#allocation172_spill] sm:$0xff]  ;;  %v7190_v41 = vld [vmem:[%s8728_s2 + $0x518] sm:$0xff]  ;;  %v7197_v32 = vld [vmem:[%s8728_s2 + $0x510] sm:$0xff] }
 0x4c3   :  { %10114 = vst [vmem:[#allocation164_spill] sm:$0xff] %v7190_v41  ;;  %10116 = vst [vmem:[#allocation49_spill] sm:$0xff] %v7197_v32 }
 0x4c4   :  { %3060 = vtanh.f32 %v1758_v42  ;;  %v1759_v24 = vadd.f32 %v1757_v34, %v455_v5  ;;  %v10117_v5 = vld [vmem:[#allocation174_spill] sm:$0xff]  ;;  %v7204_v42 = vld [vmem:[%s8728_s2 + $0x4e8] sm:$0xff]  ;;  %v10119_v34 = vld [vmem:[#allocation175_spill] sm:$0xff] }
 0x4c5   :  { %10118 = vst [vmem:[#allocation165_spill] sm:$0xff] %v7204_v42 }
 0x4c6   :  { %3062 = vtanh.f32 %v1759_v24  ;;  %v7211_v24 = vld [vmem:[%s8728_s2 + $0x4e0] sm:$0xff] }
 0x4c7   :  { %10120 = vst [vmem:[#allocation53_spill] sm:$0xff] %v7211_v24 }
 0x4d1   :  { %v3061_v59 = vpop.eup %3060 }
 0x4d2   :  { %v1762_v48 = vsub.f32 %v6671_v19, %v3061_v59  ;;  %v6917_v19 = vld [vmem:[%s8728_s2 + $0x2d0] sm:$0xff] }
 0x4d3   :  { %v3063_v38 = vpop.eup %3062 }
 0x4d4   :  { %v1763_v47 = vsub.f32 %v6673_v43, %v3063_v38  ;;  %v1764_v17 = vmul.f32 %v1762_v48, %v1752_v60  ;;  %v6924_v43 = vld [vmem:[%s8728_s2 + $0x2a8] sm:$0xff]  ;;  %v10125_v60 = vld [vmem:[#allocation178_spill] sm:$0xff] }
 0x4d5   :  { %v7232_v48 = vld [vmem:[%s8728_s2 + $0x488] sm:$0xff] }
 0x4d6   :  { %v1765_v46 = vmul.f32 %v1763_v47, %v1753_v44  ;;  %v6895_v29 = vadd.f32 %v3061_v59, %v1764_v17  ;;  %v10111_v59 = vld [vmem:[#allocation171_spill] sm:$0xff]  ;;  %10126 = vst [vmem:[#allocation55_spill] sm:$0xff] %v7232_v48  ;;  %v10129_v47 = vld [vmem:[#allocation180_spill] sm:$0xff]  ;;  %v7246_v17 = vld [vmem:[%s8728_s2 + $0x458] sm:$0xff] }
 0x4d7   :  { %v7239_v44 = vld [vmem:[%s8728_s2 + $0x480] sm:$0xff]  ;;  %10130 = vst [vmem:[#allocation60_spill] sm:$0xff] %v7246_v17 }
 0x4d8   :  { %v6897_v18 = vadd.f32 %v3063_v38, %v1765_v46  ;;  %2970 = vst [vmem:[%s8731_s7 + $0x18] sm:$0xff] %v6895_v29  ;;  %v10115_v46 = vld [vmem:[#allocation173_spill] sm:$0xff]  ;;  %v10127_v38 = vld [vmem:[#allocation179_spill] sm:$0xff]  ;;  %10128 = vst [vmem:[#allocation58_spill] sm:$0xff] %v7239_v44 }
 0x4da   :  { %1845 = vmatprep.mubr.f32.mxu1 %v6897_v18  ;;  %1916 = vmatprep.mubr.f32.mxu0 %v6897_v18  ;;  %2971 = vst [vmem:[%s8732_s8 + $0x20] sm:$0xff] %v6897_v18 }
 0x4db   :  { %1846 = vmatmul.mubr.f32.vlgmr.msra.gmra.mxu1 %v6895_v29  ;;  %1917 = vmatmul.mubr.f32.vlgmr.msra.gmra.mxu0 %v6895_v29 }
 0x4dc   :  { %1924 = vmatpush1.msra.mxu1 %v6146_v30  ;;  %1987 = vmatprep.mubr.f32.mxu1 %v6897_v18  ;;  %v6931_v30 = vld [vmem:[%s8728_s2 + $0x2a0] sm:$0xff] }
 0x4dd   :  { %1925 = vmatprep.subr.mxu1 %v6153_v40  ;;  %2042 = vmatpush1.msra.mxu0 %v6917_v19  ;;  %v6938_v40 = vld [vmem:[%s8728_s2 + $0x278] sm:$0xff] }
 0x4de   :  { %1926 = vmatpush1.msra.mxu1 %v6160_v10  ;;  %2043 = vmatprep.subr.mxu0 %v6924_v43  ;;  %v6945_v10 = vld [vmem:[%s8728_s2 + $0x270] sm:$0xff] }
 0x4df   :  { %1927 = vmatprep.subr.mxu1 %v6167_v7  ;;  %2044 = vmatpush1.msra.mxu0 %v6931_v30  ;;  %v6952_v7 = vld [vmem:[%s8728_s2 + $0x248] sm:$0xff] }
 0x4e0   :  { %1928 = vmatpush1.msra.mxu1 %v6174_v33  ;;  %2045 = vmatprep.subr.mxu0 %v6938_v40  ;;  %v6959_v33 = vld [vmem:[%s8728_s2 + $0x240] sm:$0xff] }
 0x4e1   :  { %1929 = vmatprep.subr.mxu1 %v6181_v62  ;;  %2046 = vmatpush1.msra.mxu0 %v6945_v10  ;;  %v6966_v62 = vld [vmem:[%s8728_s2 + $0x218] sm:$0xff] }
 0x4e2   :  { %1930 = vmatpush1.msra.mxu1 %v6188_v58  ;;  %2047 = vmatprep.subr.mxu0 %v6952_v7  ;;  %v6973_v58 = vld [vmem:[%s8728_s2 + $0x210] sm:$0xff] }
 0x4e3   :  { %1931 = vmatprep.subr.mxu1 %v6195_v11  ;;  %2048 = vmatpush1.msra.mxu0 %v6959_v33  ;;  %v6980_v11 = vld [vmem:[%s8728_s2 + $0x1e8] sm:$0xff] }
 0x4e4   :  { %1932 = vmatpush1.msra.mxu1 %v6202_v56  ;;  %2049 = vmatprep.subr.mxu0 %v6966_v62  ;;  %v6987_v56 = vld [vmem:[%s8728_s2 + $0x1e0] sm:$0xff] }
 0x4e5   :  { %1933 = vmatprep.subr.mxu1 %v6209_v55  ;;  %2050 = vmatpush1.msra.mxu0 %v6973_v58  ;;  %v6994_v55 = vld [vmem:[%s8728_s2 + $0x1b8] sm:$0xff] }
 0x4e6   :  { %1934 = vmatpush1.msra.mxu1 %v6216_v53  ;;  %2051 = vmatprep.subr.mxu0 %v6980_v11  ;;  %v7001_v53 = vld [vmem:[%s8728_s2 + $0x1b0] sm:$0xff] }
 0x4e7   :  { %1935 = vmatprep.subr.mxu1 %v6223_v13  ;;  %2052 = vmatpush1.msra.mxu0 %v6987_v56  ;;  %v7008_v13 = vld [vmem:[%s8728_s2 + $0x188] sm:$0xff] }
 0x4e8   :  { %1936 = vmatpush1.msra.mxu1 %v6230_v45  ;;  %2053 = vmatprep.subr.mxu0 %v6994_v55  ;;  %v7015_v45 = vld [vmem:[%s8728_s2 + $0x180] sm:$0xff] }
 0x4e9   :  { %1937 = vmatprep.subr.mxu1 %v6237_v57  ;;  %2054 = vmatpush1.msra.mxu0 %v7001_v53  ;;  %v7022_v57 = vld [vmem:[%s8728_s2 + $0x158] sm:$0xff] }
 0x4ea   :  { %1938 = vmatpush1.msra.mxu1 %v6244_v6  ;;  %2055 = vmatprep.subr.mxu0 %v7008_v13  ;;  %v7029_v6 = vld [vmem:[%s8728_s2 + $0x150] sm:$0xff] }
 0x4eb   :  { %1939 = vmatprep.subr.mxu1 %v9926_v16  ;;  %2056 = vmatpush1.msra.mxu0 %v7015_v45  ;;  %v7036_v16 = vld [vmem:[%s8728_s2 + $0x128] sm:$0xff] }
 0x4ec   :  { %1940 = vmatpush1.msra.mxu1 %v9928_v22  ;;  %2057 = vmatprep.subr.mxu0 %v7022_v57  ;;  %10089 = vst [vmem:[#allocation4_spill] sm:$0xff] %v7036_v16  ;;  %v7043_v22 = vld [vmem:[%s8728_s2 + $0x120] sm:$0xff] }
 0x4ed   :  { %1941 = vmatprep.subr.mxu1 %v9930_v2  ;;  %2058 = vmatpush1.msra.mxu0 %v7029_v6  ;;  %10090 = vst [vmem:[#allocation3_spill] sm:$0xff] %v7043_v22  ;;  %v7050_v2 = vld [vmem:[%s8728_s2 + $0xf8] sm:$0xff] }
 0x4ee   :  { %1942 = vmatpush1.msra.mxu1 %v9932_v50  ;;  %2059 = vmatprep.subr.mxu0 %v7036_v16  ;;  %10091 = vst [vmem:[#allocation17_spill] sm:$0xff] %v7050_v2  ;;  %v7057_v50 = vld [vmem:[%s8728_s2 + $0xf0] sm:$0xff] }
 0x4ef   :  { %1943 = vmatprep.subr.mxu1 %v9934_v54  ;;  %2060 = vmatpush1.msra.mxu0 %v7043_v22  ;;  %10092 = vst [vmem:[#allocation15_spill] sm:$0xff] %v7057_v50  ;;  %v7064_v54 = vld [vmem:[%s8728_s2 + $0xc8] sm:$0xff] }
 0x4f0   :  { %1944 = vmatpush1.msra.mxu1 %v9936_v20  ;;  %2061 = vmatprep.subr.mxu0 %v7050_v2  ;;  %10093 = vst [vmem:[#allocation21_spill] sm:$0xff] %v7064_v54  ;;  %v7071_v20 = vld [vmem:[%s8728_s2 + $0xc0] sm:$0xff] }
 0x4f1   :  { %1945 = vmatprep.subr.mxu1 %v9938_v12  ;;  %2062 = vmatpush1.msra.mxu0 %v7057_v50  ;;  %10094 = vst [vmem:[#allocation23_spill] sm:$0xff] %v7071_v20  ;;  %v7078_v12 = vld [vmem:[%s8728_s2 + $0x98] sm:$0xff] }
 0x4f2   :  { %1946 = vmatpush1.msra.mxu1 %v9940_v3  ;;  %2063 = vmatprep.subr.mxu0 %v7064_v54  ;;  %10095 = vst [vmem:[#allocation19_spill] sm:$0xff] %v7078_v12  ;;  %v7085_v3 = vld [vmem:[%s8728_s2 + $0x90] sm:$0xff] }
 0x4f3   :  { %1947 = vmatprep.subr.mxu1 %v9942_v31  ;;  %2064 = vmatpush1.msra.mxu0 %v7071_v20  ;;  %10096 = vst [vmem:[#allocation43_spill] sm:$0xff] %v7085_v3  ;;  %v7092_v31 = vld [vmem:[%s8728_s2 + $0x68] sm:$0xff] }
 0x4f4   :  { %1948 = vmatpush1.msra.mxu1 %v9944_v39  ;;  %2065 = vmatprep.subr.mxu0 %v7078_v12  ;;  %10097 = vst [vmem:[#allocation157_spill] sm:$0xff] %v7092_v31  ;;  %v7099_v39 = vld [vmem:[%s8728_s2 + $0x60] sm:$0xff] }
 0x4f5   :  { %1949 = vmatprep.subr.mxu1 %v9946_v51  ;;  %2066 = vmatpush1.msra.mxu0 %v7085_v3  ;;  %10098 = vst [vmem:[#allocation45_spill] sm:$0xff] %v7099_v39  ;;  %v7169_v51 = vld [vmem:[%s8728_s2 + $0x570] sm:$0xff] }
 0x4f6   :  { %1950 = vmatpush1.msra.mxu1 %v6328_v4  ;;  %2067 = vmatprep.subr.mxu0 %v7092_v31  ;;  %v7106_v4 = vld [vmem:[%s8728_s2 + $0x38] sm:$0xff]  ;;  %10108 = vst [vmem:[#allocation48_spill] sm:$0xff] %v7169_v51 }
 0x4f7   :  { %1951 = vmatprep.subr.mxu1 %v6335_v25  ;;  %2068 = vmatpush1.msra.mxu0 %v7099_v39  ;;  %10099 = vst [vmem:[#allocation158_spill] sm:$0xff] %v7106_v4  ;;  %v7113_v25 = vld [vmem:[%s8728_s2 + $0x30] sm:$0xff] }
 0x4f8   :  { %1952 = vmatpush1.msra.mxu1 %v6342_v1  ;;  %2069 = vmatprep.subr.mxu0 %v7106_v4  ;;  %10100 = vst [vmem:[#allocation44_spill] sm:$0xff] %v7113_v25  ;;  %v7120_v1 = vld [vmem:[%s8728_s2 + $0x8] sm:$0xff] }
 0x4f9   :  { %1953 = vmatprep.subr.mxu1 %v6349_v63  ;;  %2070 = vmatpush1.msra.mxu0 %v7113_v25  ;;  %10101 = vst [vmem:[#allocation159_spill] sm:$0xff] %v7120_v1  ;;  %v7127_v63 = vld [vmem:[%s8728_s2] sm:$0xff] }
 0x4fa   :  { %1954 = vmatpush1.msra.mxu1 %v6356_v9  ;;  %2071 = vmatprep.subr.mxu0 %v7120_v1  ;;  %10102 = vst [vmem:[#allocation47_spill] sm:$0xff] %v7127_v63  ;;  %v7134_v9 = vld [vmem:[%s8728_s2 + $0x5d8] sm:$0xff] }
 0x4fb   :  { %1955 = vmatprep.subr.mxu1 %v6363_v14  ;;  %2072 = vmatpush1.msra.mxu0 %v7127_v63  ;;  %10103 = vst [vmem:[#allocation160_spill] sm:$0xff] %v7134_v9  ;;  %v7141_v14 = vld [vmem:[%s8728_s2 + $0x5d0] sm:$0xff] }
 0x4fc   :  { %1956 = vmatpush2.msra.mxu1 %v6370_v27  ;;  %2073 = vmatprep.subr.mxu0 %v7134_v9  ;;  %10104 = vst [vmem:[#allocation46_spill] sm:$0xff] %v7141_v14  ;;  %v7148_v27 = vld [vmem:[%s8728_s2 + $0x5a8] sm:$0xff] }
 0x4fd   :  { %1957 = vmatprep.subr.mxu1 %v6377_v23  ;;  %2074 = vmatpush2.msra.mxu0 %v7141_v14  ;;  %10105 = vst [vmem:[#allocation161_spill] sm:$0xff] %v7148_v27  ;;  %v7155_v23 = vld [vmem:[%s8728_s2 + $0x5a0] sm:$0xff] }
 0x4fe   :  { %1958 = vmatpush2.msra.mxu1 %v6384_v37  ;;  %2075 = vmatprep.subr.mxu0 %v7148_v27  ;;  %10106 = vst [vmem:[#allocation50_spill] sm:$0xff] %v7155_v23  ;;  %v7162_v37 = vld [vmem:[%s8728_s2 + $0x578] sm:$0xff] }
 0x4ff   :  { %1959 = vmatprep.subr.mxu1 %v9957_v35  ;;  %2076 = vmatpush2.msra.mxu0 %v7155_v23  ;;  %10107 = vst [vmem:[#allocation162_spill] sm:$0xff] %v7162_v37  ;;  %v10109_v35 = vld [vmem:[#allocation170_spill] sm:$0xff] }
 0x500   :  { %1960 = vmatpush2.msra.mxu1 %v9959_v61  ;;  %2077 = vmatprep.subr.mxu0 %v7162_v37  ;;  %v7176_v61 = vld [vmem:[%s8728_s2 + $0x548] sm:$0xff] }
 0x501   :  { %1961 = vmatprep.subr.mxu1 %v9961_v26  ;;  %2078 = vmatpush2.msra.mxu0 %v7169_v51  ;;  %10110 = vst [vmem:[#allocation163_spill] sm:$0xff] %v7176_v61  ;;  %v7183_v26 = vld [vmem:[%s8728_s2 + $0x540] sm:$0xff] }
 0x502   :  { %1962 = vmatpush2.msra.mxu1 %v10109_v35  ;;  %2079 = vmatprep.subr.mxu0 %v7176_v61  ;;  %10112 = vst [vmem:[#allocation51_spill] sm:$0xff] %v7183_v26  ;;  %v10131_v35 = vld [vmem:[#allocation181_spill] sm:$0xff] }
 0x503   :  { %1963 = vmatprep.subr.mxu1 %v10111_v59  ;;  %2080 = vmatpush2.msra.mxu0 %v7183_v26  ;;  %v7253_v59 = vld [vmem:[%s8728_s2 + $0x450] sm:$0xff] }
 0x504   :  { %1964 = vmatpush2.msra.mxu1 %v10113_v52  ;;  %2081 = vmatprep.subr.mxu0 %v7190_v41  ;;  %10132 = vst [vmem:[#allocation62_spill] sm:$0xff] %v7253_v59  ;;  %v10133_v52 = vld [vmem:[#allocation182_spill] sm:$0xff] }
 0x505   :  { %1965 = vmatprep.subr.mxu1 %v10115_v46  ;;  %2082 = vmatpush2.msra.mxu0 %v7197_v32  ;;  %v7260_v46 = vld [vmem:[%s8728_s2 + $0x428] sm:$0xff] }
 0x506   :  { %1966 = vmatpush2.msra.mxu1 %v10117_v5  ;;  %2083 = vmatprep.subr.mxu0 %v7204_v42  ;;  %10134 = vst [vmem:[#allocation65_spill] sm:$0xff] %v7260_v46  ;;  %v10135_v5 = vld [vmem:[#allocation183_spill] sm:$0xff] }
 0x507   :  { %1967 = vmatprep.subr.mxu1 %v10119_v34  ;;  %2084 = vmatpush2.msra.mxu0 %v7211_v24  ;;  %v7267_v34 = vld [vmem:[%s8728_s2 + $0x420] sm:$0xff] }
 0x508   :  { %1968 = vmatpush2.msra.mxu1 %v10121_v0  ;;  %2085 = vmatprep.subr.mxu0 %v7218_v49  ;;  %10136 = vst [vmem:[#allocation67_spill] sm:$0xff] %v7267_v34  ;;  %v10137_v0 = vld [vmem:[#allocation184_spill] sm:$0xff]  ;;  %v10230_v49 = vld [vmem:[#allocation22_spill] sm:$0xff] }
 0x509   :  { %1969 = vmatprep.subr.mxu1 %v10123_v36  ;;  %2086 = vmatpush2.msra.mxu0 %v7225_v8  ;;  %v7274_v36 = vld [vmem:[%s8728_s2 + $0x3f8] sm:$0xff] }
 0x50a   :  { %1970 = vmatpush2.msra.mxu1 %v10125_v60  ;;  %2087 = vmatprep.subr.mxu0 %v7232_v48  ;;  %10138 = vst [vmem:[#allocation69_spill] sm:$0xff] %v7274_v36  ;;  %v10139_v60 = vld [vmem:[#allocation185_spill] sm:$0xff] }
 0x50b   :  { %1971 = vmatprep.subr.mxu1 %v10127_v38  ;;  %2088 = vmatpush2.msra.mxu0 %v7239_v44  ;;  %v7281_v38 = vld [vmem:[%s8728_s2 + $0x3f0] sm:$0xff]  ;;  %v10229_v44 = vld [vmem:[#allocation20_spill] sm:$0xff] }
 0x50c   :  { %1972 = vmatpush2.msra.mxu1 %v10129_v47  ;;  %2089 = vmatprep.subr.mxu0 %v7246_v17  ;;  %10140 = vst [vmem:[#allocation72_spill] sm:$0xff] %v7281_v38  ;;  %v10141_v47 = vld [vmem:[#allocation186_spill] sm:$0xff]  ;;  %v10228_v17 = vld [vmem:[#allocation39_spill] sm:$0xff] }
 0x50d   :  { %1973 = vmatprep.subr.mxu1 %v10131_v35  ;;  %2090 = vmatpush2.msra.mxu0 %v7253_v59  ;;  %v7288_v35 = vld [vmem:[%s8728_s2 + $0x3c8] sm:$0xff]  ;;  %v346_v48 = vadd.f32 %v10229_v44, %v10228_v17 }
 0x50e   :  { %1974 = vmatpush2.msra.mxu1 %v10133_v52  ;;  %2091 = vmatprep.subr.mxu0 %v7260_v46  ;;  %10142 = vst [vmem:[#allocation74_spill] sm:$0xff] %v7288_v35  ;;  %v10143_v52 = vld [vmem:[#allocation187_spill] sm:$0xff] }
 0x50f   :  { %1975 = vmatprep.subr.mxu1 %v10135_v5  ;;  %2092 = vmatpush2.msra.mxu0 %v7267_v34  ;;  %v7295_v5 = vld [vmem:[%s8728_s2 + $0x3c0] sm:$0xff] }
 0x510   :  { %1976 = vmatpush2.msra.mxu1 %v10137_v0  ;;  %2093 = vmatprep.subr.mxu0 %v7274_v36  ;;  %10144 = vst [vmem:[#allocation167_spill] sm:$0xff] %v7295_v5  ;;  %v10145_v0 = vld [vmem:[#allocation188_spill] sm:$0xff]  ;;  %v10227_v36 = vld [vmem:[#allocation7_spill] sm:$0xff] }
 0x511   :  { %1977 = vmatprep.subr.mxu1 %v10139_v60  ;;  %2094 = vmatpush2.msra.mxu0 %v7281_v38  ;;  %v7302_v60 = vld [vmem:[%s8728_s2 + $0x398] sm:$0xff]  ;;  %v10226_v38 = vld [vmem:[#allocation9_spill] sm:$0xff] }
 0x512   :  { %1978 = vmatpush2.msra.mxu1 %v10141_v47  ;;  %2095 = vmatprep.subr.mxu0 %v7288_v35  ;;  %10146 = vst [vmem:[#allocation76_spill] sm:$0xff] %v7302_v60  ;;  %v10147_v47 = vld [vmem:[#allocation189_spill] sm:$0xff]  ;;  %v10149_v35 = vld [vmem:[#allocation190_spill] sm:$0xff] }
 0x513   :  { %1979 = vmatprep.subr.mxu1 %v10143_v52  ;;  %2096 = vmatpush2.msra.mxu0 %v7295_v5  ;;  %v7309_v52 = vld [vmem:[%s8728_s2 + $0x390] sm:$0xff]  ;;  %v10151_v5 = vld [vmem:[#allocation191_spill] sm:$0xff] }
 0x514   :  { %1980 = vmatpush2.msra.mxu1 %v10145_v0  ;;  %2097 = vmatprep.subr.mxu0 %v7302_v60  ;;  %10148 = vst [vmem:[#allocation168_spill] sm:$0xff] %v7309_v52  ;;  %v7316_v0 = vld [vmem:[%s8728_s2 + $0x368] sm:$0xff] }
 0x515   :  { %1981 = vmatprep.subr.mxu1 %v10147_v47  ;;  %2098 = vmatpush2.msra.mxu0 %v7309_v52  ;;  %10150 = vst [vmem:[#allocation79_spill] sm:$0xff] %v7316_v0  ;;  %v7323_v47 = vld [vmem:[%s8728_s2 + $0x360] sm:$0xff]  ;;  %v10153_v60 = vld [vmem:[#allocation192_spill] sm:$0xff]  ;;  %v10155_v52 = vld [vmem:[#allocation193_spill] sm:$0xff] }
 0x516   :  { %1982 = vmatpush2.msra.mxu1 %v10149_v35  ;;  %2099 = vmatprep.subr.mxu0 %v7316_v0  ;;  %10152 = vst [vmem:[#allocation169_spill] sm:$0xff] %v7323_v47  ;;  %v7330_v35 = vld [vmem:[%s8728_s2 + $0x338] sm:$0xff] }
 0x517   :  { %1983 = vmatprep.subr.mxu1 %v10151_v5  ;;  %2100 = vmatpush2.msra.mxu0 %v7323_v47  ;;  %10154 = vst [vmem:[#allocation81_spill] sm:$0xff] %v7330_v35  ;;  %v7337_v5 = vld [vmem:[%s8728_s2 + $0x330] sm:$0xff]  ;;  %v10157_v0 = vld [vmem:[#allocation194_spill] sm:$0xff] }
 0x518   :  { %1984 = vmatpush2.msra.mxu1 %v10153_v60  ;;  %2101 = vmatprep.subr.mxu0 %v7330_v35  ;;  %10156 = vst [vmem:[#allocation83_spill] sm:$0xff] %v7337_v5  ;;  %v7344_v60 = vld [vmem:[%s8728_s2 + $0x308] sm:$0xff] }
 0x519   :  { %1985 = vmatprep.subr.mxu1 %v10155_v52  ;;  %2102 = vmatpush2.msra.mxu0 %v7337_v5  ;;  %10158 = vst [vmem:[#allocation86_spill] sm:$0xff] %v7344_v60  ;;  %v7351_v52 = vld [vmem:[%s8728_s2 + $0x2e8] sm:$0xff]  ;;  %v7369_v5 = vld [vmem:[%s8728_s2 + $0x2b8] sm:$0xff] }
 0x51a   :  { %1986 = vmatpush2.msra.mxu1 %v10157_v0  ;;  %2103 = vmatprep.subr.mxu0 %v7344_v60  ;;  %10159 = vst [vmem:[#allocation88_spill] sm:$0xff] %v7351_v52  ;;  %v7357_v0 = vld [vmem:[%s8728_s2 + $0x2e0] sm:$0xff]  ;;  %10162 = vst [vmem:[#allocation95_spill] sm:$0xff] %v7369_v5 }
 0x51b   :  { %1988 = vmatmul.mubr.f32.vlgmr.msra.gmra.mxu1 %v6895_v29  ;;  %2112 = vmatprep.subr.mxu1 %v7351_v52  ;;  %10160 = vst [vmem:[#allocation90_spill] sm:$0xff] %v7357_v0  ;;  %v7363_v60 = vld [vmem:[%s8728_s2 + $0x300] sm:$0xff]  ;;  %v7375_v52 = vld [vmem:[%s8728_s2 + $0x2f8] sm:$0xff] }
 0x51c   :  { %2113 = vmatpush1.msra.mxu1 %v7357_v0  ;;  %10161 = vst [vmem:[#allocation93_spill] sm:$0xff] %v7363_v60  ;;  %2104 = vmatpush2.msra.mxu0 %v7363_v60  ;;  %10163 = vst [vmem:[#allocation97_spill] sm:$0xff] %v7375_v52  ;;  %v7381_v0 = vld [vmem:[%s8728_s2 + $0x2b0] sm:$0xff]  ;;  %v7387_v60 = vld [vmem:[%s8728_s2 + $0x288] sm:$0xff] }
 0x51d   :  { %2114 = vmatprep.subr.mxu1 %v7369_v5  ;;  %2183 = vmatprep.subr.mxu0 %v7375_v52  ;;  %10164 = vst [vmem:[#allocation99_spill] sm:$0xff] %v7381_v0  ;;  %10165 = vst [vmem:[#allocation54_spill] sm:$0xff] %v7387_v60  ;;  %v7393_v5 = vld [vmem:[%s8728_s2 + $0x280] sm:$0xff]  ;;  %v7399_v52 = vld [vmem:[%s8728_s2 + $0x258] sm:$0xff] }
 0x51e   :  { %2115 = vmatpush1.msra.mxu1 %v7381_v0  ;;  %10166 = vst [vmem:[#allocation56_spill] sm:$0xff] %v7393_v5  ;;  %10167 = vst [vmem:[#allocation57_spill] sm:$0xff] %v7399_v52  ;;  %v7405_v0 = vld [vmem:[%s8728_s2 + $0x250] sm:$0xff] }
 0x51f   :  { %2116 = vmatprep.subr.mxu1 %v7387_v60  ;;  %10168 = vst [vmem:[#allocation59_spill] sm:$0xff] %v7405_v0  ;;  %v7411_v60 = vld [vmem:[%s8728_s2 + $0x228] sm:$0xff] }
 0x520   :  { %2117 = vmatpush1.msra.mxu1 %v7393_v5  ;;  %10169 = vst [vmem:[#allocation61_spill] sm:$0xff] %v7411_v60  ;;  %v7417_v5 = vld [vmem:[%s8728_s2 + $0x220] sm:$0xff] }
 0x521   :  { %2118 = vmatprep.subr.mxu1 %v7399_v52  ;;  %10170 = vst [vmem:[#allocation63_spill] sm:$0xff] %v7417_v5  ;;  %v7423_v52 = vld [vmem:[%s8728_s2 + $0x1f8] sm:$0xff] }
 0x522   :  { %2119 = vmatpush1.msra.mxu1 %v7405_v0  ;;  %10171 = vst [vmem:[#allocation64_spill] sm:$0xff] %v7423_v52  ;;  %v7429_v0 = vld [vmem:[%s8728_s2 + $0x1f0] sm:$0xff] }
 0x523   :  { %2120 = vmatprep.subr.mxu1 %v7411_v60  ;;  %10172 = vst [vmem:[#allocation66_spill] sm:$0xff] %v7429_v0  ;;  %v7435_v60 = vld [vmem:[%s8728_s2 + $0x1c8] sm:$0xff] }
 0x524   :  { %2121 = vmatpush1.msra.mxu1 %v7417_v5  ;;  %10173 = vst [vmem:[#allocation68_spill] sm:$0xff] %v7435_v60  ;;  %v7441_v5 = vld [vmem:[%s8728_s2 + $0x1c0] sm:$0xff] }
 0x525   :  { %2122 = vmatprep.subr.mxu1 %v7423_v52  ;;  %10174 = vst [vmem:[#allocation70_spill] sm:$0xff] %v7441_v5  ;;  %v7447_v52 = vld [vmem:[%s8728_s2 + $0x198] sm:$0xff] }
 0x526   :  { %2123 = vmatpush1.msra.mxu1 %v7429_v0  ;;  %10175 = vst [vmem:[#allocation71_spill] sm:$0xff] %v7447_v52  ;;  %v7453_v0 = vld [vmem:[%s8728_s2 + $0x190] sm:$0xff] }
 0x527   :  { %2124 = vmatprep.subr.mxu1 %v7435_v60  ;;  %10176 = vst [vmem:[#allocation73_spill] sm:$0xff] %v7453_v0  ;;  %v7459_v60 = vld [vmem:[%s8728_s2 + $0x168] sm:$0xff] }
 0x528   :  { %2125 = vmatpush1.msra.mxu1 %v7441_v5  ;;  %10177 = vst [vmem:[#allocation75_spill] sm:$0xff] %v7459_v60  ;;  %v7465_v5 = vld [vmem:[%s8728_s2 + $0x160] sm:$0xff] }
 0x529   :  { %2126 = vmatprep.subr.mxu1 %v7447_v52  ;;  %10178 = vst [vmem:[#allocation77_spill] sm:$0xff] %v7465_v5  ;;  %v7471_v52 = vld [vmem:[%s8728_s2 + $0x138] sm:$0xff] }
 0x52a   :  { %2127 = vmatpush1.msra.mxu1 %v7453_v0  ;;  %10179 = vst [vmem:[#allocation78_spill] sm:$0xff] %v7471_v52  ;;  %v7477_v0 = vld [vmem:[%s8728_s2 + $0x130] sm:$0xff] }
 0x52b   :  { %2128 = vmatprep.subr.mxu1 %v7459_v60  ;;  %10180 = vst [vmem:[#allocation80_spill] sm:$0xff] %v7477_v0  ;;  %v7483_v60 = vld [vmem:[%s8728_s2 + $0x108] sm:$0xff] }
 0x52c   :  { %2129 = vmatpush1.msra.mxu1 %v7465_v5  ;;  %10181 = vst [vmem:[#allocation82_spill] sm:$0xff] %v7483_v60  ;;  %v7489_v5 = vld [vmem:[%s8728_s2 + $0x100] sm:$0xff] }
 0x52d   :  { %2130 = vmatprep.subr.mxu1 %v7471_v52  ;;  %10182 = vst [vmem:[#allocation84_spill] sm:$0xff] %v7489_v5  ;;  %v7495_v52 = vld [vmem:[%s8728_s2 + $0xd8] sm:$0xff] }
 0x52e   :  { %2131 = vmatpush1.msra.mxu1 %v7477_v0  ;;  %10183 = vst [vmem:[#allocation85_spill] sm:$0xff] %v7495_v52  ;;  %v7501_v0 = vld [vmem:[%s8728_s2 + $0xd0] sm:$0xff] }
 0x52f   :  { %2132 = vmatprep.subr.mxu1 %v7483_v60  ;;  %10184 = vst [vmem:[#allocation87_spill] sm:$0xff] %v7501_v0  ;;  %v7507_v60 = vld [vmem:[%s8728_s2 + $0xa8] sm:$0xff] }
 0x530   :  { %2133 = vmatpush1.msra.mxu1 %v7489_v5  ;;  %10185 = vst [vmem:[#allocation89_spill] sm:$0xff] %v7507_v60  ;;  %v7513_v5 = vld [vmem:[%s8728_s2 + $0xa0] sm:$0xff] }
 0x531   :  { %2134 = vmatprep.subr.mxu1 %v7495_v52  ;;  %10186 = vst [vmem:[#allocation91_spill] sm:$0xff] %v7513_v5  ;;  %v7519_v52 = vld [vmem:[%s8728_s2 + $0x78] sm:$0xff] }
 0x532   :  { %2135 = vmatpush1.msra.mxu1 %v7501_v0  ;;  %10187 = vst [vmem:[#allocation92_spill] sm:$0xff] %v7519_v52  ;;  %v7525_v0 = vld [vmem:[%s8728_s2 + $0x70] sm:$0xff] }
 0x533   :  { %2136 = vmatprep.subr.mxu1 %v7507_v60  ;;  %10188 = vst [vmem:[#allocation94_spill] sm:$0xff] %v7525_v0  ;;  %v7531_v60 = vld [vmem:[%s8728_s2 + $0x48] sm:$0xff] }
 0x534   :  { %2137 = vmatpush1.msra.mxu1 %v7513_v5  ;;  %10189 = vst [vmem:[#allocation96_spill] sm:$0xff] %v7531_v60  ;;  %v7537_v5 = vld [vmem:[%s8728_s2 + $0x40] sm:$0xff] }
 0x535   :  { %2138 = vmatprep.subr.mxu1 %v7519_v52  ;;  %10190 = vst [vmem:[#allocation98_spill] sm:$0xff] %v7537_v5  ;;  %v7543_v52 = vld [vmem:[%s8728_s2 + $0x18] sm:$0xff] }
 0x536   :  { %2139 = vmatpush1.msra.mxu1 %v7525_v0  ;;  %10191 = vst [vmem:[#allocation100_spill] sm:$0xff] %v7543_v52  ;;  %v7549_v0 = vld [vmem:[%s8728_s2 + $0x10] sm:$0xff] }
 0x537   :  { %2140 = vmatprep.subr.mxu1 %v7531_v60  ;;  %10192 = vst [vmem:[#allocation101_spill] sm:$0xff] %v7549_v0  ;;  %v7555_v60 = vld [vmem:[%s8728_s2 + $0x5e8] sm:$0xff] }
 0x538   :  { %2141 = vmatpush1.msra.mxu1 %v7537_v5  ;;  %10193 = vst [vmem:[#allocation102_spill] sm:$0xff] %v7555_v60  ;;  %v7561_v5 = vld [vmem:[%s8728_s2 + $0x5e0] sm:$0xff] }
 0x539   :  { %2142 = vmatprep.subr.mxu1 %v7543_v52  ;;  %10194 = vst [vmem:[#allocation103_spill] sm:$0xff] %v7561_v5  ;;  %v7567_v52 = vld [vmem:[%s8728_s2 + $0x5b8] sm:$0xff] }
 0x53a   :  { %2143 = vmatpush1.msra.mxu1 %v7549_v0  ;;  %10195 = vst [vmem:[#allocation104_spill] sm:$0xff] %v7567_v52  ;;  %v7573_v0 = vld [vmem:[%s8728_s2 + $0x5b0] sm:$0xff] }
 0x53b   :  { %2144 = vmatprep.subr.mxu1 %v7555_v60  ;;  %10196 = vst [vmem:[#allocation105_spill] sm:$0xff] %v7573_v0  ;;  %v7579_v60 = vld [vmem:[%s8728_s2 + $0x588] sm:$0xff] }
 0x53c   :  { %2145 = vmatpush2.msra.mxu1 %v7561_v5  ;;  %10197 = vst [vmem:[#allocation106_spill] sm:$0xff] %v7579_v60  ;;  %v7585_v5 = vld [vmem:[%s8728_s2 + $0x580] sm:$0xff] }
 0x53d   :  { %2146 = vmatprep.subr.mxu1 %v7567_v52  ;;  %10198 = vst [vmem:[#allocation107_spill] sm:$0xff] %v7585_v5  ;;  %v7591_v52 = vld [vmem:[%s8728_s2 + $0x558] sm:$0xff] }
 0x53e   :  { %2147 = vmatpush2.msra.mxu1 %v7573_v0  ;;  %10199 = vst [vmem:[#allocation108_spill] sm:$0xff] %v7591_v52  ;;  %v7597_v0 = vld [vmem:[%s8728_s2 + $0x550] sm:$0xff] }
 0x53f   :  { %2148 = vmatprep.subr.mxu1 %v7579_v60  ;;  %10200 = vst [vmem:[#allocation109_spill] sm:$0xff] %v7597_v0  ;;  %v7603_v60 = vld [vmem:[%s8728_s2 + $0x528] sm:$0xff] }
 0x540   :  { %2149 = vmatpush2.msra.mxu1 %v7585_v5  ;;  %10201 = vst [vmem:[#allocation110_spill] sm:$0xff] %v7603_v60  ;;  %v7609_v5 = vld [vmem:[%s8728_s2 + $0x520] sm:$0xff] }
 0x541   :  { %2150 = vmatprep.subr.mxu1 %v7591_v52  ;;  %10202 = vst [vmem:[#allocation111_spill] sm:$0xff] %v7609_v5  ;;  %v7615_v52 = vld [vmem:[%s8728_s2 + $0x4f8] sm:$0xff] }
 0x542   :  { %2151 = vmatpush2.msra.mxu1 %v7597_v0  ;;  %10203 = vst [vmem:[#allocation112_spill] sm:$0xff] %v7615_v52  ;;  %v7621_v0 = vld [vmem:[%s8728_s2 + $0x4f0] sm:$0xff] }
 0x543   :  { %2152 = vmatprep.subr.mxu1 %v7603_v60  ;;  %10204 = vst [vmem:[#allocation113_spill] sm:$0xff] %v7621_v0  ;;  %v7627_v60 = vld [vmem:[%s8728_s2 + $0x4c8] sm:$0xff] }
 0x544   :  { %2153 = vmatpush2.msra.mxu1 %v7609_v5  ;;  %10205 = vst [vmem:[#allocation114_spill] sm:$0xff] %v7627_v60  ;;  %v7633_v5 = vld [vmem:[%s8728_s2 + $0x4c0] sm:$0xff] }
 0x545   :  { %2154 = vmatprep.subr.mxu1 %v7615_v52  ;;  %10206 = vst [vmem:[#allocation115_spill] sm:$0xff] %v7633_v5  ;;  %v7639_v52 = vld [vmem:[%s8728_s2 + $0x498] sm:$0xff] }
 0x546   :  { %2155 = vmatpush2.msra.mxu1 %v7621_v0  ;;  %10207 = vst [vmem:[#allocation116_spill] sm:$0xff] %v7639_v52  ;;  %v7645_v0 = vld [vmem:[%s8728_s2 + $0x490] sm:$0xff] }
 0x547   :  { %2156 = vmatprep.subr.mxu1 %v7627_v60  ;;  %10208 = vst [vmem:[#allocation117_spill] sm:$0xff] %v7645_v0  ;;  %v7651_v60 = vld [vmem:[%s8728_s2 + $0x468] sm:$0xff] }
 0x548   :  { %2157 = vmatpush2.msra.mxu1 %v7633_v5  ;;  %10209 = vst [vmem:[#allocation118_spill] sm:$0xff] %v7651_v60  ;;  %v7657_v5 = vld [vmem:[%s8728_s2 + $0x460] sm:$0xff] }
 0x549   :  { %2158 = vmatprep.subr.mxu1 %v7639_v52  ;;  %10210 = vst [vmem:[#allocation119_spill] sm:$0xff] %v7657_v5  ;;  %v7663_v52 = vld [vmem:[%s8728_s2 + $0x438] sm:$0xff] }
 0x54a   :  { %2159 = vmatpush2.msra.mxu1 %v7645_v0  ;;  %10211 = vst [vmem:[#allocation120_spill] sm:$0xff] %v7663_v52  ;;  %v7669_v0 = vld [vmem:[%s8728_s2 + $0x430] sm:$0xff] }
 0x54b   :  { %2160 = vmatprep.subr.mxu1 %v7651_v60  ;;  %10212 = vst [vmem:[#allocation121_spill] sm:$0xff] %v7669_v0  ;;  %v7675_v60 = vld [vmem:[%s8728_s2 + $0x408] sm:$0xff] }
 0x54c   :  { %2161 = vmatpush2.msra.mxu1 %v7657_v5  ;;  %10213 = vst [vmem:[#allocation122_spill] sm:$0xff] %v7675_v60  ;;  %v7681_v5 = vld [vmem:[%s8728_s2 + $0x400] sm:$0xff] }
 0x54d   :  { %2162 = vmatprep.subr.mxu1 %v7663_v52  ;;  %10214 = vst [vmem:[#allocation123_spill] sm:$0xff] %v7681_v5  ;;  %v7687_v52 = vld [vmem:[%s8728_s2 + $0x3d8] sm:$0xff] }
 0x54e   :  { %2163 = vmatpush2.msra.mxu1 %v7669_v0  ;;  %10215 = vst [vmem:[#allocation124_spill] sm:$0xff] %v7687_v52  ;;  %v7693_v0 = vld [vmem:[%s8728_s2 + $0x3d0] sm:$0xff] }
 0x54f   :  { %2164 = vmatprep.subr.mxu1 %v7675_v60  ;;  %10216 = vst [vmem:[#allocation125_spill] sm:$0xff] %v7693_v0  ;;  %v7699_v60 = vld [vmem:[%s8728_s2 + $0x3a8] sm:$0xff] }
 0x550   :  { %2165 = vmatpush2.msra.mxu1 %v7681_v5  ;;  %10217 = vst [vmem:[#allocation126_spill] sm:$0xff] %v7699_v60  ;;  %v7705_v5 = vld [vmem:[%s8728_s2 + $0x3a0] sm:$0xff] }
 0x551   :  { %2166 = vmatprep.subr.mxu1 %v7687_v52  ;;  %10218 = vst [vmem:[#allocation127_spill] sm:$0xff] %v7705_v5  ;;  %v7711_v52 = vld [vmem:[%s8728_s2 + $0x378] sm:$0xff] }
 0x552   :  { %2167 = vmatpush2.msra.mxu1 %v7693_v0  ;;  %10219 = vst [vmem:[#allocation128_spill] sm:$0xff] %v7711_v52  ;;  %v7717_v0 = vld [vmem:[%s8728_s2 + $0x370] sm:$0xff] }
 0x553   :  { %2168 = vmatprep.subr.mxu1 %v7699_v60  ;;  %10220 = vst [vmem:[#allocation129_spill] sm:$0xff] %v7717_v0  ;;  %v7723_v60 = vld [vmem:[%s8728_s2 + $0x348] sm:$0xff] }
 0x554   :  { %2169 = vmatpush2.msra.mxu1 %v7705_v5  ;;  %10221 = vst [vmem:[#allocation130_spill] sm:$0xff] %v7723_v60  ;;  %v7729_v5 = vld [vmem:[%s8728_s2 + $0x340] sm:$0xff] }
 0x555   :  { %2170 = vmatprep.subr.mxu1 %v7711_v52  ;;  %10222 = vst [vmem:[#allocation131_spill] sm:$0xff] %v7729_v5  ;;  %v7735_v52 = vld [vmem:[%s8728_s2 + $0x318] sm:$0xff] }
 0x556   :  { %2171 = vmatpush2.msra.mxu1 %v7717_v0  ;;  %10223 = vst [vmem:[#allocation132_spill] sm:$0xff] %v7735_v52  ;;  %v7741_v0 = vld [vmem:[%s8728_s2 + $0x310] sm:$0xff] }
 0x557   :  { %2172 = vmatprep.subr.mxu1 %v7723_v60  ;;  %10224 = vst [vmem:[#allocation133_spill] sm:$0xff] %v7741_v0  ;;  %v10225_v60 = vld [vmem:[#allocation195_spill] sm:$0xff] }
 0x558   :  { %2173 = vmatpush2.msra.mxu1 %v7729_v5 }
 0x559   :  { %2174 = vmatprep.subr.mxu1 %v7735_v52 }
 0x55a   :  { %2175 = vmatpush2.msra.mxu1 %v7741_v0  ;;  %v348_v0 = vadd.f32 %v10230_v49, %v5234_v15 }
 0x55b   :  { %2301 = vmatprep.subr.mxu1 %v10225_v60 }
 0x59b   :  { %v1847_v35 = vpop.f32.mrf.mxu1  ;;  %v1918_v52 = vpop.f32.mrf.mxu0 }
 0x59c   :  { %v1994_v5 = vadd.f32 %v1847_v35, %v10226_v38  ;;  %v1996_v24 = vadd.f32 %v1918_v52, %v346_v48  ;;  %v10233_v48 = vld [vmem:[#allocation40_spill] sm:$0xff] }
 0x59d   :  { %v1849_v47 = vpop.f32.mrf.mxu1  ;;  %v1920_v8 = vpop.f32.mrf.mxu0 }
 0x59e   :  { %v1995_v34 = vadd.f32 %v1849_v47, %v10227_v36  ;;  %v1998_v46 = vmul.f32 0.5, %v1994_v5  ;;  %v1997_v42 = vadd.f32 %v1920_v8, %v348_v0  ;;  %v2000_v41 = vmul.f32 0.5, %v1996_v24  ;;  %v10232_v5 = vld [vmem:[#allocation29_spill] sm:$0xff]  ;;  %v10234_v8 = vld [vmem:[#allocation31_spill] sm:$0xff] }
 0x59f   :  { %v459_v44 = vadd.f32 %v10232_v5, %v5248_v21  ;;  %v461_v24 = vadd.f32 %v10234_v8, %v5255_v28 }
 0x5a0   :  { %v1999_v59 = vmul.f32 0.5, %v1995_v34  ;;  %3064 = vtanh.f32 %v1998_v46  ;;  %v2001_v35 = vmul.f32 0.5, %v1997_v42 }
 0x5a2   :  { %3066 = vtanh.f32 %v1999_v59  ;;  %v10231_v59 = vld [vmem:[#allocation42_spill] sm:$0xff] }
 0x5a3   :  { %3068 = vtanh.f32 %v2000_v41 }
 0x5a4   :  { %3070 = vtanh.f32 %v2001_v35 }
 0x5ad   :  { %v3065_v60 = vpop.eup %3064 }
 0x5ae   :  { %v2006_v38 = vmul.f32 0.5, %v3065_v60 }
 0x5af   :  { %v3067_v32 = vpop.eup %3066 }
 0x5b0   :  { %v2007_v36 = vmul.f32 0.5, %v3067_v32  ;;  %v2010_v46 = vadd.f32 0.5, %v2006_v38  ;;  %v3069_v41 = vpop.eup %3068 }
 0x5b1   :  { %v3071_v60 = vpop.eup %3070  ;;  %v2008_v38 = vmul.f32 0.5, %v3069_v41  ;;  %v7855_v41 = vld [vmem:[%s8728_s2 + $0x1d8] sm:$0xff] }
 0x5b2   :  { %v2011_v49 = vadd.f32 0.5, %v2007_v36 }
 0x5b3   :  { %v2012_v5 = vadd.f32 0.5, %v2008_v38  ;;  %v7869_v38 = vld [vmem:[%s8728_s2 + $0x1a8] sm:$0xff] }
 0x5db   :  { %v1989_v47 = vpop.f32.mrf.mxu1 }
 0x5dc   :  { %v2014_v34 = vadd.f32 %v1989_v47, %v10231_v59  ;;  %v2009_v47 = vmul.f32 0.5, %v3071_v60  ;;  %v7862_v60 = vld [vmem:[%s8728_s2 + $0x1d0] sm:$0xff] }
 0x5dd   :  { %v1991_v17 = vpop.f32.mrf.mxu1 }
 0x5de   :  { %v2016_v26 = vmul.f32 %v2014_v34, %v2010_v46  ;;  %v2015_v52 = vadd.f32 %v1991_v17, %v10233_v48  ;;  %v2013_v36 = vadd.f32 0.5, %v2009_v47  ;;  %v7876_v47 = vld [vmem:[%s8728_s2 + $0x1a0] sm:$0xff] }
 0x5e0   :  { %v2018_v0 = vadd.f32 %v2016_v26, %v459_v44  ;;  %v2017_v42 = vmul.f32 %v2015_v52, %v2011_v49  ;;  %v7799_v44 = vld [vmem:[%s8728_s2 + $0x298] sm:$0xff]  ;;  %v7806_v49 = vld [vmem:[%s8728_s2 + $0x290] sm:$0xff]  ;;  %v7820_v52 = vld [vmem:[%s8728_s2 + $0x260] sm:$0xff] }
 0x5e2   :  { %3072 = vtanh.f32 %v2018_v0  ;;  %v2019_v32 = vadd.f32 %v2017_v42, %v461_v24  ;;  %v7827_v24 = vld [vmem:[%s8728_s2 + $0x238] sm:$0xff]  ;;  %v7834_v0 = vld [vmem:[%s8728_s2 + $0x230] sm:$0xff]  ;;  %v7841_v42 = vld [vmem:[%s8728_s2 + $0x208] sm:$0xff] }
 0x5e4   :  { %3074 = vtanh.f32 %v2019_v32  ;;  %v7848_v32 = vld [vmem:[%s8728_s2 + $0x200] sm:$0xff] }
 0x5ef   :  { %v3073_v59 = vpop.eup %3072 }
 0x5f0   :  { %v2022_v35 = vsub.f32 %v6895_v29, %v3073_v59  ;;  %v7778_v29 = vld [vmem:[%s8728_s2 + $0x2f0] sm:$0xff] }
 0x5f1   :  { %v3075_v46 = vpop.eup %3074 }
 0x5f2   :  { %v2023_v17 = vsub.f32 %v6897_v18, %v3075_v46  ;;  %v2024_v34 = vmul.f32 %v2022_v35, %v2012_v5  ;;  %v7785_v18 = vld [vmem:[%s8728_s2 + $0x2c8] sm:$0xff]  ;;  %v7883_v5 = vld [vmem:[%s8728_s2 + $0x178] sm:$0xff]  ;;  %v7890_v35 = vld [vmem:[%s8728_s2 + $0x170] sm:$0xff] }
 0x5f4   :  { %v2025_v48 = vmul.f32 %v2023_v17, %v2013_v36  ;;  %v7759_v8 = vadd.f32 %v3073_v59, %v2024_v34  ;;  %v7792_v59 = vld [vmem:[%s8728_s2 + $0x2c0] sm:$0xff]  ;;  %v7911_v17 = vld [vmem:[%s8728_s2 + $0x118] sm:$0xff]  ;;  %v7918_v34 = vld [vmem:[%s8728_s2 + $0x110] sm:$0xff] }
 0x5f5   :  { %v7904_v36 = vld [vmem:[%s8728_s2 + $0x140] sm:$0xff] }
 0x5f6   :  { %v7761_v26 = vadd.f32 %v3075_v46, %v2025_v48  ;;  %2972 = vst [vmem:[%s8731_s7 + $0x20] sm:$0xff] %v7759_v8  ;;  %v7813_v48 = vld [vmem:[%s8728_s2 + $0x268] sm:$0xff] }
 0x5f7   :  { %v7897_v46 = vld [vmem:[%s8728_s2 + $0x148] sm:$0xff] }
 0x5f8   :  { %2105 = vmatprep.mubr.f32.mxu0 %v7761_v26  ;;  %2176 = vmatprep.mubr.f32.mxu1 %v7761_v26  ;;  %2973 = vst [vmem:[%s8732_s8 + $0x18] sm:$0xff] %v7761_v26 }
 0x5f9   :  { %2106 = vmatmul.mubr.f32.vlgmr.msra.gmra.mxu0 %v7759_v8  ;;  %2177 = vmatmul.mubr.f32.vlgmr.msra.gmra.mxu1 %v7759_v8 }
 0x5fa   :  { %2184 = vmatpush1.msra.mxu0 %v7778_v29  ;;  %2247 = vmatprep.mubr.f32.mxu0 %v7761_v26 }
 0x5fb   :  { %2185 = vmatprep.subr.mxu0 %v7785_v18  ;;  %2302 = vmatpush1.msra.mxu1 %v6917_v19 }
 0x5fc   :  { %2186 = vmatpush1.msra.mxu0 %v7792_v59  ;;  %2303 = vmatprep.subr.mxu1 %v6924_v43 }
 0x5fd   :  { %2187 = vmatprep.subr.mxu0 %v7799_v44  ;;  %2304 = vmatpush1.msra.mxu1 %v6931_v30 }
 0x5fe   :  { %2188 = vmatpush1.msra.mxu0 %v7806_v49  ;;  %2305 = vmatprep.subr.mxu1 %v6938_v40 }
 0x5ff   :  { %2189 = vmatprep.subr.mxu0 %v7813_v48  ;;  %2306 = vmatpush1.msra.mxu1 %v6945_v10 }
 0x600   :  { %2190 = vmatpush1.msra.mxu0 %v7820_v52  ;;  %2307 = vmatprep.subr.mxu1 %v6952_v7 }
 0x601   :  { %2191 = vmatprep.subr.mxu0 %v7827_v24  ;;  %2308 = vmatpush1.msra.mxu1 %v6959_v33 }
 0x602   :  { %2192 = vmatpush1.msra.mxu0 %v7834_v0  ;;  %2309 = vmatprep.subr.mxu1 %v6966_v62 }
 0x603   :  { %2193 = vmatprep.subr.mxu0 %v7841_v42  ;;  %2310 = vmatpush1.msra.mxu1 %v6973_v58 }
 0x604   :  { %2194 = vmatpush1.msra.mxu0 %v7848_v32  ;;  %2311 = vmatprep.subr.mxu1 %v6980_v11 }
 0x605   :  { %2195 = vmatprep.subr.mxu0 %v7855_v41  ;;  %2312 = vmatpush1.msra.mxu1 %v6987_v56 }
 0x606   :  { %2196 = vmatpush1.msra.mxu0 %v7862_v60  ;;  %2313 = vmatprep.subr.mxu1 %v6994_v55 }
 0x607   :  { %2197 = vmatprep.subr.mxu0 %v7869_v38  ;;  %2314 = vmatpush1.msra.mxu1 %v7001_v53 }
 0x608   :  { %2198 = vmatpush1.msra.mxu0 %v7876_v47  ;;  %2315 = vmatprep.subr.mxu1 %v7008_v13 }
 0x609   :  { %2199 = vmatprep.subr.mxu0 %v7883_v5  ;;  %2316 = vmatpush1.msra.mxu1 %v7015_v45 }
 0x60a   :  { %2200 = vmatpush1.msra.mxu0 %v7890_v35  ;;  %2317 = vmatprep.subr.mxu1 %v7022_v57 }
 0x60b   :  { %2201 = vmatprep.subr.mxu0 %v7897_v46  ;;  %2318 = vmatpush1.msra.mxu1 %v7029_v6 }
 0x60c   :  { %2202 = vmatpush1.msra.mxu0 %v7904_v36  ;;  %2319 = vmatprep.subr.mxu1 %v7036_v16  ;;  %v7925_v16 = vld [vmem:[%s8728_s2 + $0xe8] sm:$0xff] }
 0x60d   :  { %2203 = vmatprep.subr.mxu0 %v7911_v17  ;;  %2320 = vmatpush1.msra.mxu1 %v7043_v22  ;;  %10235 = vst [vmem:[#allocation134_spill] sm:$0xff] %v7925_v16  ;;  %v7932_v22 = vld [vmem:[%s8728_s2 + $0xe0] sm:$0xff] }
 0x60e   :  { %2204 = vmatpush1.msra.mxu0 %v7918_v34  ;;  %2321 = vmatprep.subr.mxu1 %v7050_v2  ;;  %10236 = vst [vmem:[#allocation135_spill] sm:$0xff] %v7932_v22  ;;  %v7939_v2 = vld [vmem:[%s8728_s2 + $0xb8] sm:$0xff] }
 0x60f   :  { %2205 = vmatprep.subr.mxu0 %v7925_v16  ;;  %2322 = vmatpush1.msra.mxu1 %v7057_v50  ;;  %10237 = vst [vmem:[#allocation136_spill] sm:$0xff] %v7939_v2  ;;  %v7946_v50 = vld [vmem:[%s8728_s2 + $0xb0] sm:$0xff] }
 0x610   :  { %2206 = vmatpush1.msra.mxu0 %v7932_v22  ;;  %2323 = vmatprep.subr.mxu1 %v7064_v54  ;;  %10238 = vst [vmem:[#allocation137_spill] sm:$0xff] %v7946_v50  ;;  %v7953_v54 = vld [vmem:[%s8728_s2 + $0x88] sm:$0xff] }
 0x611   :  { %2207 = vmatprep.subr.mxu0 %v7939_v2  ;;  %2324 = vmatpush1.msra.mxu1 %v7071_v20  ;;  %10239 = vst [vmem:[#allocation138_spill] sm:$0xff] %v7953_v54  ;;  %v7960_v20 = vld [vmem:[%s8728_s2 + $0x80] sm:$0xff] }
 0x612   :  { %2208 = vmatpush1.msra.mxu0 %v7946_v50  ;;  %2325 = vmatprep.subr.mxu1 %v7078_v12  ;;  %10240 = vst [vmem:[#allocation139_spill] sm:$0xff] %v7960_v20  ;;  %v7967_v12 = vld [vmem:[%s8728_s2 + $0x58] sm:$0xff] }
 0x613   :  { %2209 = vmatprep.subr.mxu0 %v7953_v54  ;;  %2326 = vmatpush1.msra.mxu1 %v7085_v3  ;;  %10241 = vst [vmem:[#allocation140_spill] sm:$0xff] %v7967_v12  ;;  %v7974_v3 = vld [vmem:[%s8728_s2 + $0x50] sm:$0xff] }
 0x614   :  { %2210 = vmatpush1.msra.mxu0 %v7960_v20  ;;  %2327 = vmatprep.subr.mxu1 %v7092_v31  ;;  %10242 = vst [vmem:[#allocation141_spill] sm:$0xff] %v7974_v3  ;;  %v7981_v31 = vld [vmem:[%s8728_s2 + $0x28] sm:$0xff] }
 0x615   :  { %2211 = vmatprep.subr.mxu0 %v7967_v12  ;;  %2328 = vmatpush1.msra.mxu1 %v7099_v39  ;;  %10243 = vst [vmem:[#allocation142_spill] sm:$0xff] %v7981_v31  ;;  %v7988_v39 = vld [vmem:[%s8728_s2 + $0x20] sm:$0xff]  ;;  %v10371_v12 = vld [vmem:[#allocation26_spill] sm:$0xff] }
 0x616   :  { %2212 = vmatpush1.msra.mxu0 %v7974_v3  ;;  %2329 = vmatprep.subr.mxu1 %v7106_v4  ;;  %10244 = vst [vmem:[#allocation143_spill] sm:$0xff] %v7988_v39  ;;  %v7995_v4 = vld [vmem:[%s8728_s2 + $0x5f8] sm:$0xff]  ;;  %v354_v20 = vadd.f32 %v10371_v12, %v5234_v15 }
 0x617   :  { %2213 = vmatprep.subr.mxu0 %v7981_v31  ;;  %2330 = vmatpush1.msra.mxu1 %v7113_v25  ;;  %10245 = vst [vmem:[#allocation144_spill] sm:$0xff] %v7995_v4  ;;  %v8002_v25 = vld [vmem:[%s8728_s2 + $0x5f0] sm:$0xff] }
 0x618   :  { %2214 = vmatpush1.msra.mxu0 %v7988_v39  ;;  %2331 = vmatprep.subr.mxu1 %v7120_v1  ;;  %10246 = vst [vmem:[#allocation145_spill] sm:$0xff] %v8002_v25  ;;  %v8009_v1 = vld [vmem:[%s8728_s2 + $0x5c8] sm:$0xff] }
 0x619   :  { %2215 = vmatprep.subr.mxu0 %v7995_v4  ;;  %2332 = vmatpush1.msra.mxu1 %v7127_v63  ;;  %10247 = vst [vmem:[#allocation146_spill] sm:$0xff] %v8009_v1  ;;  %v8016_v63 = vld [vmem:[%s8728_s2 + $0x5c0] sm:$0xff]  ;;  %v10311_v4 = vld [vmem:[#allocation61_spill] sm:$0xff] }
 0x61a   :  { %2216 = vmatpush2.msra.mxu0 %v8002_v25  ;;  %2333 = vmatprep.subr.mxu1 %v7134_v9  ;;  %10248 = vst [vmem:[#allocation147_spill] sm:$0xff] %v8016_v63  ;;  %v8023_v9 = vld [vmem:[%s8728_s2 + $0x598] sm:$0xff]  ;;  %v10308_v25 = vld [vmem:[#allocation56_spill] sm:$0xff] }
 0x61b   :  { %2217 = vmatprep.subr.mxu0 %v8009_v1  ;;  %2334 = vmatpush2.msra.mxu1 %v7141_v14  ;;  %10249 = vst [vmem:[#allocation148_spill] sm:$0xff] %v8023_v9  ;;  %v8030_v14 = vld [vmem:[%s8728_s2 + $0x590] sm:$0xff]  ;;  %v10307_v1 = vld [vmem:[#allocation54_spill] sm:$0xff] }
 0x61c   :  { %2218 = vmatpush2.msra.mxu0 %v8016_v63  ;;  %2335 = vmatprep.subr.mxu1 %v7148_v27  ;;  %10250 = vst [vmem:[#allocation149_spill] sm:$0xff] %v8030_v14  ;;  %v8037_v27 = vld [vmem:[%s8728_s2 + $0x568] sm:$0xff]  ;;  %v10306_v63 = vld [vmem:[#allocation99_spill] sm:$0xff] }
 0x61d   :  { %2219 = vmatprep.subr.mxu0 %v8023_v9  ;;  %2336 = vmatpush2.msra.mxu1 %v7155_v23  ;;  %10251 = vst [vmem:[#allocation150_spill] sm:$0xff] %v8037_v27  ;;  %v8044_v23 = vld [vmem:[%s8728_s2 + $0x560] sm:$0xff]  ;;  %v10303_v9 = vld [vmem:[#allocation93_spill] sm:$0xff] }
 0x61e   :  { %2220 = vmatpush2.msra.mxu0 %v8030_v14  ;;  %2337 = vmatprep.subr.mxu1 %v7162_v37  ;;  %10252 = vst [vmem:[#allocation151_spill] sm:$0xff] %v8044_v23  ;;  %v8051_v37 = vld [vmem:[%s8728_s2 + $0x538] sm:$0xff]  ;;  %v10254_v14 = vld [vmem:[#allocation51_spill] sm:$0xff] }
 0x61f   :  { %2221 = vmatprep.subr.mxu0 %v8037_v27  ;;  %2338 = vmatpush2.msra.mxu1 %v7169_v51  ;;  %10253 = vst [vmem:[#allocation152_spill] sm:$0xff] %v8051_v37  ;;  %v8058_v51 = vld [vmem:[%s8728_s2 + $0x530] sm:$0xff]  ;;  %v10256_v27 = vld [vmem:[#allocation164_spill] sm:$0xff] }
 0x620   :  { %2222 = vmatpush2.msra.mxu0 %v8044_v23  ;;  %2339 = vmatprep.subr.mxu1 %v7176_v61  ;;  %10255 = vst [vmem:[#allocation153_spill] sm:$0xff] %v8058_v51  ;;  %v8065_v61 = vld [vmem:[%s8728_s2 + $0x508] sm:$0xff]  ;;  %v10258_v23 = vld [vmem:[#allocation49_spill] sm:$0xff] }
 0x621   :  { %2223 = vmatprep.subr.mxu0 %v8051_v37  ;;  %2340 = vmatpush2.msra.mxu1 %v10254_v14  ;;  %10257 = vst [vmem:[#allocation154_spill] sm:$0xff] %v8065_v61  ;;  %v8072_v14 = vld [vmem:[%s8728_s2 + $0x500] sm:$0xff]  ;;  %v10260_v37 = vld [vmem:[#allocation165_spill] sm:$0xff] }
 0x622   :  { %2224 = vmatpush2.msra.mxu0 %v8058_v51  ;;  %2341 = vmatprep.subr.mxu1 %v10256_v27  ;;  %10259 = vst [vmem:[#allocation155_spill] sm:$0xff] %v8072_v14  ;;  %v8079_v27 = vld [vmem:[%s8728_s2 + $0x4d8] sm:$0xff]  ;;  %v10262_v51 = vld [vmem:[#allocation53_spill] sm:$0xff] }
 0x623   :  { %2225 = vmatprep.subr.mxu0 %v8065_v61  ;;  %2342 = vmatpush2.msra.mxu1 %v10258_v23  ;;  %10261 = vst [vmem:[#allocation156_spill] sm:$0xff] %v8079_v27  ;;  %v8086_v23 = vld [vmem:[%s8728_s2 + $0x4d0] sm:$0xff]  ;;  %v10264_v61 = vld [vmem:[#allocation166_spill] sm:$0xff] }
 0x624   :  { %2226 = vmatpush2.msra.mxu0 %v8072_v14  ;;  %2343 = vmatprep.subr.mxu1 %v10260_v37  ;;  %10263 = vst [vmem:[#allocation6_spill] sm:$0xff] %v8086_v23  ;;  %v8093_v37 = vld [vmem:[%s8728_s2 + $0x4a8] sm:$0xff] }
 0x625   :  { %2227 = vmatprep.subr.mxu0 %v8079_v27  ;;  %2344 = vmatpush2.msra.mxu1 %v10262_v51  ;;  %10265 = vst [vmem:[#allocation5_spill] sm:$0xff] %v8093_v37  ;;  %v10266_v14 = vld [vmem:[#allocation52_spill] sm:$0xff]  ;;  %v8100_v51 = vld [vmem:[%s8728_s2 + $0x4a0] sm:$0xff] }
 0x626   :  { %2228 = vmatpush2.msra.mxu0 %v8086_v23  ;;  %2345 = vmatprep.subr.mxu1 %v10264_v61  ;;  %10267 = vst [vmem:[#allocation18_spill] sm:$0xff] %v8100_v51  ;;  %v10268_v27 = vld [vmem:[#allocation55_spill] sm:$0xff]  ;;  %v8107_v61 = vld [vmem:[%s8728_s2 + $0x478] sm:$0xff] }
 0x627   :  { %2229 = vmatprep.subr.mxu0 %v8093_v37  ;;  %2346 = vmatpush2.msra.mxu1 %v10266_v14  ;;  %10269 = vst [vmem:[#allocation16_spill] sm:$0xff] %v8107_v61  ;;  %v10270_v23 = vld [vmem:[#allocation58_spill] sm:$0xff]  ;;  %v8114_v14 = vld [vmem:[%s8728_s2 + $0x470] sm:$0xff]  ;;  %v10272_v37 = vld [vmem:[#allocation60_spill] sm:$0xff] }
 0x628   :  { %2230 = vmatpush2.msra.mxu0 %v8100_v51  ;;  %2347 = vmatprep.subr.mxu1 %v10268_v27  ;;  %10271 = vst [vmem:[#allocation24_spill] sm:$0xff] %v8114_v14  ;;  %v8121_v27 = vld [vmem:[%s8728_s2 + $0x448] sm:$0xff]  ;;  %v10274_v51 = vld [vmem:[#allocation62_spill] sm:$0xff] }
 0x629   :  { %2231 = vmatprep.subr.mxu0 %v8107_v61  ;;  %2348 = vmatpush2.msra.mxu1 %v10270_v23  ;;  %10273 = vst [vmem:[#allocation27_spill] sm:$0xff] %v8121_v27  ;;  %v8128_v23 = vld [vmem:[%s8728_s2 + $0x440] sm:$0xff]  ;;  %v10276_v61 = vld [vmem:[#allocation65_spill] sm:$0xff] }
 0x62a   :  { %2232 = vmatpush2.msra.mxu0 %v8114_v14  ;;  %2349 = vmatprep.subr.mxu1 %v10272_v37  ;;  %10275 = vst [vmem:[#allocation170_spill] sm:$0xff] %v8128_v23  ;;  %v8135_v37 = vld [vmem:[%s8728_s2 + $0x418] sm:$0xff]  ;;  %v10278_v14 = vld [vmem:[#allocation67_spill] sm:$0xff] }
 0x62b   :  { %2233 = vmatprep.subr.mxu0 %v8121_v27  ;;  %2350 = vmatpush2.msra.mxu1 %v10274_v51  ;;  %10277 = vst [vmem:[#allocation171_spill] sm:$0xff] %v8135_v37  ;;  %v8142_v51 = vld [vmem:[%s8728_s2 + $0x410] sm:$0xff] }
 0x62c   :  { %2234 = vmatpush2.msra.mxu0 %v8128_v23  ;;  %2351 = vmatprep.subr.mxu1 %v10276_v61  ;;  %10279 = vst [vmem:[#allocation172_spill] sm:$0xff] %v8142_v51  ;;  %v10280_v27 = vld [vmem:[#allocation69_spill] sm:$0xff]  ;;  %v8149_v61 = vld [vmem:[%s8728_s2 + $0x3e8] sm:$0xff] }
 0x62d   :  { %2235 = vmatprep.subr.mxu0 %v8135_v37  ;;  %2352 = vmatpush2.msra.mxu1 %v10278_v14  ;;  %10281 = vst [vmem:[#allocation173_spill] sm:$0xff] %v8149_v61  ;;  %v10282_v23 = vld [vmem:[#allocation72_spill] sm:$0xff]  ;;  %v8156_v14 = vld [vmem:[%s8728_s2 + $0x3e0] sm:$0xff]  ;;  %v10284_v37 = vld [vmem:[#allocation74_spill] sm:$0xff] }
 0x62e   :  { %2236 = vmatpush2.msra.mxu0 %v8142_v51  ;;  %2353 = vmatprep.subr.mxu1 %v10280_v27  ;;  %10283 = vst [vmem:[#allocation174_spill] sm:$0xff] %v8156_v14  ;;  %v8163_v27 = vld [vmem:[%s8728_s2 + $0x3b8] sm:$0xff]  ;;  %v10286_v51 = vld [vmem:[#allocation167_spill] sm:$0xff] }
 0x62f   :  { %2237 = vmatprep.subr.mxu0 %v8149_v61  ;;  %2354 = vmatpush2.msra.mxu1 %v10282_v23  ;;  %10285 = vst [vmem:[#allocation175_spill] sm:$0xff] %v8163_v27  ;;  %v8170_v23 = vld [vmem:[%s8728_s2 + $0x3b0] sm:$0xff]  ;;  %v10288_v61 = vld [vmem:[#allocation76_spill] sm:$0xff] }
 0x630   :  { %2238 = vmatpush2.msra.mxu0 %v8156_v14  ;;  %2355 = vmatprep.subr.mxu1 %v10284_v37  ;;  %10287 = vst [vmem:[#allocation176_spill] sm:$0xff] %v8170_v23  ;;  %v8177_v37 = vld [vmem:[%s8728_s2 + $0x388] sm:$0xff] }
 0x631   :  { %2239 = vmatprep.subr.mxu0 %v8163_v27  ;;  %2356 = vmatpush2.msra.mxu1 %v10286_v51  ;;  %10289 = vst [vmem:[#allocation177_spill] sm:$0xff] %v8177_v37  ;;  %v10290_v14 = vld [vmem:[#allocation168_spill] sm:$0xff]  ;;  %v8184_v51 = vld [vmem:[%s8728_s2 + $0x380] sm:$0xff] }
 0x632   :  { %2240 = vmatpush2.msra.mxu0 %v8170_v23  ;;  %2357 = vmatprep.subr.mxu1 %v10288_v61  ;;  %10291 = vst [vmem:[#allocation178_spill] sm:$0xff] %v8184_v51  ;;  %v10292_v27 = vld [vmem:[#allocation79_spill] sm:$0xff]  ;;  %v8191_v61 = vld [vmem:[%s8728_s2 + $0x358] sm:$0xff]  ;;  %v10294_v23 = vld [vmem:[#allocation169_spill] sm:$0xff] }
 0x633   :  { %2241 = vmatprep.subr.mxu0 %v8177_v37  ;;  %2358 = vmatpush2.msra.mxu1 %v10290_v14  ;;  %10293 = vst [vmem:[#allocation179_spill] sm:$0xff] %v8191_v61  ;;  %v8198_v14 = vld [vmem:[%s8728_s2 + $0x350] sm:$0xff] }
 0x634   :  { %2242 = vmatpush2.msra.mxu0 %v8184_v51  ;;  %2359 = vmatprep.subr.mxu1 %v10292_v27  ;;  %10295 = vst [vmem:[#allocation180_spill] sm:$0xff] %v8198_v14  ;;  %v10296_v37 = vld [vmem:[#allocation81_spill] sm:$0xff]  ;;  %v8205_v27 = vld [vmem:[%s8728_s2 + $0x328] sm:$0xff]  ;;  %v10298_v51 = vld [vmem:[#allocation83_spill] sm:$0xff] }
 0x635   :  { %2243 = vmatprep.subr.mxu0 %v8191_v61  ;;  %2360 = vmatpush2.msra.mxu1 %v10294_v23  ;;  %10297 = vst [vmem:[#allocation181_spill] sm:$0xff] %v8205_v27  ;;  %v8212_v23 = vld [vmem:[%s8728_s2 + $0x320] sm:$0xff]  ;;  %v10300_v61 = vld [vmem:[#allocation86_spill] sm:$0xff] }
 0x636   :  { %2244 = vmatpush2.msra.mxu0 %v8198_v14  ;;  %2361 = vmatprep.subr.mxu1 %v10296_v37  ;;  %10299 = vst [vmem:[#allocation182_spill] sm:$0xff] %v8212_v23  ;;  %v10301_v37 = vld [vmem:[#allocation88_spill] sm:$0xff]  ;;  %v10302_v14 = vld [vmem:[#allocation90_spill] sm:$0xff] }
 0x637   :  { %2245 = vmatprep.subr.mxu0 %v8205_v27  ;;  %2362 = vmatpush2.msra.mxu1 %v10298_v51  ;;  %v10304_v27 = vld [vmem:[#allocation95_spill] sm:$0xff]  ;;  %v10305_v51 = vld [vmem:[#allocation97_spill] sm:$0xff] }
 0x638   :  { %2246 = vmatpush2.msra.mxu0 %v8212_v23  ;;  %2363 = vmatprep.subr.mxu1 %v10300_v61  ;;  %v10309_v23 = vld [vmem:[#allocation57_spill] sm:$0xff]  ;;  %v10310_v61 = vld [vmem:[#allocation59_spill] sm:$0xff] }
 0x639   :  { %2248 = vmatmul.mubr.f32.vlgmr.msra.gmra.mxu0 %v7759_v8  ;;  %2372 = vmatprep.subr.mxu0 %v10301_v37  ;;  %v10312_v37 = vld [vmem:[#allocation63_spill] sm:$0xff] }
 0x63a   :  { %2373 = vmatpush1.msra.mxu0 %v10302_v14  ;;  %2364 = vmatpush2.msra.mxu1 %v10303_v9  ;;  %v10313_v14 = vld [vmem:[#allocation64_spill] sm:$0xff]  ;;  %v10314_v9 = vld [vmem:[#allocation66_spill] sm:$0xff] }
 0x63b   :  { %2374 = vmatprep.subr.mxu0 %v10304_v27  ;;  %2443 = vmatprep.subr.mxu1 %v10305_v51  ;;  %v10315_v27 = vld [vmem:[#allocation68_spill] sm:$0xff]  ;;  %v10316_v51 = vld [vmem:[#allocation70_spill] sm:$0xff] }
 0x63c   :  { %2375 = vmatpush1.msra.mxu0 %v10306_v63  ;;  %v10317_v63 = vld [vmem:[#allocation71_spill] sm:$0xff] }
 0x63d   :  { %2376 = vmatprep.subr.mxu0 %v10307_v1  ;;  %v10318_v1 = vld [vmem:[#allocation73_spill] sm:$0xff] }
 0x63e   :  { %2377 = vmatpush1.msra.mxu0 %v10308_v25  ;;  %v10319_v25 = vld [vmem:[#allocation75_spill] sm:$0xff] }
 0x63f   :  { %2378 = vmatprep.subr.mxu0 %v10309_v23  ;;  %v10320_v23 = vld [vmem:[#allocation77_spill] sm:$0xff] }
 0x640   :  { %2379 = vmatpush1.msra.mxu0 %v10310_v61  ;;  %v10321_v61 = vld [vmem:[#allocation78_spill] sm:$0xff] }
 0x641   :  { %2380 = vmatprep.subr.mxu0 %v10311_v4  ;;  %v10322_v4 = vld [vmem:[#allocation80_spill] sm:$0xff] }
 0x642   :  { %2381 = vmatpush1.msra.mxu0 %v10312_v37  ;;  %v10323_v37 = vld [vmem:[#allocation82_spill] sm:$0xff] }
 0x643   :  { %2382 = vmatprep.subr.mxu0 %v10313_v14  ;;  %v10324_v14 = vld [vmem:[#allocation84_spill] sm:$0xff] }
 0x644   :  { %2383 = vmatpush1.msra.mxu0 %v10314_v9  ;;  %v10325_v9 = vld [vmem:[#allocation85_spill] sm:$0xff] }
 0x645   :  { %2384 = vmatprep.subr.mxu0 %v10315_v27  ;;  %v10326_v27 = vld [vmem:[#allocation87_spill] sm:$0xff] }
 0x646   :  { %2385 = vmatpush1.msra.mxu0 %v10316_v51  ;;  %v10327_v51 = vld [vmem:[#allocation89_spill] sm:$0xff] }
 0x647   :  { %2386 = vmatprep.subr.mxu0 %v10317_v63  ;;  %v10328_v63 = vld [vmem:[#allocation91_spill] sm:$0xff] }
 0x648   :  { %2387 = vmatpush1.msra.mxu0 %v10318_v1  ;;  %v10329_v1 = vld [vmem:[#allocation92_spill] sm:$0xff] }
 0x649   :  { %2388 = vmatprep.subr.mxu0 %v10319_v25  ;;  %v10330_v25 = vld [vmem:[#allocation94_spill] sm:$0xff] }
 0x64a   :  { %2389 = vmatpush1.msra.mxu0 %v10320_v23  ;;  %v10331_v23 = vld [vmem:[#allocation96_spill] sm:$0xff] }
 0x64b   :  { %2390 = vmatprep.subr.mxu0 %v10321_v61  ;;  %v10332_v61 = vld [vmem:[#allocation98_spill] sm:$0xff] }
 0x64c   :  { %2391 = vmatpush1.msra.mxu0 %v10322_v4  ;;  %v10333_v4 = vld [vmem:[#allocation100_spill] sm:$0xff] }
 0x64d   :  { %2392 = vmatprep.subr.mxu0 %v10323_v37  ;;  %v10334_v37 = vld [vmem:[#allocation101_spill] sm:$0xff] }
 0x64e   :  { %2393 = vmatpush1.msra.mxu0 %v10324_v14  ;;  %v10335_v14 = vld [vmem:[#allocation102_spill] sm:$0xff] }
 0x64f   :  { %2394 = vmatprep.subr.mxu0 %v10325_v9  ;;  %v10336_v9 = vld [vmem:[#allocation103_spill] sm:$0xff] }
 0x650   :  { %2395 = vmatpush1.msra.mxu0 %v10326_v27  ;;  %v10337_v27 = vld [vmem:[#allocation104_spill] sm:$0xff] }
 0x651   :  { %2396 = vmatprep.subr.mxu0 %v10327_v51  ;;  %v10338_v51 = vld [vmem:[#allocation105_spill] sm:$0xff] }
 0x652   :  { %2397 = vmatpush1.msra.mxu0 %v10328_v63  ;;  %v10339_v63 = vld [vmem:[#allocation106_spill] sm:$0xff] }
 0x653   :  { %2398 = vmatprep.subr.mxu0 %v10329_v1  ;;  %v10340_v1 = vld [vmem:[#allocation107_spill] sm:$0xff] }
 0x654   :  { %2399 = vmatpush1.msra.mxu0 %v10330_v25  ;;  %v10341_v25 = vld [vmem:[#allocation108_spill] sm:$0xff] }
 0x655   :  { %2400 = vmatprep.subr.mxu0 %v10331_v23  ;;  %v10342_v23 = vld [vmem:[#allocation109_spill] sm:$0xff] }
 0x656   :  { %2401 = vmatpush1.msra.mxu0 %v10332_v61  ;;  %v10343_v61 = vld [vmem:[#allocation110_spill] sm:$0xff] }
 0x657   :  { %2402 = vmatprep.subr.mxu0 %v10333_v4  ;;  %v10344_v4 = vld [vmem:[#allocation111_spill] sm:$0xff] }
 0x658   :  { %2403 = vmatpush1.msra.mxu0 %v10334_v37  ;;  %v10345_v37 = vld [vmem:[#allocation112_spill] sm:$0xff] }
 0x659   :  { %2404 = vmatprep.subr.mxu0 %v10335_v14  ;;  %v10346_v14 = vld [vmem:[#allocation113_spill] sm:$0xff] }
 0x65a   :  { %2405 = vmatpush2.msra.mxu0 %v10336_v9  ;;  %v10347_v9 = vld [vmem:[#allocation114_spill] sm:$0xff] }
 0x65b   :  { %2406 = vmatprep.subr.mxu0 %v10337_v27  ;;  %v10348_v27 = vld [vmem:[#allocation115_spill] sm:$0xff] }
 0x65c   :  { %2407 = vmatpush2.msra.mxu0 %v10338_v51  ;;  %v10349_v51 = vld [vmem:[#allocation116_spill] sm:$0xff] }
 0x65d   :  { %2408 = vmatprep.subr.mxu0 %v10339_v63  ;;  %v10350_v63 = vld [vmem:[#allocation117_spill] sm:$0xff] }
 0x65e   :  { %2409 = vmatpush2.msra.mxu0 %v10340_v1  ;;  %v10351_v1 = vld [vmem:[#allocation118_spill] sm:$0xff] }
 0x65f   :  { %2410 = vmatprep.subr.mxu0 %v10341_v25  ;;  %v10352_v25 = vld [vmem:[#allocation119_spill] sm:$0xff] }
 0x660   :  { %2411 = vmatpush2.msra.mxu0 %v10342_v23  ;;  %v10353_v23 = vld [vmem:[#allocation120_spill] sm:$0xff] }
 0x661   :  { %2412 = vmatprep.subr.mxu0 %v10343_v61  ;;  %v10354_v61 = vld [vmem:[#allocation121_spill] sm:$0xff] }
 0x662   :  { %2413 = vmatpush2.msra.mxu0 %v10344_v4  ;;  %v10355_v4 = vld [vmem:[#allocation122_spill] sm:$0xff] }
 0x663   :  { %2414 = vmatprep.subr.mxu0 %v10345_v37  ;;  %v10356_v37 = vld [vmem:[#allocation123_spill] sm:$0xff] }
 0x664   :  { %2415 = vmatpush2.msra.mxu0 %v10346_v14  ;;  %v10357_v14 = vld [vmem:[#allocation124_spill] sm:$0xff] }
 0x665   :  { %2416 = vmatprep.subr.mxu0 %v10347_v9  ;;  %v10358_v9 = vld [vmem:[#allocation125_spill] sm:$0xff] }
 0x666   :  { %2417 = vmatpush2.msra.mxu0 %v10348_v27  ;;  %v10359_v27 = vld [vmem:[#allocation126_spill] sm:$0xff] }
 0x667   :  { %2418 = vmatprep.subr.mxu0 %v10349_v51  ;;  %v10360_v51 = vld [vmem:[#allocation127_spill] sm:$0xff] }
 0x668   :  { %2419 = vmatpush2.msra.mxu0 %v10350_v63  ;;  %v10361_v63 = vld [vmem:[#allocation128_spill] sm:$0xff] }
 0x669   :  { %2420 = vmatprep.subr.mxu0 %v10351_v1  ;;  %v10362_v1 = vld [vmem:[#allocation129_spill] sm:$0xff] }
 0x66a   :  { %2421 = vmatpush2.msra.mxu0 %v10352_v25  ;;  %v10363_v25 = vld [vmem:[#allocation130_spill] sm:$0xff] }
 0x66b   :  { %2422 = vmatprep.subr.mxu0 %v10353_v23  ;;  %v10364_v23 = vld [vmem:[#allocation131_spill] sm:$0xff] }
 0x66c   :  { %2423 = vmatpush2.msra.mxu0 %v10354_v61  ;;  %v10365_v61 = vld [vmem:[#allocation132_spill] sm:$0xff] }
 0x66d   :  { %2424 = vmatprep.subr.mxu0 %v10355_v4  ;;  %v10366_v4 = vld [vmem:[#allocation133_spill] sm:$0xff] }
 0x66e   :  { %2425 = vmatpush2.msra.mxu0 %v10356_v37 }
 0x66f   :  { %2426 = vmatprep.subr.mxu0 %v10357_v14 }
 0x670   :  { %2427 = vmatpush2.msra.mxu0 %v10358_v9  ;;  %v3498_v9 = vld [vmem:[%s8728_s2 + $0x2d8] sm:$0xff] }
 0x671   :  { %2428 = vmatprep.subr.mxu0 %v10359_v27 }
 0x672   :  { %2429 = vmatpush2.msra.mxu0 %v10360_v51  ;;  %v10367_v51 = vld [vmem:[#allocation10_spill] sm:$0xff] }
 0x673   :  { %2430 = vmatprep.subr.mxu0 %v10361_v63  ;;  %v10368_v63 = vld [vmem:[#allocation8_spill] sm:$0xff] }
 0x674   :  { %2431 = vmatpush2.msra.mxu0 %v10362_v1 }
 0x675   :  { %2432 = vmatprep.subr.mxu0 %v10363_v25  ;;  %v10369_v25 = vld [vmem:[#allocation39_spill] sm:$0xff] }
 0x676   :  { %2433 = vmatpush2.msra.mxu0 %v10364_v23 }
 0x677   :  { %2434 = vmatprep.subr.mxu0 %v10365_v61  ;;  %v10370_v61 = vld [vmem:[#allocation25_spill] sm:$0xff] }
 0x678   :  { %2435 = vmatpush2.msra.mxu0 %v10366_v4  ;;  %v352_v3 = vadd.f32 %v10370_v61, %v10369_v25 }
 0x679   :  { %2561 = vmatprep.subr.mxu0 %v3498_v9 }
 0x6b9   :  { %v2107_v27 = vpop.f32.mrf.mxu0  ;;  %v2178_v23 = vpop.f32.mrf.mxu1 }
 0x6ba   :  { %v2254_v37 = vadd.f32 %v2107_v27, %v10367_v51  ;;  %v2256_v54 = vadd.f32 %v2178_v23, %v352_v3  ;;  %v10374_v3 = vld [vmem:[#allocation40_spill] sm:$0xff] }
 0x6bb   :  { %v2109_v14 = vpop.f32.mrf.mxu0  ;;  %v2180_v4 = vpop.f32.mrf.mxu1 }
 0x6bc   :  { %v2255_v39 = vadd.f32 %v2109_v14, %v10368_v63  ;;  %v2258_v1 = vmul.f32 0.5, %v2254_v37  ;;  %v2257_v50 = vadd.f32 %v2180_v4, %v354_v20  ;;  %v2260_v22 = vmul.f32 0.5, %v2256_v54  ;;  %v10373_v37 = vld [vmem:[#allocation32_spill] sm:$0xff] }
 0x6bd   :  { %v465_v61 = vadd.f32 %v10373_v37, %v5248_v21  ;;  %v10375_v20 = vld [vmem:[#allocation36_spill] sm:$0xff] }
 0x6be   :  { %v2259_v31 = vmul.f32 0.5, %v2255_v39  ;;  %3076 = vtanh.f32 %v2258_v1  ;;  %v2261_v51 = vmul.f32 0.5, %v2257_v50  ;;  %v467_v54 = vadd.f32 %v10375_v20, %v5255_v28 }
 0x6c0   :  { %3078 = vtanh.f32 %v2259_v31  ;;  %v10372_v31 = vld [vmem:[#allocation42_spill] sm:$0xff] }
 0x6c1   :  { %3080 = vtanh.f32 %v2260_v22 }
 0x6c2   :  { %3082 = vtanh.f32 %v2261_v51 }
 0x6cb   :  { %v3077_v9 = vpop.eup %3076 }
 0x6cc   :  { %v2266_v27 = vmul.f32 0.5, %v3077_v9 }
 0x6cd   :  { %v3079_v2 = vpop.eup %3078 }
 0x6ce   :  { %v2267_v63 = vmul.f32 0.5, %v3079_v2  ;;  %v2270_v39 = vadd.f32 0.5, %v2266_v27  ;;  %v3081_v22 = vpop.eup %3080 }
 0x6cf   :  { %v3083_v9 = vpop.eup %3082  ;;  %v2268_v27 = vmul.f32 0.5, %v3081_v22  ;;  %v10404_v22 = vld [vmem:[#allocation46_spill] sm:$0xff] }
 0x6d0   :  { %v2271_v12 = vadd.f32 0.5, %v2267_v63 }
 0x6d1   :  { %v2272_v37 = vadd.f32 0.5, %v2268_v27  ;;  %v10406_v27 = vld [vmem:[#allocation161_spill] sm:$0xff] }
 0x6f9   :  { %v2249_v14 = vpop.f32.mrf.mxu0 }
 0x6fa   :  { %v2274_v1 = vadd.f32 %v2249_v14, %v10372_v31  ;;  %v2269_v14 = vmul.f32 0.5, %v3083_v9  ;;  %v10405_v9 = vld [vmem:[#allocation147_spill] sm:$0xff] }
 0x6fb   :  { %v2251_v25 = vpop.f32.mrf.mxu0 }
 0x6fc   :  { %v2276_v16 = vmul.f32 %v2274_v1, %v2270_v39  ;;  %v2275_v23 = vadd.f32 %v2251_v25, %v10374_v3  ;;  %v2273_v63 = vadd.f32 0.5, %v2269_v14  ;;  %v10407_v14 = vld [vmem:[#allocation148_spill] sm:$0xff] }
 0x6fe   :  { %v2278_v4 = vadd.f32 %v2276_v16, %v465_v61  ;;  %v2277_v50 = vmul.f32 %v2275_v23, %v2271_v12  ;;  %v10396_v61 = vld [vmem:[#allocation44_spill] sm:$0xff]  ;;  %v10397_v12 = vld [vmem:[#allocation143_spill] sm:$0xff] }
 0x6ff   :  { %v10399_v23 = vld [vmem:[#allocation144_spill] sm:$0xff] }
 0x700   :  { %3084 = vtanh.f32 %v2278_v4  ;;  %v2279_v2 = vadd.f32 %v2277_v50, %v467_v54  ;;  %v10400_v54 = vld [vmem:[#allocation47_spill] sm:$0xff]  ;;  %v10401_v4 = vld [vmem:[#allocation145_spill] sm:$0xff]  ;;  %v10402_v50 = vld [vmem:[#allocation160_spill] sm:$0xff] }
 0x702   :  { %3086 = vtanh.f32 %v2279_v2  ;;  %v10403_v2 = vld [vmem:[#allocation146_spill] sm:$0xff] }
 0x70d   :  { %v3085_v31 = vpop.eup %3084 }
 0x70e   :  { %v2282_v51 = vsub.f32 %v7759_v8, %v3085_v31  ;;  %v10393_v8 = vld [vmem:[#allocation141_spill] sm:$0xff] }
 0x70f   :  { %v3087_v39 = vpop.eup %3086 }
 0x710   :  { %v2283_v25 = vsub.f32 %v7761_v26, %v3087_v39  ;;  %v2284_v1 = vmul.f32 %v2282_v51, %v2272_v37  ;;  %v10394_v26 = vld [vmem:[#allocation158_spill] sm:$0xff]  ;;  %v10409_v51 = vld [vmem:[#allocation149_spill] sm:$0xff] }
 0x711   :  { %v10408_v37 = vld [vmem:[#allocation50_spill] sm:$0xff] }
 0x712   :  { %v2285_v3 = vmul.f32 %v2283_v25, %v2273_v63  ;;  %v8300_v20 = vadd.f32 %v3085_v31, %v2284_v1  ;;  %v10395_v31 = vld [vmem:[#allocation142_spill] sm:$0xff]  ;;  %v10412_v25 = vld [vmem:[#allocation48_spill] sm:$0xff]  ;;  %v10413_v1 = vld [vmem:[#allocation151_spill] sm:$0xff] }
 0x713   :  { %v10411_v63 = vld [vmem:[#allocation150_spill] sm:$0xff] }
 0x714   :  { %v8302_v16 = vadd.f32 %v3087_v39, %v2285_v3  ;;  %2974 = vst [vmem:[%s8731_s7 + $0x28] sm:$0xff] %v8300_v20  ;;  %v10398_v3 = vld [vmem:[#allocation159_spill] sm:$0xff]  ;;  %v10410_v39 = vld [vmem:[#allocation162_spill] sm:$0xff] }
 0x716   :  { %2365 = vmatprep.mubr.f32.mxu1 %v8302_v16  ;;  %2436 = vmatprep.mubr.f32.mxu0 %v8302_v16  ;;  %2975 = vst [vmem:[%s8732_s8 + $0x10] sm:$0xff] %v8302_v16 }
 0x717   :  { %2366 = vmatmul.mubr.f32.vlgmr.msra.gmra.mxu1 %v8300_v20  ;;  %2437 = vmatmul.mubr.f32.vlgmr.msra.gmra.mxu0 %v8300_v20 }
 0x718   :  { %2444 = vmatpush1.msra.mxu1 %v7778_v29  ;;  %2507 = vmatprep.mubr.f32.mxu1 %v8302_v16 }
 0x719   :  { %2445 = vmatprep.subr.mxu1 %v7785_v18  ;;  %2562 = vmatpush1.msra.mxu0 %v6917_v19  ;;  %v10376_v19 = vld [vmem:[#allocation4_spill] sm:$0xff] }
 0x71a   :  { %2446 = vmatpush1.msra.mxu1 %v7792_v59  ;;  %2563 = vmatprep.subr.mxu0 %v6924_v43  ;;  %v10377_v43 = vld [vmem:[#allocation3_spill] sm:$0xff] }
 0x71b   :  { %2447 = vmatprep.subr.mxu1 %v7799_v44  ;;  %2564 = vmatpush1.msra.mxu0 %v6931_v30  ;;  %v10378_v30 = vld [vmem:[#allocation17_spill] sm:$0xff] }
 0x71c   :  { %2448 = vmatpush1.msra.mxu1 %v7806_v49  ;;  %2565 = vmatprep.subr.mxu0 %v6938_v40  ;;  %v10379_v40 = vld [vmem:[#allocation134_spill] sm:$0xff] }
 0x71d   :  { %2449 = vmatprep.subr.mxu1 %v7813_v48  ;;  %2566 = vmatpush1.msra.mxu0 %v6945_v10  ;;  %v10380_v10 = vld [vmem:[#allocation15_spill] sm:$0xff] }
 0x71e   :  { %2450 = vmatpush1.msra.mxu1 %v7820_v52  ;;  %2567 = vmatprep.subr.mxu0 %v6952_v7  ;;  %v10381_v7 = vld [vmem:[#allocation135_spill] sm:$0xff] }
 0x71f   :  { %2451 = vmatprep.subr.mxu1 %v7827_v24  ;;  %2568 = vmatpush1.msra.mxu0 %v6959_v33  ;;  %v10382_v33 = vld [vmem:[#allocation21_spill] sm:$0xff] }
 0x720   :  { %2452 = vmatpush1.msra.mxu1 %v7834_v0  ;;  %2569 = vmatprep.subr.mxu0 %v6966_v62  ;;  %v10383_v62 = vld [vmem:[#allocation136_spill] sm:$0xff] }
 0x721   :  { %2453 = vmatprep.subr.mxu1 %v7841_v42  ;;  %2570 = vmatpush1.msra.mxu0 %v6973_v58  ;;  %v10384_v58 = vld [vmem:[#allocation23_spill] sm:$0xff] }
 0x722   :  { %2454 = vmatpush1.msra.mxu1 %v7848_v32  ;;  %2571 = vmatprep.subr.mxu0 %v6980_v11  ;;  %v10385_v11 = vld [vmem:[#allocation137_spill] sm:$0xff] }
 0x723   :  { %2455 = vmatprep.subr.mxu1 %v7855_v41  ;;  %2572 = vmatpush1.msra.mxu0 %v6987_v56  ;;  %v10386_v56 = vld [vmem:[#allocation19_spill] sm:$0xff] }
 0x724   :  { %2456 = vmatpush1.msra.mxu1 %v7862_v60  ;;  %2573 = vmatprep.subr.mxu0 %v6994_v55  ;;  %v10387_v55 = vld [vmem:[#allocation138_spill] sm:$0xff] }
 0x725   :  { %2457 = vmatprep.subr.mxu1 %v7869_v38  ;;  %2574 = vmatpush1.msra.mxu0 %v7001_v53  ;;  %v10388_v53 = vld [vmem:[#allocation43_spill] sm:$0xff] }
 0x726   :  { %2458 = vmatpush1.msra.mxu1 %v7876_v47  ;;  %2575 = vmatprep.subr.mxu0 %v7008_v13  ;;  %v10389_v13 = vld [vmem:[#allocation139_spill] sm:$0xff] }
 0x727   :  { %2459 = vmatprep.subr.mxu1 %v7883_v5  ;;  %2576 = vmatpush1.msra.mxu0 %v7015_v45  ;;  %v10390_v45 = vld [vmem:[#allocation157_spill] sm:$0xff] }
 0x728   :  { %2460 = vmatpush1.msra.mxu1 %v7890_v35  ;;  %2577 = vmatprep.subr.mxu0 %v7022_v57  ;;  %v10391_v57 = vld [vmem:[#allocation140_spill] sm:$0xff] }
 0x729   :  { %2461 = vmatprep.subr.mxu1 %v7897_v46  ;;  %2578 = vmatpush1.msra.mxu0 %v7029_v6  ;;  %v10392_v6 = vld [vmem:[#allocation45_spill] sm:$0xff] }
 0x72a   :  { %2462 = vmatpush1.msra.mxu1 %v7904_v36  ;;  %2579 = vmatprep.subr.mxu0 %v10376_v19  ;;  %v10414_v19 = vld [vmem:[#allocation163_spill] sm:$0xff] }
 0x72b   :  { %2463 = vmatprep.subr.mxu1 %v7911_v17  ;;  %2580 = vmatpush1.msra.mxu0 %v10377_v43  ;;  %v10415_v43 = vld [vmem:[#allocation152_spill] sm:$0xff] }
 0x72c   :  { %2464 = vmatpush1.msra.mxu1 %v7918_v34  ;;  %2581 = vmatprep.subr.mxu0 %v10378_v30  ;;  %v10416_v30 = vld [vmem:[#allocation51_spill] sm:$0xff] }
 0x72d   :  { %2465 = vmatprep.subr.mxu1 %v10379_v40  ;;  %2582 = vmatpush1.msra.mxu0 %v10380_v10  ;;  %v10417_v10 = vld [vmem:[#allocation153_spill] sm:$0xff] }
 0x72e   :  { %2466 = vmatpush1.msra.mxu1 %v10381_v7  ;;  %2583 = vmatprep.subr.mxu0 %v10382_v33  ;;  %v10418_v33 = vld [vmem:[#allocation164_spill] sm:$0xff] }
 0x72f   :  { %2467 = vmatprep.subr.mxu1 %v10383_v62  ;;  %2584 = vmatpush1.msra.mxu0 %v10384_v58  ;;  %v10419_v58 = vld [vmem:[#allocation154_spill] sm:$0xff] }
 0x730   :  { %2468 = vmatpush1.msra.mxu1 %v10385_v11  ;;  %2585 = vmatprep.subr.mxu0 %v10386_v56  ;;  %v10420_v56 = vld [vmem:[#allocation49_spill] sm:$0xff] }
 0x731   :  { %2469 = vmatprep.subr.mxu1 %v10387_v55  ;;  %2586 = vmatpush1.msra.mxu0 %v10388_v53  ;;  %v10421_v53 = vld [vmem:[#allocation155_spill] sm:$0xff] }
 0x732   :  { %2470 = vmatpush1.msra.mxu1 %v10389_v13  ;;  %2587 = vmatprep.subr.mxu0 %v10390_v45  ;;  %v10422_v45 = vld [vmem:[#allocation165_spill] sm:$0xff] }
 0x733   :  { %2471 = vmatprep.subr.mxu1 %v10391_v57  ;;  %2588 = vmatpush1.msra.mxu0 %v10392_v6  ;;  %v10423_v6 = vld [vmem:[#allocation156_spill] sm:$0xff] }
 0x734   :  { %2472 = vmatpush1.msra.mxu1 %v10393_v8  ;;  %2589 = vmatprep.subr.mxu0 %v10394_v26  ;;  %v10424_v26 = vld [vmem:[#allocation53_spill] sm:$0xff] }
 0x735   :  { %2473 = vmatprep.subr.mxu1 %v10395_v31  ;;  %2590 = vmatpush1.msra.mxu0 %v10396_v61  ;;  %v10425_v61 = vld [vmem:[#allocation6_spill] sm:$0xff] }
 0x736   :  { %2474 = vmatpush1.msra.mxu1 %v10397_v12  ;;  %2591 = vmatprep.subr.mxu0 %v10398_v3  ;;  %v10426_v3 = vld [vmem:[#allocation166_spill] sm:$0xff] }
 0x737   :  { %2475 = vmatprep.subr.mxu1 %v10399_v23  ;;  %2592 = vmatpush1.msra.mxu0 %v10400_v54  ;;  %v10427_v54 = vld [vmem:[#allocation5_spill] sm:$0xff] }
 0x738   :  { %2476 = vmatpush2.msra.mxu1 %v10401_v4  ;;  %2593 = vmatprep.subr.mxu0 %v10402_v50  ;;  %v10428_v50 = vld [vmem:[#allocation52_spill] sm:$0xff] }
 0x739   :  { %2477 = vmatprep.subr.mxu1 %v10403_v2  ;;  %2594 = vmatpush2.msra.mxu0 %v10404_v22  ;;  %v10429_v22 = vld [vmem:[#allocation18_spill] sm:$0xff] }
 0x73a   :  { %2478 = vmatpush2.msra.mxu1 %v10405_v9  ;;  %2595 = vmatprep.subr.mxu0 %v10406_v27  ;;  %v10430_v27 = vld [vmem:[#allocation55_spill] sm:$0xff] }
 0x73b   :  { %2479 = vmatprep.subr.mxu1 %v10407_v14  ;;  %2596 = vmatpush2.msra.mxu0 %v10408_v37  ;;  %v10431_v37 = vld [vmem:[#allocation16_spill] sm:$0xff] }
 0x73c   :  { %2480 = vmatpush2.msra.mxu1 %v10409_v51  ;;  %2597 = vmatprep.subr.mxu0 %v10410_v39  ;;  %v10432_v39 = vld [vmem:[#allocation58_spill] sm:$0xff] }
 0x73d   :  { %2481 = vmatprep.subr.mxu1 %v10411_v63  ;;  %2598 = vmatpush2.msra.mxu0 %v10412_v25  ;;  %v10433_v25 = vld [vmem:[#allocation24_spill] sm:$0xff] }
 0x73e   :  { %2482 = vmatpush2.msra.mxu1 %v10413_v1  ;;  %2599 = vmatprep.subr.mxu0 %v10414_v19  ;;  %v10434_v19 = vld [vmem:[#allocation60_spill] sm:$0xff] }
 0x73f   :  { %2483 = vmatprep.subr.mxu1 %v10415_v43  ;;  %2600 = vmatpush2.msra.mxu0 %v10416_v30  ;;  %v10435_v30 = vld [vmem:[#allocation27_spill] sm:$0xff] }
 0x740   :  { %2484 = vmatpush2.msra.mxu1 %v10417_v10  ;;  %2601 = vmatprep.subr.mxu0 %v10418_v33  ;;  %v10436_v33 = vld [vmem:[#allocation62_spill] sm:$0xff] }
 0x741   :  { %2485 = vmatprep.subr.mxu1 %v10419_v58  ;;  %2602 = vmatpush2.msra.mxu0 %v10420_v56  ;;  %v10437_v56 = vld [vmem:[#allocation170_spill] sm:$0xff] }
 0x742   :  { %2486 = vmatpush2.msra.mxu1 %v10421_v53  ;;  %2603 = vmatprep.subr.mxu0 %v10422_v45  ;;  %v10438_v45 = vld [vmem:[#allocation65_spill] sm:$0xff] }
 0x743   :  { %2487 = vmatprep.subr.mxu1 %v10423_v6  ;;  %2604 = vmatpush2.msra.mxu0 %v10424_v26  ;;  %v10439_v26 = vld [vmem:[#allocation171_spill] sm:$0xff] }
 0x744   :  { %2488 = vmatpush2.msra.mxu1 %v10425_v61  ;;  %2605 = vmatprep.subr.mxu0 %v10426_v3  ;;  %v10440_v3 = vld [vmem:[#allocation67_spill] sm:$0xff]  ;;  %v10532_v61 = vld [vmem:[#allocation28_spill] sm:$0xff] }
 0x745   :  { %2489 = vmatprep.subr.mxu1 %v10427_v54  ;;  %2606 = vmatpush2.msra.mxu0 %v10428_v50  ;;  %v10441_v50 = vld [vmem:[#allocation172_spill] sm:$0xff] }
 0x746   :  { %2490 = vmatpush2.msra.mxu1 %v10429_v22  ;;  %2607 = vmatprep.subr.mxu0 %v10430_v27  ;;  %v10442_v27 = vld [vmem:[#allocation69_spill] sm:$0xff]  ;;  %v10530_v22 = vld [vmem:[#allocation11_spill] sm:$0xff] }
 0x747   :  { %2491 = vmatprep.subr.mxu1 %v10431_v37  ;;  %2608 = vmatpush2.msra.mxu0 %v10432_v39  ;;  %v10443_v39 = vld [vmem:[#allocation173_spill] sm:$0xff]  ;;  %v10529_v37 = vld [vmem:[#allocation12_spill] sm:$0xff] }
 0x748   :  { %2492 = vmatpush2.msra.mxu1 %v10433_v25  ;;  %2609 = vmatprep.subr.mxu0 %v10434_v19  ;;  %v10444_v25 = vld [vmem:[#allocation72_spill] sm:$0xff]  ;;  %v10445_v19 = vld [vmem:[#allocation174_spill] sm:$0xff] }
 0x749   :  { %2493 = vmatprep.subr.mxu1 %v10435_v30  ;;  %2610 = vmatpush2.msra.mxu0 %v10436_v33  ;;  %v10446_v30 = vld [vmem:[#allocation74_spill] sm:$0xff]  ;;  %v10447_v33 = vld [vmem:[#allocation175_spill] sm:$0xff] }
 0x74a   :  { %2494 = vmatpush2.msra.mxu1 %v10437_v56  ;;  %2611 = vmatprep.subr.mxu0 %v10438_v45  ;;  %v10448_v56 = vld [vmem:[#allocation167_spill] sm:$0xff]  ;;  %v10449_v45 = vld [vmem:[#allocation176_spill] sm:$0xff] }
 0x74b   :  { %2495 = vmatprep.subr.mxu1 %v10439_v26  ;;  %2612 = vmatpush2.msra.mxu0 %v10440_v3  ;;  %v10450_v26 = vld [vmem:[#allocation76_spill] sm:$0xff]  ;;  %v10451_v3 = vld [vmem:[#allocation177_spill] sm:$0xff] }
 0x74c   :  { %2496 = vmatpush2.msra.mxu1 %v10441_v50  ;;  %2613 = vmatprep.subr.mxu0 %v10442_v27  ;;  %v10452_v50 = vld [vmem:[#allocation168_spill] sm:$0xff]  ;;  %v10453_v27 = vld [vmem:[#allocation178_spill] sm:$0xff] }
 0x74d   :  { %2497 = vmatprep.subr.mxu1 %v10443_v39  ;;  %2614 = vmatpush2.msra.mxu0 %v10444_v25  ;;  %v10454_v39 = vld [vmem:[#allocation79_spill] sm:$0xff] }
 0x74e   :  { %2498 = vmatpush2.msra.mxu1 %v10445_v19  ;;  %2615 = vmatprep.subr.mxu0 %v10446_v30  ;;  %v10455_v25 = vld [vmem:[#allocation179_spill] sm:$0xff]  ;;  %v10456_v19 = vld [vmem:[#allocation169_spill] sm:$0xff]  ;;  %v10457_v30 = vld [vmem:[#allocation180_spill] sm:$0xff] }
 0x74f   :  { %2499 = vmatprep.subr.mxu1 %v10447_v33  ;;  %2616 = vmatpush2.msra.mxu0 %v10448_v56  ;;  %v10458_v33 = vld [vmem:[#allocation81_spill] sm:$0xff] }
 0x750   :  { %2500 = vmatpush2.msra.mxu1 %v10449_v45  ;;  %2617 = vmatprep.subr.mxu0 %v10450_v26  ;;  %v10459_v56 = vld [vmem:[#allocation181_spill] sm:$0xff]  ;;  %v10460_v45 = vld [vmem:[#allocation83_spill] sm:$0xff]  ;;  %v10461_v26 = vld [vmem:[#allocation182_spill] sm:$0xff] }
 0x751   :  { %2501 = vmatprep.subr.mxu1 %v10451_v3  ;;  %2618 = vmatpush2.msra.mxu0 %v10452_v50  ;;  %v10462_v3 = vld [vmem:[#allocation86_spill] sm:$0xff]  ;;  %v10463_v50 = vld [vmem:[#allocation88_spill] sm:$0xff] }
 0x752   :  { %2502 = vmatpush2.msra.mxu1 %v10453_v27  ;;  %2619 = vmatprep.subr.mxu0 %v10454_v39  ;;  %v10464_v39 = vld [vmem:[#allocation90_spill] sm:$0xff]  ;;  %v10473_v27 = vld [vmem:[#allocation61_spill] sm:$0xff] }
 0x753   :  { %2503 = vmatprep.subr.mxu1 %v10455_v25  ;;  %2620 = vmatpush2.msra.mxu0 %v10456_v19  ;;  %v10465_v25 = vld [vmem:[#allocation93_spill] sm:$0xff]  ;;  %v10466_v19 = vld [vmem:[#allocation95_spill] sm:$0xff] }
 0x754   :  { %2504 = vmatpush2.msra.mxu1 %v10457_v30  ;;  %2621 = vmatprep.subr.mxu0 %v10458_v33  ;;  %v10467_v30 = vld [vmem:[#allocation97_spill] sm:$0xff]  ;;  %v10468_v33 = vld [vmem:[#allocation99_spill] sm:$0xff] }
 0x755   :  { %2505 = vmatprep.subr.mxu1 %v10459_v56  ;;  %2622 = vmatpush2.msra.mxu0 %v10460_v45  ;;  %v10469_v56 = vld [vmem:[#allocation54_spill] sm:$0xff]  ;;  %v10470_v45 = vld [vmem:[#allocation56_spill] sm:$0xff] }
 0x756   :  { %2506 = vmatpush2.msra.mxu1 %v10461_v26  ;;  %2623 = vmatprep.subr.mxu0 %v10462_v3  ;;  %v10471_v26 = vld [vmem:[#allocation57_spill] sm:$0xff]  ;;  %v10472_v3 = vld [vmem:[#allocation59_spill] sm:$0xff] }
 0x757   :  { %2508 = vmatmul.mubr.f32.vlgmr.msra.gmra.mxu1 %v8300_v20  ;;  %2632 = vmatprep.subr.mxu1 %v10463_v50  ;;  %v10474_v50 = vld [vmem:[#allocation63_spill] sm:$0xff] }
 0x758   :  { %2633 = vmatpush1.msra.mxu1 %v10464_v39  ;;  %2624 = vmatpush2.msra.mxu0 %v10465_v25  ;;  %v10475_v39 = vld [vmem:[#allocation64_spill] sm:$0xff]  ;;  %v10476_v25 = vld [vmem:[#allocation66_spill] sm:$0xff] }
 0x759   :  { %2634 = vmatprep.subr.mxu1 %v10466_v19  ;;  %2703 = vmatprep.subr.mxu0 %v10467_v30  ;;  %v10477_v19 = vld [vmem:[#allocation68_spill] sm:$0xff]  ;;  %v10478_v30 = vld [vmem:[#allocation70_spill] sm:$0xff] }
 0x75a   :  { %2635 = vmatpush1.msra.mxu1 %v10468_v33  ;;  %v10479_v33 = vld [vmem:[#allocation71_spill] sm:$0xff] }
 0x75b   :  { %2636 = vmatprep.subr.mxu1 %v10469_v56  ;;  %v10480_v56 = vld [vmem:[#allocation73_spill] sm:$0xff] }
 0x75c   :  { %2637 = vmatpush1.msra.mxu1 %v10470_v45  ;;  %v10481_v45 = vld [vmem:[#allocation75_spill] sm:$0xff] }
 0x75d   :  { %2638 = vmatprep.subr.mxu1 %v10471_v26  ;;  %v10482_v26 = vld [vmem:[#allocation77_spill] sm:$0xff] }
 0x75e   :  { %2639 = vmatpush1.msra.mxu1 %v10472_v3  ;;  %v10483_v3 = vld [vmem:[#allocation78_spill] sm:$0xff] }
 0x75f   :  { %2640 = vmatprep.subr.mxu1 %v10473_v27  ;;  %v10484_v27 = vld [vmem:[#allocation80_spill] sm:$0xff] }
 0x760   :  { %2641 = vmatpush1.msra.mxu1 %v10474_v50  ;;  %v10485_v50 = vld [vmem:[#allocation82_spill] sm:$0xff] }
 0x761   :  { %2642 = vmatprep.subr.mxu1 %v10475_v39  ;;  %v10486_v39 = vld [vmem:[#allocation84_spill] sm:$0xff] }
 0x762   :  { %2643 = vmatpush1.msra.mxu1 %v10476_v25  ;;  %v10487_v25 = vld [vmem:[#allocation85_spill] sm:$0xff] }
 0x763   :  { %2644 = vmatprep.subr.mxu1 %v10477_v19  ;;  %v10488_v19 = vld [vmem:[#allocation87_spill] sm:$0xff] }
 0x764   :  { %2645 = vmatpush1.msra.mxu1 %v10478_v30  ;;  %v10489_v30 = vld [vmem:[#allocation89_spill] sm:$0xff] }
 0x765   :  { %2646 = vmatprep.subr.mxu1 %v10479_v33  ;;  %v10490_v33 = vld [vmem:[#allocation91_spill] sm:$0xff] }
 0x766   :  { %2647 = vmatpush1.msra.mxu1 %v10480_v56  ;;  %v10491_v56 = vld [vmem:[#allocation92_spill] sm:$0xff] }
 0x767   :  { %2648 = vmatprep.subr.mxu1 %v10481_v45  ;;  %v10492_v45 = vld [vmem:[#allocation94_spill] sm:$0xff] }
 0x768   :  { %2649 = vmatpush1.msra.mxu1 %v10482_v26  ;;  %v10493_v26 = vld [vmem:[#allocation96_spill] sm:$0xff] }
 0x769   :  { %2650 = vmatprep.subr.mxu1 %v10483_v3  ;;  %v10494_v3 = vld [vmem:[#allocation98_spill] sm:$0xff] }
 0x76a   :  { %2651 = vmatpush1.msra.mxu1 %v10484_v27  ;;  %v10495_v27 = vld [vmem:[#allocation100_spill] sm:$0xff] }
 0x76b   :  { %2652 = vmatprep.subr.mxu1 %v10485_v50  ;;  %v10496_v50 = vld [vmem:[#allocation101_spill] sm:$0xff] }
 0x76c   :  { %2653 = vmatpush1.msra.mxu1 %v10486_v39  ;;  %v10497_v39 = vld [vmem:[#allocation102_spill] sm:$0xff] }
 0x76d   :  { %2654 = vmatprep.subr.mxu1 %v10487_v25  ;;  %v10498_v25 = vld [vmem:[#allocation103_spill] sm:$0xff] }
 0x76e   :  { %2655 = vmatpush1.msra.mxu1 %v10488_v19  ;;  %v10499_v19 = vld [vmem:[#allocation104_spill] sm:$0xff] }
 0x76f   :  { %2656 = vmatprep.subr.mxu1 %v10489_v30  ;;  %v10500_v30 = vld [vmem:[#allocation105_spill] sm:$0xff] }
 0x770   :  { %2657 = vmatpush1.msra.mxu1 %v10490_v33  ;;  %v10501_v33 = vld [vmem:[#allocation106_spill] sm:$0xff] }
 0x771   :  { %2658 = vmatprep.subr.mxu1 %v10491_v56  ;;  %v10502_v56 = vld [vmem:[#allocation107_spill] sm:$0xff] }
 0x772   :  { %2659 = vmatpush1.msra.mxu1 %v10492_v45  ;;  %v10503_v45 = vld [vmem:[#allocation108_spill] sm:$0xff] }
 0x773   :  { %2660 = vmatprep.subr.mxu1 %v10493_v26  ;;  %v10504_v26 = vld [vmem:[#allocation109_spill] sm:$0xff] }
 0x774   :  { %2661 = vmatpush1.msra.mxu1 %v10494_v3  ;;  %v10505_v3 = vld [vmem:[#allocation110_spill] sm:$0xff] }
 0x775   :  { %2662 = vmatprep.subr.mxu1 %v10495_v27  ;;  %v10506_v27 = vld [vmem:[#allocation111_spill] sm:$0xff] }
 0x776   :  { %2663 = vmatpush1.msra.mxu1 %v10496_v50  ;;  %v10507_v50 = vld [vmem:[#allocation112_spill] sm:$0xff] }
 0x777   :  { %2664 = vmatprep.subr.mxu1 %v10497_v39  ;;  %v10508_v39 = vld [vmem:[#allocation113_spill] sm:$0xff] }
 0x778   :  { %2665 = vmatpush2.msra.mxu1 %v10498_v25  ;;  %v10509_v25 = vld [vmem:[#allocation114_spill] sm:$0xff] }
 0x779   :  { %2666 = vmatprep.subr.mxu1 %v10499_v19  ;;  %v10510_v19 = vld [vmem:[#allocation115_spill] sm:$0xff] }
 0x77a   :  { %2667 = vmatpush2.msra.mxu1 %v10500_v30  ;;  %v10511_v30 = vld [vmem:[#allocation116_spill] sm:$0xff] }
 0x77b   :  { %2668 = vmatprep.subr.mxu1 %v10501_v33  ;;  %v10512_v33 = vld [vmem:[#allocation117_spill] sm:$0xff] }
 0x77c   :  { %2669 = vmatpush2.msra.mxu1 %v10502_v56  ;;  %v10513_v56 = vld [vmem:[#allocation118_spill] sm:$0xff] }
 0x77d   :  { %2670 = vmatprep.subr.mxu1 %v10503_v45  ;;  %v10514_v45 = vld [vmem:[#allocation119_spill] sm:$0xff] }
 0x77e   :  { %2671 = vmatpush2.msra.mxu1 %v10504_v26  ;;  %v10515_v26 = vld [vmem:[#allocation120_spill] sm:$0xff] }
 0x77f   :  { %2672 = vmatprep.subr.mxu1 %v10505_v3  ;;  %v10516_v3 = vld [vmem:[#allocation121_spill] sm:$0xff] }
 0x780   :  { %2673 = vmatpush2.msra.mxu1 %v10506_v27  ;;  %v10517_v27 = vld [vmem:[#allocation122_spill] sm:$0xff] }
 0x781   :  { %2674 = vmatprep.subr.mxu1 %v10507_v50  ;;  %v10518_v50 = vld [vmem:[#allocation123_spill] sm:$0xff] }
 0x782   :  { %2675 = vmatpush2.msra.mxu1 %v10508_v39  ;;  %v10519_v39 = vld [vmem:[#allocation124_spill] sm:$0xff] }
 0x783   :  { %2676 = vmatprep.subr.mxu1 %v10509_v25  ;;  %v10520_v25 = vld [vmem:[#allocation125_spill] sm:$0xff] }
 0x784   :  { %2677 = vmatpush2.msra.mxu1 %v10510_v19  ;;  %v10521_v19 = vld [vmem:[#allocation126_spill] sm:$0xff] }
 0x785   :  { %2678 = vmatprep.subr.mxu1 %v10511_v30  ;;  %v10522_v30 = vld [vmem:[#allocation127_spill] sm:$0xff] }
 0x786   :  { %2679 = vmatpush2.msra.mxu1 %v10512_v33  ;;  %v10523_v33 = vld [vmem:[#allocation128_spill] sm:$0xff] }
 0x787   :  { %2680 = vmatprep.subr.mxu1 %v10513_v56  ;;  %v10524_v56 = vld [vmem:[#allocation129_spill] sm:$0xff] }
 0x788   :  { %2681 = vmatpush2.msra.mxu1 %v10514_v45  ;;  %v10525_v45 = vld [vmem:[#allocation130_spill] sm:$0xff] }
 0x789   :  { %2682 = vmatprep.subr.mxu1 %v10515_v26  ;;  %v10526_v26 = vld [vmem:[#allocation131_spill] sm:$0xff] }
 0x78a   :  { %2683 = vmatpush2.msra.mxu1 %v10516_v3  ;;  %v10527_v3 = vld [vmem:[#allocation132_spill] sm:$0xff] }
 0x78b   :  { %2684 = vmatprep.subr.mxu1 %v10517_v27  ;;  %v10528_v27 = vld [vmem:[#allocation133_spill] sm:$0xff] }
 0x78c   :  { %2685 = vmatpush2.msra.mxu1 %v10518_v50 }
 0x78d   :  { %2686 = vmatprep.subr.mxu1 %v10519_v39 }
 0x78e   :  { %2687 = vmatpush2.msra.mxu1 %v10520_v25 }
 0x78f   :  { %2688 = vmatprep.subr.mxu1 %v10521_v19 }
 0x790   :  { %2689 = vmatpush2.msra.mxu1 %v10522_v30 }
 0x791   :  { %2690 = vmatprep.subr.mxu1 %v10523_v33 }
 0x792   :  { %2691 = vmatpush2.msra.mxu1 %v10524_v56  ;;  %v10531_v56 = vld [vmem:[#allocation39_spill] sm:$0xff] }
 0x793   :  { %2692 = vmatprep.subr.mxu1 %v10525_v45  ;;  %v358_v45 = vadd.f32 %v10532_v61, %v10531_v56 }
 0x794   :  { %2693 = vmatpush2.msra.mxu1 %v10526_v26  ;;  %v10533_v26 = vld [vmem:[#allocation30_spill] sm:$0xff] }
 0x795   :  { %2694 = vmatprep.subr.mxu1 %v10527_v3  ;;  %v360_v3 = vadd.f32 %v10533_v26, %v5234_v15 }
 0x796   :  { %2695 = vmatpush2.msra.mxu1 %v10528_v27 }
 0x7d7   :  { %v2367_v50 = vpop.f32.mrf.mxu1  ;;  %v2438_v33 = vpop.f32.mrf.mxu0 }
 0x7d8   :  { %v2514_v25 = vadd.f32 %v2367_v50, %v10529_v37  ;;  %v2516_v53 = vadd.f32 %v2438_v33, %v358_v45  ;;  %v10536_v33 = vld [vmem:[#allocation40_spill] sm:$0xff] }
 0x7d9   :  { %v2369_v39 = vpop.f32.mrf.mxu1  ;;  %v2440_v6 = vpop.f32.mrf.mxu0 }
 0x7da   :  { %v2515_v19 = vadd.f32 %v2369_v39, %v10530_v22  ;;  %v2518_v54 = vmul.f32 0.5, %v2514_v25  ;;  %v2517_v58 = vadd.f32 %v2440_v6, %v360_v3  ;;  %v2520_v43 = vmul.f32 0.5, %v2516_v53  ;;  %v10534_v25 = vld [vmem:[#allocation42_spill] sm:$0xff] }
 0x7db   :  { %v10537_v6 = vld [vmem:[#allocation38_spill] sm:$0xff] }
 0x7dc   :  { %v2519_v30 = vmul.f32 0.5, %v2515_v19  ;;  %3088 = vtanh.f32 %v2518_v54  ;;  %v2521_v50 = vmul.f32 0.5, %v2517_v58  ;;  %v473_v53 = vadd.f32 %v10537_v6, %v5255_v28 }
 0x7de   :  { %3090 = vtanh.f32 %v2519_v30  ;;  %v10535_v30 = vld [vmem:[#allocation35_spill] sm:$0xff] }
 0x7df   :  { %3092 = vtanh.f32 %v2520_v43  ;;  %v471_v61 = vadd.f32 %v10535_v30, %v5248_v21 }
 0x7e0   :  { %3094 = vtanh.f32 %v2521_v50 }
 0x7e9   :  { %v3089_v27 = vpop.eup %3088 }
 0x7ea   :  { %v2526_v37 = vmul.f32 0.5, %v3089_v27 }
 0x7eb   :  { %v3091_v10 = vpop.eup %3090 }
 0x7ec   :  { %v2527_v22 = vmul.f32 0.5, %v3091_v10  ;;  %v2530_v54 = vadd.f32 0.5, %v2526_v37  ;;  %v3093_v43 = vpop.eup %3092 }
 0x7ed   :  { %v3095_v27 = vpop.eup %3094  ;;  %v2528_v37 = vmul.f32 0.5, %v3093_v43  ;;  %v2830_v43 = vld [vmem:[%s8733_s5 + $0x98] sm:$0xff] }
 0x7ee   :  { %v2531_v26 = vadd.f32 0.5, %v2527_v22 }
 0x7ef   :  { %v2532_v30 = vadd.f32 0.5, %v2528_v37  ;;  %v2829_v37 = vld [vmem:[%s8733_s5 + $0x90] sm:$0xff] }
 0x817   :  { %v2509_v39 = vpop.f32.mrf.mxu1 }
 0x818   :  { %v2534_v19 = vadd.f32 %v2509_v39, %v10534_v25  ;;  %v2529_v39 = vmul.f32 0.5, %v3095_v27  ;;  %v2814_v27 = vld [vmem:[%s8733_s5 + $0x18] sm:$0xff] }
 0x819   :  { %v2511_v56 = vpop.f32.mrf.mxu1 }
 0x81a   :  { %v2536_v1 = vmul.f32 %v2534_v19, %v2530_v54  ;;  %v2535_v45 = vadd.f32 %v2511_v56, %v10536_v33  ;;  %v2533_v22 = vadd.f32 0.5, %v2529_v39  ;;  %v2813_v39 = vld [vmem:[%s8733_s5 + $0x10] sm:$0xff] }
 0x81c   :  { %v2538_v3 = vadd.f32 %v2536_v1, %v471_v61  ;;  %v2537_v58 = vmul.f32 %v2535_v45, %v2531_v26  ;;  %v2834_v61 = vld [vmem:[%s8733_s5 + $0xb8] sm:$0xff]  ;;  %v2817_v45 = vld [vmem:[%s8733_s5 + $0x30] sm:$0xff] }
 0x81d   :  { %v2818_v26 = vld [vmem:[%s8733_s5 + $0x38] sm:$0xff] }
 0x81e   :  { %3096 = vtanh.f32 %v2538_v3  ;;  %v2539_v10 = vadd.f32 %v2537_v58, %v473_v53  ;;  %v2832_v53 = vld [vmem:[%s8733_s5 + $0xa8] sm:$0xff]  ;;  %v2831_v58 = vld [vmem:[%s8733_s5 + $0xa0] sm:$0xff] }
 0x81f   :  { %v2816_v3 = vld [vmem:[%s8733_s5 + $0x28] sm:$0xff] }
 0x820   :  { %3098 = vtanh.f32 %v2539_v10  ;;  %v2815_v10 = vld [vmem:[%s8733_s5 + $0x20] sm:$0xff] }
 0x82b   :  { %v3097_v25 = vpop.eup %3096 }
 0x82c   :  { %v2542_v50 = vsub.f32 %v8300_v20, %v3097_v25  ;;  %v10559_v20 = vld [vmem:[#allocation179_spill] sm:$0xff] }
 0x82d   :  { %v3099_v54 = vpop.eup %3098 }
 0x82e   :  { %v2543_v56 = vsub.f32 %v8302_v16, %v3099_v54  ;;  %v2544_v19 = vmul.f32 %v2542_v50, %v2532_v30  ;;  %v10560_v16 = vld [vmem:[#allocation180_spill] sm:$0xff] }
 0x82f   :  { %v2828_v30 = vld [vmem:[%s8733_s5 + $0x88] sm:$0xff] }
 0x830   :  { %v2545_v33 = vmul.f32 %v2543_v56, %v2533_v22  ;;  %v8523_v6 = vadd.f32 %v3097_v25, %v2544_v19  ;;  %v2819_v25 = vld [vmem:[%s8733_s5 + $0x40] sm:$0xff]  ;;  %v2812_v50 = vld [vmem:[%s8733_s5 + $0x8] sm:$0xff] }
 0x831   :  { %v2811_v22 = vld [vmem:[%s8733_s5] sm:$0xff] }
 0x832   :  { %v8525_v1 = vadd.f32 %v3099_v54, %v2545_v33  ;;  %2976 = vst [vmem:[%s8731_s7 + $0x30] sm:$0xff] %v8523_v6  ;;  %v2833_v33 = vld [vmem:[%s8733_s5 + $0xb0] sm:$0xff]  ;;  %v2827_v54 = vld [vmem:[%s8733_s5 + $0x80] sm:$0xff] }
 0x834   :  { %2625 = vmatprep.mubr.f32.mxu0 %v8525_v1  ;;  %2696 = vmatprep.mubr.f32.mxu1 %v8525_v1  ;;  %2977 = vst [vmem:[%s8732_s8 + $0x8] sm:$0xff] %v8525_v1 }
 0x835   :  { %2626 = vmatmul.mubr.f32.vlgmr.msra.gmra.mxu0 %v8523_v6  ;;  %2697 = vmatmul.mubr.f32.vlgmr.msra.gmra.mxu1 %v8523_v6 }
 0x836   :  { %2704 = vmatpush1.msra.mxu0 %v7778_v29  ;;  %2767 = vmatprep.mubr.f32.mxu0 %v8525_v1  ;;  %v10538_v29 = vld [vmem:[#allocation151_spill] sm:$0xff] }
 0x837   :  { %2705 = vmatprep.subr.mxu0 %v7785_v18  ;;  %v10539_v18 = vld [vmem:[#allocation152_spill] sm:$0xff] }
 0x838   :  { %2706 = vmatpush1.msra.mxu0 %v7792_v59  ;;  %v10540_v59 = vld [vmem:[#allocation153_spill] sm:$0xff] }
 0x839   :  { %2707 = vmatprep.subr.mxu0 %v7799_v44  ;;  %v10541_v44 = vld [vmem:[#allocation154_spill] sm:$0xff] }
 0x83a   :  { %2708 = vmatpush1.msra.mxu0 %v7806_v49  ;;  %v10542_v49 = vld [vmem:[#allocation155_spill] sm:$0xff] }
 0x83b   :  { %2709 = vmatprep.subr.mxu0 %v7813_v48  ;;  %v10543_v48 = vld [vmem:[#allocation156_spill] sm:$0xff] }
 0x83c   :  { %2710 = vmatpush1.msra.mxu0 %v7820_v52  ;;  %v10544_v52 = vld [vmem:[#allocation6_spill] sm:$0xff] }
 0x83d   :  { %2711 = vmatprep.subr.mxu0 %v7827_v24  ;;  %v10545_v24 = vld [vmem:[#allocation5_spill] sm:$0xff] }
 0x83e   :  { %2712 = vmatpush1.msra.mxu0 %v7834_v0  ;;  %v10546_v0 = vld [vmem:[#allocation18_spill] sm:$0xff] }
 0x83f   :  { %2713 = vmatprep.subr.mxu0 %v7841_v42  ;;  %v10547_v42 = vld [vmem:[#allocation16_spill] sm:$0xff] }
 0x840   :  { %2714 = vmatpush1.msra.mxu0 %v7848_v32  ;;  %v10548_v32 = vld [vmem:[#allocation24_spill] sm:$0xff] }
 0x841   :  { %2715 = vmatprep.subr.mxu0 %v7855_v41  ;;  %v10549_v41 = vld [vmem:[#allocation27_spill] sm:$0xff] }
 0x842   :  { %2716 = vmatpush1.msra.mxu0 %v7862_v60  ;;  %v10550_v60 = vld [vmem:[#allocation170_spill] sm:$0xff] }
 0x843   :  { %2717 = vmatprep.subr.mxu0 %v7869_v38  ;;  %v10551_v38 = vld [vmem:[#allocation171_spill] sm:$0xff] }
 0x844   :  { %2718 = vmatpush1.msra.mxu0 %v7876_v47  ;;  %v10552_v47 = vld [vmem:[#allocation172_spill] sm:$0xff] }
 0x845   :  { %2719 = vmatprep.subr.mxu0 %v7883_v5  ;;  %v10553_v5 = vld [vmem:[#allocation173_spill] sm:$0xff] }
 0x846   :  { %2720 = vmatpush1.msra.mxu0 %v7890_v35  ;;  %v10554_v35 = vld [vmem:[#allocation174_spill] sm:$0xff] }
 0x847   :  { %2721 = vmatprep.subr.mxu0 %v7897_v46  ;;  %v10555_v46 = vld [vmem:[#allocation175_spill] sm:$0xff] }
 0x848   :  { %2722 = vmatpush1.msra.mxu0 %v7904_v36  ;;  %v10556_v36 = vld [vmem:[#allocation176_spill] sm:$0xff] }
 0x849   :  { %2723 = vmatprep.subr.mxu0 %v7911_v17  ;;  %v10557_v17 = vld [vmem:[#allocation177_spill] sm:$0xff] }
 0x84a   :  { %2724 = vmatpush1.msra.mxu0 %v7918_v34  ;;  %v10558_v34 = vld [vmem:[#allocation178_spill] sm:$0xff] }
 0x84b   :  { %2725 = vmatprep.subr.mxu0 %v10379_v40  ;;  %v10561_v40 = vld [vmem:[#allocation181_spill] sm:$0xff] }
 0x84c   :  { %2726 = vmatpush1.msra.mxu0 %v10381_v7  ;;  %v10562_v7 = vld [vmem:[#allocation182_spill] sm:$0xff] }
 0x84d   :  { %2727 = vmatprep.subr.mxu0 %v10383_v62  ;;  %v2842_v62 = vld [vmem:[%s8733_s5 + $0xf8] sm:$0xff] }
 0x84e   :  { %2728 = vmatpush1.msra.mxu0 %v10385_v11  ;;  %v2826_v11 = vld [vmem:[%s8733_s5 + $0x78] sm:$0xff]  ;;  %2980 = vmatprep.subr.mxu1 %v2842_v62  ;;  %v10569_v62 = vld [vmem:[#allocation37_spill] sm:$0xff] }
 0x84f   :  { %2729 = vmatprep.subr.mxu0 %v10387_v55  ;;  %2981 = vmatpush3.msra.mxu1 %v2826_v11  ;;  %v2841_v55 = vld [vmem:[%s8733_s5 + $0xf0] sm:$0xff]  ;;  %v477_v11 = vadd.f32 %v10569_v62, %v5248_v21 }
 0x850   :  { %2730 = vmatpush1.msra.mxu0 %v10389_v13  ;;  %2982 = vmatprep.subr.mxu1 %v2841_v55  ;;  %v2825_v13 = vld [vmem:[%s8733_s5 + $0x70] sm:$0xff] }
 0x851   :  { %2731 = vmatprep.subr.mxu0 %v10391_v57  ;;  %2983 = vmatpush3.msra.mxu1 %v2825_v13  ;;  %v2840_v57 = vld [vmem:[%s8733_s5 + $0xe8] sm:$0xff] }
 0x852   :  { %2732 = vmatpush1.msra.mxu0 %v10393_v8  ;;  %2984 = vmatprep.subr.mxu1 %v2840_v57  ;;  %v2824_v8 = vld [vmem:[%s8733_s5 + $0x68] sm:$0xff] }
 0x853   :  { %2733 = vmatprep.subr.mxu0 %v10395_v31  ;;  %2985 = vmatpush3.msra.mxu1 %v2824_v8  ;;  %v2839_v31 = vld [vmem:[%s8733_s5 + $0xe0] sm:$0xff]  ;;  %v10570_v57 = vld [vmem:[#allocation40_spill] sm:$0xff] }
 0x854   :  { %2734 = vmatpush1.msra.mxu0 %v10397_v12  ;;  %2986 = vmatprep.subr.mxu1 %v2839_v31  ;;  %v2823_v12 = vld [vmem:[%s8733_s5 + $0x60] sm:$0xff]  ;;  %v10571_v31 = vld [vmem:[#allocation41_spill] sm:$0xff] }
 0x855   :  { %2735 = vmatprep.subr.mxu0 %v10399_v23  ;;  %2987 = vmatpush3.msra.mxu1 %v2823_v12  ;;  %v2838_v23 = vld [vmem:[%s8733_s5 + $0xd8] sm:$0xff]  ;;  %v479_v12 = vadd.f32 %v10571_v31, %v5255_v28 }
 0x856   :  { %2736 = vmatpush2.msra.mxu0 %v10401_v4  ;;  %2988 = vmatprep.subr.mxu1 %v2838_v23  ;;  %v2822_v4 = vld [vmem:[%s8733_s5 + $0x58] sm:$0xff] }
 0x857   :  { %2737 = vmatprep.subr.mxu0 %v10403_v2  ;;  %2989 = vmatpush3.msra.mxu1 %v2822_v4  ;;  %v2837_v2 = vld [vmem:[%s8733_s5 + $0xd0] sm:$0xff] }
 0x858   :  { %2738 = vmatpush2.msra.mxu0 %v10405_v9  ;;  %2990 = vmatprep.subr.mxu1 %v2837_v2  ;;  %v2821_v9 = vld [vmem:[%s8733_s5 + $0x50] sm:$0xff] }
 0x859   :  { %2739 = vmatprep.subr.mxu0 %v10407_v14  ;;  %2991 = vmatpush3.msra.mxu1 %v2821_v9  ;;  %v2836_v14 = vld [vmem:[%s8733_s5 + $0xc8] sm:$0xff] }
 0x85a   :  { %2740 = vmatpush2.msra.mxu0 %v10409_v51  ;;  %v2820_v51 = vld [vmem:[%s8733_s5 + $0x48] sm:$0xff]  ;;  %2992 = vmatprep.subr.mxu1 %v2836_v14 }
 0x85b   :  { %2741 = vmatprep.subr.mxu0 %v10411_v63  ;;  %v2835_v63 = vld [vmem:[%s8733_s5 + $0xc0] sm:$0xff]  ;;  %2993 = vmatpush3.msra.mxu1 %v2820_v51 }
 0x85c   :  { %2742 = vmatpush2.msra.mxu0 %v10538_v29  ;;  %2994 = vmatprep.subr.mxu1 %v2835_v63  ;;  %v10563_v29 = vld [vmem:[#allocation14_spill] sm:$0xff] }
 0x85d   :  { %2743 = vmatprep.subr.mxu0 %v10539_v18  ;;  %2995 = vmatpush3.msra.mxu1 %v2819_v25 }
 0x85e   :  { %2744 = vmatpush2.msra.mxu0 %v10540_v59  ;;  %2996 = vmatprep.subr.mxu1 %v2834_v61  ;;  %v10564_v59 = vld [vmem:[#allocation13_spill] sm:$0xff] }
 0x85f   :  { %2745 = vmatprep.subr.mxu0 %v10541_v44  ;;  %2997 = vmatpush3.msra.mxu1 %v2818_v26 }
 0x860   :  { %2746 = vmatpush2.msra.mxu0 %v10542_v49  ;;  %2998 = vmatprep.subr.mxu1 %v2833_v33 }
 0x861   :  { %2747 = vmatprep.subr.mxu0 %v10543_v48  ;;  %2999 = vmatpush3.msra.mxu1 %v2817_v45 }
 0x862   :  { %2748 = vmatpush2.msra.mxu0 %v10544_v52  ;;  %3000 = vmatprep.subr.mxu1 %v2832_v53 }
 0x863   :  { %2749 = vmatprep.subr.mxu0 %v10545_v24  ;;  %3001 = vmatpush3.msra.mxu1 %v2816_v3  ;;  %v10565_v24 = vld [vmem:[#allocation39_spill] sm:$0xff] }
 0x864   :  { %2750 = vmatpush2.msra.mxu0 %v10546_v0  ;;  %3002 = vmatprep.subr.mxu1 %v2831_v58  ;;  %v10566_v0 = vld [vmem:[#allocation33_spill] sm:$0xff] }
 0x865   :  { %2751 = vmatprep.subr.mxu0 %v10547_v42  ;;  %3003 = vmatpush3.msra.mxu1 %v2815_v10  ;;  %v364_v42 = vadd.f32 %v10566_v0, %v10565_v24 }
 0x866   :  { %2752 = vmatpush2.msra.mxu0 %v10548_v32  ;;  %3004 = vmatprep.subr.mxu1 %v2830_v43 }
 0x867   :  { %2753 = vmatprep.subr.mxu0 %v10549_v41  ;;  %3005 = vmatpush3.msra.mxu1 %v2814_v27  ;;  %v10567_v41 = vld [vmem:[#allocation34_spill] sm:$0xff] }
 0x868   :  { %2754 = vmatpush2.msra.mxu0 %v10550_v60  ;;  %3006 = vmatprep.subr.mxu1 %v2829_v37  ;;  %v366_v60 = vadd.f32 %v10567_v41, %v5234_v15 }
 0x869   :  { %2755 = vmatprep.subr.mxu0 %v10551_v38  ;;  %3007 = vmatpush3.msra.mxu1 %v2813_v39 }
 0x86a   :  { %2756 = vmatpush2.msra.mxu0 %v10552_v47  ;;  %3008 = vmatprep.subr.mxu1 %v2828_v30 }
 0x86b   :  { %2757 = vmatprep.subr.mxu0 %v10553_v5  ;;  %3009 = vmatpush3.msra.mxu1 %v2812_v50 }
 0x86c   :  { %2758 = vmatpush2.msra.mxu0 %v10554_v35  ;;  %3010 = vmatprep.subr.mxu1 %v2827_v54 }
 0x86d   :  { %2759 = vmatprep.subr.mxu0 %v10555_v46  ;;  %3011 = vmatpush3.msra.mxu1 %v2811_v22 }
 0x86e   :  { %2760 = vmatpush2.msra.mxu0 %v10556_v36 }
 0x86f   :  { %2761 = vmatprep.subr.mxu0 %v10557_v17 }
 0x870   :  { %2762 = vmatpush2.msra.mxu0 %v10558_v34 }
 0x871   :  { %2763 = vmatprep.subr.mxu0 %v10559_v20 }
 0x872   :  { %2764 = vmatpush2.msra.mxu0 %v10560_v16 }
 0x873   :  { %2765 = vmatprep.subr.mxu0 %v10561_v40  ;;  %v10568_v40 = vld [vmem:[#allocation42_spill] sm:$0xff] }
 0x874   :  { %2766 = vmatpush2.msra.mxu0 %v10562_v7 }
 0x875   :  { %2768 = vmatmul.mubr.f32.vlgmr.msra.gmra.mxu0 %v8523_v6 }
 0x8f5   :  { %v2627_v56 = vpop.f32.mrf.mxu0  ;;  %v2698_v52 = vpop.f32.mrf.mxu1 }
 0x8f6   :  { %v2774_v18 = vadd.f32 %v2627_v56, %v10563_v29  ;;  %v2776_v38 = vadd.f32 %v2698_v52, %v364_v42 }
 0x8f7   :  { %v2629_v19 = vpop.f32.mrf.mxu0  ;;  %v2700_v32 = vpop.f32.mrf.mxu1 }
 0x8f8   :  { %v2775_v44 = vadd.f32 %v2629_v19, %v10564_v59  ;;  %v2778_v49 = vmul.f32 0.5, %v2774_v18  ;;  %v2777_v5 = vadd.f32 %v2700_v32, %v366_v60  ;;  %v2780_v46 = vmul.f32 0.5, %v2776_v38 }
 0x8fa   :  { %v2779_v48 = vmul.f32 0.5, %v2775_v44  ;;  %3100 = vtanh.f32 %v2778_v49  ;;  %v2781_v17 = vmul.f32 0.5, %v2777_v5 }
 0x8fc   :  { %3102 = vtanh.f32 %v2779_v48 }
 0x8fd   :  { %3104 = vtanh.f32 %v2780_v46 }
 0x8fe   :  { %3106 = vtanh.f32 %v2781_v17 }
 0x907   :  { %v3101_v47 = vpop.eup %3100 }
 0x908   :  { %v2786_v36 = vmul.f32 0.5, %v3101_v47 }
 0x909   :  { %v3103_v35 = vpop.eup %3102 }
 0x90a   :  { %v2787_v34 = vmul.f32 0.5, %v3103_v35  ;;  %v2790_v16 = vadd.f32 0.5, %v2786_v36  ;;  %v3105_v9 = vpop.eup %3104 }
 0x90b   :  { %v3107_v14 = vpop.eup %3106  ;;  %v2788_v51 = vmul.f32 0.5, %v3105_v9 }
 0x90c   :  { %v2791_v15 = vadd.f32 0.5, %v2787_v34  ;;  %v2789_v63 = vmul.f32 0.5, %v3107_v14 }
 0x90d   :  { %v2792_v21 = vadd.f32 0.5, %v2788_v51 }
 0x90e   :  { %v2793_v33 = vadd.f32 0.5, %v2789_v63 }
 0x935   :  { %v2769_v20 = vpop.f32.mrf.mxu0 }
 0x936   :  { %v2794_v7 = vadd.f32 %v2769_v20, %v10568_v40 }
 0x937   :  { %v2771_v55 = vpop.f32.mrf.mxu0 }
 0x938   :  { %v2796_v13 = vmul.f32 %v2794_v7, %v2790_v16  ;;  %v2795_v8 = vadd.f32 %v2771_v55, %v10570_v57 }
 0x93a   :  { %v2798_v23 = vadd.f32 %v2796_v13, %v477_v11  ;;  %v2797_v4 = vmul.f32 %v2795_v8, %v2791_v15 }
 0x93c   :  { %3108 = vtanh.f32 %v2798_v23  ;;  %v2799_v2 = vadd.f32 %v2797_v4, %v479_v12 }
 0x93e   :  { %3110 = vtanh.f32 %v2799_v2 }
 0x949   :  { %v3109_v25 = vpop.eup %3108 }
 0x94a   :  { %v2802_v61 = vsub.f32 %v8523_v6, %v3109_v25  ;;  %v2979_v6 = vld [vmem:[%s8734_s6] ss:$0 sm:$0xff] }
 0x94b   :  { %v3111_v26 = vpop.eup %3110 }
 0x94c   :  { %v2803_v45 = vsub.f32 %v8525_v1, %v3111_v26  ;;  %v2804_v53 = vmul.f32 %v2802_v61, %v2792_v21 }
 0x94e   :  { %v2805_v3 = vmul.f32 %v2803_v45, %v2793_v33  ;;  %v2806_v28 = vadd.f32 %v3109_v25, %v2804_v53 }
 0x950   :  { %v2807_v58 = vadd.f32 %v3111_v26, %v2805_v3  ;;  %2978 = vst [vmem:[%s8731_s7 + $0x38] sm:$0xff] %v2806_v28 }
 0x952   :  { %2810 = vst [vmem:[%s8732_s8] sm:$0xff] %v2807_v58  ;;  %2914 = vmatprep.mubr.f32.mxu1 %v2807_v58 }
 0x953   :  { %2915 = vmatmul.mubr.f32.vlgmr.msra.gmra.mxu1 %v2806_v28 }
 0xa13   :  { %v3012_v10 = vpop.f32.mrf.mxu1 }
 0xa15   :  { %v3013_v1 = vpop.f32.mrf.mxu1 }
 0xa16   :  { %v3014_v43 = vadd.f32 %v3013_v1, %v3012_v10 }
 0xa18   :  { %v2917_v27 = vadd.f32 %v3014_v43, %v2979_v6 }
 0xa1a   :  { %3112 = vtanh.f32 %v2917_v27 }
 0xa27   :  { %v3113_v37 = vpop.eup %3112 }
 0xa28   :  { %2921 = vst [vmem:[%s8735_s9] sm:$0xff] %v3113_v37 }

</bundles_post_ra>
